<compile_context>
chip_gen: v7x
topology: tpu7x:2x2x1
jax: 0.10.0
libtpu: 0.0.40
codegen_flags: <defaults>
</compile_context>

<pallas_src>
import functools

import jax
import jax.numpy as jnp
from jax.experimental import pallas as pl
from jax.experimental.pallas import tpu as pltpu

_INV_SQRT2 = 0.7071067811865476
_LN_EPS = 1e-5


def _gelu(x, approximate):
    if approximate:
        # tanh-approx: transcendental goes to the EUP slot; ~1e-3 abs vs exact.
        return jax.nn.gelu(x, approximate=True)
    # Exact (erf) -- matches torch.nn.GELU() default.
    return 0.5 * x * (1.0 + jax.lax.erf(x * _INV_SQRT2))


def _dp_kernel(h0_ref, m_ref, cw_ref, cb_ref, ln_g_ref, ln_b_ref,
               w_out_ref, b_out_ref, o_ref, h_ref, *,
               T, Tp, D, K, Bt, CT, cdtype, approximate_gelu):
    """Grid = (batch_blocks, depth); one conv/LN/GELU layer per depth step.

    h0_ref:    (Bt, Tp, D) cdtype      input_proj(x) * mask (computed by XLA)
    m_ref:     (Bt, NC, CT) f32 {0,1}  lane-dense mask, chunked over time
    cw_ref:    (1, K, D, D) cdtype     this layer's conv taps, (Cin, Cout) per tap
    cb/ln_g/ln_b: (1, 1, D) f32
    w_out_ref: (1, D) f32, b_out_ref: (1, 1) f32
    o_ref:     (Bt, NC, CT) f32        lane-dense output, chunked over time
    h_ref:     VMEM (2, Bt, Tp + 2*pad, D) cdtype ping-pong hidden state
               (time-padded; halo rows stay zero).
    """
    l = pl.program_id(1)
    n_layers = pl.num_programs(1)
    pad = K // 2
    n_chunks = Tp // CT

    r_slot = l % 2            # read: previous layer's hidden state
    w_slot = 1 - r_slot       # write: this layer's output
    is_last = l == n_layers - 1

    # ---- layer 0 only: zero halos of both slots, stage h0 into the read slot ----
    @pl.when(l == 0)
    def _():
        if pad > 0:
            halo = jnp.zeros((2, Bt, pad, D), cdtype)
            h_ref[:, :, :pad, :] = halo
            h_ref[:, :, pad + Tp:, :] = halo

        @pl.loop(0, n_chunks)          # chunked staging copy (bounded live range)
        def _stage(c):
            start = pl.multiple_of(c * CT, CT)
            h_ref[0, :, pl.ds(pad + start, CT), :] = h0_ref[:, pl.ds(start, CT), :]

    # ---- one layer, chunked over time so f32 transients stay ~Bt*CT*D ----
    @pl.loop(0, n_chunks)
    def _chunk(c):
        start = pl.multiple_of(c * CT, CT)

        # Conv1d(D, D, K, padding=K//2, groups=1): K per-tap MXU contractions
        # accumulated in f32 (no K*D lane-concat materialization).
        acc = jnp.dot(
            h_ref[r_slot, :, pl.ds(start, CT), :].reshape(Bt * CT, D),
            cw_ref[0, 0], preferred_element_type=jnp.float32)
        for k in range(1, K):
            acc = acc + jnp.dot(
                h_ref[r_slot, :, pl.ds(start + k, CT), :].reshape(Bt * CT, D),
                cw_ref[0, k], preferred_element_type=jnp.float32)
        acc = acc + cb_ref[0]                                  # (1, D) broadcast

        # LayerNorm over channels (biased variance, eps=1e-5), f32 math; reuse
        # the centered diff and fold gamma into the rsqrt scale (VPU trim).
        mean = jnp.mean(acc, axis=-1, keepdims=True)
        diff = acc - mean
        var = jnp.mean(diff * diff, axis=-1, keepdims=True)
        inv = jax.lax.rsqrt(var + _LN_EPS)
        h_new = _gelu(diff * (inv * ln_g_ref[0]) + ln_b_ref[0], approximate_gelu)

        # Dropout is identity at inference.
        @pl.when(l < n_layers - 1)
        def _():
            h_ref[w_slot, :, pl.ds(pad + start, CT), :] = (
                h_new.reshape(Bt, CT, D).astype(cdtype))

        # Last layer: output_proj as VPU mul + lane reduce; the per-row mask
        # commutes with the reduce, so apply it on the lane-dense result.
        @pl.when(is_last)
        def _():
            h3 = h_new.reshape(Bt, CT, D)
            dur = jnp.sum(h3 * w_out_ref[...][None, :, :], axis=-1)   # (Bt, CT)
            res = m_ref[:, pl.ds(c, 1), :] * dur[:, None, :] + b_out_ref[...]
            o_ref[:, pl.ds(c, 1), :] = res.astype(o_ref.dtype)

    # Keep times [T, T+pad) of the freshly written layer output zero so the
    # next layer's "same" conv sees zero padding at the true sequence end
    # (T may have been padded up to the lane multiple Tp).
    if pad > 0:
        @pl.when(l < n_layers - 1)
        def _():
            h_ref[w_slot, :, pad + T:pad + T + pad, :] = jnp.zeros(
                (Bt, pad, D), cdtype)


def duration_predictor_pallas(x, mask, params, *, depth, kernel_size,
                              batch_block=8, time_chunk=512,
                              compute_dtype=jnp.bfloat16,
                              approximate_gelu=False,
                              vmem_limit_bytes=None):
    """x: (B, T, Din) f32, mask: (B, T) bool -> (B, T) f32 durations."""
    # TODO(synk): even kernel_size needs fairseq2's "remove last frame" trick;
    # only odd kernel sizes ("same" conv) are implemented.
    assert kernel_size % 2 == 1, "only odd kernel_size supported"
    B, T, Din = x.shape
    D = params["w_in"].shape[1]
    K = kernel_size
    pad = K // 2
    cdtype = compute_dtype

    # Batch block (leading dim, no sublane/lane constraint).  Keep >= 2 blocks
    # when possible so v7x's second TensorCore gets work via the parallel axis.
    Bt = max(1, min(batch_block, B))
    if B > 1 and (B + Bt - 1) // Bt < 2:
        Bt = max(1, (B + 1) // 2)
    Bp = ((B + Bt - 1) // Bt) * Bt

    # Time: pad to a 128-lane multiple (unmasked output stores) and pick the
    # largest 128-multiple chunk CT <= time_chunk that divides Tp.
    Tp = ((T + 127) // 128) * 128
    tp_units = Tp // 128
    ct_units = 1
    for u in range(1, min(max(time_chunk // 128, 1), tp_units) + 1):
        if tp_units % u == 0:
            ct_units = u
    CT = ct_units * 128
    NC = Tp // CT

    # Input projection + mask hoisted to XLA (contraction = Din barely touches
    # the MXU and a (Bt,T,Din) block would lane-pad Din to 128 in VMEM).
    mf = mask.astype(jnp.float32)
    h0 = (x @ params["w_in"] + params["b_in"]) * mf[..., None]
    h0 = h0.astype(cdtype)
    if Bp != B or Tp != T:
        h0 = jnp.pad(h0, ((0, Bp - B), (0, Tp - T), (0, 0)))
        mf = jnp.pad(mf, ((0, Bp - B), (0, Tp - T)))
    m3 = mf.reshape(Bp, NC, CT)                                 # lane-dense mask

    conv_w = params["conv_w"].astype(cdtype)                    # (depth, K, D, D)
    conv_b = params["conv_b"].reshape(depth, 1, D)
    ln_g = params["ln_g"].reshape(depth, 1, D)
    ln_b = params["ln_b"].reshape(depth, 1, D)
    w_out = params["w_out"].reshape(1, D)
    b_out = params["b_out"].reshape(1, 1)

    kernel = functools.partial(
        _dp_kernel, T=T, Tp=Tp, D=D, K=K, Bt=Bt, CT=CT, cdtype=cdtype,
        approximate_gelu=approximate_gelu)

    # Rough VMEM budget -> raise the scoped limit above the 32 MiB default when
    # needed, capped well under v7x's 64 MiB physical.  For large T*D on v7x,
    # shrink batch_block / time_chunk instead of raising this further.
    if vmem_limit_bytes is None:
        esz = jnp.dtype(cdtype).itemsize
        est = (2 * Bt * Tp * D * esz                 # h0 block (double-buffered)
               + 2 * 2 * Bt * Tp * 4                 # mask + out blocks
               + 2 * K * D * D * esz + 8 * D * 4     # per-layer weights
               + 2 * Bt * (Tp + 2 * pad) * D * esz   # ping-pong hidden scratch
               + 6 * Bt * CT * D * 4)                # f32 per-chunk transients
        vmem_limit_bytes = int(min(100 * 2**20, max(32 * 2**20, int(est * 1.4))))

    out = pl.pallas_call(
        kernel,
        out_shape=jax.ShapeDtypeStruct((Bp, NC, CT), jnp.float32),
        grid_spec=pltpu.PrefetchScalarGridSpec(
            num_scalar_prefetch=0,
            grid=(Bp // Bt, depth),
            in_specs=[
                pl.BlockSpec((Bt, Tp, D), lambda g, l: (g, 0, 0)),       # h0
                pl.BlockSpec((Bt, NC, CT), lambda g, l: (g, 0, 0)),      # mask
                pl.BlockSpec((1, K, D, D), lambda g, l: (l, 0, 0, 0)),   # conv_w
                pl.BlockSpec((1, 1, D), lambda g, l: (l, 0, 0)),         # conv_b
                pl.BlockSpec((1, 1, D), lambda g, l: (l, 0, 0)),         # ln_g
                pl.BlockSpec((1, 1, D), lambda g, l: (l, 0, 0)),         # ln_b
                pl.BlockSpec((1, D), lambda g, l: (0, 0)),               # w_out
                pl.BlockSpec((1, 1), lambda g, l: (0, 0)),               # b_out
            ],
            out_specs=pl.BlockSpec((Bt, NC, CT), lambda g, l: (g, 0, 0)),
            scratch_shapes=[pltpu.VMEM((2, Bt, Tp + 2 * pad, D), cdtype)],
        ),
        compiler_params=pltpu.CompilerParams(
            dimension_semantics=("parallel", "arbitrary"),
            vmem_limit_bytes=vmem_limit_bytes),
    )(h0, m3, conv_w, conv_b, ln_g, ln_b, w_out, b_out)

    return out.reshape(Bp, Tp)[:B, :T]


def duration_predictor_ref(x, mask, params, *, depth, kernel_size):
    """Pure-JAX f32 reference mirroring the PyTorch forward semantics."""
    pad = kernel_size // 2
    T = x.shape[1]
    h = x @ params["w_in"] + params["b_in"][0]
    h = jnp.where(mask[..., None], h, 0.0)
    for l in range(depth):
        hp = jnp.pad(h, ((0, 0), (pad, pad), (0, 0)))
        acc = jnp.zeros_like(h) + params["conv_b"][l]
        for k in range(kernel_size):
            acc = acc + hp[:, k:k + T, :] @ params["conv_w"][l, k]
        mean = acc.mean(-1, keepdims=True)
        var = ((acc - mean) ** 2).mean(-1, keepdims=True)
        acc = (acc - mean) / jnp.sqrt(var + _LN_EPS)
        acc = acc * params["ln_g"][l] + params["ln_b"][l]
        h = _gelu(acc, approximate=False)
    h = jnp.where(mask[..., None], h, 0.0)
    out = h @ params["w_out"] + params["b_out"][0]
    return out[..., 0]


def init_params(key, dim_input, dim, depth, kernel_size):
    ks = jax.random.split(key, 8)
    scale = 0.1
    return {
        "w_in":   scale * jax.random.normal(ks[0], (dim_input, dim), jnp.float32),
        "b_in":   scale * jax.random.normal(ks[1], (1, dim), jnp.float32),
        # Conv weights tap-major as (depth, K, Cin, Cout); equivalent to the
        # PyTorch Conv1d weight (Cout, Cin, K) transposed to (K, Cin, Cout).
        "conv_w": scale * jax.random.normal(ks[2], (depth, kernel_size, dim, dim), jnp.float32),
        "conv_b": scale * jax.random.normal(ks[3], (depth, dim), jnp.float32),
        "ln_g":   1.0 + scale * jax.random.normal(ks[4], (depth, dim), jnp.float32),
        "ln_b":   scale * jax.random.normal(ks[5], (depth, dim), jnp.float32),
        "w_out":  scale * jax.random.normal(ks[6], (dim, 1), jnp.float32),
        "b_out":  scale * jax.random.normal(ks[7], (1, 1), jnp.float32),
    }


if __name__ == "__main__":
    # B not a multiple of the batch block and T not a multiple of 128:
    # exercises batch/time padding plus the tail re-zeroing.
    B, T = 12, 200
    dim_input, dim, depth, kernel_size = 8, 32, 3, 3

    key = jax.random.PRNGKey(0)
    kx, kp = jax.random.split(key)
    x = jax.random.normal(kx, (B, T, dim_input), jnp.float32)
    lengths = 1 + (jnp.arange(B, dtype=jnp.int32) * 37) % T
    lengths = lengths.at[0].set(T)
    mask = jnp.arange(T)[None, :] < lengths[:, None]              # (B, T) bool

    params = init_params(kp, dim_input, dim, depth, kernel_size)
    ref = duration_predictor_ref(x, mask, params,
                                 depth=depth, kernel_size=kernel_size)

    # f32 + exact GELU, 128-wide time chunks (exercises the chunked ping-pong
    # hidden state): must track the f32 reference tightly.
    out_f32 = duration_predictor_pallas(
        x, mask, params, depth=depth, kernel_size=kernel_size,
        time_chunk=128, compute_dtype=jnp.float32, approximate_gelu=False)
    out_f32 = jax.block_until_ready(out_f32)
    assert out_f32.shape == (B, T)
    assert jnp.allclose(out_f32, ref, atol=1e-3, rtol=1e-3), (
        f"f32 max abs err {jnp.max(jnp.abs(out_f32 - ref))}")

    # Production-flavoured path: bf16 MXU operands + tanh-approx GELU,
    # single full-width chunk. Loose tolerance vs the exact f32 reference.
    out_fast = duration_predictor_pallas(
        x, mask, params, depth=depth, kernel_size=kernel_size,
        compute_dtype=jnp.bfloat16, approximate_gelu=True)
    out_fast = jax.block_until_ready(out_fast)
    assert out_fast.shape == (B, T)
    assert jnp.allclose(out_fast, ref, atol=5e-2, rtol=5e-2), (
        f"bf16 max abs err {jnp.max(jnp.abs(out_fast - ref))}")

    print("KERNEL_OK")
</pallas_src>

<mosaic_0001>
module attributes {stable_mosaic.version = 11 : i64} {
  func.func @_dp_kernel(%arg0: i32, %arg1: i32, %arg2: memref<8x256x32xf32, #tpu.memory_space<vmem>>, %arg3: memref<8x2x128xf32, #tpu.memory_space<vmem>>, %arg4: memref<1x3x32x32xf32, #tpu.memory_space<vmem>>, %arg5: memref<1x1x32xf32, #tpu.memory_space<vmem>>, %arg6: memref<1x1x32xf32, #tpu.memory_space<vmem>>, %arg7: memref<1x1x32xf32, #tpu.memory_space<vmem>>, %arg8: memref<1x32xf32, #tpu.memory_space<vmem>>, %arg9: memref<1x1xf32, #tpu.memory_space<vmem>>, %arg10: memref<8x2x128xf32, #tpu.memory_space<vmem>>, %arg11: memref<2x8x258x32xf32, #tpu.memory_space<vmem>>) attributes {dimension_semantics = [#tpu.dimension_semantics<parallel>, #tpu.dimension_semantics<arbitrary>], iteration_bounds = array<i64: 2, 3>, scalar_prefetch = 0 : i64, scratch_operands = 1 : i64, tpu.core_type = #tpu.core_type<tc>, window_params = [{transform_indices = @transform_0, window_bounds = array<i64: 8, 256, 32>}, {transform_indices = @transform_1, window_bounds = array<i64: 8, 2, 128>}, {transform_indices = @transform_2, window_bounds = array<i64: 1, 3, 32, 32>}, {transform_indices = @transform_3, window_bounds = array<i64: 1, 1, 32>}, {transform_indices = @transform_4, window_bounds = array<i64: 1, 1, 32>}, {transform_indices = @transform_5, window_bounds = array<i64: 1, 1, 32>}, {pipeline_mode = #tpu.pipeline_mode<synchronous>, transform_indices = @transform_6, window_bounds = array<i64: 1, 32>}, {pipeline_mode = #tpu.pipeline_mode<synchronous>, transform_indices = @transform_7, window_bounds = array<i64: 1, 1>}, {transform_indices = @transform_8, window_bounds = array<i64: 8, 2, 128>}]} {
    %c2_i32 = arith.constant 2 : i32
    %c0_i32 = arith.constant 0 : i32
    %0 = arith.cmpi eq, %c2_i32, %c0_i32 : i32
    %c1_i32 = arith.constant 1 : i32
    %1 = arith.select %0, %c1_i32, %c2_i32 : i32
    %2 = arith.remsi %arg1, %1 : i32
    %c0_i32_0 = arith.constant 0 : i32
    %3 = arith.cmpi ne, %2, %c0_i32_0 : i32
    %c0_i32_1 = arith.constant 0 : i32
    %4 = arith.cmpi slt, %2, %c0_i32_1 : i32
    %c0_i32_2 = arith.constant 0 : i32
    %5 = arith.cmpi slt, %1, %c0_i32_2 : i32
    %6 = arith.xori %4, %5 : i1
    %7 = arith.andi %6, %3 : i1
    %8 = arith.addi %2, %1 : i32
    %9 = arith.select %7, %8, %2 : i32
    %c1_i32_3 = arith.constant 1 : i32
    %10 = arith.subi %c1_i32_3, %9 : i32
    %c2_i32_4 = arith.constant 2 : i32
    %11 = arith.cmpi eq, %arg1, %c2_i32_4 : i32
    %c0_i32_5 = arith.constant 0 : i32
    %12 = arith.cmpi eq, %arg1, %c0_i32_5 : i32
    %13 = arith.extui %12 : i1 to i32
    %c0_i32_6 = arith.constant 0 : i32
    %14 = arith.cmpi ne, %13, %c0_i32_6 : i32
    scf.if %14 {
      %cst = arith.constant 0.000000e+00 : f32
      %19 = vector.broadcast %cst : f32 to vector<2x8x1x32xf32>
      %c0 = arith.constant 0 : index
      %c0_13 = arith.constant 0 : index
      %c0_14 = arith.constant 0 : index
      %c0_15 = arith.constant 0 : index
      %20 = vector.load %arg11[%c0, %c0_13, %c0_14, %c0_15] : memref<2x8x258x32xf32, #tpu.memory_space<vmem>>, vector<2x8x1x32xf32>
      tpu.vector_store %arg11[%c0, %c0_13, %c0_14, %c0_15], %19 {strides = array<i32>} : memref<2x8x258x32xf32, #tpu.memory_space<vmem>>, vector<2x8x1x32xf32>,
      %c0_16 = arith.constant 0 : index
      %c0_17 = arith.constant 0 : index
      %c257 = arith.constant 257 : index
      %c0_18 = arith.constant 0 : index
      %21 = vector.load %arg11[%c0_16, %c0_17, %c257, %c0_18] : memref<2x8x258x32xf32, #tpu.memory_space<vmem>>, vector<2x8x1x32xf32>
      tpu.vector_store %arg11[%c0_16, %c0_17, %c257, %c0_18], %19 {strides = array<i32>} : memref<2x8x258x32xf32, #tpu.memory_space<vmem>>, vector<2x8x1x32xf32>,
      %c0_i32_19 = arith.constant 0 : i32
      %c2_i32_20 = arith.constant 2 : i32
      %22 = arith.addi %c0_i32_19, %c2_i32_20 : i32
      %c1_i32_21 = arith.constant 1 : i32
      scf.for %arg12 = %c0_i32_19 to %22 step %c1_i32_21  : i32 {
        %c1_i32_23 = arith.constant 1 : i32
        %23 = arith.muli %arg12, %c1_i32_23 : i32
        %c0_i32_24 = arith.constant 0 : i32
        %24 = arith.addi %c0_i32_24, %23 : i32
        %c128_i32 = arith.constant 128 : i32
        %25 = arith.muli %24, %c128_i32 : i32
        %26 = tpu.assume_multiple %25, 128 : i32
        %c0_25 = arith.constant 0 : index
        %27 = arith.index_cast %26 : i32 to index
        %c0_26 = arith.constant 0 : index
        %28 = vector.load %arg2[%c0_25, %27, %c0_26] : memref<8x256x32xf32, #tpu.memory_space<vmem>>, vector<8x128x32xf32>
        %c1_i32_27 = arith.constant 1 : i32
        %29 = arith.addi %c1_i32_27, %26 : i32
        %c0_28 = arith.constant 0 : index
        %c0_29 = arith.constant 0 : index
        %30 = arith.index_cast %29 : i32 to index
        %c0_30 = arith.constant 0 : index
        %31 = vector.load %arg11[%c0_28, %c0_29, %30, %c0_30] : memref<2x8x258x32xf32, #tpu.memory_space<vmem>>, vector<1x8x128x32xf32>
        %32 = vector.shape_cast %31 : vector<1x8x128x32xf32> to vector<8x128x32xf32>
        %33 = vector.shape_cast %28 : vector<8x128x32xf32> to vector<1x8x128x32xf32>
        tpu.vector_store %arg11[%c0_28, %c0_29, %30, %c0_30], %33 {strides = array<i32>} : memref<2x8x258x32xf32, #tpu.memory_space<vmem>>, vector<1x8x128x32xf32>,
      }
      %c2_i32_22 = arith.constant 2 : i32
    } else {
    }
    %c0_i32_7 = arith.constant 0 : i32
    %c2_i32_8 = arith.constant 2 : i32
    %15 = arith.addi %c0_i32_7, %c2_i32_8 : i32
    %c1_i32_9 = arith.constant 1 : i32
    scf.for %arg12 = %c0_i32_7 to %15 step %c1_i32_9  : i32 {
      %c1_i32_13 = arith.constant 1 : i32
      %19 = arith.muli %arg12, %c1_i32_13 : i32
      %c0_i32_14 = arith.constant 0 : i32
      %20 = arith.addi %c0_i32_14, %19 : i32
      %c128_i32 = arith.constant 128 : i32
      %21 = arith.muli %20, %c128_i32 : i32
      %22 = tpu.assume_multiple %21, 128 : i32
      %23 = arith.index_cast %9 : i32 to index
      %c0 = arith.constant 0 : index
      %24 = arith.index_cast %22 : i32 to index
      %c0_15 = arith.constant 0 : index
      %25 = vector.load %arg11[%23, %c0, %24, %c0_15] : memref<2x8x258x32xf32, #tpu.memory_space<vmem>>, vector<1x8x128x32xf32>
      %26 = vector.shape_cast %25 : vector<1x8x128x32xf32> to vector<8x128x32xf32>
      %27 = vector.shape_cast %26 : vector<8x128x32xf32> to vector<1024x32xf32>
      %c0_16 = arith.constant 0 : index
      %c0_17 = arith.constant 0 : index
      %c0_18 = arith.constant 0 : index
      %c0_19 = arith.constant 0 : index
      %28 = vector.load %arg4[%c0_16, %c0_17, %c0_18, %c0_19] : memref<1x3x32x32xf32, #tpu.memory_space<vmem>>, vector<1x1x32x32xf32>
      %29 = vector.shape_cast %28 : vector<1x1x32x32xf32> to vector<32x32xf32>
      %cst = arith.constant dense<0.000000e+00> : vector<1024x32xf32>
      %30 = tpu.matmul %27, %29, %cst {dimension_numbers = #tpu.dot_dimension_numbers<[1], [0], [0], [1], [0, 0, 1, 1], [], []>} : vector<1024x32xf32>, vector<32x32xf32>, vector<1024x32xf32> -> vector<1024x32xf32>
      %c1_i32_20 = arith.constant 1 : i32
      %31 = arith.addi %22, %c1_i32_20 : i32
      %32 = arith.index_cast %9 : i32 to index
      %c0_21 = arith.constant 0 : index
      %33 = arith.index_cast %31 : i32 to index
      %c0_22 = arith.constant 0 : index
      %34 = vector.load %arg11[%32, %c0_21, %33, %c0_22] : memref<2x8x258x32xf32, #tpu.memory_space<vmem>>, vector<1x8x128x32xf32>
      %35 = vector.shape_cast %34 : vector<1x8x128x32xf32> to vector<8x128x32xf32>
      %36 = vector.shape_cast %35 : vector<8x128x32xf32> to vector<1024x32xf32>
      %c0_23 = arith.constant 0 : index
      %c1 = arith.constant 1 : index
      %c0_24 = arith.constant 0 : index
      %c0_25 = arith.constant 0 : index
      %37 = vector.load %arg4[%c0_23, %c1, %c0_24, %c0_25] : memref<1x3x32x32xf32, #tpu.memory_space<vmem>>, vector<1x1x32x32xf32>
      %38 = vector.shape_cast %37 : vector<1x1x32x32xf32> to vector<32x32xf32>
      %cst_26 = arith.constant dense<0.000000e+00> : vector<1024x32xf32>
      %39 = tpu.matmul %36, %38, %cst_26 {dimension_numbers = #tpu.dot_dimension_numbers<[1], [0], [0], [1], [0, 0, 1, 1], [], []>} : vector<1024x32xf32>, vector<32x32xf32>, vector<1024x32xf32> -> vector<1024x32xf32>
      %40 = arith.addf %30, %39 : vector<1024x32xf32>
      %c2_i32_27 = arith.constant 2 : i32
      %41 = arith.addi %22, %c2_i32_27 : i32
      %42 = arith.index_cast %9 : i32 to index
      %c0_28 = arith.constant 0 : index
      %43 = arith.index_cast %41 : i32 to index
      %c0_29 = arith.constant 0 : index
      %44 = vector.load %arg11[%42, %c0_28, %43, %c0_29] : memref<2x8x258x32xf32, #tpu.memory_space<vmem>>, vector<1x8x128x32xf32>
      %45 = vector.shape_cast %44 : vector<1x8x128x32xf32> to vector<8x128x32xf32>
      %46 = vector.shape_cast %45 : vector<8x128x32xf32> to vector<1024x32xf32>
      %c0_30 = arith.constant 0 : index
      %c2 = arith.constant 2 : index
      %c0_31 = arith.constant 0 : index
      %c0_32 = arith.constant 0 : index
      %47 = vector.load %arg4[%c0_30, %c2, %c0_31, %c0_32] : memref<1x3x32x32xf32, #tpu.memory_space<vmem>>, vector<1x1x32x32xf32>
      %48 = vector.shape_cast %47 : vector<1x1x32x32xf32> to vector<32x32xf32>
      %cst_33 = arith.constant dense<0.000000e+00> : vector<1024x32xf32>
      %49 = tpu.matmul %46, %48, %cst_33 {dimension_numbers = #tpu.dot_dimension_numbers<[1], [0], [0], [1], [0, 0, 1, 1], [], []>} : vector<1024x32xf32>, vector<32x32xf32>, vector<1024x32xf32> -> vector<1024x32xf32>
      %50 = arith.addf %40, %49 : vector<1024x32xf32>
      %c0_34 = arith.constant 0 : index
      %c0_35 = arith.constant 0 : index
      %c0_36 = arith.constant 0 : index
      %51 = vector.load %arg5[%c0_34, %c0_35, %c0_36] : memref<1x1x32xf32, #tpu.memory_space<vmem>>, vector<1x1x32xf32>
      %52 = vector.shape_cast %51 : vector<1x1x32xf32> to vector<1x32xf32>
      %53 = vector.broadcast %52 : vector<1x32xf32> to vector<1024x32xf32>
      %54 = arith.addf %50, %53 : vector<1024x32xf32>
      %cst_37 = arith.constant dense<0.000000e+00> : vector<1024xf32>
      %55 = vector.multi_reduction <add>, %54, %cst_37 [1] : vector<1024x32xf32> to vector<1024xf32>
      %56 = vector.shape_cast %55 : vector<1024xf32> to vector<1024x1xf32>
      %cst_38 = arith.constant 3.200000e+01 : f32
      %57 = vector.broadcast %cst_38 : f32 to vector<1024x1xf32>
      %58 = arith.divf %56, %57 : vector<1024x1xf32>
      %59 = vector.broadcast %58 : vector<1024x1xf32> to vector<1024x32xf32>
      %60 = arith.subf %54, %59 : vector<1024x32xf32>
      %61 = arith.mulf %60, %60 : vector<1024x32xf32>
      %cst_39 = arith.constant dense<0.000000e+00> : vector<1024xf32>
      %62 = vector.multi_reduction <add>, %61, %cst_39 [1] : vector<1024x32xf32> to vector<1024xf32>
      %63 = vector.shape_cast %62 : vector<1024xf32> to vector<1024x1xf32>
      %cst_40 = arith.constant 3.200000e+01 : f32
      %64 = vector.broadcast %cst_40 : f32 to vector<1024x1xf32>
      %65 = arith.divf %63, %64 : vector<1024x1xf32>
      %cst_41 = arith.constant 9.99999974E-6 : f32
      %66 = vector.broadcast %cst_41 : f32 to vector<1024x1xf32>
      %67 = arith.addf %65, %66 : vector<1024x1xf32>
      %68 = math.rsqrt %67 : vector<1024x1xf32>
      %c0_42 = arith.constant 0 : index
      %c0_43 = arith.constant 0 : index
      %c0_44 = arith.constant 0 : index
      %69 = vector.load %arg6[%c0_42, %c0_43, %c0_44] : memref<1x1x32xf32, #tpu.memory_space<vmem>>, vector<1x1x32xf32>
      %70 = vector.shape_cast %69 : vector<1x1x32xf32> to vector<1x32xf32>
      %71 = vector.broadcast %68 : vector<1024x1xf32> to vector<1024x32xf32>
      %72 = vector.broadcast %70 : vector<1x32xf32> to vector<1024x32xf32>
      %73 = arith.mulf %71, %72 : vector<1024x32xf32>
      %74 = arith.mulf %60, %73 : vector<1024x32xf32>
      %c0_45 = arith.constant 0 : index
      %c0_46 = arith.constant 0 : index
      %c0_47 = arith.constant 0 : index
      %75 = vector.load %arg7[%c0_45, %c0_46, %c0_47] : memref<1x1x32xf32, #tpu.memory_space<vmem>>, vector<1x1x32xf32>
      %76 = vector.shape_cast %75 : vector<1x1x32xf32> to vector<1x32xf32>
      %77 = vector.broadcast %76 : vector<1x32xf32> to vector<1024x32xf32>
      %78 = arith.addf %74, %77 : vector<1024x32xf32>
      %cst_48 = arith.constant 5.000000e-01 : f32
      %79 = vector.broadcast %cst_48 : f32 to vector<1024x32xf32>
      %80 = arith.mulf %79, %78 : vector<1024x32xf32>
      %cst_49 = arith.constant 0.707106769 : f32
      %81 = vector.broadcast %cst_49 : f32 to vector<1024x32xf32>
      %82 = arith.mulf %78, %81 : vector<1024x32xf32>
      %83 = math.erf %82 : vector<1024x32xf32>
      %cst_50 = arith.constant 1.000000e+00 : f32
      %84 = vector.broadcast %cst_50 : f32 to vector<1024x32xf32>
      %85 = arith.addf %84, %83 : vector<1024x32xf32>
      %86 = arith.mulf %80, %85 : vector<1024x32xf32>
      %c2_i32_51 = arith.constant 2 : i32
      %87 = arith.cmpi slt, %arg1, %c2_i32_51 : i32
      %88 = arith.extui %87 : i1 to i32
      %c0_i32_52 = arith.constant 0 : i32
      %89 = arith.cmpi ne, %88, %c0_i32_52 : i32
      scf.if %89 {
        %92 = vector.shape_cast %86 : vector<1024x32xf32> to vector<8x128x32xf32>
        %c1_i32_54 = arith.constant 1 : i32
        %93 = arith.addi %c1_i32_54, %22 : i32
        %94 = arith.index_cast %10 : i32 to index
        %c0_55 = arith.constant 0 : index
        %95 = arith.index_cast %93 : i32 to index
        %c0_56 = arith.constant 0 : index
        %96 = vector.load %arg11[%94, %c0_55, %95, %c0_56] : memref<2x8x258x32xf32, #tpu.memory_space<vmem>>, vector<1x8x128x32xf32>
        %97 = vector.shape_cast %96 : vector<1x8x128x32xf32> to vector<8x128x32xf32>
        %98 = vector.shape_cast %92 : vector<8x128x32xf32> to vector<1x8x128x32xf32>
        tpu.vector_store %arg11[%94, %c0_55, %95, %c0_56], %98 {strides = array<i32>} : memref<2x8x258x32xf32, #tpu.memory_space<vmem>>, vector<1x8x128x32xf32>,
      } else {
      }
      %90 = arith.extui %11 : i1 to i32
      %c0_i32_53 = arith.constant 0 : i32
      %91 = arith.cmpi ne, %90, %c0_i32_53 : i32
      scf.if %91 {
        %92 = vector.shape_cast %86 : vector<1024x32xf32> to vector<8x128x32xf32>
        %c0_54 = arith.constant 0 : index
        %c0_55 = arith.constant 0 : index
        %93 = vector.load %arg8[%c0_54, %c0_55] : memref<1x32xf32, #tpu.memory_space<vmem>>, vector<1x32xf32>
        %94 = vector.shape_cast %93 : vector<1x32xf32> to vector<1x1x32xf32>
        %95 = vector.broadcast %94 : vector<1x1x32xf32> to vector<8x128x32xf32>
        %96 = arith.mulf %92, %95 : vector<8x128x32xf32>
        %cst_56 = arith.constant dense<0.000000e+00> : vector<8x128xf32>
        %97 = vector.multi_reduction <add>, %96, %cst_56 [2] : vector<8x128x32xf32> to vector<8x128xf32>
        %c0_57 = arith.constant 0 : index
        %98 = arith.index_cast %20 : i32 to index
        %c0_58 = arith.constant 0 : index
        %99 = vector.load %arg3[%c0_57, %98, %c0_58] : memref<8x2x128xf32, #tpu.memory_space<vmem>>, vector<8x1x128xf32>
        %100 = vector.shape_cast %97 : vector<8x128xf32> to vector<8x1x128xf32>
        %101 = arith.mulf %99, %100 : vector<8x1x128xf32>
        %c0_59 = arith.constant 0 : index
        %c0_60 = arith.constant 0 : index
        %102 = vector.load %arg9[%c0_59, %c0_60] : memref<1x1xf32, #tpu.memory_space<vmem>>, vector<1x1xf32>
        %103 = vector.shape_cast %102 : vector<1x1xf32> to vector<1x1x1xf32>
        %104 = vector.broadcast %103 : vector<1x1x1xf32> to vector<8x1x128xf32>
        %105 = arith.addf %101, %104 : vector<8x1x128xf32>
        %c0_61 = arith.constant 0 : index
        %106 = arith.index_cast %20 : i32 to index
        %c0_62 = arith.constant 0 : index
        %107 = vector.load %arg10[%c0_61, %106, %c0_62] : memref<8x2x128xf32, #tpu.memory_space<vmem>>, vector<8x1x128xf32>
        tpu.vector_store %arg10[%c0_61, %106, %c0_62], %105 {strides = array<i32>} : memref<8x2x128xf32, #tpu.memory_space<vmem>>, vector<8x1x128xf32>,
      } else {
      }
    }
    %c2_i32_10 = arith.constant 2 : i32
    %c2_i32_11 = arith.constant 2 : i32
    %16 = arith.cmpi slt, %arg1, %c2_i32_11 : i32
    %17 = arith.extui %16 : i1 to i32
    %c0_i32_12 = arith.constant 0 : i32
    %18 = arith.cmpi ne, %17, %c0_i32_12 : i32
    scf.if %18 {
      %cst = arith.constant 0.000000e+00 : f32
      %19 = vector.broadcast %cst : f32 to vector<8x1x32xf32>
      %20 = arith.index_cast %10 : i32 to index
      %c0 = arith.constant 0 : index
      %c201 = arith.constant 201 : index
      %c0_13 = arith.constant 0 : index
      %21 = vector.load %arg11[%20, %c0, %c201, %c0_13] : memref<2x8x258x32xf32, #tpu.memory_space<vmem>>, vector<1x8x1x32xf32>
      %22 = vector.shape_cast %21 : vector<1x8x1x32xf32> to vector<8x1x32xf32>
      %23 = vector.shape_cast %19 : vector<8x1x32xf32> to vector<1x8x1x32xf32>
      tpu.vector_store %arg11[%20, %c0, %c201, %c0_13], %23 {strides = array<i32>} : memref<2x8x258x32xf32, #tpu.memory_space<vmem>>, vector<1x8x1x32xf32>,
    } else {
    }
    return
  }
  func.func @transform_0(%arg0: i32, %arg1: i32) -> (i32, i32, i32) {
    %c0_i32 = arith.constant 0 : i32
    %c0_i32_0 = arith.constant 0 : i32
    %c0_i32_1 = arith.constant 0 : i32
    return %arg0, %c0_i32, %c0_i32_0 : i32, i32, i32
  }
  func.func @transform_1(%arg0: i32, %arg1: i32) -> (i32, i32, i32) {
    %c0_i32 = arith.constant 0 : i32
    %c0_i32_0 = arith.constant 0 : i32
    %c0_i32_1 = arith.constant 0 : i32
    return %arg0, %c0_i32, %c0_i32_0 : i32, i32, i32
  }
  func.func @transform_2(%arg0: i32, %arg1: i32) -> (i32, i32, i32, i32) {
    %c0_i32 = arith.constant 0 : i32
    %c0_i32_0 = arith.constant 0 : i32
    %c0_i32_1 = arith.constant 0 : i32
    %c0_i32_2 = arith.constant 0 : i32
    return %arg1, %c0_i32, %c0_i32_0, %c0_i32_1 : i32, i32, i32, i32
  }
  func.func @transform_3(%arg0: i32, %arg1: i32) -> (i32, i32, i32) {
    %c0_i32 = arith.constant 0 : i32
    %c0_i32_0 = arith.constant 0 : i32
    %c0_i32_1 = arith.constant 0 : i32
    return %arg1, %c0_i32, %c0_i32_0 : i32, i32, i32
  }
  func.func @transform_4(%arg0: i32, %arg1: i32) -> (i32, i32, i32) {
    %c0_i32 = arith.constant 0 : i32
    %c0_i32_0 = arith.constant 0 : i32
    %c0_i32_1 = arith.constant 0 : i32
    return %arg1, %c0_i32, %c0_i32_0 : i32, i32, i32
  }
  func.func @transform_5(%arg0: i32, %arg1: i32) -> (i32, i32, i32) {
    %c0_i32 = arith.constant 0 : i32
    %c0_i32_0 = arith.constant 0 : i32
    %c0_i32_1 = arith.constant 0 : i32
    return %arg1, %c0_i32, %c0_i32_0 : i32, i32, i32
  }
  func.func @transform_6(%arg0: i32, %arg1: i32) -> (i32, i32) {
    %c0_i32 = arith.constant 0 : i32
    %c0_i32_0 = arith.constant 0 : i32
    %c0_i32_1 = arith.constant 0 : i32
    return %c0_i32, %c0_i32_0 : i32, i32
  }
  func.func @transform_7(%arg0: i32, %arg1: i32) -> (i32, i32) {
    %c0_i32 = arith.constant 0 : i32
    %c0_i32_0 = arith.constant 0 : i32
    %c0_i32_1 = arith.constant 0 : i32
    return %c0_i32, %c0_i32_0 : i32, i32
  }
  func.func @transform_8(%arg0: i32, %arg1: i32) -> (i32, i32, i32) {
    %c0_i32 = arith.constant 0 : i32
    %c0_i32_0 = arith.constant 0 : i32
    %c0_i32_1 = arith.constant 0 : i32
    return %arg0, %c0_i32, %c0_i32_0 : i32, i32, i32
  }
}

</mosaic_0001>

<bundles_post_ra>
// kernel: tpu_custom_call.1
= control target key start
LH: loop header
LB: loop body
LE: loop exit
PB: predicated region body
PF: predicated region fallthrough
CT: control target
= control target key end

     0   :  { %s17944_s0 = inlined_call_operand.vmem [shape: f32[16,256,32], index: 0, kind: input, shape index: {}]   ;;  %s17945_s1 = inlined_call_operand.vmem [shape: f32[16,2,128], index: 1, kind: input, shape index: {}]   ;;  %s17946_s2 = inlined_call_operand.vmem [shape: f32[3,3,32,32], index: 2, kind: input, shape index: {}]   ;;  %s17947_s3 = inlined_call_operand.vmem [shape: f32[3,1,32], index: 3, kind: input, shape index: {}]   ;;  %s17948_s4 = inlined_call_operand.vmem [shape: f32[3,1,32], index: 4, kind: input, shape index: {}]   ;;  %s17949_s5 = inlined_call_operand.vmem [shape: f32[3,1,32], index: 5, kind: input, shape index: {}]   ;;  %s17950_s6 = inlined_call_operand.vmem [shape: f32[1,32], index: 6, kind: input, shape index: {}]   ;;  %s17951_s7 = inlined_call_operand.<no memory space> [shape: f32[1,1], index: 7, kind: input, shape index: {}]   ;;  %s17952_s8 = inlined_call_operand.hbm [shape: f32[16,2,128], index: 8, kind: output, shape index: {}]  }
   0x1   :  { %18163 = sst [smem:[#allocation148_spill]] %s17944_s0  ;;  %v13_v0 = vstv %s17951_s7 }
   0x2   :  { %18164 = sst [smem:[#allocation149_spill]] %s17945_s1  ;;  %14 = vst [vmem:[#allocation3] sm:$0x1] %v13_v0 }
   0x3   :  { %15 = vsyncpa [#allocation5], 0 }
   0x4   :  { %17 = vsyncpa [#allocation5 + $0x1], 0  ;;  %s11941_s29 = smov 0   ;;  %s11943_s30 = smov 0  }
   0x5   :  { %s11945_s9 = smov 0   ;;  %s11947_s10 = smov 0  }
   0x6   :  { %s11949_s11 = smov 0   ;;  %s11951_s12 = smov 0  }
   0x7   :  { %s11953_s13 = smov 0   ;;  %s11955_s14 = smov 0  }
   0x8 LB: > { %18165 = sst [smem:[#allocation7_spill]] %s11857_s9  ;;  %s8938_s7 = sadd.s32 4294967295, %s11877_s14   ;;  %s11877_s14 = sphi %s11955_s14, %s23_s14   ;;  %s11873_s13 = sphi %s11953_s13, %s18908_s13   ;;  %s11869_s12 = sphi %s11951_s12, %s18907_s12   ;;  %s11865_s11 = sphi %s11949_s11, %s18906_s11   ;;  %s11861_s10 = sphi %s11947_s10, %s18905_s10   ;;  %s11857_s9 = sphi %s11945_s9, %s18904_s9   ;;  %s11853_s30 = sphi %s11943_s30, %s18910_s30   ;;  %s11849_s29 = sphi %s11941_s29, %s18909_s29  }
   0x9   : > { %18166 = sst [smem:[#allocation8_spill]] %s11869_s12  ;;  %s8939_s15 = sadd.s32 4294967294, %s11877_s14  }
   0xa   : > { %18167 = sst [smem:[#allocation9_spill]] %s11873_s13  ;;  %s32_s16 = sadd.s32 1, %s11869_s12 }
   0xb   : > { %p33_p0 = scmp.ge.s32.totalorder %s32_s16, 3  ;;  %s35_s17 = sadd.s32 1, %s11873_s13 }
   0xc   : > { %p250_p1 = scmp.ne.s32.totalorder %s11857_s9, %s11853_s30  ;;  %p251_p2 = scmp.eq.s32.totalorder %s8938_s7, 5 }
   0xd   : > { %s18912_s16 = smov (%p33_p0, %s32_s16), 0  ;;  %s18914_s17 = smov (!%p33_p0, %s35_s17), %s11873_s13 }
   0xe   : > { %18168 = sst [smem:[#allocation10_spill]] %s18912_s16  ;;  %p11990_p3 = por %p251_p2, %p250_p1 }
   0xf   : > { %p256_p4 = scmp.ne.s32.totalorder %s11853_s30, %s11849_s29  ;;  %p37_p5 = scmp.ge.s32.totalorder %s18914_s17, 2 }
  0x10   : > { %p257_p6 = scmp.eq.s32.totalorder %s8939_s15, 5  ;;  %p8942_p7 = scmp.ge.s32.totalorder %s11877_s14, 1 }
  0x11   : > { %p326_p8 = scmp.lt.s32.totalorder %s11877_s14, 7  ;;  %s18916_s17 = smov (%p37_p5, %s18914_s17), 0 }
  0x12   : > { %18170 = sst [smem:[#allocation11_spill]] %s18916_s17  ;;  %p12000_p9 = por %p257_p6, %p256_p4 }
  0x13   : > { %p327_p10 = pnand %p8942_p7, %p326_p8  ;;  %s237_s20 = ssub.s32 %s11873_s13, %s18916_s17 }
  0x14   : > { %s18171_s19 = scalar_select %p12000_p9, 1, 0 }
  0x15   : > { %s240_s21 = sadd.s32 1, %s11857_s9  ;;  %p238_p11 = scmp.eq.s32.totalorder %s237_s20, 0 }
  0x16   : > { %18172 = sst [smem:[#allocation12_spill]] %s18171_s19  ;;  %330 = sbr.rel (%p327_p10) target bundleno = 1706 (0x6aa), region = 52 }
  0x17   : > { %s12008_s22 = scalar_select %p238_p11, %s11857_s9, %s240_s21  }
  0x18   : > { %s17954_s23 = sand.u32 (!%p327_p10), 1, %s11853_s30   ;;  %s8944_s24 = sshll.u32 (!%p327_p10), %s11865_s11, 3 }
  0x19   : > { %18173 = sst [smem:[#allocation13_spill]] %s12008_s22  ;;  %s12014_s25 = sshll.u32 (!%p327_p10), %s17954_s23, 4 }
  0x1a   : > { %p381_p12 = scmp.lt.s32.totalorder (!%p327_p10), %s8944_s24, 15  ;;  %p393_p13 = scmp.lt.s32.totalorder (!%p327_p10), %s11861_s10, 2 }
  0x1b   : > { %s18174_s0 = sld [smem:[#allocation148_spill]] (!%p327_p10)  ;;  %s18175_s1 = sld [smem:[#allocation149_spill]] (!%p327_p10) }
  0x1c   : > { %p408_p0 = scmp.lt.s32.totalorder (!%p327_p10), %s11861_s10, 0  ;;  %s379_s7 = scalar_lea.vmem (!%p327_p10), [#allocation4], %s12014_s25 }
  0x1d   : > { %s18918_s24 = smov (!%p381_p12, %s8944_s24), 15  ;;  %p8953_p2 = scmp.ne.s32.totalorder %s11861_s10, 0 }
  0x1e   : > { %s394_s26 = scalar_select %p393_p13, %s11861_s10, 2 }
  0x1f   : > { %s9876_s27 = sshll.u32 %s18918_s24, 8  ;;  %s8948_s28 = sshll.u32 %s18918_s24, 1  ;;  %vm426_vm0 = vcmask (!%p8953_p2), 253952   ;;  %v11887_v1 = vmov (!%p8953_p2), 0.0  }
  0x20   : > { %s11158_s23 = smul.u32 96, %s394_s26  ;;  %s12031_s22 = scalar_lea.vmem %s17947_s3, %s394_s26  ;;  %427 = vst.msk [vmem:[#allocation2] sm:$0x1] (!%p8953_p2), %vm426_vm0, %v11887_v1  ;;  %428 = vst.msk [vmem:[#allocation2 + $0x108] sm:$0x1] (!%p8953_p2), %vm426_vm0, %v11887_v1 }
  0x21   : > { %s12021_s20 = scalar_lea.vmem %s18174_s0, %s9876_s27  ;;  %s12026_s16 = scalar_lea.vmem %s18175_s1, %s8948_s28  ;;  %429 = vst.msk [vmem:[#allocation2 + $0x210] sm:$0x1] (!%p8953_p2), %vm426_vm0, %v11887_v1  ;;  %430 = vst.msk [vmem:[#allocation2 + $0x318] sm:$0x1] (!%p8953_p2), %vm426_vm0, %v11887_v1 }
  0x22   : > { %s12036_s24 = scalar_lea.vmem %s17948_s4, %s394_s26  ;;  %s12041_s15 = scalar_lea.vmem %s17949_s5, %s394_s26  ;;  %431 = vst.msk [vmem:[#allocation2 + $0x420] sm:$0x1] (!%p8953_p2), %vm426_vm0, %v11887_v1  ;;  %432 = vst.msk [vmem:[#allocation2 + $0x528] sm:$0x1] (!%p8953_p2), %vm426_vm0, %v11887_v1 }
  0x23   : > { %s12046_s21 = scalar_lea.vmem %s17946_s2, %s11158_s23  ;;  %s409_s0 = ssub.s32 0, %s11861_s10  ;;  %433 = vst.msk [vmem:[#allocation2 + $0x630] sm:$0x1] (!%p8953_p2), %vm426_vm0, %v11887_v1  ;;  %434 = vst.msk [vmem:[#allocation2 + $0x738] sm:$0x1] (!%p8953_p2), %vm426_vm0, %v11887_v1 }
  0x24   : > { %s8950_s12 = smin.u32 %s11861_s10, %s409_s0  ;;  %435 = vst.msk [vmem:[#allocation2 + $0x840] sm:$0x1] (!%p8953_p2), %vm426_vm0, %v11887_v1  ;;  %436 = vst.msk [vmem:[#allocation2 + $0x948] sm:$0x1] (!%p8953_p2), %vm426_vm0, %v11887_v1  ;;  %s12088_s0 = smov (!%p8953_p2), 0  }
  0x25   : > { %s411_s13 = sand.u32 1, %s8950_s12   ;;  %425 = sbr.rel (%p8953_p2) target bundleno = 115 (0x73), region = 56  ;;  %437 = vst.msk [vmem:[#allocation2 + $0xa50] sm:$0x1] (!%p8953_p2), %vm426_vm0, %v11887_v1  ;;  %438 = vst.msk [vmem:[#allocation2 + $0xb58] sm:$0x1] (!%p8953_p2), %vm426_vm0, %v11887_v1 }
  0x26   : > { %s412_s1 = ssub.s32 0, %s411_s13  ;;  %439 = vst.msk [vmem:[#allocation2 + $0xc60] sm:$0x1] (!%p8953_p2), %vm426_vm0, %v11887_v1  ;;  %440 = vst.msk [vmem:[#allocation2 + $0xd68] sm:$0x1] (!%p8953_p2), %vm426_vm0, %v11887_v1 }
  0x27   : > { %s18920_s1 = smov (!%p408_p0, %s412_s1), %s411_s13  ;;  %441 = vst.msk [vmem:[#allocation2 + $0xe70] sm:$0x1] (!%p8953_p2), %vm426_vm0, %v11887_v1  ;;  %442 = vst.msk [vmem:[#allocation2 + $0xf78] sm:$0x1] (!%p8953_p2), %vm426_vm0, %v11887_v1 }
  0x28   : > { %p8952_p1 = scmp.lt.s32.totalorder %s18920_s1, 0  ;;  %s418_s9 = sadd.s32 2, %s18920_s1  ;;  %443 = vst.msk [vmem:[#allocation2 + $0x101] sm:$0x1] (!%p8953_p2), %vm426_vm0, %v11887_v1  ;;  %444 = vst.msk [vmem:[#allocation2 + $0x209] sm:$0x1] (!%p8953_p2), %vm426_vm0, %v11887_v1 }
  0x29   : > { %445 = vst.msk [vmem:[#allocation2 + $0x311] sm:$0x1] (!%p8953_p2), %vm426_vm0, %v11887_v1  ;;  %446 = vst.msk [vmem:[#allocation2 + $0x419] sm:$0x1] (!%p8953_p2), %vm426_vm0, %v11887_v1 }
  0x2a   : > { %s18922_s9 = smov (!%p8952_p1, %s418_s9), %s18920_s1  ;;  %447 = vst.msk [vmem:[#allocation2 + $0x521] sm:$0x1] (!%p8953_p2), %vm426_vm0, %v11887_v1  ;;  %448 = vst.msk [vmem:[#allocation2 + $0x629] sm:$0x1] (!%p8953_p2), %vm426_vm0, %v11887_v1 }
  0x2b   : > { %s420_s19 = ssub.s32 1, %s18922_s9  ;;  %449 = vst.msk [vmem:[#allocation2 + $0x731] sm:$0x1] (!%p8953_p2), %vm426_vm0, %v11887_v1  ;;  %450 = vst.msk [vmem:[#allocation2 + $0x839] sm:$0x1] (!%p8953_p2), %vm426_vm0, %v11887_v1 }
  0x2c   : > { %451 = vst.msk [vmem:[#allocation2 + $0x941] sm:$0x1] %vm426_vm0, %v11887_v1  ;;  %452 = vst.msk [vmem:[#allocation2 + $0xa49] sm:$0x1] %vm426_vm0, %v11887_v1 }
  0x2d   : > { %453 = vst.msk [vmem:[#allocation2 + $0xb51] sm:$0x1] %vm426_vm0, %v11887_v1  ;;  %454 = vst.msk [vmem:[#allocation2 + $0xc59] sm:$0x1] %vm426_vm0, %v11887_v1 }
  0x2e   : > { %455 = vst.msk [vmem:[#allocation2 + $0xd61] sm:$0x1] %vm426_vm0, %v11887_v1  ;;  %456 = vst.msk [vmem:[#allocation2 + $0xe69] sm:$0x1] %vm426_vm0, %v11887_v1 }
  0x2f   : > { %457 = vst.msk [vmem:[#allocation2 + $0xf71] sm:$0x1] %vm426_vm0, %v11887_v1  ;;  %458 = vst.msk [vmem:[#allocation2 + $0x1079] sm:$0x1] %vm426_vm0, %v11887_v1 }
  0x30 LB: >> { %s8954_s1 = sshll.u32 %s11881_s0, 7  ;;  %vm597_vm1 = vcmask 261120   ;;  %s464_s0 = sadd.s32 1, %s11881_s0   ;;  %s11881_s0 = sphi %s12088_s0, %s464_s0  }
  0x31   : >> { %s12095_s23 = scalar_lea.vmem %s12021_s20, %s8954_s1  ;;  %s12100_s26 = scalar_lea.vmem [#allocation2], %s8954_s1 }
  0x32   : >> { %v467_v2 = vld [vmem:[%s12095_s23] sm:$0xff]  ;;  %v468_v3 = vld [vmem:[%s12095_s23 + $0x8] sm:$0xff]  ;;  %v469_v4 = vld [vmem:[%s12095_s23 + $0x10] sm:$0xff]  ;;  %p461_p4 = scmp.ge.s32.totalorder %s464_s0, 2  }
  0x33   : >> { %8956 = vst.msk [vmem:[%s12100_s26 + $0x1] sm:$0xff] %vm597_vm1, %v467_v2  ;;  %8957 = vst.msk [vmem:[%s12100_s26 + $0x9] sm:$0xff] %vm597_vm1, %v468_v3  ;;  %v470_v5 = vld [vmem:[%s12095_s23 + $0x18] sm:$0xff]  ;;  %v471_v6 = vld [vmem:[%s12095_s23 + $0x20] sm:$0xff] }
  0x34   : >> { %8958 = vst.msk [vmem:[%s12100_s26 + $0x11] sm:$0xff] %vm597_vm1, %v469_v4  ;;  %v472_v7 = vld [vmem:[%s12095_s23 + $0x28] sm:$0xff]  ;;  %8959 = vst.msk [vmem:[%s12100_s26 + $0x19] sm:$0xff] %vm597_vm1, %v470_v5  ;;  %v473_v8 = vld [vmem:[%s12095_s23 + $0x30] sm:$0xff] }
  0x35   : >> { %8960 = vst.msk [vmem:[%s12100_s26 + $0x21] sm:$0xff] %vm597_vm1, %v471_v6  ;;  %8961 = vst.msk [vmem:[%s12100_s26 + $0x29] sm:$0xff] %vm597_vm1, %v472_v7  ;;  %v474_v9 = vld [vmem:[%s12095_s23 + $0x38] sm:$0xff]  ;;  %v475_v10 = vld [vmem:[%s12095_s23 + $0x40] sm:$0xff] }
  0x36   : >> { %8962 = vst.msk [vmem:[%s12100_s26 + $0x31] sm:$0xff] %vm597_vm1, %v473_v8  ;;  %8963 = vst.msk [vmem:[%s12100_s26 + $0x39] sm:$0xff] %vm597_vm1, %v474_v9  ;;  %v476_v11 = vld [vmem:[%s12095_s23 + $0x48] sm:$0xff]  ;;  %v477_v12 = vld [vmem:[%s12095_s23 + $0x50] sm:$0xff] }
  0x37   : >> { %8964 = vst.msk [vmem:[%s12100_s26 + $0x41] sm:$0xff] %vm597_vm1, %v475_v10  ;;  %v478_v13 = vld [vmem:[%s12095_s23 + $0x58] sm:$0xff]  ;;  %8965 = vst.msk [vmem:[%s12100_s26 + $0x49] sm:$0xff] %vm597_vm1, %v476_v11  ;;  %v479_v14 = vld [vmem:[%s12095_s23 + $0x60] sm:$0xff] }
  0x38   : >> { %8966 = vst.msk [vmem:[%s12100_s26 + $0x51] sm:$0xff] %vm597_vm1, %v477_v12  ;;  %8967 = vst.msk [vmem:[%s12100_s26 + $0x59] sm:$0xff] %vm597_vm1, %v478_v13  ;;  %v480_v15 = vld [vmem:[%s12095_s23 + $0x68] sm:$0xff]  ;;  %v481_v16 = vld [vmem:[%s12095_s23 + $0x70] sm:$0xff] }
  0x39   : >> { %8968 = vst.msk [vmem:[%s12100_s26 + $0x61] sm:$0xff] %vm597_vm1, %v479_v14  ;;  %8969 = vst.msk [vmem:[%s12100_s26 + $0x69] sm:$0xff] %vm597_vm1, %v480_v15  ;;  %v482_v17 = vld [vmem:[%s12095_s23 + $0x78] sm:$0xff]  ;;  %v483_v18 = vld [vmem:[%s12095_s23 + $0x100] sm:$0xff] }
  0x3a   : >> { %8970 = vst.msk [vmem:[%s12100_s26 + $0x71] sm:$0xff] %vm597_vm1, %v481_v16  ;;  %v484_v19 = vld [vmem:[%s12095_s23 + $0x108] sm:$0xff]  ;;  %8971 = vst.msk [vmem:[%s12100_s26 + $0x79] sm:$0xff] %vm597_vm1, %v482_v17  ;;  %v485_v20 = vld [vmem:[%s12095_s23 + $0x110] sm:$0xff] }
  0x3b   : >> { %8972 = vst.msk [vmem:[%s12100_s26 + $0x109] sm:$0xff] %vm597_vm1, %v483_v18  ;;  %8973 = vst.msk [vmem:[%s12100_s26 + $0x111] sm:$0xff] %vm597_vm1, %v484_v19  ;;  %v486_v21 = vld [vmem:[%s12095_s23 + $0x118] sm:$0xff]  ;;  %v487_v22 = vld [vmem:[%s12095_s23 + $0x120] sm:$0xff] }
  0x3c   : >> { %8974 = vst.msk [vmem:[%s12100_s26 + $0x119] sm:$0xff] %vm597_vm1, %v485_v20  ;;  %8975 = vst.msk [vmem:[%s12100_s26 + $0x121] sm:$0xff] %vm597_vm1, %v486_v21  ;;  %v488_v23 = vld [vmem:[%s12095_s23 + $0x128] sm:$0xff]  ;;  %v489_v24 = vld [vmem:[%s12095_s23 + $0x130] sm:$0xff] }
  0x3d   : >> { %8976 = vst.msk [vmem:[%s12100_s26 + $0x129] sm:$0xff] %vm597_vm1, %v487_v22  ;;  %v490_v25 = vld [vmem:[%s12095_s23 + $0x138] sm:$0xff]  ;;  %8977 = vst.msk [vmem:[%s12100_s26 + $0x131] sm:$0xff] %vm597_vm1, %v488_v23  ;;  %v491_v26 = vld [vmem:[%s12095_s23 + $0x140] sm:$0xff] }
  0x3e   : >> { %8978 = vst.msk [vmem:[%s12100_s26 + $0x139] sm:$0xff] %vm597_vm1, %v489_v24  ;;  %8979 = vst.msk [vmem:[%s12100_s26 + $0x141] sm:$0xff] %vm597_vm1, %v490_v25  ;;  %v492_v27 = vld [vmem:[%s12095_s23 + $0x148] sm:$0xff]  ;;  %v493_v28 = vld [vmem:[%s12095_s23 + $0x150] sm:$0xff] }
  0x3f   : >> { %8980 = vst.msk [vmem:[%s12100_s26 + $0x149] sm:$0xff] %vm597_vm1, %v491_v26  ;;  %8981 = vst.msk [vmem:[%s12100_s26 + $0x151] sm:$0xff] %vm597_vm1, %v492_v27  ;;  %v494_v29 = vld [vmem:[%s12095_s23 + $0x158] sm:$0xff]  ;;  %v495_v30 = vld [vmem:[%s12095_s23 + $0x160] sm:$0xff] }
  0x40   : >> { %8982 = vst.msk [vmem:[%s12100_s26 + $0x159] sm:$0xff] %vm597_vm1, %v493_v28  ;;  %v496_v31 = vld [vmem:[%s12095_s23 + $0x168] sm:$0xff]  ;;  %8983 = vst.msk [vmem:[%s12100_s26 + $0x161] sm:$0xff] %vm597_vm1, %v494_v29  ;;  %v497_v32 = vld [vmem:[%s12095_s23 + $0x170] sm:$0xff] }
  0x41   : >> { %8984 = vst.msk [vmem:[%s12100_s26 + $0x169] sm:$0xff] %vm597_vm1, %v495_v30  ;;  %8985 = vst.msk [vmem:[%s12100_s26 + $0x171] sm:$0xff] %vm597_vm1, %v496_v31  ;;  %v498_v33 = vld [vmem:[%s12095_s23 + $0x178] sm:$0xff]  ;;  %v499_v34 = vld [vmem:[%s12095_s23 + $0x200] sm:$0xff] }
  0x42   : >> { %8986 = vst.msk [vmem:[%s12100_s26 + $0x179] sm:$0xff] %vm597_vm1, %v497_v32  ;;  %8987 = vst.msk [vmem:[%s12100_s26 + $0x181] sm:$0xff] %vm597_vm1, %v498_v33  ;;  %v500_v35 = vld [vmem:[%s12095_s23 + $0x208] sm:$0xff]  ;;  %v501_v36 = vld [vmem:[%s12095_s23 + $0x210] sm:$0xff] }
  0x43   : >> { %8988 = vst.msk [vmem:[%s12100_s26 + $0x211] sm:$0xff] %vm597_vm1, %v499_v34  ;;  %v502_v37 = vld [vmem:[%s12095_s23 + $0x218] sm:$0xff]  ;;  %8989 = vst.msk [vmem:[%s12100_s26 + $0x219] sm:$0xff] %vm597_vm1, %v500_v35  ;;  %v503_v38 = vld [vmem:[%s12095_s23 + $0x220] sm:$0xff] }
  0x44   : >> { %8990 = vst.msk [vmem:[%s12100_s26 + $0x221] sm:$0xff] %vm597_vm1, %v501_v36  ;;  %8991 = vst.msk [vmem:[%s12100_s26 + $0x229] sm:$0xff] %vm597_vm1, %v502_v37  ;;  %v504_v39 = vld [vmem:[%s12095_s23 + $0x228] sm:$0xff]  ;;  %v505_v40 = vld [vmem:[%s12095_s23 + $0x230] sm:$0xff] }
  0x45   : >> { %8992 = vst.msk [vmem:[%s12100_s26 + $0x231] sm:$0xff] %vm597_vm1, %v503_v38  ;;  %8993 = vst.msk [vmem:[%s12100_s26 + $0x239] sm:$0xff] %vm597_vm1, %v504_v39  ;;  %v506_v41 = vld [vmem:[%s12095_s23 + $0x238] sm:$0xff]  ;;  %v507_v42 = vld [vmem:[%s12095_s23 + $0x240] sm:$0xff] }
  0x46   : >> { %8994 = vst.msk [vmem:[%s12100_s26 + $0x241] sm:$0xff] %vm597_vm1, %v505_v40  ;;  %v508_v43 = vld [vmem:[%s12095_s23 + $0x248] sm:$0xff]  ;;  %8995 = vst.msk [vmem:[%s12100_s26 + $0x249] sm:$0xff] %vm597_vm1, %v506_v41  ;;  %v509_v44 = vld [vmem:[%s12095_s23 + $0x250] sm:$0xff] }
  0x47   : >> { %8996 = vst.msk [vmem:[%s12100_s26 + $0x251] sm:$0xff] %vm597_vm1, %v507_v42  ;;  %8997 = vst.msk [vmem:[%s12100_s26 + $0x259] sm:$0xff] %vm597_vm1, %v508_v43  ;;  %v510_v45 = vld [vmem:[%s12095_s23 + $0x258] sm:$0xff]  ;;  %v511_v46 = vld [vmem:[%s12095_s23 + $0x260] sm:$0xff] }
  0x48   : >> { %8998 = vst.msk [vmem:[%s12100_s26 + $0x261] sm:$0xff] %vm597_vm1, %v509_v44  ;;  %8999 = vst.msk [vmem:[%s12100_s26 + $0x269] sm:$0xff] %vm597_vm1, %v510_v45  ;;  %v512_v47 = vld [vmem:[%s12095_s23 + $0x268] sm:$0xff]  ;;  %v513_v48 = vld [vmem:[%s12095_s23 + $0x270] sm:$0xff] }
  0x49   : >> { %9000 = vst.msk [vmem:[%s12100_s26 + $0x271] sm:$0xff] %vm597_vm1, %v511_v46  ;;  %v514_v49 = vld [vmem:[%s12095_s23 + $0x278] sm:$0xff]  ;;  %9001 = vst.msk [vmem:[%s12100_s26 + $0x279] sm:$0xff] %vm597_vm1, %v512_v47  ;;  %v515_v50 = vld [vmem:[%s12095_s23 + $0x300] sm:$0xff] }
  0x4a   : >> { %9002 = vst.msk [vmem:[%s12100_s26 + $0x281] sm:$0xff] %vm597_vm1, %v513_v48  ;;  %9003 = vst.msk [vmem:[%s12100_s26 + $0x289] sm:$0xff] %vm597_vm1, %v514_v49  ;;  %v516_v51 = vld [vmem:[%s12095_s23 + $0x308] sm:$0xff]  ;;  %v517_v52 = vld [vmem:[%s12095_s23 + $0x310] sm:$0xff] }
  0x4b   : >> { %9004 = vst.msk [vmem:[%s12100_s26 + $0x319] sm:$0xff] %vm597_vm1, %v515_v50  ;;  %9005 = vst.msk [vmem:[%s12100_s26 + $0x321] sm:$0xff] %vm597_vm1, %v516_v51  ;;  %v518_v53 = vld [vmem:[%s12095_s23 + $0x318] sm:$0xff]  ;;  %v519_v54 = vld [vmem:[%s12095_s23 + $0x320] sm:$0xff] }
  0x4c   : >> { %9006 = vst.msk [vmem:[%s12100_s26 + $0x329] sm:$0xff] %vm597_vm1, %v517_v52  ;;  %v520_v55 = vld [vmem:[%s12095_s23 + $0x328] sm:$0xff]  ;;  %9007 = vst.msk [vmem:[%s12100_s26 + $0x331] sm:$0xff] %vm597_vm1, %v518_v53  ;;  %v521_v56 = vld [vmem:[%s12095_s23 + $0x330] sm:$0xff] }
  0x4d   : >> { %9008 = vst.msk [vmem:[%s12100_s26 + $0x339] sm:$0xff] %vm597_vm1, %v519_v54  ;;  %9009 = vst.msk [vmem:[%s12100_s26 + $0x341] sm:$0xff] %vm597_vm1, %v520_v55  ;;  %v522_v57 = vld [vmem:[%s12095_s23 + $0x338] sm:$0xff]  ;;  %v523_v58 = vld [vmem:[%s12095_s23 + $0x340] sm:$0xff] }
  0x4e   : >> { %9010 = vst.msk [vmem:[%s12100_s26 + $0x349] sm:$0xff] %vm597_vm1, %v521_v56  ;;  %9011 = vst.msk [vmem:[%s12100_s26 + $0x351] sm:$0xff] %vm597_vm1, %v522_v57  ;;  %v524_v59 = vld [vmem:[%s12095_s23 + $0x348] sm:$0xff]  ;;  %v525_v60 = vld [vmem:[%s12095_s23 + $0x350] sm:$0xff] }
  0x4f   : >> { %9012 = vst.msk [vmem:[%s12100_s26 + $0x359] sm:$0xff] %vm597_vm1, %v523_v58  ;;  %v526_v61 = vld [vmem:[%s12095_s23 + $0x358] sm:$0xff]  ;;  %9013 = vst.msk [vmem:[%s12100_s26 + $0x361] sm:$0xff] %vm597_vm1, %v524_v59  ;;  %v527_v62 = vld [vmem:[%s12095_s23 + $0x360] sm:$0xff] }
  0x50   : >> { %9014 = vst.msk [vmem:[%s12100_s26 + $0x369] sm:$0xff] %vm597_vm1, %v525_v60  ;;  %9015 = vst.msk [vmem:[%s12100_s26 + $0x371] sm:$0xff] %vm597_vm1, %v526_v61  ;;  %v528_v63 = vld [vmem:[%s12095_s23 + $0x368] sm:$0xff]  ;;  %v529_v0 = vld [vmem:[%s12095_s23 + $0x370] sm:$0xff] }
  0x51   : >> { %9016 = vst.msk [vmem:[%s12100_s26 + $0x379] sm:$0xff] %vm597_vm1, %v527_v62  ;;  %9017 = vst.msk [vmem:[%s12100_s26 + $0x381] sm:$0xff] %vm597_vm1, %v528_v63  ;;  %v530_v1 = vld [vmem:[%s12095_s23 + $0x378] sm:$0xff]  ;;  %v531_v2 = vld [vmem:[%s12095_s23 + $0x400] sm:$0xff] }
  0x52   : >> { %9018 = vst.msk [vmem:[%s12100_s26 + $0x389] sm:$0xff] %vm597_vm1, %v529_v0  ;;  %v532_v3 = vld [vmem:[%s12095_s23 + $0x408] sm:$0xff]  ;;  %9019 = vst.msk [vmem:[%s12100_s26 + $0x391] sm:$0xff] %vm597_vm1, %v530_v1  ;;  %v533_v4 = vld [vmem:[%s12095_s23 + $0x410] sm:$0xff] }
  0x53   : >> { %9020 = vst.msk [vmem:[%s12100_s26 + $0x421] sm:$0xff] %vm597_vm1, %v531_v2  ;;  %9021 = vst.msk [vmem:[%s12100_s26 + $0x429] sm:$0xff] %vm597_vm1, %v532_v3  ;;  %v534_v5 = vld [vmem:[%s12095_s23 + $0x418] sm:$0xff]  ;;  %v535_v6 = vld [vmem:[%s12095_s23 + $0x420] sm:$0xff] }
  0x54   : >> { %9022 = vst.msk [vmem:[%s12100_s26 + $0x431] sm:$0xff] %vm597_vm1, %v533_v4  ;;  %9023 = vst.msk [vmem:[%s12100_s26 + $0x439] sm:$0xff] %vm597_vm1, %v534_v5  ;;  %v536_v7 = vld [vmem:[%s12095_s23 + $0x428] sm:$0xff]  ;;  %v537_v8 = vld [vmem:[%s12095_s23 + $0x430] sm:$0xff] }
  0x55   : >> { %9024 = vst.msk [vmem:[%s12100_s26 + $0x441] sm:$0xff] %vm597_vm1, %v535_v6  ;;  %v538_v9 = vld [vmem:[%s12095_s23 + $0x438] sm:$0xff]  ;;  %9025 = vst.msk [vmem:[%s12100_s26 + $0x449] sm:$0xff] %vm597_vm1, %v536_v7  ;;  %v539_v10 = vld [vmem:[%s12095_s23 + $0x440] sm:$0xff] }
  0x56   : >> { %9026 = vst.msk [vmem:[%s12100_s26 + $0x451] sm:$0xff] %vm597_vm1, %v537_v8  ;;  %9027 = vst.msk [vmem:[%s12100_s26 + $0x459] sm:$0xff] %vm597_vm1, %v538_v9  ;;  %v540_v11 = vld [vmem:[%s12095_s23 + $0x448] sm:$0xff]  ;;  %v541_v12 = vld [vmem:[%s12095_s23 + $0x450] sm:$0xff] }
  0x57   : >> { %9028 = vst.msk [vmem:[%s12100_s26 + $0x461] sm:$0xff] %vm597_vm1, %v539_v10  ;;  %9029 = vst.msk [vmem:[%s12100_s26 + $0x469] sm:$0xff] %vm597_vm1, %v540_v11  ;;  %v542_v13 = vld [vmem:[%s12095_s23 + $0x458] sm:$0xff]  ;;  %v543_v14 = vld [vmem:[%s12095_s23 + $0x460] sm:$0xff] }
  0x58   : >> { %9030 = vst.msk [vmem:[%s12100_s26 + $0x471] sm:$0xff] %vm597_vm1, %v541_v12  ;;  %v544_v15 = vld [vmem:[%s12095_s23 + $0x468] sm:$0xff]  ;;  %9031 = vst.msk [vmem:[%s12100_s26 + $0x479] sm:$0xff] %vm597_vm1, %v542_v13  ;;  %v545_v16 = vld [vmem:[%s12095_s23 + $0x470] sm:$0xff] }
  0x59   : >> { %9032 = vst.msk [vmem:[%s12100_s26 + $0x481] sm:$0xff] %vm597_vm1, %v543_v14  ;;  %9033 = vst.msk [vmem:[%s12100_s26 + $0x489] sm:$0xff] %vm597_vm1, %v544_v15  ;;  %v546_v17 = vld [vmem:[%s12095_s23 + $0x478] sm:$0xff]  ;;  %v547_v18 = vld [vmem:[%s12095_s23 + $0x500] sm:$0xff] }
  0x5a   : >> { %9034 = vst.msk [vmem:[%s12100_s26 + $0x491] sm:$0xff] %vm597_vm1, %v545_v16  ;;  %9035 = vst.msk [vmem:[%s12100_s26 + $0x499] sm:$0xff] %vm597_vm1, %v546_v17  ;;  %v548_v19 = vld [vmem:[%s12095_s23 + $0x508] sm:$0xff]  ;;  %v549_v20 = vld [vmem:[%s12095_s23 + $0x510] sm:$0xff] }
  0x5b   : >> { %9036 = vst.msk [vmem:[%s12100_s26 + $0x529] sm:$0xff] %vm597_vm1, %v547_v18  ;;  %v550_v21 = vld [vmem:[%s12095_s23 + $0x518] sm:$0xff]  ;;  %9037 = vst.msk [vmem:[%s12100_s26 + $0x531] sm:$0xff] %vm597_vm1, %v548_v19  ;;  %v551_v22 = vld [vmem:[%s12095_s23 + $0x520] sm:$0xff] }
  0x5c   : >> { %9038 = vst.msk [vmem:[%s12100_s26 + $0x539] sm:$0xff] %vm597_vm1, %v549_v20  ;;  %9039 = vst.msk [vmem:[%s12100_s26 + $0x541] sm:$0xff] %vm597_vm1, %v550_v21  ;;  %v552_v23 = vld [vmem:[%s12095_s23 + $0x528] sm:$0xff]  ;;  %v553_v24 = vld [vmem:[%s12095_s23 + $0x530] sm:$0xff] }
  0x5d   : >> { %9040 = vst.msk [vmem:[%s12100_s26 + $0x549] sm:$0xff] %vm597_vm1, %v551_v22  ;;  %9041 = vst.msk [vmem:[%s12100_s26 + $0x551] sm:$0xff] %vm597_vm1, %v552_v23  ;;  %v554_v25 = vld [vmem:[%s12095_s23 + $0x538] sm:$0xff]  ;;  %v555_v26 = vld [vmem:[%s12095_s23 + $0x540] sm:$0xff] }
  0x5e   : >> { %9042 = vst.msk [vmem:[%s12100_s26 + $0x559] sm:$0xff] %vm597_vm1, %v553_v24  ;;  %v556_v27 = vld [vmem:[%s12095_s23 + $0x548] sm:$0xff]  ;;  %9043 = vst.msk [vmem:[%s12100_s26 + $0x561] sm:$0xff] %vm597_vm1, %v554_v25  ;;  %v557_v28 = vld [vmem:[%s12095_s23 + $0x550] sm:$0xff] }
  0x5f   : >> { %9044 = vst.msk [vmem:[%s12100_s26 + $0x569] sm:$0xff] %vm597_vm1, %v555_v26  ;;  %9045 = vst.msk [vmem:[%s12100_s26 + $0x571] sm:$0xff] %vm597_vm1, %v556_v27  ;;  %v558_v29 = vld [vmem:[%s12095_s23 + $0x558] sm:$0xff]  ;;  %v559_v30 = vld [vmem:[%s12095_s23 + $0x560] sm:$0xff] }
  0x60   : >> { %9046 = vst.msk [vmem:[%s12100_s26 + $0x579] sm:$0xff] %vm597_vm1, %v557_v28  ;;  %9047 = vst.msk [vmem:[%s12100_s26 + $0x581] sm:$0xff] %vm597_vm1, %v558_v29  ;;  %v560_v31 = vld [vmem:[%s12095_s23 + $0x568] sm:$0xff]  ;;  %v561_v32 = vld [vmem:[%s12095_s23 + $0x570] sm:$0xff] }
  0x61   : >> { %9048 = vst.msk [vmem:[%s12100_s26 + $0x589] sm:$0xff] %vm597_vm1, %v559_v30  ;;  %v562_v33 = vld [vmem:[%s12095_s23 + $0x578] sm:$0xff]  ;;  %9049 = vst.msk [vmem:[%s12100_s26 + $0x591] sm:$0xff] %vm597_vm1, %v560_v31  ;;  %v563_v34 = vld [vmem:[%s12095_s23 + $0x600] sm:$0xff] }
  0x62   : >> { %9050 = vst.msk [vmem:[%s12100_s26 + $0x599] sm:$0xff] %vm597_vm1, %v561_v32  ;;  %9051 = vst.msk [vmem:[%s12100_s26 + $0x5a1] sm:$0xff] %vm597_vm1, %v562_v33  ;;  %v564_v35 = vld [vmem:[%s12095_s23 + $0x608] sm:$0xff]  ;;  %v565_v36 = vld [vmem:[%s12095_s23 + $0x610] sm:$0xff] }
  0x63   : >> { %9052 = vst.msk [vmem:[%s12100_s26 + $0x631] sm:$0xff] %vm597_vm1, %v563_v34  ;;  %9053 = vst.msk [vmem:[%s12100_s26 + $0x639] sm:$0xff] %vm597_vm1, %v564_v35  ;;  %v566_v37 = vld [vmem:[%s12095_s23 + $0x618] sm:$0xff]  ;;  %v567_v38 = vld [vmem:[%s12095_s23 + $0x620] sm:$0xff] }
  0x64   : >> { %9054 = vst.msk [vmem:[%s12100_s26 + $0x641] sm:$0xff] %vm597_vm1, %v565_v36  ;;  %v568_v39 = vld [vmem:[%s12095_s23 + $0x628] sm:$0xff]  ;;  %9055 = vst.msk [vmem:[%s12100_s26 + $0x649] sm:$0xff] %vm597_vm1, %v566_v37  ;;  %v569_v40 = vld [vmem:[%s12095_s23 + $0x630] sm:$0xff] }
  0x65   : >> { %9056 = vst.msk [vmem:[%s12100_s26 + $0x651] sm:$0xff] %vm597_vm1, %v567_v38  ;;  %9057 = vst.msk [vmem:[%s12100_s26 + $0x659] sm:$0xff] %vm597_vm1, %v568_v39  ;;  %v570_v41 = vld [vmem:[%s12095_s23 + $0x638] sm:$0xff]  ;;  %v571_v42 = vld [vmem:[%s12095_s23 + $0x640] sm:$0xff] }
  0x66   : >> { %9058 = vst.msk [vmem:[%s12100_s26 + $0x661] sm:$0xff] %vm597_vm1, %v569_v40  ;;  %9059 = vst.msk [vmem:[%s12100_s26 + $0x669] sm:$0xff] %vm597_vm1, %v570_v41  ;;  %v572_v43 = vld [vmem:[%s12095_s23 + $0x648] sm:$0xff]  ;;  %v573_v44 = vld [vmem:[%s12095_s23 + $0x650] sm:$0xff] }
  0x67   : >> { %9060 = vst.msk [vmem:[%s12100_s26 + $0x671] sm:$0xff] %vm597_vm1, %v571_v42  ;;  %v574_v45 = vld [vmem:[%s12095_s23 + $0x658] sm:$0xff]  ;;  %9061 = vst.msk [vmem:[%s12100_s26 + $0x679] sm:$0xff] %vm597_vm1, %v572_v43  ;;  %v575_v46 = vld [vmem:[%s12095_s23 + $0x660] sm:$0xff] }
  0x68   : >> { %9062 = vst.msk [vmem:[%s12100_s26 + $0x681] sm:$0xff] %vm597_vm1, %v573_v44  ;;  %9063 = vst.msk [vmem:[%s12100_s26 + $0x689] sm:$0xff] %vm597_vm1, %v574_v45  ;;  %v576_v47 = vld [vmem:[%s12095_s23 + $0x668] sm:$0xff]  ;;  %v577_v48 = vld [vmem:[%s12095_s23 + $0x670] sm:$0xff] }
  0x69   : >> { %9064 = vst.msk [vmem:[%s12100_s26 + $0x691] sm:$0xff] %vm597_vm1, %v575_v46  ;;  %9065 = vst.msk [vmem:[%s12100_s26 + $0x699] sm:$0xff] %vm597_vm1, %v576_v47  ;;  %v578_v49 = vld [vmem:[%s12095_s23 + $0x678] sm:$0xff]  ;;  %v579_v50 = vld [vmem:[%s12095_s23 + $0x700] sm:$0xff] }
  0x6a   : >> { %9066 = vst.msk [vmem:[%s12100_s26 + $0x6a1] sm:$0xff] %vm597_vm1, %v577_v48  ;;  %v580_v51 = vld [vmem:[%s12095_s23 + $0x708] sm:$0xff]  ;;  %9067 = vst.msk [vmem:[%s12100_s26 + $0x6a9] sm:$0xff] %vm597_vm1, %v578_v49  ;;  %v581_v52 = vld [vmem:[%s12095_s23 + $0x710] sm:$0xff] }
  0x6b   : >> { %9068 = vst.msk [vmem:[%s12100_s26 + $0x739] sm:$0xff] %vm597_vm1, %v579_v50  ;;  %9069 = vst.msk [vmem:[%s12100_s26 + $0x741] sm:$0xff] %vm597_vm1, %v580_v51  ;;  %v582_v53 = vld [vmem:[%s12095_s23 + $0x718] sm:$0xff]  ;;  %v583_v54 = vld [vmem:[%s12095_s23 + $0x720] sm:$0xff] }
  0x6c   : >> { %9070 = vst.msk [vmem:[%s12100_s26 + $0x749] sm:$0xff] %vm597_vm1, %v581_v52  ;;  %9071 = vst.msk [vmem:[%s12100_s26 + $0x751] sm:$0xff] %vm597_vm1, %v582_v53  ;;  %v584_v55 = vld [vmem:[%s12095_s23 + $0x728] sm:$0xff]  ;;  %v585_v56 = vld [vmem:[%s12095_s23 + $0x730] sm:$0xff]  ;;  %463 = sbr.rel (!%p461_p4) target bundleno = 48 (0x30), region = 143 }
  0x6d   : >> { %9072 = vst.msk [vmem:[%s12100_s26 + $0x759] sm:$0xff] %vm597_vm1, %v583_v54  ;;  %v586_v57 = vld [vmem:[%s12095_s23 + $0x738] sm:$0xff]  ;;  %9073 = vst.msk [vmem:[%s12100_s26 + $0x761] sm:$0xff] %vm597_vm1, %v584_v55  ;;  %v587_v58 = vld [vmem:[%s12095_s23 + $0x740] sm:$0xff] }
  0x6e   : >> { %9074 = vst.msk [vmem:[%s12100_s26 + $0x769] sm:$0xff] %vm597_vm1, %v585_v56  ;;  %9075 = vst.msk [vmem:[%s12100_s26 + $0x771] sm:$0xff] %vm597_vm1, %v586_v57  ;;  %v588_v59 = vld [vmem:[%s12095_s23 + $0x748] sm:$0xff]  ;;  %v589_v60 = vld [vmem:[%s12095_s23 + $0x750] sm:$0xff] }
  0x6f   : >> { %9076 = vst.msk [vmem:[%s12100_s26 + $0x779] sm:$0xff] %vm597_vm1, %v587_v58  ;;  %9077 = vst.msk [vmem:[%s12100_s26 + $0x781] sm:$0xff] %vm597_vm1, %v588_v59  ;;  %v590_v61 = vld [vmem:[%s12095_s23 + $0x758] sm:$0xff]  ;;  %v591_v62 = vld [vmem:[%s12095_s23 + $0x760] sm:$0xff] }
  0x70   : >> { %9078 = vst.msk [vmem:[%s12100_s26 + $0x789] sm:$0xff] %vm597_vm1, %v589_v60  ;;  %v592_v63 = vld [vmem:[%s12095_s23 + $0x768] sm:$0xff]  ;;  %9079 = vst.msk [vmem:[%s12100_s26 + $0x791] sm:$0xff] %vm597_vm1, %v590_v61  ;;  %v593_v0 = vld [vmem:[%s12095_s23 + $0x770] sm:$0xff] }
  0x71   : >> { %9080 = vst.msk [vmem:[%s12100_s26 + $0x799] sm:$0xff] %vm597_vm1, %v591_v62  ;;  %9081 = vst.msk [vmem:[%s12100_s26 + $0x7a1] sm:$0xff] %vm597_vm1, %v592_v63  ;;  %v594_v1 = vld [vmem:[%s12095_s23 + $0x778] sm:$0xff] }
  0x72   : >> { %9082 = vst.msk [vmem:[%s12100_s26 + $0x7a9] sm:$0xff] %vm597_vm1, %v593_v0  ;;  %9083 = vst.msk [vmem:[%s12100_s26 + $0x7b1] sm:$0xff] %vm597_vm1, %v594_v1 }
  0x73 PF: > { %s12486_s27 = smov 0  }
  0x74 LB: >> { %v9214_v2 = vld [vmem:[%s12046_s21 + $0x20] sm:$0xff]  ;;  %v9215_v3 = vld [vmem:[%s12046_s21 + $0x28] sm:$0xff]  ;;  %s733_s20 = smul.u32 2112, %s18922_s9  ;;  %v9216_v7 = vld [vmem:[%s12046_s21 + $0x30] sm:$0xff]  ;;  %s9084_s17 = sshll.u32 %s11885_s27, 7  ;;  %vm1004_vm2 = vcmask 261120   ;;  %s11885_s27 = sphi %s12486_s27, %s731_s27  }
  0x75   : >> { %v864_v4 = vld [vmem:[%s12046_s21] sm:$0xff]  ;;  %v10874_v5 = vpack.c.bf16 %v9215_v3, %v9214_v2  ;;  %v865_v6 = vld [vmem:[%s12046_s21 + $0x8] sm:$0xff]  ;;  %v9217_v8 = vld [vmem:[%s12046_s21 + $0x38] sm:$0xff]  ;;  %p9738_p5 = scmp.ge.s32.totalorder %s11861_s10, 2 }
  0x76   : >> { %v10882_v9 = vpack.c.bf16 %v865_v6, %v864_v4  ;;  %v10878_v10 = vpack.c.bf16 %v9217_v8, %v9216_v7  ;;  %v866_v11 = vld [vmem:[%s12046_s21 + $0x10] sm:$0xff]  ;;  %v867_v12 = vld [vmem:[%s12046_s21 + $0x18] sm:$0xff]  ;;  %s734_s28 = sadd.s32 %s9084_s17, %s733_s20  ;;  %v9603_v14 = vld [vmem:[%s12046_s21 + $0x40] sm:$0xff]  ;;  %s8850_s13 = smul.u32 (!%p9738_p5), 2112, %s420_s19 }
  0x77   : >> { %10875 = vmatprep.subr.bf16.mxu1 %v10874_v5  ;;  %v10886_v13 = vpack.c.bf16 %v867_v12, %v866_v11  ;;  %v9604_v15 = vld [vmem:[%s12046_s21 + $0x48] sm:$0xff]  ;;  %s12505_s12 = scalar_lea.vmem [#allocation2], %s734_s28  ;;  %v9605_v19 = vld [vmem:[%s12046_s21 + $0x50] sm:$0xff]  ;;  %v9606_v20 = vld [vmem:[%s12046_s21 + $0x58] sm:$0xff] }
  0x78   : >> { %10883 = vmatprep.subr.bf16.mxu0 %v10882_v9  ;;  %10877 = vmatpush3.bf16.msra.mxu1 %v10874_v5  ;;  %v10890_v18 = vpack.c.bf16 %v9604_v15, %v9603_v14  ;;  %v10894_v25 = vpack.c.bf16 %v9606_v20, %v9605_v19  ;;  %s8851_s0 = sadd.s32 (!%p9738_p5), %s9084_s17, %s8850_s13 }
  0x79   : >> { %10885 = vmatpush3.bf16.msra.mxu0 %v10882_v9  ;;  %10879 = vmatprep.subr.bf16.mxu1 %v10878_v10  ;;  %v9086_v16 = vld [vmem:[%s12505_s12 + $0x1] sm:$0xff]  ;;  %v9087_v21 = vld [vmem:[%s12505_s12 + $0x9] sm:$0xff]  ;;  %v9088_v23 = vld [vmem:[%s12505_s12 + $0x11] sm:$0xff]  ;;  %s16731_s1 = scalar_lea.vmem (!%p9738_p5), [#allocation2], %s8851_s0 }
  0x7a   : >> { %v736_v17 = vld [vmem:[%s12505_s12] sm:$0xff]  ;;  %10887 = vmatprep.subr.bf16.mxu0 %v10886_v13  ;;  %10282 = vmatprep.mubr.msk.f32.mxu1 %vm1004_vm2, %v9086_v16  ;;  %v737_v22 = vld [vmem:[%s12505_s12 + $0x8] sm:$0xff]  ;;  %v738_v24 = vld [vmem:[%s12505_s12 + $0x10] sm:$0xff] }
  0x7b   : >> { %10482 = vmatprep.mubr.msk.f32.mxu0 %vm1004_vm2, %v736_v17  ;;  %v9089_v26 = vld [vmem:[%s12505_s12 + $0x19] sm:$0xff]  ;;  %v9090_v28 = vld [vmem:[%s12505_s12 + $0x21] sm:$0xff]  ;;  %v9091_v30 = vld [vmem:[%s12505_s12 + $0x29] sm:$0xff] }
  0x7c   : >> { %10881 = vmatpush3.bf16.msra.mxu1 %v10878_v10  ;;  %v739_v27 = vld [vmem:[%s12505_s12 + $0x18] sm:$0xff]  ;;  %v740_v29 = vld [vmem:[%s12505_s12 + $0x20] sm:$0xff]  ;;  %v741_v31 = vld [vmem:[%s12505_s12 + $0x28] sm:$0xff] }
  0x7d   : >> { %10889 = vmatpush3.bf16.msra.mxu0 %v10886_v13  ;;  %10898 = vmatprep.subr.bf16.mxu1 %v10882_v9  ;;  %v9092_v32 = vld [vmem:[%s12505_s12 + $0x31] sm:$0xff]  ;;  %v9093_v34 = vld [vmem:[%s12505_s12 + $0x39] sm:$0xff]  ;;  %v9094_v36 = vld [vmem:[%s12505_s12 + $0x41] sm:$0xff] }
  0x7e   : >> { %10891 = vmatprep.subr.bf16.mxu0 %v10890_v18  ;;  %v742_v33 = vld [vmem:[%s12505_s12 + $0x30] sm:$0xff]  ;;  %v743_v35 = vld [vmem:[%s12505_s12 + $0x38] sm:$0xff]  ;;  %v744_v37 = vld [vmem:[%s12505_s12 + $0x40] sm:$0xff] }
  0x7f   : >> { %10283 = vmatmul.mubr.msk.f32.vlgmr.msra.gmra.mrb[0].mxu1 %vm1004_vm2, %v9087_v21  ;;  %v9095_v38 = vld [vmem:[%s12505_s12 + $0x49] sm:$0xff]  ;;  %v9096_v40 = vld [vmem:[%s12505_s12 + $0x51] sm:$0xff]  ;;  %v9097_v42 = vld [vmem:[%s12505_s12 + $0x59] sm:$0xff] }
  0x80   : >> { %10483 = vmatmul.mubr.msk.f32.vlgmr.msra.gmra.mrb[0].mxu0 %vm1004_vm2, %v737_v22  ;;  %10285 = vmatprep.mubr.msk.f32.mxu1 %vm1004_vm2, %v9088_v23  ;;  %v745_v39 = vld [vmem:[%s12505_s12 + $0x48] sm:$0xff]  ;;  %v746_v41 = vld [vmem:[%s12505_s12 + $0x50] sm:$0xff]  ;;  %v747_v43 = vld [vmem:[%s12505_s12 + $0x58] sm:$0xff] }
  0x81   : >> { %10893 = vmatpush3.bf16.msra.mxu0 %v10890_v18  ;;  %10485 = vmatprep.mubr.msk.f32.mxu0 %vm1004_vm2, %v738_v24  ;;  %v9098_v44 = vld [vmem:[%s12505_s12 + $0x61] sm:$0xff]  ;;  %v9099_v46 = vld [vmem:[%s12505_s12 + $0x69] sm:$0xff]  ;;  %v9100_v48 = vld [vmem:[%s12505_s12 + $0x71] sm:$0xff] }
  0x82   : >> { %10900 = vmatpush3.bf16.msra.mxu1 %v10882_v9  ;;  %10895 = vmatprep.subr.bf16.mxu0 %v10894_v25  ;;  %v748_v45 = vld [vmem:[%s12505_s12 + $0x60] sm:$0xff]  ;;  %v749_v47 = vld [vmem:[%s12505_s12 + $0x68] sm:$0xff]  ;;  %v750_v49 = vld [vmem:[%s12505_s12 + $0x70] sm:$0xff] }
  0x83   : >> { %10286 = vmatmul.mubr.msk.f32.gmra.mrb[2].mxu1 %vm1004_vm2, %v9089_v26  ;;  %10899 = vmatprep.subr.bf16.mxu1 %v10886_v13  ;;  %v9101_v50 = vld [vmem:[%s12505_s12 + $0x79] sm:$0xff]  ;;  %v9102_v52 = vld [vmem:[%s12505_s12 + $0x109] sm:$0xff]  ;;  %v9103_v54 = vld [vmem:[%s12505_s12 + $0x111] sm:$0xff] }
  0x84   : >> { %10486 = vmatmul.mubr.msk.f32.gmra.mrb[2].mxu0 %vm1004_vm2, %v739_v27  ;;  %10288 = vmatprep.mubr.msk.f32.mxu1 %vm1004_vm2, %v9090_v28  ;;  %v751_v51 = vld [vmem:[%s12505_s12 + $0x78] sm:$0xff]  ;;  %v752_v53 = vld [vmem:[%s12505_s12 + $0x108] sm:$0xff]  ;;  %v753_v55 = vld [vmem:[%s12505_s12 + $0x110] sm:$0xff] }
  0x85   : >> { %10488 = vmatprep.mubr.msk.f32.mxu0 %vm1004_vm2, %v740_v29  ;;  %10897 = vmatpush3.bf16.msra.mxu0 %v10894_v25  ;;  %v9104_v56 = vld [vmem:[%s12505_s12 + $0x119] sm:$0xff]  ;;  %v9105_v58 = vld [vmem:[%s12505_s12 + $0x121] sm:$0xff]  ;;  %v9106_v60 = vld [vmem:[%s12505_s12 + $0x129] sm:$0xff] }
  0x86   : >> { %10901 = vmatpush3.bf16.msra.mxu1 %v10886_v13  ;;  %v754_v57 = vld [vmem:[%s12505_s12 + $0x118] sm:$0xff]  ;;  %v755_v59 = vld [vmem:[%s12505_s12 + $0x120] sm:$0xff]  ;;  %v756_v61 = vld [vmem:[%s12505_s12 + $0x128] sm:$0xff] }
  0x87   : >> { %10289 = vmatmul.mubr.msk.f32.gmra.mrb[4].mxu1 %vm1004_vm2, %v9091_v30  ;;  %v9107_v62 = vld [vmem:[%s12505_s12 + $0x131] sm:$0xff]  ;;  %v9108_v0 = vld [vmem:[%s12505_s12 + $0x139] sm:$0xff]  ;;  %v9109_v2 = vld [vmem:[%s12505_s12 + $0x141] sm:$0xff] }
  0x88   : >> { %10489 = vmatmul.mubr.msk.f32.gmra.mrb[4].mxu0 %vm1004_vm2, %v741_v31  ;;  %10291 = vmatprep.mubr.msk.f32.mxu1 %vm1004_vm2, %v9092_v32  ;;  %v757_v63 = vld [vmem:[%s12505_s12 + $0x130] sm:$0xff]  ;;  %v758_v1 = vld [vmem:[%s12505_s12 + $0x138] sm:$0xff]  ;;  %v759_v3 = vld [vmem:[%s12505_s12 + $0x140] sm:$0xff] }
  0x89   : >> { %10491 = vmatprep.mubr.msk.f32.mxu0 %vm1004_vm2, %v742_v33  ;;  %v9110_v4 = vld [vmem:[%s12505_s12 + $0x149] sm:$0xff]  ;;  %v9111_v6 = vld [vmem:[%s12505_s12 + $0x151] sm:$0xff]  ;;  %v9112_v8 = vld [vmem:[%s12505_s12 + $0x159] sm:$0xff] }
  0x8a   : >> { %v760_v5 = vld [vmem:[%s12505_s12 + $0x148] sm:$0xff]  ;;  %v761_v7 = vld [vmem:[%s12505_s12 + $0x150] sm:$0xff]  ;;  %v762_v9 = vld [vmem:[%s12505_s12 + $0x158] sm:$0xff] }
  0x8b   : >> { %10292 = vmatmul.mubr.msk.f32.gmra.mrb[6].mxu1 %vm1004_vm2, %v9093_v34  ;;  %v9113_v10 = vld [vmem:[%s12505_s12 + $0x161] sm:$0xff]  ;;  %v9114_v12 = vld [vmem:[%s12505_s12 + $0x169] sm:$0xff]  ;;  %v9115_v14 = vld [vmem:[%s12505_s12 + $0x171] sm:$0xff] }
  0x8c   : >> { %10492 = vmatmul.mubr.msk.f32.gmra.mrb[6].mxu0 %vm1004_vm2, %v743_v35  ;;  %10294 = vmatprep.mubr.msk.f32.mxu1 %vm1004_vm2, %v9094_v36  ;;  %v763_v11 = vld [vmem:[%s12505_s12 + $0x160] sm:$0xff]  ;;  %v764_v13 = vld [vmem:[%s12505_s12 + $0x168] sm:$0xff]  ;;  %v765_v15 = vld [vmem:[%s12505_s12 + $0x170] sm:$0xff] }
  0x8d   : >> { %10494 = vmatprep.mubr.msk.f32.mxu0 %vm1004_vm2, %v744_v37  ;;  %v9116_v16 = vld [vmem:[%s12505_s12 + $0x179] sm:$0xff]  ;;  %v9117_v18 = vld [vmem:[%s12505_s12 + $0x181] sm:$0xff]  ;;  %v9118_v20 = vld [vmem:[%s12505_s12 + $0x211] sm:$0xff] }
  0x8e   : >> { %v766_v17 = vld [vmem:[%s12505_s12 + $0x178] sm:$0xff]  ;;  %v767_v19 = vld [vmem:[%s12505_s12 + $0x180] sm:$0xff]  ;;  %v768_v21 = vld [vmem:[%s12505_s12 + $0x210] sm:$0xff] }
  0x8f   : >> { %10295 = vmatmul.mubr.msk.f32.gmra.mrb[8].mxu1 %vm1004_vm2, %v9095_v38  ;;  %v9119_v22 = vld [vmem:[%s12505_s12 + $0x219] sm:$0xff]  ;;  %v9120_v24 = vld [vmem:[%s12505_s12 + $0x221] sm:$0xff]  ;;  %v9121_v26 = vld [vmem:[%s12505_s12 + $0x229] sm:$0xff] }
  0x90   : >> { %10495 = vmatmul.mubr.msk.f32.gmra.mrb[8].mxu0 %vm1004_vm2, %v745_v39  ;;  %10297 = vmatprep.mubr.msk.f32.mxu1 %vm1004_vm2, %v9096_v40  ;;  %v769_v23 = vld [vmem:[%s12505_s12 + $0x218] sm:$0xff]  ;;  %v770_v25 = vld [vmem:[%s12505_s12 + $0x220] sm:$0xff]  ;;  %v771_v27 = vld [vmem:[%s12505_s12 + $0x228] sm:$0xff] }
  0x91   : >> { %10497 = vmatprep.mubr.msk.f32.mxu0 %vm1004_vm2, %v746_v41  ;;  %v9122_v28 = vld [vmem:[%s12505_s12 + $0x231] sm:$0xff]  ;;  %v9123_v30 = vld [vmem:[%s12505_s12 + $0x239] sm:$0xff]  ;;  %v9124_v32 = vld [vmem:[%s12505_s12 + $0x241] sm:$0xff] }
  0x92   : >> { %v772_v29 = vld [vmem:[%s12505_s12 + $0x230] sm:$0xff]  ;;  %v773_v31 = vld [vmem:[%s12505_s12 + $0x238] sm:$0xff]  ;;  %v774_v33 = vld [vmem:[%s12505_s12 + $0x240] sm:$0xff] }
  0x93   : >> { %10298 = vmatmul.mubr.msk.f32.gmra.mrb[10].mxu1 %vm1004_vm2, %v9097_v42  ;;  %v9125_v34 = vld [vmem:[%s12505_s12 + $0x249] sm:$0xff]  ;;  %v9126_v36 = vld [vmem:[%s12505_s12 + $0x251] sm:$0xff]  ;;  %v9127_v38 = vld [vmem:[%s12505_s12 + $0x259] sm:$0xff] }
  0x94   : >> { %10498 = vmatmul.mubr.msk.f32.gmra.mrb[10].mxu0 %vm1004_vm2, %v747_v43  ;;  %10300 = vmatprep.mubr.msk.f32.mxu1 %vm1004_vm2, %v9098_v44  ;;  %v775_v35 = vld [vmem:[%s12505_s12 + $0x248] sm:$0xff]  ;;  %v776_v37 = vld [vmem:[%s12505_s12 + $0x250] sm:$0xff]  ;;  %v777_v39 = vld [vmem:[%s12505_s12 + $0x258] sm:$0xff] }
  0x95   : >> { %10500 = vmatprep.mubr.msk.f32.mxu0 %vm1004_vm2, %v748_v45  ;;  %v9128_v40 = vld [vmem:[%s12505_s12 + $0x261] sm:$0xff]  ;;  %v9129_v42 = vld [vmem:[%s12505_s12 + $0x269] sm:$0xff]  ;;  %v9130_v44 = vld [vmem:[%s12505_s12 + $0x271] sm:$0xff] }
  0x96   : >> { %v778_v41 = vld [vmem:[%s12505_s12 + $0x260] sm:$0xff]  ;;  %v779_v43 = vld [vmem:[%s12505_s12 + $0x268] sm:$0xff]  ;;  %v780_v45 = vld [vmem:[%s12505_s12 + $0x270] sm:$0xff] }
  0x97   : >> { %10301 = vmatmul.mubr.msk.f32.gmra.mrb[12].mxu1 %vm1004_vm2, %v9099_v46  ;;  %v9131_v46 = vld [vmem:[%s12505_s12 + $0x279] sm:$0xff] }
  0x98   : >> { %10501 = vmatmul.mubr.msk.f32.gmra.mrb[12].mxu0 %vm1004_vm2, %v749_v47  ;;  %10303 = vmatprep.mubr.msk.f32.mxu1 %vm1004_vm2, %v9100_v48  ;;  %v781_v47 = vld [vmem:[%s12505_s12 + $0x278] sm:$0xff]  ;;  %v9132_v48 = vld [vmem:[%s12505_s12 + $0x281] sm:$0xff] }
  0x99   : >> { %10503 = vmatprep.mubr.msk.f32.mxu0 %vm1004_vm2, %v750_v49  ;;  %v782_v49 = vld [vmem:[%s12505_s12 + $0x280] sm:$0xff] }
  0x9b   : >> { %10304 = vmatmul.mubr.msk.f32.gmra.mrb[14].mxu1 %vm1004_vm2, %v9101_v50  ;;  %v9133_v50 = vld [vmem:[%s12505_s12 + $0x289] sm:$0xff] }
  0x9c   : >> { %10504 = vmatmul.mubr.msk.f32.gmra.mrb[14].mxu0 %vm1004_vm2, %v751_v51  ;;  %10306 = vmatprep.mubr.msk.f32.mxu1 %vm1004_vm2, %v9102_v52  ;;  %v783_v51 = vld [vmem:[%s12505_s12 + $0x288] sm:$0xff]  ;;  %v9134_v52 = vld [vmem:[%s12505_s12 + $0x319] sm:$0xff] }
  0x9d   : >> { %10506 = vmatprep.mubr.msk.f32.mxu0 %vm1004_vm2, %v752_v53  ;;  %v784_v53 = vld [vmem:[%s12505_s12 + $0x318] sm:$0xff] }
  0x9f   : >> { %10307 = vmatmul.mubr.msk.f32.gmra.mrb[16].mxu1 %vm1004_vm2, %v9103_v54  ;;  %v9135_v54 = vld [vmem:[%s12505_s12 + $0x321] sm:$0xff] }
  0xa0   : >> { %10507 = vmatmul.mubr.msk.f32.gmra.mrb[16].mxu0 %vm1004_vm2, %v753_v55  ;;  %10309 = vmatprep.mubr.msk.f32.mxu1 %vm1004_vm2, %v9104_v56  ;;  %v785_v55 = vld [vmem:[%s12505_s12 + $0x320] sm:$0xff]  ;;  %v9136_v56 = vld [vmem:[%s12505_s12 + $0x329] sm:$0xff] }
  0xa1   : >> { %10509 = vmatprep.mubr.msk.f32.mxu0 %vm1004_vm2, %v754_v57  ;;  %v786_v57 = vld [vmem:[%s12505_s12 + $0x328] sm:$0xff] }
  0xa3   : >> { %10310 = vmatmul.mubr.msk.f32.gmra.mrb[18].mxu1 %vm1004_vm2, %v9105_v58  ;;  %v9137_v58 = vld [vmem:[%s12505_s12 + $0x331] sm:$0xff] }
  0xa4   : >> { %10510 = vmatmul.mubr.msk.f32.gmra.mrb[18].mxu0 %vm1004_vm2, %v755_v59  ;;  %10312 = vmatprep.mubr.msk.f32.mxu1 %vm1004_vm2, %v9106_v60  ;;  %v787_v59 = vld [vmem:[%s12505_s12 + $0x330] sm:$0xff]  ;;  %v9138_v60 = vld [vmem:[%s12505_s12 + $0x339] sm:$0xff] }
  0xa5   : >> { %10512 = vmatprep.mubr.msk.f32.mxu0 %vm1004_vm2, %v756_v61  ;;  %v788_v61 = vld [vmem:[%s12505_s12 + $0x338] sm:$0xff] }
  0xa7   : >> { %10313 = vmatmul.mubr.msk.f32.gmra.mrb[20].mxu1 %vm1004_vm2, %v9107_v62  ;;  %v9139_v62 = vld [vmem:[%s12505_s12 + $0x341] sm:$0xff] }
  0xa8   : >> { %10513 = vmatmul.mubr.msk.f32.gmra.mrb[20].mxu0 %vm1004_vm2, %v757_v63  ;;  %10315 = vmatprep.mubr.msk.f32.mxu1 %vm1004_vm2, %v9108_v0  ;;  %v789_v63 = vld [vmem:[%s12505_s12 + $0x340] sm:$0xff]  ;;  %v9140_v0 = vld [vmem:[%s12505_s12 + $0x349] sm:$0xff] }
  0xa9   : >> { %10515 = vmatprep.mubr.msk.f32.mxu0 %vm1004_vm2, %v758_v1  ;;  %v790_v1 = vld [vmem:[%s12505_s12 + $0x348] sm:$0xff] }
  0xab   : >> { %10316 = vmatmul.mubr.msk.f32.gmra.mrb[22].mxu1 %vm1004_vm2, %v9109_v2  ;;  %v9141_v2 = vld [vmem:[%s12505_s12 + $0x351] sm:$0xff] }
  0xac   : >> { %10516 = vmatmul.mubr.msk.f32.gmra.mrb[22].mxu0 %vm1004_vm2, %v759_v3  ;;  %10318 = vmatprep.mubr.msk.f32.mxu1 %vm1004_vm2, %v9110_v4  ;;  %v791_v3 = vld [vmem:[%s12505_s12 + $0x350] sm:$0xff]  ;;  %v9142_v4 = vld [vmem:[%s12505_s12 + $0x359] sm:$0xff] }
  0xad   : >> { %10518 = vmatprep.mubr.msk.f32.mxu0 %vm1004_vm2, %v760_v5  ;;  %v792_v5 = vld [vmem:[%s12505_s12 + $0x358] sm:$0xff] }
  0xaf   : >> { %10319 = vmatmul.mubr.msk.f32.gmra.mrb[24].mxu1 %vm1004_vm2, %v9111_v6  ;;  %v9143_v6 = vld [vmem:[%s12505_s12 + $0x361] sm:$0xff] }
  0xb0   : >> { %10519 = vmatmul.mubr.msk.f32.gmra.mrb[24].mxu0 %vm1004_vm2, %v761_v7  ;;  %10321 = vmatprep.mubr.msk.f32.mxu1 %vm1004_vm2, %v9112_v8  ;;  %v793_v7 = vld [vmem:[%s12505_s12 + $0x360] sm:$0xff]  ;;  %v9144_v8 = vld [vmem:[%s12505_s12 + $0x369] sm:$0xff] }
  0xb1   : >> { %10521 = vmatprep.mubr.msk.f32.mxu0 %vm1004_vm2, %v762_v9  ;;  %v794_v9 = vld [vmem:[%s12505_s12 + $0x368] sm:$0xff] }
  0xb3   : >> { %10322 = vmatmul.mubr.msk.f32.gmra.mrb[26].mxu1 %vm1004_vm2, %v9113_v10  ;;  %v9145_v10 = vld [vmem:[%s12505_s12 + $0x371] sm:$0xff] }
  0xb4   : >> { %10522 = vmatmul.mubr.msk.f32.gmra.mrb[26].mxu0 %vm1004_vm2, %v763_v11  ;;  %10324 = vmatprep.mubr.msk.f32.mxu1 %vm1004_vm2, %v9114_v12  ;;  %v795_v11 = vld [vmem:[%s12505_s12 + $0x370] sm:$0xff]  ;;  %v9146_v12 = vld [vmem:[%s12505_s12 + $0x379] sm:$0xff] }
  0xb5   : >> { %10524 = vmatprep.mubr.msk.f32.mxu0 %vm1004_vm2, %v764_v13  ;;  %v796_v13 = vld [vmem:[%s12505_s12 + $0x378] sm:$0xff] }
  0xb7   : >> { %10325 = vmatmul.mubr.msk.f32.gmra.mrb[28].mxu1 %vm1004_vm2, %v9115_v14  ;;  %v9147_v14 = vld [vmem:[%s12505_s12 + $0x381] sm:$0xff] }
  0xb8   : >> { %10525 = vmatmul.mubr.msk.f32.gmra.mrb[28].mxu0 %vm1004_vm2, %v765_v15  ;;  %10327 = vmatprep.mubr.msk.f32.mxu1 %vm1004_vm2, %v9116_v16  ;;  %v797_v15 = vld [vmem:[%s12505_s12 + $0x380] sm:$0xff]  ;;  %v9148_v16 = vld [vmem:[%s12505_s12 + $0x389] sm:$0xff] }
  0xb9   : >> { %10527 = vmatprep.mubr.msk.f32.mxu0 %vm1004_vm2, %v766_v17  ;;  %v798_v17 = vld [vmem:[%s12505_s12 + $0x388] sm:$0xff] }
  0xbb   : >> { %10328 = vmatmul.mubr.msk.f32.gmra.mrb[30].mxu1 %vm1004_vm2, %v9117_v18  ;;  %v9149_v18 = vld [vmem:[%s12505_s12 + $0x391] sm:$0xff] }
  0xbc   : >> { %10528 = vmatmul.mubr.msk.f32.gmra.mrb[30].mxu0 %vm1004_vm2, %v767_v19  ;;  %10330 = vmatprep.mubr.msk.f32.mxu1 %vm1004_vm2, %v9118_v20  ;;  %v799_v19 = vld [vmem:[%s12505_s12 + $0x390] sm:$0xff]  ;;  %v9150_v20 = vld [vmem:[%s12505_s12 + $0x421] sm:$0xff] }
  0xbd   : >> { %10530 = vmatprep.mubr.msk.f32.mxu0 %vm1004_vm2, %v768_v21  ;;  %v9475_v21 = vld [vmem:[%s12505_s12 + $0x2] sm:$0xff] }
  0xbf   : >> { %10331 = vmatmul.mubr.msk.f32.gmra.mrb[32].mxu1 %vm1004_vm2, %v9119_v22  ;;  %v9151_v22 = vld [vmem:[%s12505_s12 + $0x429] sm:$0xff] }
  0xc0   : >> { %10531 = vmatmul.mubr.msk.f32.gmra.mrb[32].mxu0 %vm1004_vm2, %v769_v23  ;;  %10333 = vmatprep.mubr.msk.f32.mxu1 %vm1004_vm2, %v9120_v24  ;;  %v9476_v23 = vld [vmem:[%s12505_s12 + $0xa] sm:$0xff] }
  0xc1   : >> { %10533 = vmatprep.mubr.msk.f32.mxu0 %vm1004_vm2, %v770_v25  ;;  %v9152_v24 = vld [vmem:[%s12505_s12 + $0x431] sm:$0xff] }
  0xc2   : >> { %v9477_v25 = vld [vmem:[%s12505_s12 + $0x12] sm:$0xff] }
  0xc3   : >> { %10334 = vmatmul.mubr.msk.f32.gmra.mrb[34].mxu1 %vm1004_vm2, %v9121_v26  ;;  %v9153_v26 = vld [vmem:[%s12505_s12 + $0x439] sm:$0xff] }
  0xc4   : >> { %10534 = vmatmul.mubr.msk.f32.gmra.mrb[34].mxu0 %vm1004_vm2, %v771_v27  ;;  %10336 = vmatprep.mubr.msk.f32.mxu1 %vm1004_vm2, %v9122_v28  ;;  %v9478_v27 = vld [vmem:[%s12505_s12 + $0x1a] sm:$0xff] }
  0xc5   : >> { %10536 = vmatprep.mubr.msk.f32.mxu0 %vm1004_vm2, %v772_v29  ;;  %v9154_v28 = vld [vmem:[%s12505_s12 + $0x441] sm:$0xff] }
  0xc6   : >> { %v9479_v29 = vld [vmem:[%s12505_s12 + $0x22] sm:$0xff] }
  0xc7   : >> { %10337 = vmatmul.mubr.msk.f32.gmra.mrb[36].mxu1 %vm1004_vm2, %v9123_v30  ;;  %v9155_v30 = vld [vmem:[%s12505_s12 + $0x449] sm:$0xff] }
  0xc8   : >> { %10537 = vmatmul.mubr.msk.f32.gmra.mrb[36].mxu0 %vm1004_vm2, %v773_v31  ;;  %10339 = vmatprep.mubr.msk.f32.mxu1 %vm1004_vm2, %v9124_v32  ;;  %v9480_v31 = vld [vmem:[%s12505_s12 + $0x2a] sm:$0xff] }
  0xc9   : >> { %10539 = vmatprep.mubr.msk.f32.mxu0 %vm1004_vm2, %v774_v33  ;;  %v9156_v32 = vld [vmem:[%s12505_s12 + $0x451] sm:$0xff] }
  0xca   : >> { %v9481_v33 = vld [vmem:[%s12505_s12 + $0x32] sm:$0xff] }
  0xcb   : >> { %10340 = vmatmul.mubr.msk.f32.gmra.mrb[38].mxu1 %vm1004_vm2, %v9125_v34  ;;  %v9157_v34 = vld [vmem:[%s12505_s12 + $0x459] sm:$0xff] }
  0xcc   : >> { %10540 = vmatmul.mubr.msk.f32.gmra.mrb[38].mxu0 %vm1004_vm2, %v775_v35  ;;  %10342 = vmatprep.mubr.msk.f32.mxu1 %vm1004_vm2, %v9126_v36  ;;  %v9482_v35 = vld [vmem:[%s12505_s12 + $0x3a] sm:$0xff] }
  0xcd   : >> { %10542 = vmatprep.mubr.msk.f32.mxu0 %vm1004_vm2, %v776_v37  ;;  %v9158_v36 = vld [vmem:[%s12505_s12 + $0x461] sm:$0xff] }
  0xce   : >> { %v9483_v37 = vld [vmem:[%s12505_s12 + $0x42] sm:$0xff] }
  0xcf   : >> { %10343 = vmatmul.mubr.msk.f32.gmra.mrb[40].mxu1 %vm1004_vm2, %v9127_v38  ;;  %v9159_v38 = vld [vmem:[%s12505_s12 + $0x469] sm:$0xff] }
  0xd0   : >> { %10543 = vmatmul.mubr.msk.f32.gmra.mrb[40].mxu0 %vm1004_vm2, %v777_v39  ;;  %10345 = vmatprep.mubr.msk.f32.mxu1 %vm1004_vm2, %v9128_v40  ;;  %v9484_v39 = vld [vmem:[%s12505_s12 + $0x4a] sm:$0xff] }
  0xd1   : >> { %10545 = vmatprep.mubr.msk.f32.mxu0 %vm1004_vm2, %v778_v41  ;;  %v9160_v40 = vld [vmem:[%s12505_s12 + $0x471] sm:$0xff] }
  0xd2   : >> { %v9485_v41 = vld [vmem:[%s12505_s12 + $0x52] sm:$0xff] }
  0xd3   : >> { %10346 = vmatmul.mubr.msk.f32.gmra.mrb[42].mxu1 %vm1004_vm2, %v9129_v42  ;;  %v9161_v42 = vld [vmem:[%s12505_s12 + $0x479] sm:$0xff] }
  0xd4   : >> { %10546 = vmatmul.mubr.msk.f32.gmra.mrb[42].mxu0 %vm1004_vm2, %v779_v43  ;;  %10348 = vmatprep.mubr.msk.f32.mxu1 %vm1004_vm2, %v9130_v44  ;;  %v9486_v43 = vld [vmem:[%s12505_s12 + $0x5a] sm:$0xff] }
  0xd5   : >> { %10548 = vmatprep.mubr.msk.f32.mxu0 %vm1004_vm2, %v780_v45  ;;  %v9162_v44 = vld [vmem:[%s12505_s12 + $0x481] sm:$0xff] }
  0xd6   : >> { %v9487_v45 = vld [vmem:[%s12505_s12 + $0x62] sm:$0xff] }
  0xd7   : >> { %10349 = vmatmul.mubr.msk.f32.gmra.mrb[44].mxu1 %vm1004_vm2, %v9131_v46  ;;  %v9163_v46 = vld [vmem:[%s12505_s12 + $0x489] sm:$0xff] }
  0xd8   : >> { %10549 = vmatmul.mubr.msk.f32.gmra.mrb[44].mxu0 %vm1004_vm2, %v781_v47  ;;  %10351 = vmatprep.mubr.msk.f32.mxu1 %vm1004_vm2, %v9132_v48  ;;  %v9488_v47 = vld [vmem:[%s12505_s12 + $0x6a] sm:$0xff] }
  0xd9   : >> { %10551 = vmatprep.mubr.msk.f32.mxu0 %vm1004_vm2, %v782_v49  ;;  %v9164_v48 = vld [vmem:[%s12505_s12 + $0x491] sm:$0xff] }
  0xda   : >> { %v9489_v49 = vld [vmem:[%s12505_s12 + $0x72] sm:$0xff] }
  0xdb   : >> { %10352 = vmatmul.mubr.msk.f32.gmra.mrb[46].mxu1 %vm1004_vm2, %v9133_v50  ;;  %v9165_v50 = vld [vmem:[%s12505_s12 + $0x499] sm:$0xff] }
  0xdc   : >> { %10552 = vmatmul.mubr.msk.f32.gmra.mrb[46].mxu0 %vm1004_vm2, %v783_v51  ;;  %10354 = vmatprep.mubr.msk.f32.mxu1 %vm1004_vm2, %v9134_v52  ;;  %v9490_v51 = vld [vmem:[%s12505_s12 + $0x7a] sm:$0xff]  ;;  %v9166_v52 = vld [vmem:[%s12505_s12 + $0x529] sm:$0xff] }
  0xdd   : >> { %10554 = vmatprep.mubr.msk.f32.mxu0 %vm1004_vm2, %v784_v53  ;;  %v9491_v53 = vld [vmem:[%s12505_s12 + $0x10a] sm:$0xff] }
  0xdf   : >> { %10355 = vmatmul.mubr.msk.f32.gmra.mrb[48].mxu1 %vm1004_vm2, %v9135_v54  ;;  %v9167_v54 = vld [vmem:[%s12505_s12 + $0x531] sm:$0xff] }
  0xe0   : >> { %10555 = vmatmul.mubr.msk.f32.gmra.mrb[48].mxu0 %vm1004_vm2, %v785_v55  ;;  %10357 = vmatprep.mubr.msk.f32.mxu1 %vm1004_vm2, %v9136_v56  ;;  %v9492_v55 = vld [vmem:[%s12505_s12 + $0x112] sm:$0xff] }
  0xe1   : >> { %10557 = vmatprep.mubr.msk.f32.mxu0 %vm1004_vm2, %v786_v57  ;;  %v9168_v56 = vld [vmem:[%s12505_s12 + $0x539] sm:$0xff] }
  0xe2   : >> { %v9493_v57 = vld [vmem:[%s12505_s12 + $0x11a] sm:$0xff] }
  0xe3   : >> { %10358 = vmatmul.mubr.msk.f32.gmra.mrb[50].mxu1 %vm1004_vm2, %v9137_v58  ;;  %v9169_v58 = vld [vmem:[%s12505_s12 + $0x541] sm:$0xff] }
  0xe4   : >> { %10558 = vmatmul.mubr.msk.f32.gmra.mrb[50].mxu0 %vm1004_vm2, %v787_v59  ;;  %10360 = vmatprep.mubr.msk.f32.mxu1 %vm1004_vm2, %v9138_v60  ;;  %v9494_v59 = vld [vmem:[%s12505_s12 + $0x122] sm:$0xff] }
  0xe5   : >> { %10560 = vmatprep.mubr.msk.f32.mxu0 %vm1004_vm2, %v788_v61  ;;  %v9170_v60 = vld [vmem:[%s12505_s12 + $0x549] sm:$0xff] }
  0xe6   : >> { %v9495_v61 = vld [vmem:[%s12505_s12 + $0x12a] sm:$0xff] }
  0xe7   : >> { %10361 = vmatmul.mubr.msk.f32.gmra.mrb[52].mxu1 %vm1004_vm2, %v9139_v62  ;;  %v9171_v62 = vld [vmem:[%s12505_s12 + $0x551] sm:$0xff] }
  0xe8   : >> { %10561 = vmatmul.mubr.msk.f32.gmra.mrb[52].mxu0 %vm1004_vm2, %v789_v63  ;;  %10363 = vmatprep.mubr.msk.f32.mxu1 %vm1004_vm2, %v9140_v0  ;;  %v9496_v63 = vld [vmem:[%s12505_s12 + $0x132] sm:$0xff] }
  0xe9   : >> { %10563 = vmatprep.mubr.msk.f32.mxu0 %vm1004_vm2, %v790_v1  ;;  %v9172_v0 = vld [vmem:[%s12505_s12 + $0x559] sm:$0xff] }
  0xea   : >> { %v9497_v1 = vld [vmem:[%s12505_s12 + $0x13a] sm:$0xff] }
  0xeb   : >> { %10364 = vmatmul.mubr.msk.f32.gmra.mrb[54].mxu1 %vm1004_vm2, %v9141_v2  ;;  %v9173_v2 = vld [vmem:[%s12505_s12 + $0x561] sm:$0xff] }
  0xec   : >> { %10564 = vmatmul.mubr.msk.f32.gmra.mrb[54].mxu0 %vm1004_vm2, %v791_v3  ;;  %10366 = vmatprep.mubr.msk.f32.mxu1 %vm1004_vm2, %v9142_v4  ;;  %v9498_v3 = vld [vmem:[%s12505_s12 + $0x142] sm:$0xff] }
  0xed   : >> { %10566 = vmatprep.mubr.msk.f32.mxu0 %vm1004_vm2, %v792_v5  ;;  %v9174_v4 = vld [vmem:[%s12505_s12 + $0x569] sm:$0xff] }
  0xee   : >> { %v9499_v5 = vld [vmem:[%s12505_s12 + $0x14a] sm:$0xff] }
  0xef   : >> { %10367 = vmatmul.mubr.msk.f32.gmra.mrb[56].mxu1 %vm1004_vm2, %v9143_v6  ;;  %v9175_v6 = vld [vmem:[%s12505_s12 + $0x571] sm:$0xff] }
  0xf0   : >> { %10567 = vmatmul.mubr.msk.f32.gmra.mrb[56].mxu0 %vm1004_vm2, %v793_v7  ;;  %10369 = vmatprep.mubr.msk.f32.mxu1 %vm1004_vm2, %v9144_v8  ;;  %v9500_v7 = vld [vmem:[%s12505_s12 + $0x152] sm:$0xff] }
  0xf1   : >> { %10569 = vmatprep.mubr.msk.f32.mxu0 %vm1004_vm2, %v794_v9  ;;  %v9176_v8 = vld [vmem:[%s12505_s12 + $0x579] sm:$0xff] }
  0xf2   : >> { %v9501_v9 = vld [vmem:[%s12505_s12 + $0x15a] sm:$0xff] }
  0xf3   : >> { %10370 = vmatmul.mubr.msk.f32.gmra.mrb[58].mxu1 %vm1004_vm2, %v9145_v10  ;;  %v9177_v10 = vld [vmem:[%s12505_s12 + $0x581] sm:$0xff] }
  0xf4   : >> { %10570 = vmatmul.mubr.msk.f32.gmra.mrb[58].mxu0 %vm1004_vm2, %v795_v11  ;;  %10372 = vmatprep.mubr.msk.f32.mxu1 %vm1004_vm2, %v9146_v12  ;;  %v9502_v11 = vld [vmem:[%s12505_s12 + $0x162] sm:$0xff] }
  0xf5   : >> { %10572 = vmatprep.mubr.msk.f32.mxu0 %vm1004_vm2, %v796_v13  ;;  %v9178_v12 = vld [vmem:[%s12505_s12 + $0x589] sm:$0xff] }
  0xf6   : >> { %v9503_v13 = vld [vmem:[%s12505_s12 + $0x16a] sm:$0xff] }
  0xf7   : >> { %10373 = vmatmul.mubr.msk.f32.gmra.mrb[60].mxu1 %vm1004_vm2, %v9147_v14  ;;  %v9179_v14 = vld [vmem:[%s12505_s12 + $0x591] sm:$0xff] }
  0xf8   : >> { %10573 = vmatmul.mubr.msk.f32.gmra.mrb[60].mxu0 %vm1004_vm2, %v797_v15  ;;  %10375 = vmatprep.mubr.msk.f32.mxu1 %vm1004_vm2, %v9148_v16  ;;  %v9504_v15 = vld [vmem:[%s12505_s12 + $0x172] sm:$0xff] }
  0xf9   : >> { %10575 = vmatprep.mubr.msk.f32.mxu0 %vm1004_vm2, %v798_v17  ;;  %v9180_v16 = vld [vmem:[%s12505_s12 + $0x599] sm:$0xff] }
  0xfa   : >> { %v9505_v17 = vld [vmem:[%s12505_s12 + $0x17a] sm:$0xff] }
  0xfb   : >> { %10376 = vmatmul.mubr.msk.f32.gmra.mrb[62].mxu1 %vm1004_vm2, %v9149_v18  ;;  %v9181_v18 = vld [vmem:[%s12505_s12 + $0x5a1] sm:$0xff] }
  0xfc   : >> { %10576 = vmatmul.mubr.msk.f32.gmra.mrb[62].mxu0 %vm1004_vm2, %v799_v19  ;;  %10378 = vmatprep.mubr.msk.f32.mxu1 %vm1004_vm2, %v9150_v20  ;;  %v9506_v19 = vld [vmem:[%s12505_s12 + $0x182] sm:$0xff]  ;;  %v9182_v20 = vld [vmem:[%s12505_s12 + $0x631] sm:$0xff] }
  0xfd   : >> { %10682 = vmatprep.mubr.msk.f32.mxu0 %vm1004_vm2, %v9475_v21  ;;  %v9507_v21 = vld [vmem:[%s12505_s12 + $0x212] sm:$0xff] }
  0xff   : >> { %10379 = vmatmul.mubr.msk.f32.gmra.mrb[64].mxu1 %vm1004_vm2, %v9151_v22  ;;  %v9183_v22 = vld [vmem:[%s12505_s12 + $0x639] sm:$0xff] }
 0x100   : >> { %10683 = vmatmul.mubr.msk.f32.vlgmr.msra.gmra.mrb[0].mxu0 %vm1004_vm2, %v9476_v23  ;;  %10381 = vmatprep.mubr.msk.f32.mxu1 %vm1004_vm2, %v9152_v24  ;;  %v9508_v23 = vld [vmem:[%s12505_s12 + $0x21a] sm:$0xff] }
 0x101   : >> { %10685 = vmatprep.mubr.msk.f32.mxu0 %vm1004_vm2, %v9477_v25  ;;  %v9184_v24 = vld [vmem:[%s12505_s12 + $0x641] sm:$0xff] }
 0x102   : >> { %v9509_v25 = vld [vmem:[%s12505_s12 + $0x222] sm:$0xff] }
 0x103   : >> { %10382 = vmatmul.mubr.msk.f32.gmra.mrb[66].mxu1 %vm1004_vm2, %v9153_v26  ;;  %v9185_v26 = vld [vmem:[%s12505_s12 + $0x649] sm:$0xff] }
 0x104   : >> { %10686 = vmatmul.mubr.msk.f32.gmra.mrb[2].mxu0 %vm1004_vm2, %v9478_v27  ;;  %10384 = vmatprep.mubr.msk.f32.mxu1 %vm1004_vm2, %v9154_v28  ;;  %v9510_v27 = vld [vmem:[%s12505_s12 + $0x22a] sm:$0xff] }
 0x105   : >> { %10688 = vmatprep.mubr.msk.f32.mxu0 %vm1004_vm2, %v9479_v29  ;;  %v9186_v28 = vld [vmem:[%s12505_s12 + $0x651] sm:$0xff] }
 0x106   : >> { %v9511_v29 = vld [vmem:[%s12505_s12 + $0x232] sm:$0xff] }
 0x107   : >> { %10385 = vmatmul.mubr.msk.f32.gmra.mrb[68].mxu1 %vm1004_vm2, %v9155_v30  ;;  %v9187_v30 = vld [vmem:[%s12505_s12 + $0x659] sm:$0xff] }
 0x108   : >> { %10689 = vmatmul.mubr.msk.f32.gmra.mrb[4].mxu0 %vm1004_vm2, %v9480_v31  ;;  %10387 = vmatprep.mubr.msk.f32.mxu1 %vm1004_vm2, %v9156_v32  ;;  %v9512_v31 = vld [vmem:[%s12505_s12 + $0x23a] sm:$0xff] }
 0x109   : >> { %10691 = vmatprep.mubr.msk.f32.mxu0 %vm1004_vm2, %v9481_v33  ;;  %v9188_v32 = vld [vmem:[%s12505_s12 + $0x661] sm:$0xff] }
 0x10a   : >> { %v9513_v33 = vld [vmem:[%s12505_s12 + $0x242] sm:$0xff] }
 0x10b   : >> { %10388 = vmatmul.mubr.msk.f32.gmra.mrb[70].mxu1 %vm1004_vm2, %v9157_v34  ;;  %v9189_v34 = vld [vmem:[%s12505_s12 + $0x669] sm:$0xff] }
 0x10c   : >> { %10692 = vmatmul.mubr.msk.f32.gmra.mrb[6].mxu0 %vm1004_vm2, %v9482_v35  ;;  %10390 = vmatprep.mubr.msk.f32.mxu1 %vm1004_vm2, %v9158_v36  ;;  %v9514_v35 = vld [vmem:[%s12505_s12 + $0x24a] sm:$0xff] }
 0x10d   : >> { %10694 = vmatprep.mubr.msk.f32.mxu0 %vm1004_vm2, %v9483_v37  ;;  %v9190_v36 = vld [vmem:[%s12505_s12 + $0x671] sm:$0xff] }
 0x10e   : >> { %v9515_v37 = vld [vmem:[%s12505_s12 + $0x252] sm:$0xff] }
 0x10f   : >> { %10391 = vmatmul.mubr.msk.f32.gmra.mrb[72].mxu1 %vm1004_vm2, %v9159_v38  ;;  %v9191_v38 = vld [vmem:[%s12505_s12 + $0x679] sm:$0xff] }
 0x110   : >> { %10695 = vmatmul.mubr.msk.f32.gmra.mrb[8].mxu0 %vm1004_vm2, %v9484_v39  ;;  %10393 = vmatprep.mubr.msk.f32.mxu1 %vm1004_vm2, %v9160_v40  ;;  %v9516_v39 = vld [vmem:[%s12505_s12 + $0x25a] sm:$0xff] }
 0x111   : >> { %10697 = vmatprep.mubr.msk.f32.mxu0 %vm1004_vm2, %v9485_v41  ;;  %v9192_v40 = vld [vmem:[%s12505_s12 + $0x681] sm:$0xff] }
 0x112   : >> { %v9517_v41 = vld [vmem:[%s12505_s12 + $0x262] sm:$0xff] }
 0x113   : >> { %10394 = vmatmul.mubr.msk.f32.gmra.mrb[74].mxu1 %vm1004_vm2, %v9161_v42  ;;  %v9193_v42 = vld [vmem:[%s12505_s12 + $0x689] sm:$0xff] }
 0x114   : >> { %10698 = vmatmul.mubr.msk.f32.gmra.mrb[10].mxu0 %vm1004_vm2, %v9486_v43  ;;  %10396 = vmatprep.mubr.msk.f32.mxu1 %vm1004_vm2, %v9162_v44  ;;  %v9518_v43 = vld [vmem:[%s12505_s12 + $0x26a] sm:$0xff] }
 0x115   : >> { %10700 = vmatprep.mubr.msk.f32.mxu0 %vm1004_vm2, %v9487_v45  ;;  %v9194_v44 = vld [vmem:[%s12505_s12 + $0x691] sm:$0xff] }
 0x117   : >> { %10397 = vmatmul.mubr.msk.f32.gmra.mrb[76].mxu1 %vm1004_vm2, %v9163_v46  ;;  %v9519_v46 = vld [vmem:[%s12505_s12 + $0x272] sm:$0xff] }
 0x118   : >> { %10701 = vmatmul.mubr.msk.f32.gmra.mrb[12].mxu0 %vm1004_vm2, %v9488_v47  ;;  %10399 = vmatprep.mubr.msk.f32.mxu1 %vm1004_vm2, %v9164_v48  ;;  %v9195_v48 = vld [vmem:[%s12505_s12 + $0x699] sm:$0xff] }
 0x119   : >> { %10703 = vmatprep.mubr.msk.f32.mxu0 %vm1004_vm2, %v9489_v49  ;;  %v9520_v49 = vld [vmem:[%s12505_s12 + $0x27a] sm:$0xff] }
 0x11b   : >> { %10400 = vmatmul.mubr.msk.f32.gmra.mrb[78].mxu1 %vm1004_vm2, %v9165_v50  ;;  %v9196_v50 = vld [vmem:[%s12505_s12 + $0x6a1] sm:$0xff] }
 0x11c   : >> { %10704 = vmatmul.mubr.msk.f32.gmra.mrb[14].mxu0 %vm1004_vm2, %v9490_v51  ;;  %10402 = vmatprep.mubr.msk.f32.mxu1 %vm1004_vm2, %v9166_v52  ;;  %v9521_v52 = vld [vmem:[%s12505_s12 + $0x282] sm:$0xff] }
 0x11d   : >> { %10706 = vmatprep.mubr.msk.f32.mxu0 %vm1004_vm2, %v9491_v53 }
 0x11f   : >> { %10403 = vmatmul.mubr.msk.f32.gmra.mrb[80].mxu1 %vm1004_vm2, %v9167_v54  ;;  %v9197_v54 = vld [vmem:[%s12505_s12 + $0x6a9] sm:$0xff] }
 0x120   : >> { %10707 = vmatmul.mubr.msk.f32.gmra.mrb[16].mxu0 %vm1004_vm2, %v9492_v55  ;;  %10405 = vmatprep.mubr.msk.f32.mxu1 %vm1004_vm2, %v9168_v56  ;;  %v9522_v55 = vld [vmem:[%s12505_s12 + $0x28a] sm:$0xff]  ;;  %v9198_v56 = vld [vmem:[%s12505_s12 + $0x739] sm:$0xff] }
 0x121   : >> { %10709 = vmatprep.mubr.msk.f32.mxu0 %vm1004_vm2, %v9493_v57 }
 0x123   : >> { %10406 = vmatmul.mubr.msk.f32.gmra.mrb[82].mxu1 %vm1004_vm2, %v9169_v58  ;;  %v9523_v58 = vld [vmem:[%s12505_s12 + $0x31a] sm:$0xff] }
 0x124   : >> { %10710 = vmatmul.mubr.msk.f32.gmra.mrb[18].mxu0 %vm1004_vm2, %v9494_v59  ;;  %10408 = vmatprep.mubr.msk.f32.mxu1 %vm1004_vm2, %v9170_v60  ;;  %v9199_v60 = vld [vmem:[%s12505_s12 + $0x741] sm:$0xff] }
 0x125   : >> { %10712 = vmatprep.mubr.msk.f32.mxu0 %vm1004_vm2, %v9495_v61  ;;  %v9524_v61 = vld [vmem:[%s12505_s12 + $0x322] sm:$0xff] }
 0x127   : >> { %10409 = vmatmul.mubr.msk.f32.gmra.mrb[84].mxu1 %vm1004_vm2, %v9171_v62  ;;  %v9200_v62 = vld [vmem:[%s12505_s12 + $0x749] sm:$0xff] }
 0x128   : >> { %10713 = vmatmul.mubr.msk.f32.gmra.mrb[20].mxu0 %vm1004_vm2, %v9496_v63  ;;  %10411 = vmatprep.mubr.msk.f32.mxu1 %vm1004_vm2, %v9172_v0  ;;  %v9525_v0 = vld [vmem:[%s12505_s12 + $0x32a] sm:$0xff] }
 0x129   : >> { %10715 = vmatprep.mubr.msk.f32.mxu0 %vm1004_vm2, %v9497_v1 }
 0x12b   : >> { %10412 = vmatmul.mubr.msk.f32.gmra.mrb[86].mxu1 %vm1004_vm2, %v9173_v2  ;;  %v9201_v2 = vld [vmem:[%s12505_s12 + $0x751] sm:$0xff] }
 0x12c   : >> { %10716 = vmatmul.mubr.msk.f32.gmra.mrb[22].mxu0 %vm1004_vm2, %v9498_v3  ;;  %10414 = vmatprep.mubr.msk.f32.mxu1 %vm1004_vm2, %v9174_v4  ;;  %v9526_v3 = vld [vmem:[%s12505_s12 + $0x332] sm:$0xff] }
 0x12d   : >> { %10718 = vmatprep.mubr.msk.f32.mxu0 %vm1004_vm2, %v9499_v5  ;;  %v9202_v4 = vld [vmem:[%s12505_s12 + $0x759] sm:$0xff] }
 0x12f   : >> { %10415 = vmatmul.mubr.msk.f32.gmra.mrb[88].mxu1 %vm1004_vm2, %v9175_v6  ;;  %v9527_v6 = vld [vmem:[%s12505_s12 + $0x33a] sm:$0xff] }
 0x130   : >> { %10719 = vmatmul.mubr.msk.f32.gmra.mrb[24].mxu0 %vm1004_vm2, %v9500_v7  ;;  %10417 = vmatprep.mubr.msk.f32.mxu1 %vm1004_vm2, %v9176_v8  ;;  %v9203_v8 = vld [vmem:[%s12505_s12 + $0x761] sm:$0xff] }
 0x131   : >> { %10721 = vmatprep.mubr.msk.f32.mxu0 %vm1004_vm2, %v9501_v9  ;;  %v9528_v9 = vld [vmem:[%s12505_s12 + $0x342] sm:$0xff] }
 0x133   : >> { %10418 = vmatmul.mubr.msk.f32.gmra.mrb[90].mxu1 %vm1004_vm2, %v9177_v10  ;;  %v9204_v10 = vld [vmem:[%s12505_s12 + $0x769] sm:$0xff] }
 0x134   : >> { %10722 = vmatmul.mubr.msk.f32.gmra.mrb[26].mxu0 %vm1004_vm2, %v9502_v11  ;;  %10420 = vmatprep.mubr.msk.f32.mxu1 %vm1004_vm2, %v9178_v12  ;;  %v9529_v12 = vld [vmem:[%s12505_s12 + $0x34a] sm:$0xff] }
 0x135   : >> { %10724 = vmatprep.mubr.msk.f32.mxu0 %vm1004_vm2, %v9503_v13 }
 0x137   : >> { %10421 = vmatmul.mubr.msk.f32.gmra.mrb[92].mxu1 %vm1004_vm2, %v9179_v14  ;;  %v9205_v14 = vld [vmem:[%s12505_s12 + $0x771] sm:$0xff] }
 0x138   : >> { %10725 = vmatmul.mubr.msk.f32.gmra.mrb[28].mxu0 %vm1004_vm2, %v9504_v15  ;;  %10423 = vmatprep.mubr.msk.f32.mxu1 %vm1004_vm2, %v9180_v16  ;;  %v9530_v15 = vld [vmem:[%s12505_s12 + $0x352] sm:$0xff] }
 0x139   : >> { %10727 = vmatprep.mubr.msk.f32.mxu0 %vm1004_vm2, %v9505_v17  ;;  %v9206_v16 = vld [vmem:[%s12505_s12 + $0x779] sm:$0xff] }
 0x13b   : >> { %10424 = vmatmul.mubr.msk.f32.gmra.mrb[94].mxu1 %vm1004_vm2, %v9181_v18  ;;  %v9531_v18 = vld [vmem:[%s12505_s12 + $0x35a] sm:$0xff] }
 0x13c   : >> { %10728 = vmatmul.mubr.msk.f32.gmra.mrb[30].mxu0 %vm1004_vm2, %v9506_v19  ;;  %10426 = vmatprep.mubr.msk.f32.mxu1 %vm1004_vm2, %v9182_v20  ;;  %v9207_v20 = vld [vmem:[%s12505_s12 + $0x781] sm:$0xff] }
 0x13d   : >> { %10730 = vmatprep.mubr.msk.f32.mxu0 %vm1004_vm2, %v9507_v21  ;;  %v9532_v21 = vld [vmem:[%s12505_s12 + $0x362] sm:$0xff] }
 0x13f   : >> { %10427 = vmatmul.mubr.msk.f32.gmra.mrb[96].mxu1 %vm1004_vm2, %v9183_v22  ;;  %v9208_v22 = vld [vmem:[%s12505_s12 + $0x789] sm:$0xff] }
 0x140   : >> { %10731 = vmatmul.mubr.msk.f32.gmra.mrb[32].mxu0 %vm1004_vm2, %v9508_v23  ;;  %10429 = vmatprep.mubr.msk.f32.mxu1 %vm1004_vm2, %v9184_v24  ;;  %v9533_v24 = vld [vmem:[%s12505_s12 + $0x36a] sm:$0xff] }
 0x141   : >> { %10733 = vmatprep.mubr.msk.f32.mxu0 %vm1004_vm2, %v9509_v25 }
 0x143   : >> { %10430 = vmatmul.mubr.msk.f32.gmra.mrb[98].mxu1 %vm1004_vm2, %v9185_v26  ;;  %v9209_v26 = vld [vmem:[%s12505_s12 + $0x791] sm:$0xff] }
 0x144   : >> { %10734 = vmatmul.mubr.msk.f32.gmra.mrb[34].mxu0 %vm1004_vm2, %v9510_v27  ;;  %10432 = vmatprep.mubr.msk.f32.mxu1 %vm1004_vm2, %v9186_v28  ;;  %v9534_v27 = vld [vmem:[%s12505_s12 + $0x372] sm:$0xff] }
 0x145   : >> { %10736 = vmatprep.mubr.msk.f32.mxu0 %vm1004_vm2, %v9511_v29  ;;  %v9210_v28 = vld [vmem:[%s12505_s12 + $0x799] sm:$0xff] }
 0x147   : >> { %10433 = vmatmul.mubr.msk.f32.gmra.mrb[100].mxu1 %vm1004_vm2, %v9187_v30  ;;  %v9535_v30 = vld [vmem:[%s12505_s12 + $0x37a] sm:$0xff] }
 0x148   : >> { %10737 = vmatmul.mubr.msk.f32.gmra.mrb[36].mxu0 %vm1004_vm2, %v9512_v31  ;;  %10435 = vmatprep.mubr.msk.f32.mxu1 %vm1004_vm2, %v9188_v32  ;;  %v9211_v32 = vld [vmem:[%s12505_s12 + $0x7a1] sm:$0xff] }
 0x149   : >> { %10739 = vmatprep.mubr.msk.f32.mxu0 %vm1004_vm2, %v9513_v33  ;;  %v9536_v33 = vld [vmem:[%s12505_s12 + $0x382] sm:$0xff] }
 0x14b   : >> { %10436 = vmatmul.mubr.msk.f32.gmra.mrb[102].mxu1 %vm1004_vm2, %v9189_v34  ;;  %v9212_v34 = vld [vmem:[%s12505_s12 + $0x7a9] sm:$0xff] }
 0x14c   : >> { %10740 = vmatmul.mubr.msk.f32.gmra.mrb[38].mxu0 %vm1004_vm2, %v9514_v35  ;;  %10438 = vmatprep.mubr.msk.f32.mxu1 %vm1004_vm2, %v9190_v36  ;;  %v9537_v36 = vld [vmem:[%s12505_s12 + $0x38a] sm:$0xff] }
 0x14d   : >> { %10742 = vmatprep.mubr.msk.f32.mxu0 %vm1004_vm2, %v9515_v37 }
 0x14f   : >> { %10439 = vmatmul.mubr.msk.f32.gmra.mrb[104].mxu1 %vm1004_vm2, %v9191_v38  ;;  %v9213_v38 = vld [vmem:[%s12505_s12 + $0x7b1] sm:$0xff] }
 0x150   : >> { %10743 = vmatmul.mubr.msk.f32.gmra.mrb[40].mxu0 %vm1004_vm2, %v9516_v39  ;;  %10441 = vmatprep.mubr.msk.f32.mxu1 %vm1004_vm2, %v9192_v40  ;;  %v9538_v39 = vld [vmem:[%s12505_s12 + $0x392] sm:$0xff]  ;;  %v800_v40 = vld [vmem:[%s12505_s12 + $0x420] sm:$0xff] }
 0x151   : >> { %10745 = vmatprep.mubr.msk.f32.mxu0 %vm1004_vm2, %v9517_v41 }
 0x152   : >> { %v12940_v45 = vpop.f32.mrb[0].mxu1 }
 0x153   : >> { %10442 = vmatmul.mubr.msk.f32.gmra.mrb[106].mxu1 %vm1004_vm2, %v9193_v42  ;;  %v12944_v47 = vpop.f32.mrb[1].mxu1  ;;  %v9539_v42 = vld [vmem:[%s12505_s12 + $0x422] sm:$0xff] }
 0x154   : >> { %10746 = vmatmul.mubr.msk.f32.gmra.mrb[42].mxu0 %vm1004_vm2, %v9518_v43  ;;  %10444 = vmatprep.mubr.msk.f32.mxu1 %vm1004_vm2, %v9194_v44  ;;  %v801_v44 = vld [vmem:[%s12505_s12 + $0x428] sm:$0xff] }
 0x155   : >> { %10748 = vmatprep.mubr.msk.f32.mxu0 %vm1004_vm2, %v9519_v46  ;;  %v9540_v46 = vld [vmem:[%s12505_s12 + $0x42a] sm:$0xff] }
 0x156   : >> { %v12952_v51 = vpop.f32.mrb[2].mxu1 }
 0x157   : >> { %10445 = vmatmul.mubr.msk.f32.gmra.mrb[108].mxu1 %vm1004_vm2, %v9195_v48  ;;  %v12956_v53 = vpop.f32.mrb[3].mxu1  ;;  %v802_v48 = vld [vmem:[%s12505_s12 + $0x430] sm:$0xff] }
 0x158   : >> { %10749 = vmatmul.mubr.msk.f32.gmra.mrb[44].mxu0 %vm1004_vm2, %v9520_v49  ;;  %10447 = vmatprep.mubr.msk.f32.mxu1 %vm1004_vm2, %v9196_v50  ;;  %v9541_v50 = vld [vmem:[%s12505_s12 + $0x432] sm:$0xff] }
 0x159   : >> { %10751 = vmatprep.mubr.msk.f32.mxu0 %vm1004_vm2, %v9521_v52 }
 0x15a   : >> { %v12964_v57 = vpop.f32.mrb[4].mxu1 }
 0x15b   : >> { %10448 = vmatmul.mubr.msk.f32.gmra.mrb[110].mxu1 %vm1004_vm2, %v9197_v54  ;;  %v12968_v59 = vpop.f32.mrb[5].mxu1  ;;  %v803_v54 = vld [vmem:[%s12505_s12 + $0x438] sm:$0xff] }
 0x15c   : >> { %10752 = vmatmul.mubr.msk.f32.gmra.mrb[46].mxu0 %vm1004_vm2, %v9522_v55  ;;  %10450 = vmatprep.mubr.msk.f32.mxu1 %vm1004_vm2, %v9198_v56  ;;  %v9542_v55 = vld [vmem:[%s12505_s12 + $0x43a] sm:$0xff] }
 0x15d   : >> { %10754 = vmatprep.mubr.msk.f32.mxu0 %vm1004_vm2, %v9523_v58  ;;  %v804_v56 = vld [vmem:[%s12505_s12 + $0x440] sm:$0xff] }
 0x15e   : >> { %v12976_v63 = vpop.f32.mrb[6].mxu1 }
 0x15f   : >> { %10451 = vmatmul.mubr.msk.f32.gmra.mrb[112].mxu1 %vm1004_vm2, %v9199_v60  ;;  %v12980_v1 = vpop.f32.mrb[7].mxu1  ;;  %v9543_v60 = vld [vmem:[%s12505_s12 + $0x442] sm:$0xff] }
 0x160   : >> { %10755 = vmatmul.mubr.msk.f32.gmra.mrb[48].mxu0 %vm1004_vm2, %v9524_v61  ;;  %10453 = vmatprep.mubr.msk.f32.mxu1 %vm1004_vm2, %v9200_v62  ;;  %v805_v62 = vld [vmem:[%s12505_s12 + $0x448] sm:$0xff] }
 0x161   : >> { %10757 = vmatprep.mubr.msk.f32.mxu0 %vm1004_vm2, %v9525_v0  ;;  %v9544_v0 = vld [vmem:[%s12505_s12 + $0x44a] sm:$0xff] }
 0x162   : >> { %v12988_v5 = vpop.f32.mrb[8].mxu1 }
 0x163   : >> { %10454 = vmatmul.mubr.msk.f32.gmra.mrb[114].mxu1 %vm1004_vm2, %v9201_v2  ;;  %v12992_v7 = vpop.f32.mrb[9].mxu1  ;;  %v806_v2 = vld [vmem:[%s12505_s12 + $0x450] sm:$0xff] }
 0x164   : >> { %10758 = vmatmul.mubr.msk.f32.gmra.mrb[50].mxu0 %vm1004_vm2, %v9526_v3  ;;  %10456 = vmatprep.mubr.msk.f32.mxu1 %vm1004_vm2, %v9202_v4  ;;  %v9545_v4 = vld [vmem:[%s12505_s12 + $0x452] sm:$0xff] }
 0x165   : >> { %10760 = vmatprep.mubr.msk.f32.mxu0 %vm1004_vm2, %v9527_v6 }
 0x166   : >> { %v13000_v11 = vpop.f32.mrb[10].mxu1 }
 0x167   : >> { %10457 = vmatmul.mubr.msk.f32.gmra.mrb[116].mxu1 %vm1004_vm2, %v9203_v8  ;;  %v13004_v13 = vpop.f32.mrb[11].mxu1  ;;  %v807_v8 = vld [vmem:[%s12505_s12 + $0x458] sm:$0xff] }
 0x168   : >> { %10761 = vmatmul.mubr.msk.f32.gmra.mrb[52].mxu0 %vm1004_vm2, %v9528_v9  ;;  %10459 = vmatprep.mubr.msk.f32.mxu1 %vm1004_vm2, %v9204_v10  ;;  %v9546_v9 = vld [vmem:[%s12505_s12 + $0x45a] sm:$0xff] }
 0x169   : >> { %10763 = vmatprep.mubr.msk.f32.mxu0 %vm1004_vm2, %v9529_v12  ;;  %v808_v10 = vld [vmem:[%s12505_s12 + $0x460] sm:$0xff] }
 0x16a   : >> { %v13012_v17 = vpop.f32.mrb[12].mxu1 }
 0x16b   : >> { %10460 = vmatmul.mubr.msk.f32.gmra.mrb[118].mxu1 %vm1004_vm2, %v9205_v14  ;;  %v13016_v19 = vpop.f32.mrb[13].mxu1  ;;  %v9547_v14 = vld [vmem:[%s12505_s12 + $0x462] sm:$0xff] }
 0x16c   : >> { %10764 = vmatmul.mubr.msk.f32.gmra.mrb[54].mxu0 %vm1004_vm2, %v9530_v15  ;;  %10462 = vmatprep.mubr.msk.f32.mxu1 %vm1004_vm2, %v9206_v16  ;;  %v809_v16 = vld [vmem:[%s12505_s12 + $0x468] sm:$0xff] }
 0x16d   : >> { %10766 = vmatprep.mubr.msk.f32.mxu0 %vm1004_vm2, %v9531_v18  ;;  %v9548_v18 = vld [vmem:[%s12505_s12 + $0x46a] sm:$0xff] }
 0x16e   : >> { %v13024_v23 = vpop.f32.mrb[14].mxu1 }
 0x16f   : >> { %10463 = vmatmul.mubr.msk.f32.gmra.mrb[120].mxu1 %vm1004_vm2, %v9207_v20  ;;  %v13028_v25 = vpop.f32.mrb[15].mxu1  ;;  %v810_v20 = vld [vmem:[%s12505_s12 + $0x470] sm:$0xff] }
 0x170   : >> { %10767 = vmatmul.mubr.msk.f32.gmra.mrb[56].mxu0 %vm1004_vm2, %v9532_v21  ;;  %10465 = vmatprep.mubr.msk.f32.mxu1 %vm1004_vm2, %v9208_v22  ;;  %v9549_v22 = vld [vmem:[%s12505_s12 + $0x472] sm:$0xff] }
 0x171   : >> { %10769 = vmatprep.mubr.msk.f32.mxu0 %vm1004_vm2, %v9533_v24 }
 0x172   : >> { %v13036_v29 = vpop.f32.mrb[16].mxu1 }
 0x173   : >> { %10466 = vmatmul.mubr.msk.f32.gmra.mrb[122].mxu1 %vm1004_vm2, %v9209_v26  ;;  %v13040_v31 = vpop.f32.mrb[17].mxu1  ;;  %v811_v26 = vld [vmem:[%s12505_s12 + $0x478] sm:$0xff] }
 0x174   : >> { %10770 = vmatmul.mubr.msk.f32.gmra.mrb[58].mxu0 %vm1004_vm2, %v9534_v27  ;;  %10468 = vmatprep.mubr.msk.f32.mxu1 %vm1004_vm2, %v9210_v28  ;;  %v9550_v27 = vld [vmem:[%s12505_s12 + $0x47a] sm:$0xff] }
 0x175   : >> { %10772 = vmatprep.mubr.msk.f32.mxu0 %vm1004_vm2, %v9535_v30  ;;  %v812_v28 = vld [vmem:[%s12505_s12 + $0x480] sm:$0xff] }
 0x176   : >> { %v13048_v35 = vpop.f32.mrb[18].mxu1 }
 0x177   : >> { %10469 = vmatmul.mubr.msk.f32.gmra.mrb[124].mxu1 %vm1004_vm2, %v9211_v32  ;;  %v13052_v37 = vpop.f32.mrb[19].mxu1  ;;  %v9551_v32 = vld [vmem:[%s12505_s12 + $0x482] sm:$0xff] }
 0x178   : >> { %10773 = vmatmul.mubr.msk.f32.gmra.mrb[60].mxu0 %vm1004_vm2, %v9536_v33  ;;  %10471 = vmatprep.mubr.msk.f32.mxu1 %vm1004_vm2, %v9212_v34  ;;  %v813_v34 = vld [vmem:[%s12505_s12 + $0x488] sm:$0xff] }
 0x179   : >> { %10775 = vmatprep.mubr.msk.f32.mxu0 %vm1004_vm2, %v9537_v36  ;;  %v9552_v36 = vld [vmem:[%s12505_s12 + $0x48a] sm:$0xff] }
 0x17a   : >> { %v13060_v41 = vpop.f32.mrb[20].mxu1 }
 0x17b   : >> { %10472 = vmatmul.mubr.msk.f32.gmra.mrb[126].mxu1 %vm1004_vm2, %v9213_v38  ;;  %v13064_v43 = vpop.f32.mrb[21].mxu1  ;;  %v814_v38 = vld [vmem:[%s12505_s12 + $0x490] sm:$0xff] }
 0x17c   : >> { %10776 = vmatmul.mubr.msk.f32.gmra.mrb[62].mxu0 %vm1004_vm2, %v9538_v39  ;;  %10578 = vmatprep.mubr.msk.f32.mxu1 %vm1004_vm2, %v800_v40  ;;  %v9553_v40 = vld [vmem:[%s12505_s12 + $0x492] sm:$0xff] }
 0x17d   : >> { %10778 = vmatprep.mubr.msk.f32.mxu0 %vm1004_vm2, %v9539_v42 }
 0x17e   : >> { %v13072_v49 = vpop.f32.mrb[22].mxu1 }
 0x17f   : >> { %10579 = vmatmul.mubr.msk.f32.vlgmr.msra.gmra.mrb[64].mxu1 %vm1004_vm2, %v801_v44  ;;  %v13076_v52 = vpop.f32.mrb[23].mxu1  ;;  %v815_v44 = vld [vmem:[%s12505_s12 + $0x498] sm:$0xff] }
 0x180   : >> { %10779 = vmatmul.mubr.msk.f32.gmra.mrb[64].mxu0 %vm1004_vm2, %v9540_v46  ;;  %10581 = vmatprep.mubr.msk.f32.mxu1 %vm1004_vm2, %v802_v48  ;;  %v9554_v46 = vld [vmem:[%s12505_s12 + $0x49a] sm:$0xff]  ;;  %v816_v48 = vld [vmem:[%s12505_s12 + $0x528] sm:$0xff] }
 0x181   : >> { %10781 = vmatprep.mubr.msk.f32.mxu0 %vm1004_vm2, %v9541_v50 }
 0x182   : >> { %v13084_v58 = vpop.f32.mrb[24].mxu1 }
 0x183   : >> { %10582 = vmatmul.mubr.msk.f32.gmra.mrb[66].mxu1 %vm1004_vm2, %v803_v54  ;;  %v13088_v61 = vpop.f32.mrb[25].mxu1  ;;  %v9555_v54 = vld [vmem:[%s12505_s12 + $0x52a] sm:$0xff] }
 0x184   : >> { %10782 = vmatmul.mubr.msk.f32.gmra.mrb[66].mxu0 %vm1004_vm2, %v9542_v55  ;;  %10584 = vmatprep.mubr.msk.f32.mxu1 %vm1004_vm2, %v804_v56  ;;  %v817_v56 = vld [vmem:[%s12505_s12 + $0x530] sm:$0xff] }
 0x185   : >> { %10784 = vmatprep.mubr.msk.f32.mxu0 %vm1004_vm2, %v9543_v60  ;;  %v9556_v60 = vld [vmem:[%s12505_s12 + $0x532] sm:$0xff] }
 0x186   : >> { %v13096_v3 = vpop.f32.mrb[26].mxu1 }
 0x187   : >> { %10585 = vmatmul.mubr.msk.f32.gmra.mrb[68].mxu1 %vm1004_vm2, %v805_v62  ;;  %v13100_v6 = vpop.f32.mrb[27].mxu1  ;;  %v818_v62 = vld [vmem:[%s12505_s12 + $0x538] sm:$0xff] }
 0x188   : >> { %10785 = vmatmul.mubr.msk.f32.gmra.mrb[68].mxu0 %vm1004_vm2, %v9544_v0  ;;  %10587 = vmatprep.mubr.msk.f32.mxu1 %vm1004_vm2, %v806_v2  ;;  %v9557_v2 = vld [vmem:[%s12505_s12 + $0x53a] sm:$0xff] }
 0x189   : >> { %10787 = vmatprep.mubr.msk.f32.mxu0 %vm1004_vm2, %v9545_v4 }
 0x18a   : >> { %v13108_v12 = vpop.f32.mrb[28].mxu1 }
 0x18b   : >> { %10588 = vmatmul.mubr.msk.f32.gmra.mrb[70].mxu1 %vm1004_vm2, %v807_v8  ;;  %v13112_v15 = vpop.f32.mrb[29].mxu1  ;;  %v819_v8 = vld [vmem:[%s12505_s12 + $0x540] sm:$0xff] }
 0x18c   : >> { %10788 = vmatmul.mubr.msk.f32.gmra.mrb[70].mxu0 %vm1004_vm2, %v9546_v9  ;;  %10590 = vmatprep.mubr.msk.f32.mxu1 %vm1004_vm2, %v808_v10  ;;  %v9558_v9 = vld [vmem:[%s12505_s12 + $0x542] sm:$0xff] }
 0x18d   : >> { %10790 = vmatprep.mubr.msk.f32.mxu0 %vm1004_vm2, %v9547_v14  ;;  %v820_v10 = vld [vmem:[%s12505_s12 + $0x548] sm:$0xff] }
 0x18e   : >> { %v13120_v21 = vpop.f32.mrb[30].mxu1 }
 0x18f   : >> { %10591 = vmatmul.mubr.msk.f32.gmra.mrb[72].mxu1 %vm1004_vm2, %v809_v16  ;;  %v13124_v24 = vpop.f32.mrb[31].mxu1  ;;  %v9559_v16 = vld [vmem:[%s12505_s12 + $0x54a] sm:$0xff] }
 0x190   : >> { %10791 = vmatmul.mubr.msk.f32.gmra.mrb[72].mxu0 %vm1004_vm2, %v9548_v18  ;;  %10593 = vmatprep.mubr.msk.f32.mxu1 %vm1004_vm2, %v810_v20  ;;  %v821_v20 = vld [vmem:[%s12505_s12 + $0x550] sm:$0xff] }
 0x191   : >> { %10793 = vmatprep.mubr.msk.f32.mxu0 %vm1004_vm2, %v9549_v22  ;;  %v9560_v22 = vld [vmem:[%s12505_s12 + $0x552] sm:$0xff] }
 0x192   : >> { %v13132_v30 = vpop.f32.mrb[32].mxu1 }
 0x193   : >> { %10594 = vmatmul.mubr.msk.f32.gmra.mrb[74].mxu1 %vm1004_vm2, %v811_v26  ;;  %v13136_v33 = vpop.f32.mrb[33].mxu1  ;;  %v822_v26 = vld [vmem:[%s12505_s12 + $0x558] sm:$0xff] }
 0x194   : >> { %10794 = vmatmul.mubr.msk.f32.gmra.mrb[74].mxu0 %vm1004_vm2, %v9550_v27  ;;  %10596 = vmatprep.mubr.msk.f32.mxu1 %vm1004_vm2, %v812_v28  ;;  %v9561_v28 = vld [vmem:[%s12505_s12 + $0x55a] sm:$0xff] }
 0x195   : >> { %10796 = vmatprep.mubr.msk.f32.mxu0 %vm1004_vm2, %v9551_v32 }
 0x196   : >> { %v13144_v39 = vpop.f32.mrb[34].mxu1 }
 0x197   : >> { %10597 = vmatmul.mubr.msk.f32.gmra.mrb[76].mxu1 %vm1004_vm2, %v813_v34  ;;  %v13148_v42 = vpop.f32.mrb[35].mxu1  ;;  %v823_v34 = vld [vmem:[%s12505_s12 + $0x560] sm:$0xff] }
 0x198   : >> { %10797 = vmatmul.mubr.msk.f32.gmra.mrb[76].mxu0 %vm1004_vm2, %v9552_v36  ;;  %10599 = vmatprep.mubr.msk.f32.mxu1 %vm1004_vm2, %v814_v38  ;;  %v9562_v36 = vld [vmem:[%s12505_s12 + $0x562] sm:$0xff] }
 0x199   : >> { %10799 = vmatprep.mubr.msk.f32.mxu0 %vm1004_vm2, %v9553_v40  ;;  %v824_v38 = vld [vmem:[%s12505_s12 + $0x568] sm:$0xff] }
 0x19a   : >> { %v13156_v50 = vpop.f32.mrb[36].mxu1 }
 0x19b   : >> { %10600 = vmatmul.mubr.msk.f32.gmra.mrb[78].mxu1 %vm1004_vm2, %v815_v44  ;;  %v13160_v55 = vpop.f32.mrb[37].mxu1  ;;  %v9563_v44 = vld [vmem:[%s12505_s12 + $0x56a] sm:$0xff] }
 0x19c   : >> { %10800 = vmatmul.mubr.msk.f32.gmra.mrb[78].mxu0 %vm1004_vm2, %v9554_v46  ;;  %10602 = vmatprep.mubr.msk.f32.mxu1 %vm1004_vm2, %v816_v48  ;;  %v825_v48 = vld [vmem:[%s12505_s12 + $0x570] sm:$0xff] }
 0x19d   : >> { %10802 = vmatprep.mubr.msk.f32.mxu0 %vm1004_vm2, %v9555_v54  ;;  %v9564_v54 = vld [vmem:[%s12505_s12 + $0x572] sm:$0xff] }
 0x19e   : >> { %v13168_v0 = vpop.f32.mrb[38].mxu1 }
 0x19f   : >> { %10603 = vmatmul.mubr.msk.f32.gmra.mrb[80].mxu1 %vm1004_vm2, %v817_v56  ;;  %v13172_v4 = vpop.f32.mrb[39].mxu1  ;;  %v826_v56 = vld [vmem:[%s12505_s12 + $0x578] sm:$0xff] }
 0x1a0   : >> { %10803 = vmatmul.mubr.msk.f32.gmra.mrb[80].mxu0 %vm1004_vm2, %v9556_v60  ;;  %10605 = vmatprep.mubr.msk.f32.mxu1 %vm1004_vm2, %v818_v62  ;;  %v9565_v62 = vld [vmem:[%s12505_s12 + $0x57a] sm:$0xff] }
 0x1a1   : >> { %10805 = vmatprep.mubr.msk.f32.mxu0 %vm1004_vm2, %v9557_v2 }
 0x1a2   : >> { %v13180_v14 = vpop.f32.mrb[40].mxu1 }
 0x1a3   : >> { %10606 = vmatmul.mubr.msk.f32.gmra.mrb[82].mxu1 %vm1004_vm2, %v819_v8  ;;  %v13184_v18 = vpop.f32.mrb[41].mxu1  ;;  %v827_v8 = vld [vmem:[%s12505_s12 + $0x580] sm:$0xff] }
 0x1a4   : >> { %10806 = vmatmul.mubr.msk.f32.gmra.mrb[82].mxu0 %vm1004_vm2, %v9558_v9  ;;  %10608 = vmatprep.mubr.msk.f32.mxu1 %vm1004_vm2, %v820_v10  ;;  %v9566_v9 = vld [vmem:[%s12505_s12 + $0x582] sm:$0xff] }
 0x1a5   : >> { %10808 = vmatprep.mubr.msk.f32.mxu0 %vm1004_vm2, %v9559_v16  ;;  %v828_v10 = vld [vmem:[%s12505_s12 + $0x588] sm:$0xff] }
 0x1a6   : >> { %v13192_v27 = vpop.f32.mrb[42].mxu1 }
 0x1a7   : >> { %10609 = vmatmul.mubr.msk.f32.gmra.mrb[84].mxu1 %vm1004_vm2, %v821_v20  ;;  %v13196_v32 = vpop.f32.mrb[43].mxu1  ;;  %v9567_v20 = vld [vmem:[%s12505_s12 + $0x58a] sm:$0xff] }
 0x1a8   : >> { %10809 = vmatmul.mubr.msk.f32.gmra.mrb[84].mxu0 %vm1004_vm2, %v9560_v22  ;;  %10611 = vmatprep.mubr.msk.f32.mxu1 %vm1004_vm2, %v822_v26  ;;  %v829_v26 = vld [vmem:[%s12505_s12 + $0x590] sm:$0xff] }
 0x1a9   : >> { %10811 = vmatprep.mubr.msk.f32.mxu0 %vm1004_vm2, %v9561_v28  ;;  %v9568_v28 = vld [vmem:[%s12505_s12 + $0x592] sm:$0xff] }
 0x1aa   : >> { %v13204_v40 = vpop.f32.mrb[44].mxu1 }
 0x1ab   : >> { %10612 = vmatmul.mubr.msk.f32.gmra.mrb[86].mxu1 %vm1004_vm2, %v823_v34  ;;  %v13208_v46 = vpop.f32.mrb[45].mxu1  ;;  %v830_v34 = vld [vmem:[%s12505_s12 + $0x598] sm:$0xff] }
 0x1ac   : >> { %10812 = vmatmul.mubr.msk.f32.gmra.mrb[86].mxu0 %vm1004_vm2, %v9562_v36  ;;  %10614 = vmatprep.mubr.msk.f32.mxu1 %vm1004_vm2, %v824_v38  ;;  %v9569_v38 = vld [vmem:[%s12505_s12 + $0x59a] sm:$0xff] }
 0x1ad   : >> { %10814 = vmatprep.mubr.msk.f32.mxu0 %vm1004_vm2, %v9563_v44 }
 0x1ae   : >> { %v13216_v60 = vpop.f32.mrb[46].mxu1 }
 0x1af   : >> { %10615 = vmatmul.mubr.msk.f32.gmra.mrb[88].mxu1 %vm1004_vm2, %v825_v48  ;;  %v13220_v2 = vpop.f32.mrb[47].mxu1  ;;  %v831_v48 = vld [vmem:[%s12505_s12 + $0x5a0] sm:$0xff] }
 0x1b0   : >> { %10815 = vmatmul.mubr.msk.f32.gmra.mrb[88].mxu0 %vm1004_vm2, %v9564_v54  ;;  %10617 = vmatprep.mubr.msk.f32.mxu1 %vm1004_vm2, %v826_v56  ;;  %v9570_v54 = vld [vmem:[%s12505_s12 + $0x5a2] sm:$0xff]  ;;  %v832_v56 = vld [vmem:[%s12505_s12 + $0x630] sm:$0xff] }
 0x1b1   : >> { %10817 = vmatprep.mubr.msk.f32.mxu0 %vm1004_vm2, %v9565_v62 }
 0x1b2   : >> { %v13228_v16 = vpop.f32.mrb[48].mxu1 }
 0x1b3   : >> { %10618 = vmatmul.mubr.msk.f32.gmra.mrb[90].mxu1 %vm1004_vm2, %v827_v8  ;;  %v13232_v22 = vpop.f32.mrb[49].mxu1  ;;  %v9571_v8 = vld [vmem:[%s12505_s12 + $0x632] sm:$0xff] }
 0x1b4   : >> { %10818 = vmatmul.mubr.msk.f32.gmra.mrb[90].mxu0 %vm1004_vm2, %v9566_v9  ;;  %10620 = vmatprep.mubr.msk.f32.mxu1 %vm1004_vm2, %v828_v10  ;;  %v833_v10 = vld [vmem:[%s12505_s12 + $0x638] sm:$0xff] }
 0x1b5   : >> { %10820 = vmatprep.mubr.msk.f32.mxu0 %vm1004_vm2, %v9567_v20  ;;  %v9572_v20 = vld [vmem:[%s12505_s12 + $0x63a] sm:$0xff] }
 0x1b6   : >> { %v13240_v36 = vpop.f32.mrb[50].mxu1 }
 0x1b7   : >> { %10621 = vmatmul.mubr.msk.f32.gmra.mrb[92].mxu1 %vm1004_vm2, %v829_v26  ;;  %v13244_v44 = vpop.f32.mrb[51].mxu1  ;;  %v834_v26 = vld [vmem:[%s12505_s12 + $0x640] sm:$0xff] }
 0x1b8   : >> { %18176 = vst [vmem:[#allocation14_spill] sm:$0xff] %v13244_v44  ;;  %10821 = vmatmul.mubr.msk.f32.gmra.mrb[92].mxu0 %vm1004_vm2, %v9568_v28  ;;  %10623 = vmatprep.mubr.msk.f32.mxu1 %vm1004_vm2, %v830_v34  ;;  %v9573_v34 = vld [vmem:[%s12505_s12 + $0x642] sm:$0xff] }
 0x1b9   : >> { %10823 = vmatprep.mubr.msk.f32.mxu0 %vm1004_vm2, %v9569_v38  ;;  %v9585_v44 = vld [vmem:[%s12505_s12 + $0x6a2] sm:$0xff] }
 0x1ba   : >> { %v13252_v62 = vpop.f32.mrb[52].mxu1 }
 0x1bb   : >> { %18177 = vst [vmem:[#allocation15_spill] sm:$0xff] %v13252_v62  ;;  %10624 = vmatmul.mubr.msk.f32.gmra.mrb[94].mxu1 %vm1004_vm2, %v831_v48  ;;  %v13256_v9 = vpop.f32.mrb[53].mxu1  ;;  %v835_v48 = vld [vmem:[%s12505_s12 + $0x648] sm:$0xff]  ;;  %v846_v62 = vld [vmem:[%s12505_s12 + $0x6a0] sm:$0xff] }
 0x1bc   : >> { %18178 = vst [vmem:[#allocation16_spill] sm:$0xff] %v13256_v9  ;;  %10824 = vmatmul.mubr.msk.f32.gmra.mrb[94].mxu0 %vm1004_vm2, %v9570_v54  ;;  %10626 = vmatprep.mubr.msk.f32.mxu1 %vm1004_vm2, %v832_v56  ;;  %v9574_v54 = vld [vmem:[%s12505_s12 + $0x64a] sm:$0xff] }
 0x1bd   : >> { %10826 = vmatprep.mubr.msk.f32.mxu0 %vm1004_vm2, %v9571_v8  ;;  %v836_v56 = vld [vmem:[%s12505_s12 + $0x650] sm:$0xff] }
 0x1be   : >> { %v13264_v28 = vpop.f32.mrb[54].mxu1 }
 0x1bf   : >> { %18179 = vst [vmem:[#allocation17_spill] sm:$0xff] %v13264_v28  ;;  %10627 = vmatmul.mubr.msk.f32.gmra.mrb[96].mxu1 %vm1004_vm2, %v833_v10  ;;  %v13268_v38 = vpop.f32.mrb[55].mxu1  ;;  %v9575_v28 = vld [vmem:[%s12505_s12 + $0x652] sm:$0xff] }
 0x1c0   : >> { %18180 = vst [vmem:[#allocation18_spill] sm:$0xff] %v13268_v38  ;;  %10827 = vmatmul.mubr.msk.f32.gmra.mrb[96].mxu0 %vm1004_vm2, %v9572_v20  ;;  %10629 = vmatprep.mubr.msk.f32.mxu1 %vm1004_vm2, %v834_v26  ;;  %v837_v20 = vld [vmem:[%s12505_s12 + $0x658] sm:$0xff] }
 0x1c1   : >> { %10829 = vmatprep.mubr.msk.f32.mxu0 %vm1004_vm2, %v9573_v34  ;;  %v9576_v26 = vld [vmem:[%s12505_s12 + $0x65a] sm:$0xff] }
 0x1c2   : >> { %v13276_v8 = vpop.f32.mrb[56].mxu1  ;;  %v838_v34 = vld [vmem:[%s12505_s12 + $0x660] sm:$0xff] }
 0x1c3   : >> { %18181 = vst [vmem:[#allocation19_spill] sm:$0xff] %v13276_v8  ;;  %10630 = vmatmul.mubr.msk.f32.gmra.mrb[98].mxu1 %vm1004_vm2, %v835_v48  ;;  %v13280_v10 = vpop.f32.mrb[57].mxu1  ;;  %v9577_v8 = vld [vmem:[%s12505_s12 + $0x662] sm:$0xff] }
 0x1c4   : >> { %18182 = vst [vmem:[#allocation20_spill] sm:$0xff] %v13280_v10  ;;  %10830 = vmatmul.mubr.msk.f32.gmra.mrb[98].mxu0 %vm1004_vm2, %v9574_v54  ;;  %10632 = vmatprep.mubr.msk.f32.mxu1 %vm1004_vm2, %v836_v56  ;;  %v839_v54 = vld [vmem:[%s12505_s12 + $0x668] sm:$0xff]  ;;  %v840_v56 = vld [vmem:[%s12505_s12 + $0x670] sm:$0xff] }
 0x1c5   : >> { %10832 = vmatprep.mubr.msk.f32.mxu0 %vm1004_vm2, %v9575_v28  ;;  %v9578_v28 = vld [vmem:[%s12505_s12 + $0x66a] sm:$0xff] }
 0x1c6   : >> { %v13288_v38 = vpop.f32.mrb[58].mxu1 }
 0x1c7   : >> { %18183 = vst [vmem:[#allocation21_spill] sm:$0xff] %v13288_v38  ;;  %10633 = vmatmul.mubr.msk.f32.gmra.mrb[100].mxu1 %vm1004_vm2, %v837_v20  ;;  %v13292_v48 = vpop.f32.mrb[59].mxu1  ;;  %v9579_v38 = vld [vmem:[%s12505_s12 + $0x672] sm:$0xff] }
 0x1c8   : >> { %18184 = vst [vmem:[#allocation22_spill] sm:$0xff] %v13292_v48  ;;  %10833 = vmatmul.mubr.msk.f32.gmra.mrb[100].mxu0 %vm1004_vm2, %v9576_v26  ;;  %10635 = vmatprep.mubr.msk.f32.mxu1 %vm1004_vm2, %v838_v34  ;;  %v841_v26 = vld [vmem:[%s12505_s12 + $0x678] sm:$0xff]  ;;  %v842_v34 = vld [vmem:[%s12505_s12 + $0x680] sm:$0xff] }
 0x1c9   : >> { %10835 = vmatprep.mubr.msk.f32.mxu0 %vm1004_vm2, %v9577_v8  ;;  %v9580_v8 = vld [vmem:[%s12505_s12 + $0x67a] sm:$0xff]  ;;  %v9581_v48 = vld [vmem:[%s12505_s12 + $0x682] sm:$0xff] }
 0x1ca   : >> { %v13300_v10 = vpop.f32.mrb[60].mxu1 }
 0x1cb   : >> { %18185 = vst [vmem:[#allocation23_spill] sm:$0xff] %v13300_v10  ;;  %10636 = vmatmul.mubr.msk.f32.gmra.mrb[102].mxu1 %vm1004_vm2, %v839_v54  ;;  %v13304_v20 = vpop.f32.mrb[61].mxu1 }
 0x1cc   : >> { %18186 = vst [vmem:[#allocation24_spill] sm:$0xff] %v13304_v20  ;;  %10836 = vmatmul.mubr.msk.f32.gmra.mrb[102].mxu0 %vm1004_vm2, %v9578_v28  ;;  %10638 = vmatprep.mubr.msk.f32.mxu1 %vm1004_vm2, %v840_v56  ;;  %v843_v28 = vld [vmem:[%s12505_s12 + $0x688] sm:$0xff]  ;;  %v844_v56 = vld [vmem:[%s12505_s12 + $0x690] sm:$0xff] }
 0x1cd   : >> { %10838 = vmatprep.mubr.msk.f32.mxu0 %vm1004_vm2, %v9579_v38  ;;  %v9582_v38 = vld [vmem:[%s12505_s12 + $0x68a] sm:$0xff]  ;;  %v9583_v20 = vld [vmem:[%s12505_s12 + $0x692] sm:$0xff] }
 0x1ce   : >> { %v13312_v10 = vpop.f32.mrb[62].mxu1 }
 0x1cf   : >> { %18187 = vst [vmem:[#allocation25_spill] sm:$0xff] %v13312_v10  ;;  %10639 = vmatmul.mubr.msk.f32.gmra.mrb[104].mxu1 %vm1004_vm2, %v841_v26  ;;  %v13316_v54 = vpop.f32.mrb[63].mxu1  ;;  %v13327_v26 = vld [vmem:[%s12031_s22] ss:$0 sm:$0xff] }
 0x1d0   : >> { %18188 = vst [vmem:[#allocation26_spill] sm:$0xff] %v13316_v54  ;;  %10839 = vmatmul.mubr.msk.f32.gmra.mrb[104].mxu0 %vm1004_vm2, %v9580_v8  ;;  %10641 = vmatprep.mubr.msk.f32.mxu1 %vm1004_vm2, %v842_v34  ;;  %v845_v8 = vld [vmem:[%s12505_s12 + $0x698] sm:$0xff] }
 0x1d1   : >> { %10841 = vmatprep.mubr.msk.f32.mxu0 %vm1004_vm2, %v9581_v48  ;;  %v9584_v34 = vld [vmem:[%s12505_s12 + $0x69a] sm:$0xff] }
 0x1d3   : >> { %v10684_v10 = vpop.f32.mrb[0].mxu0  ;;  %10642 = vmatmul.mubr.msk.f32.gmra.mrb[106].mxu1 %vm1004_vm2, %v843_v28 }
 0x1d4   : >> { %v10902_v54 = vadd.f32 %v10684_v10, %v12940_v45  ;;  %v3769_v9 = vpop.f32.mrb[1].mxu0  ;;  %10842 = vmatmul.mubr.msk.f32.gmra.mrb[106].mxu0 %vm1004_vm2, %v9582_v38  ;;  %10644 = vmatprep.mubr.msk.f32.mxu1 %vm1004_vm2, %v844_v56  ;;  %v9586_v56 = vld [vmem:[%s12505_s12 + $0x6aa] sm:$0xff] }
 0x1d5   : >> { %v10903_v48 = vadd.f32 %v3769_v9, %v12944_v47  ;;  %10844 = vmatprep.mubr.msk.f32.mxu0 %vm1004_vm2, %v9583_v20  ;;  %v847_v9 = vld [vmem:[%s12505_s12 + $0x6a8] sm:$0xff] }
 0x1d6   : >> { %v13338_v28 = vadd.f32 %v10902_v54, %v13327_v26 }
 0x1d7   : >> { %v10687_v45 = vpop.f32.mrb[2].mxu0  ;;  %10645 = vmatmul.mubr.msk.f32.gmra.mrb[108].mxu1 %vm1004_vm2, %v845_v8  ;;  %v13349_v20 = vadd.f32 %v10903_v48, %v13327_v26 }
 0x1d8   : >> { %v10904_v10 = vadd.f32 %v10687_v45, %v12952_v51  ;;  %v3779_v38 = vpop.f32.mrb[3].mxu0  ;;  %10845 = vmatmul.mubr.msk.f32.gmra.mrb[108].mxu0 %vm1004_vm2, %v9584_v34  ;;  %v4674_v47 = vsel %vm1004_vm2, %v13338_v28, 0.0  ;;  %10647 = vmatprep.mubr.msk.f32.mxu1 %vm1004_vm2, %v846_v62  ;;  %v848_v51 = vld [vmem:[%s12505_s12 + $0x738] sm:$0xff] }
 0x1d9   : >> { %v10905_v54 = vadd.f32 %v3779_v38, %v12956_v53  ;;  %4675 = vadd.xlane.f32.xlu0 %v4674_v47  ;;  %10847 = vmatprep.mubr.msk.f32.mxu0 %vm1004_vm2, %v9585_v44  ;;  %v9587_v62 = vld [vmem:[%s12505_s12 + $0x73a] sm:$0xff]  ;;  %v4671_v53 = vsel %vm1004_vm2, %v13349_v20, 0.0 }
 0x1da   : >> { %v13356_v8 = vadd.f32 %v10904_v10, %v13327_v26  ;;  %v849_v10 = vld [vmem:[%s12505_s12 + $0x740] sm:$0xff] }
 0x1db   : >> { %v10690_v34 = vpop.f32.mrb[4].mxu0  ;;  %10648 = vmatmul.mubr.msk.f32.gmra.mrb[110].mxu1 %vm1004_vm2, %v847_v9  ;;  %v13369_v38 = vadd.f32 %v10905_v54, %v13327_v26  ;;  %v850_v9 = vld [vmem:[%s12505_s12 + $0x748] sm:$0xff] }
 0x1dc   : >> { %18189 = vst [vmem:[#allocation27_spill] sm:$0xff] %v13356_v8  ;;  %v10906_v48 = vadd.f32 %v10690_v34, %v12964_v57  ;;  %v3789_v45 = vpop.f32.mrb[5].mxu0  ;;  %10848 = vmatmul.mubr.msk.f32.gmra.mrb[110].mxu0 %vm1004_vm2, %v9586_v56  ;;  %v4680_v44 = vsel %vm1004_vm2, %v13356_v8, 0.0  ;;  %10650 = vmatprep.mubr.msk.f32.mxu1 %vm1004_vm2, %v848_v51  ;;  %v9588_v57 = vld [vmem:[%s12505_s12 + $0x742] sm:$0xff]  ;;  %v9589_v56 = vld [vmem:[%s12505_s12 + $0x74a] sm:$0xff] }
 0x1dd   : >> { %v10907_v47 = vadd.f32 %v3789_v45, %v12968_v59  ;;  %4672 = vadd.xlane.f32.xlu0 %v4671_v53  ;;  %4681 = vadd.xlane.f32.xlu1 %v4680_v44  ;;  %v4677_v59 = vsel %vm1004_vm2, %v13369_v38, 0.0 }
 0x1de   : >> { %10850 = vmatprep.mubr.msk.f32.mxu0 %vm1004_vm2, %v9587_v62  ;;  %v851_v62 = vld [vmem:[%s12505_s12 + $0x750] sm:$0xff]  ;;  %v13387_v45 = vadd.f32 %v10906_v48, %v13327_v26 }
 0x1df   : >> { %v10693_v34 = vpop.f32.mrb[6].mxu0  ;;  %10651 = vmatmul.mubr.msk.f32.gmra.mrb[112].mxu1 %vm1004_vm2, %v849_v10  ;;  %v13378_v51 = vadd.f32 %v10907_v47, %v13327_v26  ;;  %v852_v10 = vld [vmem:[%s12505_s12 + $0x758] sm:$0xff] }
 0x1e0   : >> { %v10908_v54 = vadd.f32 %v10693_v34, %v12976_v63  ;;  %v3799_v8 = vpop.f32.mrb[7].mxu0  ;;  %10851 = vmatmul.mubr.msk.f32.gmra.mrb[112].mxu0 %vm1004_vm2, %v9588_v57  ;;  %10653 = vmatprep.mubr.msk.f32.mxu1 %vm1004_vm2, %v850_v9  ;;  %v9590_v63 = vld [vmem:[%s12505_s12 + $0x752] sm:$0xff]  ;;  %v9591_v47 = vld [vmem:[%s12505_s12 + $0x75a] sm:$0xff]  ;;  %v4686_v9 = vsel %vm1004_vm2, %v13387_v45, 0.0 }
 0x1e1   : >> { %v10909_v53 = vadd.f32 %v3799_v8, %v12980_v1  ;;  %4678 = vadd.xlane.f32.xlu1 %v4677_v59  ;;  %v4683_v44 = vsel %vm1004_vm2, %v13378_v51, 0.0  ;;  %10853 = vmatprep.mubr.msk.f32.mxu0 %vm1004_vm2, %v9589_v56  ;;  %v853_v56 = vld [vmem:[%s12505_s12 + $0x760] sm:$0xff] }
 0x1e2   : >> { %4684 = vadd.xlane.f32.xlu0 %v4683_v44  ;;  %v13407_v34 = vadd.f32 %v10908_v54, %v13327_v26  ;;  %v9593_v44 = vld [vmem:[%s12505_s12 + $0x76a] sm:$0xff] }
 0x1e3   : >> { %v10696_v57 = vpop.f32.mrb[8].mxu0  ;;  %10654 = vmatmul.mubr.msk.f32.gmra.mrb[114].mxu1 %vm1004_vm2, %v851_v62  ;;  %v13398_v48 = vadd.f32 %v10909_v53, %v13327_v26  ;;  %v854_v53 = vld [vmem:[%s12505_s12 + $0x768] sm:$0xff] }
 0x1e4   : >> { %v10910_v1 = vadd.f32 %v10696_v57, %v12988_v5  ;;  %v3809_v8 = vpop.f32.mrb[9].mxu0  ;;  %10854 = vmatmul.mubr.msk.f32.gmra.mrb[114].mxu0 %vm1004_vm2, %v9590_v63  ;;  %10656 = vmatprep.mubr.msk.f32.mxu1 %vm1004_vm2, %v852_v10  ;;  %v9592_v5 = vld [vmem:[%s12505_s12 + $0x762] sm:$0xff]  ;;  %v855_v57 = vld [vmem:[%s12505_s12 + $0x770] sm:$0xff] }
 0x1e5   : >> { %v10911_v59 = vadd.f32 %v3809_v8, %v12992_v7  ;;  %4687 = vadd.xlane.f32.xlu1 %v4686_v9  ;;  %v4689_v62 = vsel %vm1004_vm2, %v13398_v48, 0.0  ;;  %10856 = vmatprep.mubr.msk.f32.mxu0 %vm1004_vm2, %v9591_v47  ;;  %v4692_v47 = vsel %vm1004_vm2, %v13407_v34, 0.0 }
 0x1e6   : >> { %4690 = vadd.xlane.f32.xlu0 %v4689_v62  ;;  %v13427_v8 = vadd.f32 %v10910_v1, %v13327_v26  ;;  %v9595_v62 = vld [vmem:[%s12505_s12 + $0x77a] sm:$0xff] }
 0x1e7   : >> { %v10699_v63 = vpop.f32.mrb[10].mxu0  ;;  %10657 = vmatmul.mubr.msk.f32.gmra.mrb[116].mxu1 %vm1004_vm2, %v853_v56  ;;  %v13418_v54 = vadd.f32 %v10911_v59, %v13327_v26  ;;  %v856_v59 = vld [vmem:[%s12505_s12 + $0x778] sm:$0xff] }
 0x1e8   : >> { %v10912_v7 = vadd.f32 %v10699_v63, %v13000_v11  ;;  %v3819_v10 = vpop.f32.mrb[11].mxu0  ;;  %10857 = vmatmul.mubr.msk.f32.gmra.mrb[116].mxu0 %vm1004_vm2, %v9592_v5  ;;  %10659 = vmatprep.mubr.msk.f32.mxu1 %vm1004_vm2, %v854_v53  ;;  %v9594_v11 = vld [vmem:[%s12505_s12 + $0x772] sm:$0xff]  ;;  %v857_v63 = vld [vmem:[%s12505_s12 + $0x780] sm:$0xff] }
 0x1e9   : >> { %v10913_v9 = vadd.f32 %v3819_v10, %v13004_v13  ;;  %4693 = vadd.xlane.f32.xlu1 %v4692_v47  ;;  %v4695_v56 = vsel %vm1004_vm2, %v13418_v54, 0.0  ;;  %10859 = vmatprep.mubr.msk.f32.mxu0 %vm1004_vm2, %v9593_v44  ;;  %v4698_v44 = vsel %vm1004_vm2, %v13427_v8, 0.0 }
 0x1ea   : >> { %4696 = vadd.xlane.f32.xlu0 %v4695_v56  ;;  %v13447_v10 = vadd.f32 %v10912_v7, %v13327_v26  ;;  %v9597_v56 = vld [vmem:[%s12505_s12 + $0x78a] sm:$0xff] }
 0x1eb   : >> { %v10702_v5 = vpop.f32.mrb[12].mxu0  ;;  %10660 = vmatmul.mubr.msk.f32.gmra.mrb[118].mxu1 %vm1004_vm2, %v855_v57  ;;  %v13438_v1 = vadd.f32 %v10913_v9, %v13327_v26  ;;  %v858_v9 = vld [vmem:[%s12505_s12 + $0x788] sm:$0xff] }
 0x1ec   : >> { %v10914_v13 = vadd.f32 %v10702_v5, %v13012_v17  ;;  %v3829_v53 = vpop.f32.mrb[13].mxu0  ;;  %10860 = vmatmul.mubr.msk.f32.gmra.mrb[118].mxu0 %vm1004_vm2, %v9594_v11  ;;  %10662 = vmatprep.mubr.msk.f32.mxu1 %vm1004_vm2, %v856_v59  ;;  %v9596_v17 = vld [vmem:[%s12505_s12 + $0x782] sm:$0xff]  ;;  %v859_v5 = vld [vmem:[%s12505_s12 + $0x790] sm:$0xff] }
 0x1ed   : >> { %v10915_v47 = vadd.f32 %v3829_v53, %v13016_v19  ;;  %4699 = vadd.xlane.f32.xlu1 %v4698_v44  ;;  %v4701_v57 = vsel %vm1004_vm2, %v13438_v1, 0.0  ;;  %10862 = vmatprep.mubr.msk.f32.mxu0 %vm1004_vm2, %v9595_v62  ;;  %v4704_v62 = vsel %vm1004_vm2, %v13447_v10, 0.0 }
 0x1ee   : >> { %4702 = vadd.xlane.f32.xlu0 %v4701_v57  ;;  %v13467_v53 = vadd.f32 %v10914_v13, %v13327_v26  ;;  %v9599_v57 = vld [vmem:[%s12505_s12 + $0x79a] sm:$0xff] }
 0x1ef   : >> { %v10705_v11 = vpop.f32.mrb[14].mxu0  ;;  %10663 = vmatmul.mubr.msk.f32.gmra.mrb[120].mxu1 %vm1004_vm2, %v857_v63  ;;  %v13458_v7 = vadd.f32 %v10915_v47, %v13327_v26  ;;  %v860_v47 = vld [vmem:[%s12505_s12 + $0x798] sm:$0xff] }
 0x1f0   : >> { %v10916_v19 = vadd.f32 %v10705_v11, %v13024_v23  ;;  %v3839_v59 = vpop.f32.mrb[15].mxu0  ;;  %10863 = vmatmul.mubr.msk.f32.gmra.mrb[120].mxu0 %vm1004_vm2, %v9596_v17  ;;  %10665 = vmatprep.mubr.msk.f32.mxu1 %vm1004_vm2, %v858_v9  ;;  %v9598_v23 = vld [vmem:[%s12505_s12 + $0x792] sm:$0xff]  ;;  %v861_v11 = vld [vmem:[%s12505_s12 + $0x7a0] sm:$0xff] }
 0x1f1   : >> { %v10917_v44 = vadd.f32 %v3839_v59, %v13028_v25  ;;  %4705 = vadd.xlane.f32.xlu1 %v4704_v62  ;;  %v4707_v63 = vsel %vm1004_vm2, %v13458_v7, 0.0  ;;  %10865 = vmatprep.mubr.msk.f32.mxu0 %vm1004_vm2, %v9597_v56  ;;  %v4710_v56 = vsel %vm1004_vm2, %v13467_v53, 0.0 }
 0x1f2   : >> { %4708 = vadd.xlane.f32.xlu0 %v4707_v63  ;;  %v13487_v59 = vadd.f32 %v10916_v19, %v13327_v26  ;;  %v9601_v63 = vld [vmem:[%s12505_s12 + $0x7aa] sm:$0xff] }
 0x1f3   : >> { %v10708_v17 = vpop.f32.mrb[16].mxu0  ;;  %10666 = vmatmul.mubr.msk.f32.gmra.mrb[122].mxu1 %vm1004_vm2, %v859_v5  ;;  %v13478_v13 = vadd.f32 %v10917_v44, %v13327_v26  ;;  %v862_v44 = vld [vmem:[%s12505_s12 + $0x7a8] sm:$0xff] }
 0x1f4   : >> { %v10918_v25 = vadd.f32 %v10708_v17, %v13036_v29  ;;  %v3849_v9 = vpop.f32.mrb[17].mxu0  ;;  %10866 = vmatmul.mubr.msk.f32.gmra.mrb[122].mxu0 %vm1004_vm2, %v9598_v23  ;;  %10668 = vmatprep.mubr.msk.f32.mxu1 %vm1004_vm2, %v860_v47  ;;  %v9600_v29 = vld [vmem:[%s12505_s12 + $0x7a2] sm:$0xff]  ;;  %v4716_v17 = vsel %vm1004_vm2, %v13487_v59, 0.0 }
 0x1f5   : >> { %v10919_v62 = vadd.f32 %v3849_v9, %v13040_v31  ;;  %4711 = vadd.xlane.f32.xlu1 %v4710_v56  ;;  %v4713_v5 = vsel %vm1004_vm2, %v13478_v13, 0.0  ;;  %10868 = vmatprep.mubr.msk.f32.mxu0 %vm1004_vm2, %v9599_v57  ;;  %v863_v57 = vld [vmem:[%s12505_s12 + $0x7b0] sm:$0xff] }
 0x1f6   : >> { %4714 = vadd.xlane.f32.xlu0 %v4713_v5  ;;  %v13507_v9 = vadd.f32 %v10918_v25, %v13327_v26 }
 0x1f7   : >> { %v10711_v23 = vpop.f32.mrb[18].mxu0  ;;  %10669 = vmatmul.mubr.msk.f32.gmra.mrb[124].mxu1 %vm1004_vm2, %v861_v11  ;;  %v13498_v19 = vadd.f32 %v10919_v62, %v13327_v26 }
 0x1f8   : >> { %v10920_v31 = vadd.f32 %v10711_v23, %v13048_v35  ;;  %v3859_v47 = vpop.f32.mrb[19].mxu0  ;;  %10869 = vmatmul.mubr.msk.f32.gmra.mrb[124].mxu0 %vm1004_vm2, %v9600_v29  ;;  %10671 = vmatprep.mubr.msk.f32.mxu1 %vm1004_vm2, %v862_v44  ;;  %v9602_v35 = vld [vmem:[%s12505_s12 + $0x7b2] sm:$0xff] }
 0x1f9   : >> { %v10921_v56 = vadd.f32 %v3859_v47, %v13052_v37  ;;  %4717 = vadd.xlane.f32.xlu1 %v4716_v17  ;;  %v4719_v11 = vsel %vm1004_vm2, %v13498_v19, 0.0  ;;  %10871 = vmatprep.mubr.msk.f32.mxu0 %vm1004_vm2, %v9601_v63  ;;  %v4722_v37 = vsel %vm1004_vm2, %v13507_v9, 0.0 }
 0x1fa   : >> { %4720 = vadd.xlane.f32.xlu0 %v4719_v11  ;;  %v13523_v44 = vadd.f32 %v10920_v31, %v13327_v26 }
 0x1fb   : >> { %v10714_v62 = vpop.f32.mrb[20].mxu0  ;;  %10672 = vmatmul.mubr.msk.f32.gmra.mrb[126].mxu1 %vm1004_vm2, %v863_v57  ;;  %v13516_v5 = vadd.f32 %v10921_v56, %v13327_v26 }
 0x1fc   : >> { %v10922_v29 = vadd.f32 %v10714_v62, %v13060_v41  ;;  %v3869_v25 = vpop.f32.mrb[21].mxu0  ;;  %10872 = vmatmul.mubr.msk.f32.gmra.mrb[126].mxu0 %vm1004_vm2, %v9602_v35  ;;  %v4728_v56 = vsel %vm1004_vm2, %v13523_v44, 0.0 }
 0x1fd   : >> { %v10923_v63 = vadd.f32 %v3869_v25, %v13064_v43  ;;  %4723 = vadd.xlane.f32.xlu1 %v4722_v37  ;;  %v4725_v23 = vsel %vm1004_vm2, %v13516_v5, 0.0 }
 0x1fe   : >> { %4726 = vadd.xlane.f32.xlu0 %v4725_v23  ;;  %v13535_v31 = vadd.f32 %v10922_v29, %v13327_v26 }
 0x1ff   : >> { %v10717_v47 = vpop.f32.mrb[22].mxu0  ;;  %v13529_v17 = vadd.f32 %v10923_v63, %v13327_v26 }
 0x200   : >> { %v10924_v41 = vadd.f32 %v10717_v47, %v13072_v49  ;;  %v3879_v57 = vpop.f32.mrb[23].mxu0  ;;  %v4734_v37 = vsel %vm1004_vm2, %v13535_v31, 0.0 }
 0x201   : >> { %v10925_v43 = vadd.f32 %v3879_v57, %v13076_v52  ;;  %4729 = vadd.xlane.f32.xlu1 %v4728_v56  ;;  %v4731_v11 = vsel %vm1004_vm2, %v13529_v17, 0.0 }
 0x202   : >> { %4732 = vadd.xlane.f32.xlu0 %v4731_v11  ;;  %v13547_v29 = vadd.f32 %v10924_v41, %v13327_v26 }
 0x203   : >> { %v10720_v35 = vpop.f32.mrb[24].mxu0  ;;  %v13541_v62 = vadd.f32 %v10925_v43, %v13327_v26 }
 0x204   : >> { %v10926_v49 = vadd.f32 %v10720_v35, %v13084_v58  ;;  %v3889_v25 = vpop.f32.mrb[25].mxu0  ;;  %v4740_v56 = vsel %vm1004_vm2, %v13547_v29, 0.0 }
 0x205   : >> { %v10927_v52 = vadd.f32 %v3889_v25, %v13088_v61  ;;  %4735 = vadd.xlane.f32.xlu1 %v4734_v37  ;;  %v4737_v63 = vsel %vm1004_vm2, %v13541_v62, 0.0 }
 0x206   : >> { %4738 = vadd.xlane.f32.xlu0 %v4737_v63  ;;  %v13559_v41 = vadd.f32 %v10926_v49, %v13327_v26 }
 0x207   : >> { %v10723_v23 = vpop.f32.mrb[26].mxu0  ;;  %v13553_v47 = vadd.f32 %v10927_v52, %v13327_v26 }
 0x208   : >> { %v10928_v58 = vadd.f32 %v10723_v23, %v13096_v3  ;;  %v3899_v57 = vpop.f32.mrb[27].mxu0  ;;  %v4746_v37 = vsel %vm1004_vm2, %v13559_v41, 0.0 }
 0x209   : >> { %v10929_v61 = vadd.f32 %v3899_v57, %v13100_v6  ;;  %4741 = vadd.xlane.f32.xlu1 %v4740_v56  ;;  %v4743_v43 = vsel %vm1004_vm2, %v13553_v47, 0.0 }
 0x20a   : >> { %4744 = vadd.xlane.f32.xlu0 %v4743_v43  ;;  %v13571_v49 = vadd.f32 %v10928_v58, %v13327_v26 }
 0x20b   : >> { %v10726_v11 = vpop.f32.mrb[28].mxu0  ;;  %v13565_v35 = vadd.f32 %v10929_v61, %v13327_v26 }
 0x20c   : >> { %v10930_v3 = vadd.f32 %v10726_v11, %v13108_v12  ;;  %v3909_v25 = vpop.f32.mrb[29].mxu0  ;;  %v4752_v56 = vsel %vm1004_vm2, %v13571_v49, 0.0 }
 0x20d   : >> { %v10931_v6 = vadd.f32 %v3909_v25, %v13112_v15  ;;  %4747 = vadd.xlane.f32.xlu1 %v4746_v37  ;;  %v4749_v52 = vsel %vm1004_vm2, %v13565_v35, 0.0 }
 0x20e   : >> { %4750 = vadd.xlane.f32.xlu0 %v4749_v52  ;;  %v13583_v58 = vadd.f32 %v10930_v3, %v13327_v26 }
 0x20f   : >> { %v10729_v63 = vpop.f32.mrb[30].mxu0  ;;  %v13577_v23 = vadd.f32 %v10931_v6, %v13327_v26 }
 0x210   : >> { %v10932_v12 = vadd.f32 %v10729_v63, %v13120_v21  ;;  %v3919_v57 = vpop.f32.mrb[31].mxu0  ;;  %v4758_v37 = vsel %vm1004_vm2, %v13583_v58, 0.0 }
 0x211   : >> { %v10933_v15 = vadd.f32 %v3919_v57, %v13124_v24  ;;  %4753 = vadd.xlane.f32.xlu1 %v4752_v56  ;;  %v4755_v61 = vsel %vm1004_vm2, %v13577_v23, 0.0 }
 0x212   : >> { %4756 = vadd.xlane.f32.xlu0 %v4755_v61  ;;  %v13595_v3 = vadd.f32 %v10932_v12, %v13327_v26 }
 0x213   : >> { %v10732_v43 = vpop.f32.mrb[32].mxu0  ;;  %v13589_v11 = vadd.f32 %v10933_v15, %v13327_v26 }
 0x214   : >> { %v10934_v21 = vadd.f32 %v10732_v43, %v13132_v30  ;;  %v3929_v25 = vpop.f32.mrb[33].mxu0  ;;  %v4764_v56 = vsel %vm1004_vm2, %v13595_v3, 0.0 }
 0x215   : >> { %v10935_v24 = vadd.f32 %v3929_v25, %v13136_v33  ;;  %4759 = vadd.xlane.f32.xlu1 %v4758_v37  ;;  %v4761_v6 = vsel %vm1004_vm2, %v13589_v11, 0.0 }
 0x216   : >> { %4762 = vadd.xlane.f32.xlu0 %v4761_v6  ;;  %v13607_v12 = vadd.f32 %v10934_v21, %v13327_v26 }
 0x217   : >> { %v10735_v52 = vpop.f32.mrb[34].mxu0  ;;  %v13601_v63 = vadd.f32 %v10935_v24, %v13327_v26 }
 0x218   : >> { %v10936_v30 = vadd.f32 %v10735_v52, %v13144_v39  ;;  %v3939_v57 = vpop.f32.mrb[35].mxu0  ;;  %18191 = vst [vmem:[#allocation29_spill] sm:$0xff] %v13607_v12  ;;  %v4770_v37 = vsel %vm1004_vm2, %v13607_v12, 0.0 }
 0x219   : >> { %18190 = vst [vmem:[#allocation28_spill] sm:$0xff] %v13601_v63  ;;  %v10937_v33 = vadd.f32 %v3939_v57, %v13148_v42  ;;  %4765 = vadd.xlane.f32.xlu1 %v4764_v56  ;;  %v4767_v15 = vsel %vm1004_vm2, %v13601_v63, 0.0 }
 0x21a   : >> { %4768 = vadd.xlane.f32.xlu0 %v4767_v15  ;;  %v13619_v21 = vadd.f32 %v10936_v30, %v13327_v26 }
 0x21b   : >> { %v10738_v61 = vpop.f32.mrb[36].mxu0  ;;  %v13613_v43 = vadd.f32 %v10937_v33, %v13327_v26 }
 0x21c   : >> { %v10938_v39 = vadd.f32 %v10738_v61, %v13156_v50  ;;  %v3949_v25 = vpop.f32.mrb[37].mxu0  ;;  %18193 = vst [vmem:[#allocation31_spill] sm:$0xff] %v13619_v21  ;;  %v4776_v56 = vsel %vm1004_vm2, %v13619_v21, 0.0 }
 0x21d   : >> { %18192 = vst [vmem:[#allocation30_spill] sm:$0xff] %v13613_v43  ;;  %v10939_v42 = vadd.f32 %v3949_v25, %v13160_v55  ;;  %4771 = vadd.xlane.f32.xlu1 %v4770_v37  ;;  %v4773_v24 = vsel %vm1004_vm2, %v13613_v43, 0.0 }
 0x21e   : >> { %4774 = vadd.xlane.f32.xlu0 %v4773_v24  ;;  %v13631_v30 = vadd.f32 %v10938_v39, %v13327_v26 }
 0x21f   : >> { %v10741_v6 = vpop.f32.mrb[38].mxu0  ;;  %v13625_v52 = vadd.f32 %v10939_v42, %v13327_v26 }
 0x220   : >> { %v10940_v50 = vadd.f32 %v10741_v6, %v13168_v0  ;;  %v3959_v57 = vpop.f32.mrb[39].mxu0  ;;  %18195 = vst [vmem:[#allocation33_spill] sm:$0xff] %v13631_v30  ;;  %v4782_v37 = vsel %vm1004_vm2, %v13631_v30, 0.0 }
 0x221   : >> { %18194 = vst [vmem:[#allocation32_spill] sm:$0xff] %v13625_v52  ;;  %v10941_v55 = vadd.f32 %v3959_v57, %v13172_v4  ;;  %4777 = vadd.xlane.f32.xlu1 %v4776_v56  ;;  %v4779_v33 = vsel %vm1004_vm2, %v13625_v52, 0.0 }
 0x222   : >> { %4780 = vadd.xlane.f32.xlu0 %v4779_v33  ;;  %v13643_v39 = vadd.f32 %v10940_v50, %v13327_v26 }
 0x223   : >> { %v10744_v15 = vpop.f32.mrb[40].mxu0  ;;  %v13637_v61 = vadd.f32 %v10941_v55, %v13327_v26 }
 0x224   : >> { %v10942_v0 = vadd.f32 %v10744_v15, %v13180_v14  ;;  %v3969_v25 = vpop.f32.mrb[41].mxu0  ;;  %18197 = vst [vmem:[#allocation35_spill] sm:$0xff] %v13643_v39  ;;  %v4788_v56 = vsel %vm1004_vm2, %v13643_v39, 0.0 }
 0x225   : >> { %18196 = vst [vmem:[#allocation34_spill] sm:$0xff] %v13637_v61  ;;  %v10943_v4 = vadd.f32 %v3969_v25, %v13184_v18  ;;  %4783 = vadd.xlane.f32.xlu1 %v4782_v37  ;;  %v4785_v42 = vsel %vm1004_vm2, %v13637_v61, 0.0 }
 0x226   : >> { %4786 = vadd.xlane.f32.xlu0 %v4785_v42  ;;  %v13655_v50 = vadd.f32 %v10942_v0, %v13327_v26 }
 0x227   : >> { %v10747_v24 = vpop.f32.mrb[42].mxu0  ;;  %v13649_v6 = vadd.f32 %v10943_v4, %v13327_v26 }
 0x228   : >> { %v10944_v14 = vadd.f32 %v10747_v24, %v13192_v27  ;;  %v3979_v57 = vpop.f32.mrb[43].mxu0  ;;  %18199 = vst [vmem:[#allocation37_spill] sm:$0xff] %v13655_v50  ;;  %v4794_v37 = vsel %vm1004_vm2, %v13655_v50, 0.0 }
 0x229   : >> { %18198 = vst [vmem:[#allocation36_spill] sm:$0xff] %v13649_v6  ;;  %v10945_v18 = vadd.f32 %v3979_v57, %v13196_v32  ;;  %4789 = vadd.xlane.f32.xlu1 %v4788_v56  ;;  %v4791_v55 = vsel %vm1004_vm2, %v13649_v6, 0.0 }
 0x22a   : >> { %4792 = vadd.xlane.f32.xlu0 %v4791_v55  ;;  %v13667_v0 = vadd.f32 %v10944_v14, %v13327_v26 }
 0x22b   : >> { %v10750_v33 = vpop.f32.mrb[44].mxu0  ;;  %v13661_v15 = vadd.f32 %v10945_v18, %v13327_v26 }
 0x22c   : >> { %v10946_v27 = vadd.f32 %v10750_v33, %v13204_v40  ;;  %v3989_v25 = vpop.f32.mrb[45].mxu0  ;;  %18201 = vst [vmem:[#allocation39_spill] sm:$0xff] %v13667_v0  ;;  %v4800_v56 = vsel %vm1004_vm2, %v13667_v0, 0.0 }
 0x22d   : >> { %18200 = vst [vmem:[#allocation38_spill] sm:$0xff] %v13661_v15  ;;  %v10947_v32 = vadd.f32 %v3989_v25, %v13208_v46  ;;  %4795 = vadd.xlane.f32.xlu1 %v4794_v37  ;;  %v4797_v4 = vsel %vm1004_vm2, %v13661_v15, 0.0 }
 0x22e   : >> { %4798 = vadd.xlane.f32.xlu0 %v4797_v4  ;;  %v13679_v14 = vadd.f32 %v10946_v27, %v13327_v26 }
 0x22f   : >> { %v10753_v42 = vpop.f32.mrb[46].mxu0  ;;  %v13673_v24 = vadd.f32 %v10947_v32, %v13327_v26 }
 0x230   : >> { %v10948_v40 = vadd.f32 %v10753_v42, %v13216_v60  ;;  %v3999_v57 = vpop.f32.mrb[47].mxu0  ;;  %18203 = vst [vmem:[#allocation41_spill] sm:$0xff] %v13679_v14  ;;  %v4806_v37 = vsel %vm1004_vm2, %v13679_v14, 0.0 }
 0x231   : >> { %18202 = vst [vmem:[#allocation40_spill] sm:$0xff] %v13673_v24  ;;  %v10949_v46 = vadd.f32 %v3999_v57, %v13220_v2  ;;  %4801 = vadd.xlane.f32.xlu1 %v4800_v56  ;;  %v4803_v18 = vsel %vm1004_vm2, %v13673_v24, 0.0 }
 0x232   : >> { %4804 = vadd.xlane.f32.xlu0 %v4803_v18  ;;  %v13691_v27 = vadd.f32 %v10948_v40, %v13327_v26 }
 0x233   : >> { %v10756_v55 = vpop.f32.mrb[48].mxu0  ;;  %v13685_v33 = vadd.f32 %v10949_v46, %v13327_v26  ;;  %v18208_v46 = vld [vmem:[#allocation14_spill] sm:$0xff] }
 0x234   : >> { %v10950_v60 = vadd.f32 %v10756_v55, %v13228_v16  ;;  %v4009_v25 = vpop.f32.mrb[49].mxu0  ;;  %18205 = vst [vmem:[#allocation43_spill] sm:$0xff] %v13691_v27  ;;  %v4812_v56 = vsel %vm1004_vm2, %v13691_v27, 0.0 }
 0x235   : >> { %18204 = vst [vmem:[#allocation42_spill] sm:$0xff] %v13685_v33  ;;  %v10951_v2 = vadd.f32 %v4009_v25, %v13232_v22  ;;  %4807 = vadd.xlane.f32.xlu1 %v4806_v37  ;;  %v4809_v32 = vsel %vm1004_vm2, %v13685_v33, 0.0  ;;  %v18210_v37 = vld [vmem:[#allocation15_spill] sm:$0xff] }
 0x236   : >> { %4810 = vadd.xlane.f32.xlu0 %v4809_v32  ;;  %v13703_v40 = vadd.f32 %v10950_v60, %v13327_v26 }
 0x237   : >> { %v10759_v4 = vpop.f32.mrb[50].mxu0  ;;  %v13697_v42 = vadd.f32 %v10951_v2, %v13327_v26 }
 0x238   : >> { %v10952_v16 = vadd.f32 %v10759_v4, %v13240_v36  ;;  %v4019_v57 = vpop.f32.mrb[51].mxu0  ;;  %18207 = vst [vmem:[#allocation45_spill] sm:$0xff] %v13703_v40  ;;  %v4818_v32 = vsel %vm1004_vm2, %v13703_v40, 0.0  ;;  %v18212_v4 = vld [vmem:[#allocation16_spill] sm:$0xff] }
 0x239   : >> { %18206 = vst [vmem:[#allocation44_spill] sm:$0xff] %v13697_v42  ;;  %v10953_v22 = vadd.f32 %v4019_v57, %v18208_v46  ;;  %4813 = vadd.xlane.f32.xlu1 %v4812_v56  ;;  %v4815_v18 = vsel %vm1004_vm2, %v13697_v42, 0.0  ;;  %v18216_v42 = vld [vmem:[#allocation18_spill] sm:$0xff] }
 0x23a   : >> { %4816 = vadd.xlane.f32.xlu0 %v4815_v18  ;;  %v13715_v60 = vadd.f32 %v10952_v16, %v13327_v26  ;;  %v18214_v18 = vld [vmem:[#allocation17_spill] sm:$0xff] }
 0x23b   : >> { %v10762_v55 = vpop.f32.mrb[52].mxu0  ;;  %v13709_v25 = vadd.f32 %v10953_v22, %v13327_v26 }
 0x23c   : >> { %v10954_v36 = vadd.f32 %v10762_v55, %v18210_v37  ;;  %v4029_v2 = vpop.f32.mrb[53].mxu0  ;;  %18211 = vst [vmem:[#allocation15_spill] sm:$0xff] %v13715_v60  ;;  %v4824_v40 = vsel %vm1004_vm2, %v13715_v60, 0.0 }
 0x23d   : >> { %18209 = vst [vmem:[#allocation14_spill] sm:$0xff] %v13709_v25  ;;  %v10955_v57 = vadd.f32 %v4029_v2, %v18212_v4  ;;  %4819 = vadd.xlane.f32.xlu1 %v4818_v32  ;;  %v4821_v56 = vsel %vm1004_vm2, %v13709_v25, 0.0  ;;  %v18220_v25 = vld [vmem:[#allocation20_spill] sm:$0xff] }
 0x23e   : >> { %4822 = vadd.xlane.f32.xlu0 %v4821_v56  ;;  %v13727_v16 = vadd.f32 %v10954_v36, %v13327_v26  ;;  %v18218_v56 = vld [vmem:[#allocation19_spill] sm:$0xff] }
 0x23f   : >> { %v10765_v46 = vpop.f32.mrb[54].mxu0  ;;  %v13721_v22 = vadd.f32 %v10955_v57, %v13327_v26 }
 0x240   : >> { %v10956_v55 = vadd.f32 %v10765_v46, %v18214_v18  ;;  %v4039_v37 = vpop.f32.mrb[55].mxu0  ;;  %18215 = vst [vmem:[#allocation17_spill] sm:$0xff] %v13727_v16  ;;  %v4830_v60 = vsel %vm1004_vm2, %v13727_v16, 0.0 }
 0x241   : >> { %18213 = vst [vmem:[#allocation16_spill] sm:$0xff] %v13721_v22  ;;  %v10957_v2 = vadd.f32 %v4039_v37, %v18216_v42  ;;  %4825 = vadd.xlane.f32.xlu1 %v4824_v40  ;;  %v4827_v32 = vsel %vm1004_vm2, %v13721_v22, 0.0  ;;  %v18224_v22 = vld [vmem:[#allocation22_spill] sm:$0xff] }
 0x242   : >> { %4828 = vadd.xlane.f32.xlu0 %v4827_v32  ;;  %v13739_v36 = vadd.f32 %v10956_v55, %v13327_v26  ;;  %v18222_v32 = vld [vmem:[#allocation21_spill] sm:$0xff] }
 0x243   : >> { %v10768_v4 = vpop.f32.mrb[56].mxu0  ;;  %v13733_v57 = vadd.f32 %v10957_v2, %v13327_v26 }
 0x244   : >> { %v10958_v46 = vadd.f32 %v10768_v4, %v18218_v56  ;;  %v4049_v18 = vpop.f32.mrb[57].mxu0  ;;  %18219 = vst [vmem:[#allocation19_spill] sm:$0xff] %v13739_v36  ;;  %v4836_v16 = vsel %vm1004_vm2, %v13739_v36, 0.0 }
 0x245   : >> { %18217 = vst [vmem:[#allocation18_spill] sm:$0xff] %v13733_v57  ;;  %v10959_v42 = vadd.f32 %v4049_v18, %v18220_v25  ;;  %4831 = vadd.xlane.f32.xlu1 %v4830_v60  ;;  %v4833_v40 = vsel %vm1004_vm2, %v13733_v57, 0.0  ;;  %v18228_v57 = vld [vmem:[#allocation24_spill] sm:$0xff] }
 0x246   : >> { %4834 = vadd.xlane.f32.xlu0 %v4833_v40  ;;  %v13751_v55 = vadd.f32 %v10958_v46, %v13327_v26  ;;  %v18226_v40 = vld [vmem:[#allocation23_spill] sm:$0xff] }
 0x247   : >> { %v10771_v37 = vpop.f32.mrb[58].mxu0  ;;  %v13745_v2 = vadd.f32 %v10959_v42, %v13327_v26 }
 0x248   : >> { %v10960_v4 = vadd.f32 %v10771_v37, %v18222_v32  ;;  %v4059_v56 = vpop.f32.mrb[59].mxu0  ;;  %18223 = vst [vmem:[#allocation21_spill] sm:$0xff] %v13751_v55  ;;  %v4842_v36 = vsel %vm1004_vm2, %v13751_v55, 0.0 }
 0x249   : >> { %18221 = vst [vmem:[#allocation20_spill] sm:$0xff] %v13745_v2  ;;  %v10961_v25 = vadd.f32 %v4059_v56, %v18224_v22  ;;  %4837 = vadd.xlane.f32.xlu1 %v4836_v16  ;;  %v4839_v60 = vsel %vm1004_vm2, %v13745_v2, 0.0  ;;  %v18232_v2 = vld [vmem:[#allocation26_spill] sm:$0xff] }
 0x24a   : >> { %4840 = vadd.xlane.f32.xlu0 %v4839_v60  ;;  %v13763_v46 = vadd.f32 %v10960_v4, %v13327_v26  ;;  %v18230_v60 = vld [vmem:[#allocation25_spill] sm:$0xff] }
 0x24b   : >> { %v10774_v18 = vpop.f32.mrb[60].mxu0  ;;  %v13757_v42 = vadd.f32 %v10961_v25, %v13327_v26 }
 0x24c   : >> { %v10962_v37 = vadd.f32 %v10774_v18, %v18226_v40  ;;  %v4069_v32 = vpop.f32.mrb[61].mxu0  ;;  %18227 = vst [vmem:[#allocation23_spill] sm:$0xff] %v13763_v46  ;;  %v4848_v55 = vsel %vm1004_vm2, %v13763_v46, 0.0 }
 0x24d   : >> { %18225 = vst [vmem:[#allocation22_spill] sm:$0xff] %v13757_v42  ;;  %v10963_v22 = vadd.f32 %v4069_v32, %v18228_v57  ;;  %4843 = vadd.xlane.f32.xlu1 %v4842_v36  ;;  %v4845_v16 = vsel %vm1004_vm2, %v13757_v42, 0.0 }
 0x24e   : >> { %4846 = vadd.xlane.f32.xlu0 %v4845_v16  ;;  %v13775_v4 = vadd.f32 %v10962_v37, %v13327_v26 }
 0x24f   : >> { %v10777_v56 = vpop.f32.mrb[62].mxu0  ;;  %v13769_v25 = vadd.f32 %v10963_v22, %v13327_v26 }
 0x250   : >> { %v10964_v18 = vadd.f32 %v10777_v56, %v18230_v60  ;;  %v4079_v40 = vpop.f32.mrb[63].mxu0  ;;  %18231 = vst [vmem:[#allocation25_spill] sm:$0xff] %v13775_v4  ;;  %v4854_v46 = vsel %vm1004_vm2, %v13775_v4, 0.0 }
 0x251   : >> { %18229 = vst [vmem:[#allocation24_spill] sm:$0xff] %v13769_v25  ;;  %v10965_v57 = vadd.f32 %v4079_v40, %v18232_v2  ;;  %4849 = vadd.xlane.f32.xlu1 %v4848_v55  ;;  %v4851_v36 = vsel %vm1004_vm2, %v13769_v25, 0.0 }
 0x252   : >> { %4852 = vadd.xlane.f32.xlu0 %v4851_v36  ;;  %v10580_v32 = vpop.f32.mrb[64].mxu1  ;;  %v13786_v37 = vadd.f32 %v10964_v18, %v13327_v26 }
 0x253   : >> { %v10780_v16 = vpop.f32.mrb[64].mxu0  ;;  %v2864_v22 = vpop.f32.mrb[65].mxu1  ;;  %v13781_v42 = vadd.f32 %v10965_v57, %v13327_v26 }
 0x254   : >> { %v10966_v56 = vadd.f32 %v10780_v16, %v10580_v32  ;;  %v4089_v60 = vpop.f32.mrb[65].mxu0  ;;  %18234 = vst [vmem:[#allocation46_spill] sm:$0xff] %v13786_v37  ;;  %v4860_v4 = vsel %vm1004_vm2, %v13786_v37, 0.0 }
 0x255   : >> { %18233 = vst [vmem:[#allocation26_spill] sm:$0xff] %v13781_v42  ;;  %v10967_v2 = vadd.f32 %v4089_v60, %v2864_v22  ;;  %4855 = vadd.xlane.f32.xlu1 %v4854_v46  ;;  %v4857_v55 = vsel %vm1004_vm2, %v13781_v42, 0.0 }
 0x256   : >> { %4858 = vadd.xlane.f32.xlu0 %v4857_v55  ;;  %v10583_v40 = vpop.f32.mrb[66].mxu1  ;;  %v13796_v18 = vadd.f32 %v10966_v56, %v13327_v26 }
 0x257   : >> { %v10783_v36 = vpop.f32.mrb[66].mxu0  ;;  %v2874_v25 = vpop.f32.mrb[67].mxu1  ;;  %v13791_v57 = vadd.f32 %v10967_v2, %v13327_v26 }
 0x258   : >> { %v10968_v32 = vadd.f32 %v10783_v36, %v10583_v40  ;;  %v4099_v16 = vpop.f32.mrb[67].mxu0  ;;  %18236 = vst [vmem:[#allocation48_spill] sm:$0xff] %v13796_v18  ;;  %v4866_v37 = vsel %vm1004_vm2, %v13796_v18, 0.0 }
 0x259   : >> { %18235 = vst [vmem:[#allocation47_spill] sm:$0xff] %v13791_v57  ;;  %v10969_v22 = vadd.f32 %v4099_v16, %v2874_v25  ;;  %4861 = vadd.xlane.f32.xlu1 %v4860_v4  ;;  %v4863_v46 = vsel %vm1004_vm2, %v13791_v57, 0.0 }
 0x25a   : >> { %4864 = vadd.xlane.f32.xlu0 %v4863_v46  ;;  %v10586_v60 = vpop.f32.mrb[68].mxu1  ;;  %v13806_v56 = vadd.f32 %v10968_v32, %v13327_v26 }
 0x25b   : >> { %v10786_v55 = vpop.f32.mrb[68].mxu0  ;;  %v2884_v42 = vpop.f32.mrb[69].mxu1  ;;  %v13801_v2 = vadd.f32 %v10969_v22, %v13327_v26 }
 0x25c   : >> { %v10970_v40 = vadd.f32 %v10786_v55, %v10586_v60  ;;  %v4109_v36 = vpop.f32.mrb[69].mxu0  ;;  %18238 = vst [vmem:[#allocation50_spill] sm:$0xff] %v13806_v56  ;;  %v4872_v18 = vsel %vm1004_vm2, %v13806_v56, 0.0 }
 0x25d   : >> { %18237 = vst [vmem:[#allocation49_spill] sm:$0xff] %v13801_v2  ;;  %v10971_v25 = vadd.f32 %v4109_v36, %v2884_v42  ;;  %4867 = vadd.xlane.f32.xlu1 %v4866_v37  ;;  %v4869_v4 = vsel %vm1004_vm2, %v13801_v2, 0.0 }
 0x25e   : >> { %4870 = vadd.xlane.f32.xlu0 %v4869_v4  ;;  %v10589_v16 = vpop.f32.mrb[70].mxu1  ;;  %v13816_v32 = vadd.f32 %v10970_v40, %v13327_v26 }
 0x25f   : >> { %v10789_v46 = vpop.f32.mrb[70].mxu0  ;;  %v2894_v57 = vpop.f32.mrb[71].mxu1  ;;  %v13811_v22 = vadd.f32 %v10971_v25, %v13327_v26 }
 0x260   : >> { %v10972_v60 = vadd.f32 %v10789_v46, %v10589_v16  ;;  %v4119_v55 = vpop.f32.mrb[71].mxu0  ;;  %18240 = vst [vmem:[#allocation52_spill] sm:$0xff] %v13816_v32  ;;  %v4878_v56 = vsel %vm1004_vm2, %v13816_v32, 0.0 }
 0x261   : >> { %18239 = vst [vmem:[#allocation51_spill] sm:$0xff] %v13811_v22  ;;  %v10973_v42 = vadd.f32 %v4119_v55, %v2894_v57  ;;  %4873 = vadd.xlane.f32.xlu1 %v4872_v18  ;;  %v4875_v37 = vsel %vm1004_vm2, %v13811_v22, 0.0 }
 0x262   : >> { %4876 = vadd.xlane.f32.xlu0 %v4875_v37  ;;  %v10592_v36 = vpop.f32.mrb[72].mxu1  ;;  %v13826_v40 = vadd.f32 %v10972_v60, %v13327_v26 }
 0x263   : >> { %v10792_v4 = vpop.f32.mrb[72].mxu0  ;;  %v2904_v2 = vpop.f32.mrb[73].mxu1  ;;  %v13821_v25 = vadd.f32 %v10973_v42, %v13327_v26 }
 0x264   : >> { %v10974_v16 = vadd.f32 %v10792_v4, %v10592_v36  ;;  %v4129_v46 = vpop.f32.mrb[73].mxu0  ;;  %18242 = vst [vmem:[#allocation54_spill] sm:$0xff] %v13826_v40  ;;  %v4884_v60 = vsel %vm1004_vm2, %v13826_v40, 0.0 }
 0x265   : >> { %18241 = vst [vmem:[#allocation53_spill] sm:$0xff] %v13821_v25  ;;  %v10975_v57 = vadd.f32 %v4129_v46, %v2904_v2  ;;  %4879 = vadd.xlane.f32.xlu1 %v4878_v56  ;;  %v4881_v18 = vsel %vm1004_vm2, %v13821_v25, 0.0 }
 0x266   : >> { %v4676_v55 = vpop.xlane.xlu0 %4675  ;;  %4882 = vadd.xlane.f32.xlu0 %v4881_v18  ;;  %v10595_v37 = vpop.f32.mrb[74].mxu1  ;;  %v13836_v2 = vadd.f32 %v10974_v16, %v13327_v26 }
 0x267   : >> { %v10795_v22 = vpop.f32.mrb[74].mxu0  ;;  %v2914_v27 = vpop.f32.mrb[75].mxu1  ;;  %v13831_v42 = vadd.f32 %v10975_v57, %v13327_v26  ;;  %v5057_v36 = vmul.f32 0.03125, %v4676_v55 }
 0x268   : >> { %v10976_v4 = vadd.f32 %v10795_v22, %v10595_v37  ;;  %v4139_v33 = vpop.f32.mrb[75].mxu0  ;;  %18244 = vst [vmem:[#allocation56_spill] sm:$0xff] %v13836_v2 }
 0x269   : >> { %18243 = vst [vmem:[#allocation55_spill] sm:$0xff] %v13831_v42  ;;  %v10977_v56 = vadd.f32 %v4139_v33, %v2914_v27  ;;  %4885 = vadd.xlane.f32.xlu1 %v4884_v60  ;;  %v4887_v46 = vsel %vm1004_vm2, %v13831_v42, 0.0  ;;  %v13844_v55 = vsub.f32 %v13338_v28, %v5057_v36  ;;  %v4890_v33 = vsel %vm1004_vm2, %v13836_v2, 0.0 }
 0x26a   : >> { %v4673_v18 = vpop.xlane.xlu0 %4672  ;;  %v4682_v25 = vpop.xlane.xlu1 %4681  ;;  %4888 = vadd.xlane.f32.xlu0 %v4887_v46  ;;  %v13849_v27 = vadd.f32 %v10976_v4, %v13327_v26 }
 0x26b   : >> { %v5056_v32 = vmul.f32 0.03125, %v4673_v18  ;;  %v10598_v57 = vpop.f32.mrb[76].mxu1  ;;  %v10798_v14 = vpop.f32.mrb[76].mxu0  ;;  %v13841_v22 = vadd.f32 %v10977_v56, %v13327_v26  ;;  %18246 = vst [vmem:[#allocation58_spill] sm:$0xff] %v13844_v55  ;;  %v5059_v42 = vmul.f32 0.03125, %v4682_v25 }
 0x26c   : >> { %v10978_v37 = vadd.f32 %v10798_v14, %v10598_v57  ;;  %v2924_v16 = vpop.f32.mrb[77].mxu1  ;;  %v4149_v40 = vpop.f32.mrb[77].mxu0  ;;  %18247 = vst [vmem:[#allocation59_spill] sm:$0xff] %v13849_v27 }
 0x26d   : >> { %18245 = vst [vmem:[#allocation57_spill] sm:$0xff] %v13841_v22  ;;  %v13852_v60 = vsub.f32 %v13349_v20, %v5056_v32  ;;  %v10979_v46 = vadd.f32 %v4149_v40, %v2924_v16  ;;  %4891 = vadd.xlane.f32.xlu1 %v4890_v33  ;;  %v4893_v56 = vsel %vm1004_vm2, %v13841_v22, 0.0  ;;  %v4896_v20 = vsel %vm1004_vm2, %v13849_v27, 0.0  ;;  %v18251_v22 = vld [vmem:[#allocation27_spill] sm:$0xff] }
 0x26e   : >> { %v4679_v18 = vpop.xlane.xlu1 %4678  ;;  %4894 = vadd.xlane.f32.xlu0 %v4893_v56  ;;  %v10601_v28 = vpop.f32.mrb[78].mxu1  ;;  %v5313_v32 = vmul.f32 %v13844_v55, %v13844_v55  ;;  %v13870_v27 = vsub.f32 %v18251_v22, %v5059_v42 }
 0x26f   : >> { %18248 = vst [vmem:[#allocation60_spill] sm:$0xff] %v13852_v60  ;;  %v5058_v14 = vmul.f32 0.03125, %v4679_v18  ;;  %v4685_v36 = vpop.xlane.xlu0 %4684  ;;  %v10801_v57 = vpop.f32.mrb[78].mxu0  ;;  %v5312_v2 = vmul.f32 %v13852_v60, %v13852_v60  ;;  %v13867_v56 = vadd.f32 %v10979_v46, %v13327_v26 }
 0x270   : >> { %v10980_v4 = vadd.f32 %v10801_v57, %v10601_v28  ;;  %v2934_v24 = vpop.f32.mrb[79].mxu1  ;;  %v4159_v0 = vpop.f32.mrb[79].mxu0  ;;  %18252 = vst [vmem:[#allocation27_spill] sm:$0xff] %v13870_v27 }
 0x271   : >> { %v13863_v40 = vsub.f32 %v13369_v38, %v5058_v14  ;;  %v10981_v16 = vadd.f32 %v4159_v0, %v2934_v24  ;;  %4897 = vadd.xlane.f32.xlu1 %v4896_v20  ;;  %v5440_v33 = vsel %vm1004_vm2, %v5312_v2, 0.0  ;;  %18250 = vst [vmem:[#allocation62_spill] sm:$0xff] %v13867_v56  ;;  %v5443_v0 = vsel %vm1004_vm2, %v5313_v32, 0.0 }
 0x272   : >> { %v4688_v25 = vpop.xlane.xlu1 %4687  ;;  %5441 = vadd.xlane.f32.xlu0 %v5440_v33  ;;  %v10604_v18 = vpop.f32.mrb[80].mxu1  ;;  %v13876_v24 = vadd.f32 %v10978_v37, %v13327_v26  ;;  %v5060_v2 = vmul.f32 0.03125, %v4685_v36  ;;  %v4899_v14 = vsel %vm1004_vm2, %v13867_v56, 0.0  ;;  %v5315_v36 = vmul.f32 %v13870_v27, %v13870_v27  ;;  %v13895_v56 = vld [vmem:[%s12031_s22] ss:$0 sm:$0xff] }
 0x273   : >> { %18249 = vst [vmem:[#allocation61_spill] sm:$0xff] %v13863_v40  ;;  %v4691_v28 = vpop.xlane.xlu0 %4690  ;;  %v10804_v57 = vpop.f32.mrb[80].mxu0  ;;  %v5314_v20 = vmul.f32 %v13863_v40, %v13863_v40 }
 0x274   : >> { %v13872_v60 = vadd.f32 %v10804_v57, %v10604_v18  ;;  %v2944_v55 = vpop.f32.mrb[81].mxu1  ;;  %v4169_v38 = vpop.f32.mrb[81].mxu0  ;;  %18253 = vst [vmem:[#allocation63_spill] sm:$0xff] %v13876_v24  ;;  %v5061_v57 = vmul.f32 0.03125, %v4688_v25  ;;  %v13898_v25 = vadd.f32 %v13895_v56, %v10981_v16  ;;  %v5062_v16 = vmul.f32 0.03125, %v4691_v28 }
 0x275   : >> { %v10983_v46 = vadd.f32 %v4169_v38, %v2944_v55  ;;  %5444 = vadd.xlane.f32.xlu1 %v5443_v0  ;;  %v4902_v55 = vsel %vm1004_vm2, %v13876_v24, 0.0  ;;  %v13889_v38 = vsub.f32 %v13378_v51, %v5060_v2 }
 0x276   : >> { %v4694_v42 = vpop.xlane.xlu1 %4693  ;;  %4900 = vadd.xlane.f32.xlu0 %v4899_v14  ;;  %v10607_v22 = vpop.f32.mrb[82].mxu1  ;;  %v5446_v14 = vsel %vm1004_vm2, %v5314_v20, 0.0  ;;  %18255 = vst [vmem:[#allocation65_spill] sm:$0xff] %v13898_v25  ;;  %v13903_v27 = vsub.f32 %v13387_v45, %v5061_v57  ;;  %v5449_v20 = vsel %vm1004_vm2, %v5315_v36, 0.0 }
 0x277   : >> { %v4697_v33 = vpop.xlane.xlu0 %4696  ;;  %v10807_v18 = vpop.f32.mrb[82].mxu0  ;;  %18254 = vst [vmem:[#allocation64_spill] sm:$0xff] %v13889_v38  ;;  %v5316_v45 = vmul.f32 %v13889_v38, %v13889_v38  ;;  %v5063_v15 = vmul.f32 0.03125, %v4694_v42  ;;  %v13934_v42 = vadd.f32 %v13895_v56, %v10983_v46  ;;  %v13948_v46 = vadd.f32 %v13895_v56, %v13872_v60 }
 0x278   : >> { %v13882_v32 = vadd.f32 %v10807_v18, %v10607_v22  ;;  %v2954_v26 = vpop.f32.mrb[83].mxu1  ;;  %v4179_v37 = vpop.f32.mrb[83].mxu0  ;;  %18256 = vst [vmem:[#allocation66_spill] sm:$0xff] %v13903_v27 }
 0x279   : >> { %v13891_v0 = vadd.f32 %v4179_v37, %v2954_v26  ;;  %4903 = vadd.xlane.f32.xlu1 %v4902_v55  ;;  %v13909_v37 = vadd.f32 %v13895_v56, %v10980_v4  ;;  %18259 = vst [vmem:[#allocation69_spill] sm:$0xff] %v13934_v42  ;;  %18261 = vst [vmem:[#allocation71_spill] sm:$0xff] %v13948_v46 }
 0x27a   : >> { %v4700_v22 = vpop.xlane.xlu1 %4699  ;;  %5447 = vadd.xlane.f32.xlu0 %v5446_v14  ;;  %v10610_v18 = vpop.f32.mrb[84].mxu1  ;;  %v4905_v14 = vsel %vm1004_vm2, %v13898_v25, 0.0  ;;  %v13928_v25 = vsub.f32 %v13398_v48, %v5062_v16 }
 0x27b   : >> { %v13900_v24 = vpop.xlane.xlu0 %4702  ;;  %v10810_v40 = vpop.f32.mrb[84].mxu0  ;;  %18257 = vst [vmem:[#allocation67_spill] sm:$0xff] %v13909_v37  ;;  %v5065_v6 = vmul.f32 0.03125, %v4700_v22  ;;  %v13974_v22 = vadd.f32 %v13895_v56, %v13891_v0  ;;  %v13988_v0 = vadd.f32 %v13895_v56, %v13882_v32 }
 0x27c   : >> { %v13905_v51 = vadd.f32 %v10810_v40, %v10610_v18  ;;  %v2964_v2 = vpop.f32.mrb[85].mxu1  ;;  %v4189_v26 = vpop.f32.mrb[85].mxu0  ;;  %18258 = vst [vmem:[#allocation68_spill] sm:$0xff] %v13928_v25 }
 0x27d   : >> { %v13911_v55 = vadd.f32 %v4189_v26, %v2964_v2  ;;  %5450 = vadd.xlane.f32.xlu1 %v5449_v20  ;;  %v4908_v26 = vsel %vm1004_vm2, %v13909_v37, 0.0  ;;  %v5317_v20 = vmul.f32 %v13903_v27, %v13903_v27  ;;  %v13941_v27 = vsub.f32 %v13407_v34, %v5063_v15  ;;  %18263 = vst [vmem:[#allocation73_spill] sm:$0xff] %v13974_v22 }
 0x27e   : >> { %v13917_v57 = vpop.xlane.xlu1 %4705  ;;  %4906 = vadd.xlane.f32.xlu0 %v4905_v14  ;;  %v10613_v40 = vpop.f32.mrb[86].mxu1  ;;  %v5452_v14 = vsel %vm1004_vm2, %v5316_v45, 0.0  ;;  %v5064_v45 = vmul.f32 0.03125, %v4697_v33  ;;  %v5318_v34 = vmul.f32 %v13928_v25, %v13928_v25  ;;  %18265 = vst [vmem:[#allocation75_spill] sm:$0xff] %v13988_v0 }
 0x27f   : >> { %v13919_v18 = vpop.xlane.xlu0 %4708  ;;  %v10813_v36 = vpop.f32.mrb[86].mxu0  ;;  %18260 = vst [vmem:[#allocation70_spill] sm:$0xff] %v13941_v27  ;;  %v5067_v32 = vmul.f32 0.03125, %v13917_v57  ;;  %v14016_v57 = vadd.f32 %v13895_v56, %v13911_v55  ;;  %v14030_v55 = vadd.f32 %v13895_v56, %v13905_v51 }
 0x280   : >> { %v13921_v4 = vadd.f32 %v10813_v36, %v10613_v40  ;;  %v2974_v28 = vpop.f32.mrb[87].mxu1  ;;  %v4199_v2 = vpop.f32.mrb[87].mxu0 }
 0x281   : >> { %v13930_v38 = vadd.f32 %v4199_v2, %v2974_v28  ;;  %4909 = vadd.xlane.f32.xlu1 %v4908_v26  ;;  %v5455_v2 = vsel %vm1004_vm2, %v5317_v20, 0.0  ;;  %18267 = vst [vmem:[#allocation77_spill] sm:$0xff] %v14016_v57  ;;  %18269 = vst [vmem:[#allocation79_spill] sm:$0xff] %v14030_v55 }
 0x282   : >> { %v13936_v40 = vpop.xlane.xlu1 %4711  ;;  %5453 = vadd.xlane.f32.xlu0 %v5452_v14  ;;  %v10616_v36 = vpop.f32.mrb[88].mxu1  ;;  %v4911_v14 = vsel %vm1004_vm2, %v13934_v42, 0.0  ;;  %v13967_v42 = vsub.f32 %v13418_v54, %v5064_v45 }
 0x283   : >> { %v13938_v50 = vpop.xlane.xlu0 %4714  ;;  %v10816_v37 = vpop.f32.mrb[88].mxu0  ;;  %v5069_v51 = vmul.f32 0.03125, %v13936_v40 }
 0x284   : >> { %v13943_v48 = vadd.f32 %v10816_v37, %v10616_v36  ;;  %v2984_v16 = vpop.f32.mrb[89].mxu1  ;;  %v4209_v28 = vpop.f32.mrb[89].mxu0  ;;  %18262 = vst [vmem:[#allocation72_spill] sm:$0xff] %v13967_v42 }
 0x285   : >> { %v13950_v26 = vadd.f32 %v4209_v28, %v2984_v16  ;;  %5456 = vadd.xlane.f32.xlu1 %v5455_v2  ;;  %v4914_v28 = vsel %vm1004_vm2, %v13948_v46, 0.0  ;;  %v5319_v2 = vmul.f32 %v13941_v27, %v13941_v27  ;;  %v13981_v27 = vsub.f32 %v13427_v8, %v5065_v6 }
 0x286   : >> { %v13956_v15 = vpop.xlane.xlu1 %4717  ;;  %4912 = vadd.xlane.f32.xlu0 %v4911_v14  ;;  %v10619_v37 = vpop.f32.mrb[90].mxu1  ;;  %v5458_v14 = vsel %vm1004_vm2, %v5318_v34, 0.0  ;;  %v5320_v8 = vmul.f32 %v13967_v42, %v13967_v42 }
 0x287   : >> { %v13958_v36 = vpop.xlane.xlu0 %4720  ;;  %v10819_v20 = vpop.f32.mrb[90].mxu0  ;;  %18264 = vst [vmem:[#allocation74_spill] sm:$0xff] %v13981_v27  ;;  %v5461_v34 = vsel %vm1004_vm2, %v5319_v2, 0.0 }
 0x288   : >> { %v13960_v60 = vadd.f32 %v10819_v20, %v10619_v37  ;;  %v2994_v33 = vpop.f32.mrb[91].mxu1  ;;  %v4219_v16 = vpop.f32.mrb[91].mxu0  ;;  %v5464_v42 = vsel %vm1004_vm2, %v5320_v8, 0.0 }
 0x289   : >> { %v13969_v25 = vadd.f32 %v4219_v16, %v2994_v33  ;;  %4915 = vadd.xlane.f32.xlu1 %v4914_v28  ;;  %v5066_v16 = vmul.f32 0.03125, %v13900_v24 }
 0x28a   : >> { %v13976_v37 = vpop.xlane.xlu1 %4723  ;;  %5459 = vadd.xlane.f32.xlu0 %v5458_v14  ;;  %v10622_v20 = vpop.f32.mrb[92].mxu1  ;;  %v4917_v14 = vsel %vm1004_vm2, %v13974_v22, 0.0 }
 0x28b   : >> { %v13978_v46 = vpop.xlane.xlu0 %4726  ;;  %v10822_v39 = vpop.f32.mrb[92].mxu0  ;;  %v14009_v22 = vsub.f32 %v13438_v1, %v5066_v16 }
 0x28c   : >> { %v13983_v54 = vadd.f32 %v10822_v39, %v10622_v20  ;;  %v3004_v45 = vpop.f32.mrb[93].mxu1  ;;  %v4229_v33 = vpop.f32.mrb[93].mxu0 }
 0x28d   : >> { %v13991_v28 = vadd.f32 %v4229_v33, %v3004_v45  ;;  %5462 = vadd.xlane.f32.xlu1 %v5461_v34  ;;  %v4920_v33 = vsel %vm1004_vm2, %v13988_v0, 0.0  ;;  %v5321_v34 = vmul.f32 %v13981_v27, %v13981_v27  ;;  %18266 = vst [vmem:[#allocation76_spill] sm:$0xff] %v14009_v22  ;;  %v14023_v27 = vsub.f32 %v13447_v10, %v5067_v32 }
 0x28e   : >> { %v13997_v39 = vpop.xlane.xlu1 %4729  ;;  %4918 = vadd.xlane.f32.xlu0 %v4917_v14  ;;  %v10625_v6 = vpop.f32.mrb[94].mxu1  ;;  %v5322_v10 = vmul.f32 %v14009_v22, %v14009_v22 }
 0x28f   : >> { %v13999_v2 = vpop.xlane.xlu0 %4732  ;;  %v10825_v20 = vpop.f32.mrb[94].mxu0  ;;  %18268 = vst [vmem:[#allocation78_spill] sm:$0xff] %v14023_v27  ;;  %v5467_v8 = vsel %vm1004_vm2, %v5321_v34, 0.0 }
 0x290   : >> { %v14002_v61 = vadd.f32 %v10825_v20, %v10625_v6  ;;  %v3014_v24 = vpop.f32.mrb[95].mxu1  ;;  %v4239_v45 = vpop.f32.mrb[95].mxu0  ;;  %v5470_v40 = vsel %vm1004_vm2, %v5322_v10, 0.0 }
 0x291   : >> { %v14011_v14 = vadd.f32 %v4239_v45, %v3014_v24  ;;  %4921 = vadd.xlane.f32.xlu1 %v4920_v33  ;;  %v5068_v45 = vmul.f32 0.03125, %v13919_v18  ;;  %v4923_v33 = vsel %vm1004_vm2, %v14016_v57, 0.0 }
 0x292   : >> { %v14018_v6 = vpop.xlane.xlu1 %4735  ;;  %5465 = vadd.xlane.f32.xlu0 %v5464_v42  ;;  %v10628_v20 = vpop.f32.mrb[96].mxu1 }
 0x293   : >> { %v14020_v0 = vpop.xlane.xlu0 %4738  ;;  %v10828_v30 = vpop.f32.mrb[96].mxu0  ;;  %v14051_v57 = vsub.f32 %v13458_v7, %v5068_v45  ;;  %v14066_v7 = vadd.f32 %v13895_v56, %v13921_v4  ;;  %v14069_v45 = vsub.f32 %v13467_v53, %v5069_v51 }
 0x294   : >> { %v14025_v1 = vadd.f32 %v10828_v30, %v10628_v20  ;;  %v3024_v16 = vpop.f32.mrb[97].mxu1  ;;  %v4249_v24 = vpop.f32.mrb[97].mxu0 }
 0x295   : >> { %v14033_v42 = vadd.f32 %v4249_v24, %v3024_v16  ;;  %5468 = vadd.xlane.f32.xlu1 %v5467_v8  ;;  %v4926_v24 = vsel %vm1004_vm2, %v14030_v55, 0.0  ;;  %v5323_v8 = vmul.f32 %v14023_v27, %v14023_v27  ;;  %18270 = vst [vmem:[#allocation80_spill] sm:$0xff] %v14051_v57  ;;  %18272 = vst [vmem:[#allocation82_spill] sm:$0xff] %v14066_v7 }
 0x296   : >> { %v14039_v30 = vpop.xlane.xlu1 %4741  ;;  %4924 = vadd.xlane.f32.xlu0 %v4923_v33  ;;  %v10631_v32 = vpop.f32.mrb[98].mxu1  ;;  %v14055_v33 = vadd.f32 %v13895_v56, %v13930_v38  ;;  %18273 = vst [vmem:[#allocation83_spill] sm:$0xff] %v14069_v45  ;;  %v5324_v4 = vmul.f32 %v14051_v57, %v14051_v57 }
 0x297   : >> { %v14041_v34 = vpop.xlane.xlu0 %4744  ;;  %v10831_v20 = vpop.f32.mrb[98].mxu0  ;;  %v5473_v10 = vsel %vm1004_vm2, %v5323_v8, 0.0  ;;  %v5071_v8 = vmul.f32 0.03125, %v13956_v15 }
 0x298   : >> { %v14044_v52 = vadd.f32 %v10831_v20, %v10631_v32  ;;  %v3034_v18 = vpop.f32.mrb[99].mxu1  ;;  %v4259_v16 = vpop.f32.mrb[99].mxu0  ;;  %18271 = vst [vmem:[#allocation81_spill] sm:$0xff] %v14055_v33  ;;  %v4929_v27 = vsel %vm1004_vm2, %v14055_v33, 0.0  ;;  %v5476_v15 = vsel %vm1004_vm2, %v5324_v4, 0.0 }
 0x299   : >> { %v14057_v22 = vadd.f32 %v4259_v16, %v3034_v18  ;;  %4927 = vadd.xlane.f32.xlu1 %v4926_v24  ;;  %v5070_v24 = vmul.f32 0.03125, %v13938_v50 }
 0x29a   : >> { %v14060_v32 = vpop.xlane.xlu1 %4747  ;;  %5471 = vadd.xlane.f32.xlu0 %v5470_v40  ;;  %v10634_v20 = vpop.f32.mrb[100].mxu1 }
 0x29b   : >> { %v14062_v55 = vpop.xlane.xlu0 %4750  ;;  %v10834_v21 = vpop.f32.mrb[100].mxu0  ;;  %v14093_v33 = vsub.f32 %v13478_v13, %v5070_v24  ;;  %v14108_v13 = vadd.f32 %v13895_v56, %v13943_v48  ;;  %v14111_v24 = vsub.f32 %v13487_v59, %v5071_v8 }
 0x29c   : >> { %v14071_v38 = vadd.f32 %v10834_v21, %v10634_v20  ;;  %v3044_v18 = vpop.f32.mrb[101].mxu1  ;;  %v4269_v16 = vpop.f32.mrb[101].mxu0 }
 0x29d   : >> { %v14075_v40 = vadd.f32 %v4269_v16, %v3044_v18  ;;  %5474 = vadd.xlane.f32.xlu1 %v5473_v10  ;;  %v4932_v16 = vsel %vm1004_vm2, %v14066_v7, 0.0  ;;  %v5325_v10 = vmul.f32 %v14069_v45, %v14069_v45  ;;  %18274 = vst [vmem:[#allocation84_spill] sm:$0xff] %v14093_v33  ;;  %18276 = vst [vmem:[#allocation86_spill] sm:$0xff] %v14108_v13 }
 0x29e   : >> { %v14081_v43 = vpop.xlane.xlu1 %4753  ;;  %4930 = vadd.xlane.f32.xlu0 %v4929_v27  ;;  %v10637_v53 = vpop.f32.mrb[102].mxu1  ;;  %v14097_v27 = vadd.f32 %v13895_v56, %v13950_v26  ;;  %18277 = vst [vmem:[#allocation87_spill] sm:$0xff] %v14111_v24  ;;  %v5326_v48 = vmul.f32 %v14093_v33, %v14093_v33 }
 0x29f   : >> { %v14083_v21 = vpop.xlane.xlu0 %4756  ;;  %v10837_v51 = vpop.f32.mrb[102].mxu0  ;;  %v5479_v4 = vsel %vm1004_vm2, %v5325_v10, 0.0  ;;  %v5073_v10 = vmul.f32 0.03125, %v13976_v37 }
 0x2a0   : >> { %v14086_v20 = vadd.f32 %v10837_v51, %v10637_v53  ;;  %v3054_v50 = vpop.f32.mrb[103].mxu1  ;;  %v4279_v18 = vpop.f32.mrb[103].mxu0  ;;  %18275 = vst [vmem:[#allocation85_spill] sm:$0xff] %v14097_v27  ;;  %v4935_v45 = vsel %vm1004_vm2, %v14097_v27, 0.0  ;;  %v5482_v37 = vsel %vm1004_vm2, %v5326_v48, 0.0 }
 0x2a1   : >> { %v14099_v57 = vadd.f32 %v4279_v18, %v3054_v50  ;;  %4933 = vadd.xlane.f32.xlu1 %v4932_v16  ;;  %v5072_v16 = vmul.f32 0.03125, %v13958_v36 }
 0x2a2   : >> { %v14102_v53 = vpop.xlane.xlu1 %4759  ;;  %5477 = vadd.xlane.f32.xlu0 %v5476_v15  ;;  %v10640_v51 = vpop.f32.mrb[104].mxu1 }
 0x2a3   : >> { %v14104_v7 = vpop.xlane.xlu0 %4762  ;;  %v10840_v12 = vpop.f32.mrb[104].mxu0  ;;  %v14135_v27 = vsub.f32 %v13498_v19, %v5072_v16  ;;  %v14150_v19 = vadd.f32 %v13895_v56, %v13960_v60  ;;  %v14153_v16 = vsub.f32 %v13507_v9, %v5073_v10 }
 0x2a4   : >> { %v14113_v26 = vadd.f32 %v10840_v12, %v10640_v51  ;;  %v3064_v50 = vpop.f32.mrb[105].mxu1  ;;  %v4289_v18 = vpop.f32.mrb[105].mxu0 }
 0x2a5   : >> { %v14117_v15 = vadd.f32 %v4289_v18, %v3064_v50  ;;  %5480 = vadd.xlane.f32.xlu1 %v5479_v4  ;;  %v4938_v18 = vsel %vm1004_vm2, %v14108_v13, 0.0  ;;  %v5327_v4 = vmul.f32 %v14111_v24, %v14111_v24  ;;  %18279 = vst [vmem:[#allocation89_spill] sm:$0xff] %v14135_v27  ;;  %18282 = vst [vmem:[#allocation92_spill] sm:$0xff] %v14150_v19 }
 0x2a6   : >> { %v14123_v63 = vpop.xlane.xlu1 %4765  ;;  %4936 = vadd.xlane.f32.xlu0 %v4935_v45  ;;  %v10643_v59 = vpop.f32.mrb[106].mxu1  ;;  %v14139_v45 = vadd.f32 %v13895_v56, %v13969_v25  ;;  %18283 = vst [vmem:[#allocation93_spill] sm:$0xff] %v14153_v16  ;;  %v5328_v60 = vmul.f32 %v14135_v27, %v14135_v27 }
 0x2a7   : >> { %v14125_v12 = vpop.xlane.xlu0 %4768  ;;  %v10843_v8 = vpop.f32.mrb[106].mxu0  ;;  %v5485_v48 = vsel %vm1004_vm2, %v5327_v4, 0.0  ;;  %v5075_v4 = vmul.f32 0.03125, %v13997_v39 }
 0x2a8   : >> { %v14128_v51 = vadd.f32 %v10843_v8, %v10643_v59  ;;  %v3074_v36 = vpop.f32.mrb[107].mxu1  ;;  %v4299_v50 = vpop.f32.mrb[107].mxu0  ;;  %18280 = vst [vmem:[#allocation90_spill] sm:$0xff] %v14139_v45  ;;  %v4941_v24 = vsel %vm1004_vm2, %v14139_v45, 0.0  ;;  %v5488_v39 = vsel %vm1004_vm2, %v5328_v60, 0.0 }
 0x2a9   : >> { %v14141_v33 = vadd.f32 %v4299_v50, %v3074_v36  ;;  %4939 = vadd.xlane.f32.xlu1 %v4938_v18  ;;  %v5074_v18 = vmul.f32 0.03125, %v13978_v46 }
 0x2aa   : >> { %18278 = vst [vmem:[#allocation88_spill] sm:$0xff] %v14128_v51  ;;  %v14144_v59 = vpop.xlane.xlu1 %4771  ;;  %5483 = vadd.xlane.f32.xlu0 %v5482_v37  ;;  %v10646_v8 = vpop.f32.mrb[108].mxu1 }
 0x2ab   : >> { %18281 = vst [vmem:[#allocation91_spill] sm:$0xff] %v14141_v33  ;;  %v14146_v13 = vpop.xlane.xlu0 %4774  ;;  %v10846_v51 = vpop.f32.mrb[108].mxu0  ;;  %v14177_v45 = vsub.f32 %v13516_v5, %v5074_v18  ;;  %v14192_v5 = vadd.f32 %v13895_v56, %v13983_v54  ;;  %v14195_v18 = vsub.f32 %v13523_v44, %v5075_v4 }
 0x2ac   : >> { %v14155_v25 = vadd.f32 %v10846_v51, %v10646_v8  ;;  %v3084_v36 = vpop.f32.mrb[109].mxu1  ;;  %v4309_v50 = vpop.f32.mrb[109].mxu0 }
 0x2ad   : >> { %v14159_v37 = vadd.f32 %v4309_v50, %v3084_v36  ;;  %5486 = vadd.xlane.f32.xlu1 %v5485_v48  ;;  %v4944_v50 = vsel %vm1004_vm2, %v14150_v19, 0.0  ;;  %v5329_v48 = vmul.f32 %v14153_v16, %v14153_v16  ;;  %18285 = vst [vmem:[#allocation95_spill] sm:$0xff] %v14177_v45  ;;  %18288 = vst [vmem:[#allocation98_spill] sm:$0xff] %v14192_v5 }
 0x2ae   : >> { %v14165_v33 = vpop.xlane.xlu1 %4777  ;;  %4942 = vadd.xlane.f32.xlu0 %v4941_v24  ;;  %v10649_v9 = vpop.f32.mrb[110].mxu1  ;;  %v14181_v24 = vadd.f32 %v13895_v56, %v13991_v28  ;;  %18289 = vst [vmem:[#allocation99_spill] sm:$0xff] %v14195_v18  ;;  %v5330_v54 = vmul.f32 %v14177_v45, %v14177_v45 }
 0x2af   : >> { %v14167_v10 = vpop.xlane.xlu0 %4780  ;;  %v10849_v51 = vpop.f32.mrb[110].mxu0  ;;  %v5491_v60 = vsel %vm1004_vm2, %v5329_v48, 0.0  ;;  %v5077_v48 = vmul.f32 0.03125, %v14018_v6 }
 0x2b0   : >> { %v14170_v8 = vadd.f32 %v10849_v51, %v10649_v9  ;;  %v3094_v46 = vpop.f32.mrb[111].mxu1  ;;  %v4319_v36 = vpop.f32.mrb[111].mxu0  ;;  %18286 = vst [vmem:[#allocation96_spill] sm:$0xff] %v14181_v24  ;;  %v4947_v16 = vsel %vm1004_vm2, %v14181_v24, 0.0  ;;  %v5494_v6 = vsel %vm1004_vm2, %v5330_v54, 0.0 }
 0x2b1   : >> { %v14183_v27 = vadd.f32 %v4319_v36, %v3094_v46  ;;  %4945 = vadd.xlane.f32.xlu1 %v4944_v50  ;;  %v5076_v50 = vmul.f32 0.03125, %v13999_v2 }
 0x2b2   : >> { %18284 = vst [vmem:[#allocation94_spill] sm:$0xff] %v14170_v8  ;;  %v14186_v9 = vpop.xlane.xlu1 %4783  ;;  %5489 = vadd.xlane.f32.xlu0 %v5488_v39  ;;  %v10652_v51 = vpop.f32.mrb[112].mxu1 }
 0x2b3   : >> { %18287 = vst [vmem:[#allocation97_spill] sm:$0xff] %v14183_v27  ;;  %v14188_v19 = vpop.xlane.xlu0 %4786  ;;  %v10852_v8 = vpop.f32.mrb[112].mxu0  ;;  %v14219_v24 = vsub.f32 %v13529_v17, %v5076_v50  ;;  %v14234_v17 = vadd.f32 %v13895_v56, %v14002_v61  ;;  %v14237_v50 = vsub.f32 %v13535_v31, %v5077_v48 }
 0x2b4   : >> { %v14197_v28 = vadd.f32 %v10852_v8, %v10652_v51  ;;  %v3104_v46 = vpop.f32.mrb[113].mxu1  ;;  %v4329_v36 = vpop.f32.mrb[113].mxu0 }
 0x2b5   : >> { %v14201_v39 = vadd.f32 %v4329_v36, %v3104_v46  ;;  %5492 = vadd.xlane.f32.xlu1 %v5491_v60  ;;  %v4950_v36 = vsel %vm1004_vm2, %v14192_v5, 0.0  ;;  %v5331_v60 = vmul.f32 %v14195_v18, %v14195_v18  ;;  %18291 = vst [vmem:[#allocation101_spill] sm:$0xff] %v14219_v24  ;;  %18294 = vst [vmem:[#allocation104_spill] sm:$0xff] %v14234_v17 }
 0x2b6   : >> { %v14207_v27 = vpop.xlane.xlu1 %4789  ;;  %4948 = vadd.xlane.f32.xlu0 %v4947_v16  ;;  %v10655_v44 = vpop.f32.mrb[114].mxu1  ;;  %v14223_v16 = vadd.f32 %v13895_v56, %v14011_v14  ;;  %18295 = vst [vmem:[#allocation105_spill] sm:$0xff] %v14237_v50  ;;  %v5332_v61 = vmul.f32 %v14219_v24, %v14219_v24 }
 0x2b7   : >> { %v14209_v4 = vpop.xlane.xlu0 %4792  ;;  %v10855_v8 = vpop.f32.mrb[114].mxu0  ;;  %v5497_v54 = vsel %vm1004_vm2, %v5331_v60, 0.0  ;;  %v5079_v60 = vmul.f32 0.03125, %v14039_v30 }
 0x2b8   : >> { %v14212_v51 = vadd.f32 %v10855_v8, %v10655_v44  ;;  %v3114_v2 = vpop.f32.mrb[115].mxu1  ;;  %v4339_v46 = vpop.f32.mrb[115].mxu0  ;;  %18292 = vst [vmem:[#allocation102_spill] sm:$0xff] %v14223_v16  ;;  %v4953_v18 = vsel %vm1004_vm2, %v14223_v16, 0.0  ;;  %v5500_v30 = vsel %vm1004_vm2, %v5332_v61, 0.0 }
 0x2b9   : >> { %v14225_v45 = vadd.f32 %v4339_v46, %v3114_v2  ;;  %4951 = vadd.xlane.f32.xlu1 %v4950_v36  ;;  %v5078_v36 = vmul.f32 0.03125, %v14020_v0 }
 0x2ba   : >> { %18290 = vst [vmem:[#allocation100_spill] sm:$0xff] %v14212_v51  ;;  %v14228_v44 = vpop.xlane.xlu1 %4795  ;;  %5495 = vadd.xlane.f32.xlu0 %v5494_v6  ;;  %v10658_v8 = vpop.f32.mrb[116].mxu1 }
 0x2bb   : >> { %18293 = vst [vmem:[#allocation103_spill] sm:$0xff] %v14225_v45  ;;  %v14230_v5 = vpop.xlane.xlu0 %4798  ;;  %v10858_v51 = vpop.f32.mrb[116].mxu0  ;;  %v14261_v16 = vsub.f32 %v13541_v62, %v5078_v36  ;;  %v14276_v62 = vadd.f32 %v13895_v56, %v14025_v1  ;;  %v14279_v36 = vsub.f32 %v13547_v29, %v5079_v60 }
 0x2bc   : >> { %v14239_v14 = vadd.f32 %v10858_v51, %v10658_v8  ;;  %v3124_v2 = vpop.f32.mrb[117].mxu1  ;;  %v4349_v46 = vpop.f32.mrb[117].mxu0 }
 0x2bd   : >> { %v14243_v6 = vadd.f32 %v4349_v46, %v3124_v2  ;;  %5498 = vadd.xlane.f32.xlu1 %v5497_v54  ;;  %v4956_v46 = vsel %vm1004_vm2, %v14234_v17, 0.0  ;;  %v5333_v54 = vmul.f32 %v14237_v50, %v14237_v50  ;;  %18297 = vst [vmem:[#allocation107_spill] sm:$0xff] %v14261_v16  ;;  %18300 = vst [vmem:[#allocation110_spill] sm:$0xff] %v14276_v62 }
 0x2be   : >> { %v14249_v45 = vpop.xlane.xlu1 %4801  ;;  %4954 = vadd.xlane.f32.xlu0 %v4953_v18  ;;  %v10661_v31 = vpop.f32.mrb[118].mxu1  ;;  %v14265_v18 = vadd.f32 %v13895_v56, %v14033_v42  ;;  %18301 = vst [vmem:[#allocation111_spill] sm:$0xff] %v14279_v36  ;;  %v5334_v1 = vmul.f32 %v14261_v16, %v14261_v16 }
 0x2bf   : >> { %v14251_v48 = vpop.xlane.xlu0 %4804  ;;  %v10861_v51 = vpop.f32.mrb[118].mxu0  ;;  %v5503_v61 = vsel %vm1004_vm2, %v5333_v54, 0.0  ;;  %v5081_v54 = vmul.f32 0.03125, %v14060_v32 }
 0x2c0   : >> { %v14254_v8 = vadd.f32 %v10861_v51, %v10661_v31  ;;  %v3134_v0 = vpop.f32.mrb[119].mxu1  ;;  %v4359_v2 = vpop.f32.mrb[119].mxu0  ;;  %18298 = vst [vmem:[#allocation108_spill] sm:$0xff] %v14265_v18  ;;  %v4959_v50 = vsel %vm1004_vm2, %v14265_v18, 0.0  ;;  %v5506_v32 = vsel %vm1004_vm2, %v5334_v1, 0.0 }
 0x2c1   : >> { %v14267_v24 = vadd.f32 %v4359_v2, %v3134_v0  ;;  %4957 = vadd.xlane.f32.xlu1 %v4956_v46  ;;  %v5080_v46 = vmul.f32 0.03125, %v14041_v34 }
 0x2c2   : >> { %18296 = vst [vmem:[#allocation106_spill] sm:$0xff] %v14254_v8  ;;  %v14270_v31 = vpop.xlane.xlu1 %4807  ;;  %5501 = vadd.xlane.f32.xlu0 %v5500_v30  ;;  %v10664_v51 = vpop.f32.mrb[120].mxu1 }
 0x2c3   : >> { %18299 = vst [vmem:[#allocation109_spill] sm:$0xff] %v14267_v24  ;;  %v14272_v17 = vpop.xlane.xlu0 %4810  ;;  %v10864_v8 = vpop.f32.mrb[120].mxu0  ;;  %v14303_v18 = vsub.f32 %v13553_v47, %v5080_v46  ;;  %v14318_v47 = vadd.f32 %v13895_v56, %v14044_v52  ;;  %v14321_v46 = vsub.f32 %v13559_v41, %v5081_v54 }
 0x2c4   : >> { %v14281_v42 = vadd.f32 %v10864_v8, %v10664_v51  ;;  %v3144_v0 = vpop.f32.mrb[121].mxu1  ;;  %v4369_v2 = vpop.f32.mrb[121].mxu0 }
 0x2c5   : >> { %v14285_v30 = vadd.f32 %v4369_v2, %v3144_v0  ;;  %5504 = vadd.xlane.f32.xlu1 %v5503_v61  ;;  %v4962_v2 = vsel %vm1004_vm2, %v14276_v62, 0.0  ;;  %v5335_v61 = vmul.f32 %v14279_v36, %v14279_v36  ;;  %18303 = vst [vmem:[#allocation113_spill] sm:$0xff] %v14303_v18  ;;  %18306 = vst [vmem:[#allocation116_spill] sm:$0xff] %v14318_v47 }
 0x2c6   : >> { %v14291_v24 = vpop.xlane.xlu1 %4813  ;;  %4960 = vadd.xlane.f32.xlu0 %v4959_v50  ;;  %v10667_v29 = vpop.f32.mrb[122].mxu1  ;;  %v14307_v50 = vadd.f32 %v13895_v56, %v14057_v22  ;;  %18307 = vst [vmem:[#allocation117_spill] sm:$0xff] %v14321_v46  ;;  %v5336_v52 = vmul.f32 %v14303_v18, %v14303_v18 }
 0x2c7   : >> { %v14293_v60 = vpop.xlane.xlu0 %4816  ;;  %v10867_v8 = vpop.f32.mrb[122].mxu0  ;;  %v5509_v1 = vsel %vm1004_vm2, %v5335_v61, 0.0  ;;  %v5083_v61 = vmul.f32 0.03125, %v14081_v43 }
 0x2c8   : >> { %v14296_v51 = vadd.f32 %v10867_v8, %v10667_v29  ;;  %v3154_v34 = vpop.f32.mrb[123].mxu1  ;;  %v4379_v0 = vpop.f32.mrb[123].mxu0  ;;  %18304 = vst [vmem:[#allocation114_spill] sm:$0xff] %v14307_v50  ;;  %v4965_v36 = vsel %vm1004_vm2, %v14307_v50, 0.0  ;;  %v5512_v43 = vsel %vm1004_vm2, %v5336_v52, 0.0 }
 0x2c9   : >> { %v14309_v16 = vadd.f32 %v4379_v0, %v3154_v34  ;;  %4963 = vadd.xlane.f32.xlu1 %v4962_v2  ;;  %v5082_v2 = vmul.f32 0.03125, %v14062_v55 }
 0x2ca   : >> { %18302 = vst [vmem:[#allocation112_spill] sm:$0xff] %v14296_v51  ;;  %v14312_v29 = vpop.xlane.xlu1 %4819  ;;  %5507 = vadd.xlane.f32.xlu0 %v5506_v32  ;;  %v10670_v8 = vpop.f32.mrb[124].mxu1 }
 0x2cb   : >> { %18305 = vst [vmem:[#allocation115_spill] sm:$0xff] %v14309_v16  ;;  %v14314_v62 = vpop.xlane.xlu0 %4822  ;;  %v10870_v51 = vpop.f32.mrb[124].mxu0  ;;  %v14345_v50 = vsub.f32 %v13565_v35, %v5082_v2  ;;  %v14363_v35 = vsub.f32 %v13571_v49, %v5083_v61  ;;  %v5084_v2 = vmul.f32 0.03125, %v14083_v21 }
 0x2cc   : >> { %v14323_v22 = vadd.f32 %v10870_v51, %v10670_v8  ;;  %v3164_v34 = vpop.f32.mrb[125].mxu1  ;;  %v4389_v0 = vpop.f32.mrb[125].mxu0 }
 0x2cd   : >> { %v14327_v32 = vadd.f32 %v4389_v0, %v3164_v34  ;;  %5510 = vadd.xlane.f32.xlu1 %v5509_v1  ;;  %v4968_v0 = vsel %vm1004_vm2, %v14318_v47, 0.0  ;;  %v5337_v1 = vmul.f32 %v14321_v46, %v14321_v46  ;;  %18308 = vst [vmem:[#allocation118_spill] sm:$0xff] %v14345_v50  ;;  %v14360_v47 = vadd.f32 %v13895_v56, %v14071_v38 }
 0x2ce   : >> { %v14333_v16 = vpop.xlane.xlu1 %4825  ;;  %4966 = vadd.xlane.f32.xlu0 %v4965_v36  ;;  %v10673_v41 = vpop.f32.mrb[126].mxu1  ;;  %v14349_v36 = vadd.f32 %v13895_v56, %v14075_v40  ;;  %18311 = vst [vmem:[#allocation121_spill] sm:$0xff] %v14363_v35  ;;  %v5085_v38 = vmul.f32 0.03125, %v14102_v53  ;;  %v5339_v21 = vmul.f32 %v14363_v35, %v14363_v35  ;;  %v14381_v61 = vsub.f32 %v13577_v23, %v5084_v2 }
 0x2cf   : >> { %v14335_v54 = vpop.xlane.xlu0 %4828  ;;  %v10873_v51 = vpop.f32.mrb[126].mxu0  ;;  %18310 = vst [vmem:[#allocation120_spill] sm:$0xff] %v14360_v47  ;;  %v5515_v40 = vsel %vm1004_vm2, %v5337_v1, 0.0  ;;  %v4974_v49 = vsel %vm1004_vm2, %v14360_v47, 0.0  ;;  %v14385_v1 = vadd.f32 %v13895_v56, %v14099_v57  ;;  %v5087_v53 = vmul.f32 0.03125, %v14123_v63 }
 0x2d0   : >> { %v14338_v8 = vadd.f32 %v10873_v51, %v10673_v41  ;;  %v3174_v55 = vpop.f32.mrb[127].mxu1  ;;  %v4399_v34 = vpop.f32.mrb[127].mxu0  ;;  %18309 = vst [vmem:[#allocation119_spill] sm:$0xff] %v14349_v36  ;;  %v4971_v52 = vsel %vm1004_vm2, %v14349_v36, 0.0  ;;  %18312 = vst [vmem:[#allocation122_spill] sm:$0xff] %v14381_v61  ;;  %v14396_v23 = vadd.f32 %v13895_v56, %v14086_v20  ;;  %v14399_v2 = vsub.f32 %v13583_v58, %v5085_v38  ;;  %v18348_v36 = vld [vmem:[#allocation36_spill] sm:$0xff] }
 0x2d1   : >> { %v14351_v18 = vadd.f32 %v4399_v34, %v3174_v55  ;;  %4969 = vadd.xlane.f32.xlu1 %v4968_v0  ;;  %v5338_v55 = vmul.f32 %v14345_v50, %v14345_v50  ;;  %18313 = vst [vmem:[#allocation123_spill] sm:$0xff] %v14385_v1  ;;  %v5521_v57 = vsel %vm1004_vm2, %v5339_v21, 0.0  ;;  %v5340_v63 = vmul.f32 %v14381_v61, %v14381_v61 }
 0x2d2   : >> { %v14354_v41 = vpop.xlane.xlu1 %4831  ;;  %5513 = vadd.xlane.f32.xlu0 %v5512_v43  ;;  %18314 = vst [vmem:[#allocation124_spill] sm:$0xff] %v14396_v23  ;;  %18315 = vst [vmem:[#allocation125_spill] sm:$0xff] %v14399_v2  ;;  %v14413_v58 = vsub.f32 %v13595_v3, %v5087_v53  ;;  %v5089_v38 = vmul.f32 0.03125, %v14144_v59  ;;  %v4980_v21 = vsel %vm1004_vm2, %v14396_v23, 0.0  ;;  %v18320_v3 = vld [vmem:[#allocation28_spill] sm:$0xff]  ;;  %v5091_v23 = vmul.f32 0.03125, %v14165_v33 }
 0x2d3   : >> { %v14356_v51 = vpop.xlane.xlu0 %4834  ;;  %v5518_v43 = vsel %vm1004_vm2, %v5338_v55, 0.0  ;;  %v5088_v55 = vmul.f32 0.03125, %v14125_v12  ;;  %v14419_v12 = vadd.f32 %v13895_v56, %v14113_v26  ;;  %v5524_v26 = vsel %vm1004_vm2, %v5340_v63, 0.0  ;;  %v18326_v33 = vld [vmem:[#allocation29_spill] sm:$0xff] }
 0x2d4   : >> { %18317 = vst [vmem:[#allocation127_spill] sm:$0xff] %v14413_v58  ;;  %v5343_v63 = vmul.f32 %v14413_v58, %v14413_v58 }
 0x2d5   : >> { %5516 = vadd.xlane.f32.xlu1 %v5515_v40  ;;  %v5086_v40 = vmul.f32 0.03125, %v14104_v7  ;;  %v4977_v7 = vsel %vm1004_vm2, %v14385_v1, 0.0  ;;  %18318 = vst [vmem:[#allocation128_spill] sm:$0xff] %v14419_v12  ;;  %v14431_v53 = vsub.f32 %v18320_v3, %v5088_v55  ;;  %v5093_v55 = vmul.f32 0.03125, %v14186_v9 }
 0x2d6   : >> { %v14371_v34 = vpop.xlane.xlu1 %4837  ;;  %4972 = vadd.xlane.f32.xlu0 %v4971_v52 }
 0x2d7   : >> { %v14373_v0 = vpop.xlane.xlu0 %4840  ;;  %18321 = vst [vmem:[#allocation28_spill] sm:$0xff] %v14431_v53  ;;  %v5344_v58 = vmul.f32 %v14431_v53, %v14431_v53 }
 0x2d9   : >> { %4975 = vadd.xlane.f32.xlu1 %v4974_v49  ;;  %v14408_v49 = vsub.f32 %v13589_v11, %v5086_v40  ;;  %v5341_v11 = vmul.f32 %v14399_v2, %v14399_v2  ;;  %v14428_v40 = vadd.f32 %v13895_v56, %v14117_v15  ;;  %v5092_v2 = vmul.f32 0.03125, %v14167_v10 }
 0x2da   : >> { %v14389_v52 = vpop.xlane.xlu1 %4843  ;;  %5519 = vadd.xlane.f32.xlu0 %v5518_v43 }
 0x2db   : >> { %v14392_v47 = vpop.xlane.xlu0 %4846  ;;  %18316 = vst [vmem:[#allocation126_spill] sm:$0xff] %v14408_v49  ;;  %18319 = vst [vmem:[#allocation129_spill] sm:$0xff] %v14428_v40  ;;  %v5342_v15 = vmul.f32 %v14408_v49, %v14408_v49  ;;  %v5527_v10 = vsel %vm1004_vm2, %v5341_v11, 0.0  ;;  %v4983_v9 = vsel %vm1004_vm2, %v14428_v40, 0.0  ;;  %v4986_v49 = vsel %vm1004_vm2, %v14419_v12, 0.0  ;;  %v18335_v12 = vld [vmem:[#allocation33_spill] sm:$0xff] }
 0x2dc   : >> { %v14483_v53 = vsub.f32 %v18335_v12, %v5093_v55  ;;  %v18338_v12 = vld [vmem:[#allocation94_spill] sm:$0xff] }
 0x2dd   : >> { %5522 = vadd.xlane.f32.xlu1 %v5521_v57  ;;  %v5090_v57 = vmul.f32 0.03125, %v14146_v13  ;;  %v14500_v55 = vadd.f32 %v13895_v56, %v18338_v12 }
 0x2de   : >> { %v14410_v43 = vpop.xlane.xlu1 %4849  ;;  %4978 = vadd.xlane.f32.xlu0 %v4977_v7  ;;  %v18322_v7 = vld [vmem:[#allocation88_spill] sm:$0xff]  ;;  %18336 = vst [vmem:[#allocation33_spill] sm:$0xff] %v14483_v53 }
 0x2df   : >> { %v14415_v20 = vpop.xlane.xlu0 %4852  ;;  %v14437_v59 = vadd.f32 %v13895_v56, %v18322_v7  ;;  %v14455_v7 = vsub.f32 %v18326_v33, %v5089_v38  ;;  %v18332_v38 = vld [vmem:[#allocation32_spill] sm:$0xff]  ;;  %18339 = vst [vmem:[#allocation94_spill] sm:$0xff] %v14500_v55 }
 0x2e0   : >> { %v14471_v33 = vsub.f32 %v18332_v38, %v5092_v2  ;;  %v5533_v2 = vsel %vm1004_vm2, %v5343_v63, 0.0  ;;  %v5536_v63 = vsel %vm1004_vm2, %v5344_v58, 0.0 }
 0x2e1   : >> { %4981 = vadd.xlane.f32.xlu1 %v4980_v21  ;;  %18323 = vst [vmem:[#allocation88_spill] sm:$0xff] %v14437_v59  ;;  %v18324_v21 = vld [vmem:[#allocation91_spill] sm:$0xff]  ;;  %18327 = vst [vmem:[#allocation29_spill] sm:$0xff] %v14455_v7 }
 0x2e2   : >> { %v14441_v61 = vpop.xlane.xlu1 %4855  ;;  %5525 = vadd.xlane.f32.xlu0 %v5524_v26  ;;  %v14452_v3 = vadd.f32 %v13895_v56, %v18324_v21  ;;  %v18328_v26 = vld [vmem:[#allocation30_spill] sm:$0xff]  ;;  %v18330_v21 = vld [vmem:[#allocation31_spill] sm:$0xff]  ;;  %18333 = vst [vmem:[#allocation32_spill] sm:$0xff] %v14471_v33 }
 0x2e3   : >> { %v14446_v13 = vpop.xlane.xlu0 %4858  ;;  %v14459_v1 = vsub.f32 %v18328_v26, %v5090_v57  ;;  %v14468_v35 = vsub.f32 %v18330_v21, %v5091_v23  ;;  %v5530_v57 = vsel %vm1004_vm2, %v5342_v15, 0.0  ;;  %v14480_v26 = vadd.f32 %v13895_v56, %v14155_v25 }
 0x2e4   : >> { %18325 = vst [vmem:[#allocation91_spill] sm:$0xff] %v14452_v3  ;;  %v5094_v23 = vmul.f32 0.03125, %v14188_v19  ;;  %v5095_v15 = vmul.f32 0.03125, %v14207_v27  ;;  %v4989_v38 = vsel %vm1004_vm2, %v14452_v3, 0.0  ;;  %v5345_v25 = vmul.f32 %v14455_v7, %v14455_v7 }
 0x2e5   : >> { %18329 = vst [vmem:[#allocation30_spill] sm:$0xff] %v14459_v1  ;;  %5528 = vadd.xlane.f32.xlu1 %v5527_v10  ;;  %18331 = vst [vmem:[#allocation31_spill] sm:$0xff] %v14468_v35  ;;  %v4992_v10 = vsel %vm1004_vm2, %v14437_v59, 0.0  ;;  %v5096_v19 = vmul.f32 0.03125, %v14209_v4  ;;  %v18340_v59 = vld [vmem:[#allocation97_spill] sm:$0xff]  ;;  %v5097_v3 = vmul.f32 0.03125, %v14228_v44  ;;  %v5347_v12 = vmul.f32 %v14468_v35, %v14468_v35 }
 0x2e6   : >> { %v14473_v11 = vpop.xlane.xlu1 %4861  ;;  %4984 = vadd.xlane.f32.xlu0 %v4983_v9  ;;  %18334 = vst [vmem:[#allocation130_spill] sm:$0xff] %v14480_v26  ;;  %v14491_v9 = vadd.f32 %v13895_v56, %v14159_v37  ;;  %v5346_v37 = vmul.f32 %v14459_v1, %v14459_v1  ;;  %v14508_v27 = vadd.f32 %v13895_v56, %v18340_v59  ;;  %v14528_v44 = vsel %vm1004_vm2, %v14480_v26, 0.0  ;;  %v18345_v35 = vld [vmem:[#allocation35_spill] sm:$0xff] }
 0x2e7   : >> { %v14486_v21 = vpop.xlane.xlu0 %4864  ;;  %v5348_v4 = vmul.f32 %v14471_v33, %v14471_v33  ;;  %v14522_v1 = vadd.f32 %v13895_v56, %v14197_v28  ;;  %v14533_v7 = vsub.f32 %v18345_v35, %v5095_v15  ;;  %v5098_v33 = vmul.f32 0.03125, %v14230_v5  ;;  %v18350_v5 = vld [vmem:[#allocation37_spill] sm:$0xff] }
 0x2e8   : >> { %18337 = vst [vmem:[#allocation131_spill] sm:$0xff] %v14491_v9  ;;  %18341 = vst [vmem:[#allocation97_spill] sm:$0xff] %v14508_v27  ;;  %v4995_v28 = vsel %vm1004_vm2, %v14491_v9, 0.0  ;;  %v14544_v26 = vsub.f32 %v18348_v36, %v5096_v19  ;;  %v14551_v35 = vsel %vm1004_vm2, %v14500_v55, 0.0  ;;  %v14554_v15 = vsub.f32 %v18350_v5, %v5097_v3  ;;  %v18352_v5 = vld [vmem:[#allocation100_spill] sm:$0xff]  ;;  %v18356_v9 = vld [vmem:[#allocation103_spill] sm:$0xff] }
 0x2e9   : >> { %4987 = vadd.xlane.f32.xlu1 %v4986_v49  ;;  %v18342_v49 = vld [vmem:[#allocation34_spill] sm:$0xff]  ;;  %18344 = vst [vmem:[#allocation132_spill] sm:$0xff] %v14522_v1  ;;  %18346 = vst [vmem:[#allocation35_spill] sm:$0xff] %v14533_v7  ;;  %v14563_v36 = vsel %vm1004_vm2, %v14508_v27, 0.0  ;;  %v5099_v19 = vmul.f32 0.03125, %v14249_v45  ;;  %v14582_v55 = vadd.f32 %v13895_v56, %v18352_v5  ;;  %v5100_v45 = vmul.f32 0.03125, %v14251_v48 }
 0x2ea   : >> { %v14511_v40 = vpop.xlane.xlu1 %4867  ;;  %5531 = vadd.xlane.f32.xlu0 %v5530_v57  ;;  %v14518_v58 = vsub.f32 %v18342_v49, %v5094_v23  ;;  %v5349_v57 = vmul.f32 %v14483_v53, %v14483_v53  ;;  %v5539_v23 = vsel %vm1004_vm2, %v5345_v25, 0.0  ;;  %v14541_v49 = vadd.f32 %v13895_v56, %v14201_v39  ;;  %18349 = vst [vmem:[#allocation36_spill] sm:$0xff] %v14544_v26 }
 0x2eb   : >> { %v14524_v59 = vpop.xlane.xlu0 %4870  ;;  %v14547_v53 = vsel %vm1004_vm2, %v5346_v37, 0.0  ;;  %18351 = vst [vmem:[#allocation37_spill] sm:$0xff] %v14554_v15  ;;  %v14559_v39 = vsel %vm1004_vm2, %v5347_v12, 0.0  ;;  %18353 = vst [vmem:[#allocation100_spill] sm:$0xff] %v14582_v55  ;;  %v14592_v50 = vadd.f32 %v13895_v56, %v18356_v9  ;;  %v14603_v48 = vadd.f32 %v13895_v56, %v14239_v14 }
 0x2ec   : >> { %18343 = vst [vmem:[#allocation34_spill] sm:$0xff] %v14518_v58  ;;  %18347 = vst [vmem:[#allocation133_spill] sm:$0xff] %v14541_v49  ;;  %v14572_v3 = vsel %vm1004_vm2, %v5349_v57, 0.0  ;;  %v5350_v12 = vmul.f32 %v14518_v58, %v14518_v58  ;;  %v5351_v57 = vmul.f32 %v14533_v7, %v14533_v7  ;;  %v14597_v58 = vsel %vm1004_vm2, %v14541_v49, 0.0  ;;  %v18360_v7 = vld [vmem:[#allocation39_spill] sm:$0xff] }
 0x2ed   : >> { %5534 = vadd.xlane.f32.xlu1 %v5533_v2  ;;  %v14566_v2 = vsel %vm1004_vm2, %v5348_v4, 0.0  ;;  %v18354_v4 = vld [vmem:[#allocation38_spill] sm:$0xff]  ;;  %18357 = vst [vmem:[#allocation103_spill] sm:$0xff] %v14592_v50  ;;  %18358 = vst [vmem:[#allocation134_spill] sm:$0xff] %v14603_v48  ;;  %v5102_v5 = vmul.f32 0.03125, %v14272_v17  ;;  %v5104_v14 = vmul.f32 0.03125, %v14293_v60 }
 0x2ee   : >> { %v14556_v25 = vpop.xlane.xlu1 %4873  ;;  %4990 = vadd.xlane.f32.xlu0 %v4989_v38  ;;  %v14576_v38 = vsel %vm1004_vm2, %v14522_v1, 0.0  ;;  %v14585_v27 = vsub.f32 %v18354_v4, %v5098_v33  ;;  %v5101_v1 = vmul.f32 0.03125, %v14270_v31  ;;  %v5352_v33 = vmul.f32 %v14544_v26, %v14544_v26 }
 0x2ef   : >> { %v14569_v37 = vpop.xlane.xlu0 %4876  ;;  %v5103_v4 = vmul.f32 0.03125, %v14291_v24  ;;  %v5353_v31 = vmul.f32 %v14554_v15, %v14554_v15  ;;  %v14616_v26 = vsub.f32 %v18360_v7, %v5099_v19  ;;  %v14622_v17 = vsel %vm1004_vm2, %v5350_v12, 0.0  ;;  %v18363_v24 = vld [vmem:[#allocation40_spill] sm:$0xff]  ;;  %v18365_v19 = vld [vmem:[#allocation41_spill] sm:$0xff] }
 0x2f0   : >> { %18355 = vst [vmem:[#allocation38_spill] sm:$0xff] %v14585_v27  ;;  %v14625_v46 = vsub.f32 %v18363_v24, %v5100_v45  ;;  %v5354_v7 = vmul.f32 %v14585_v27, %v14585_v27  ;;  %v14637_v60 = vsub.f32 %v18365_v19, %v5101_v1  ;;  %v5105_v15 = vmul.f32 0.03125, %v14312_v29 }
 0x2f1   : >> { %4993 = vadd.xlane.f32.xlu1 %v4992_v10  ;;  %v14613_v10 = vadd.f32 %v13895_v56, %v14243_v6  ;;  %18361 = vst [vmem:[#allocation39_spill] sm:$0xff] %v14616_v26  ;;  %v14632_v6 = vsel %vm1004_vm2, %v14582_v55, 0.0  ;;  %v14642_v12 = vsel %vm1004_vm2, %v14592_v50, 0.0  ;;  %v14645_v45 = vsel %vm1004_vm2, %v5352_v33, 0.0  ;;  %v18369_v55 = vld [vmem:[#allocation43_spill] sm:$0xff] }
 0x2f2   : >> { %v14607_v9 = vpop.xlane.xlu1 %4879  ;;  %5537 = vadd.xlane.f32.xlu0 %v5536_v63  ;;  %18364 = vst [vmem:[#allocation40_spill] sm:$0xff] %v14625_v46  ;;  %v14628_v63 = vsel %vm1004_vm2, %v5351_v57, 0.0  ;;  %18366 = vst [vmem:[#allocation41_spill] sm:$0xff] %v14637_v60  ;;  %v18367_v57 = vld [vmem:[#allocation42_spill] sm:$0xff]  ;;  %v14656_v29 = vsel %vm1004_vm2, %v5353_v31, 0.0  ;;  %v14660_v1 = vsel %vm1004_vm2, %v14603_v48, 0.0 }
 0x2f3   : >> { %18359 = vst [vmem:[#allocation135_spill] sm:$0xff] %v14613_v10  ;;  %v14619_v49 = vpop.xlane.xlu0 %4882  ;;  %v14648_v24 = vsub.f32 %v18367_v57, %v5102_v5  ;;  %v18374_v5 = vld [vmem:[#allocation44_spill] sm:$0xff]  ;;  %v5106_v48 = vmul.f32 0.03125, %v14314_v62  ;;  %v5357_v62 = vmul.f32 %v14637_v60, %v14637_v60 }
 0x2f4   : >> { %18362 = vst [vmem:[#allocation136_spill] sm:$0xff] %v14619_v49  ;;  %v14651_v49 = vsub.f32 %v18369_v55, %v5103_v4  ;;  %v14667_v19 = vsub.f32 %v18374_v5, %v5104_v14  ;;  %v14673_v55 = vsel %vm1004_vm2, %v14613_v10, 0.0  ;;  %v18377_v4 = vld [vmem:[#allocation109_spill] sm:$0xff]  ;;  %v5356_v14 = vmul.f32 %v14625_v46, %v14625_v46  ;;  %v18385_v46 = vld [vmem:[#allocation115_spill] sm:$0xff] }
 0x2f5   : >> { %5540 = vadd.xlane.f32.xlu1 %v5539_v23  ;;  %18368 = vst [vmem:[#allocation42_spill] sm:$0xff] %v14648_v24  ;;  %v18372_v23 = vld [vmem:[#allocation106_spill] sm:$0xff]  ;;  %v14679_v31 = vadd.f32 %v13895_v56, %v18377_v4  ;;  %v14689_v5 = vadd.f32 %v13895_v56, %v14281_v42  ;;  %v11764_v10 = vld [vmem:[%s12031_s22] ss:$0 sm:$0xff]  ;;  %v5358_v42 = vmul.f32 %v14648_v24, %v14648_v24 }
 0x2f6   : >> { %18370 = vst [vmem:[#allocation43_spill] sm:$0xff] %v14651_v49  ;;  %v14653_v27 = vpop.xlane.xlu1 %4885  ;;  %4996 = vadd.xlane.f32.xlu0 %v4995_v28  ;;  %v14664_v33 = vadd.f32 %v13895_v56, %v18372_v23  ;;  %18375 = vst [vmem:[#allocation44_spill] sm:$0xff] %v14667_v19  ;;  %v5355_v28 = vmul.f32 %v14616_v26, %v14616_v26  ;;  %v14683_v23 = vsel %vm1004_vm2, %v5354_v7, 0.0  ;;  %v18381_v26 = vld [vmem:[#allocation45_spill] sm:$0xff]  ;;  %v18383_v7 = vld [vmem:[#allocation112_spill] sm:$0xff] }
 0x2f7   : >> { %18371 = vst [vmem:[#allocation137_spill] sm:$0xff] %v14653_v27  ;;  %v14669_v57 = vpop.xlane.xlu0 %4888  ;;  %18378 = vst [vmem:[#allocation109_spill] sm:$0xff] %v14679_v31  ;;  %v14693_v50 = vadd.f32 %v11764_v10, %v14285_v30  ;;  %v14702_v4 = vadd.f32 %v11764_v10, %v18383_v7  ;;  %v14705_v27 = vadd.f32 %v11764_v10, %v18385_v46  ;;  %v18387_v7 = vld [vmem:[#allocation14_spill] sm:$0xff] }
 0x2f8   : >> { %18373 = vst [vmem:[#allocation106_spill] sm:$0xff] %v14664_v33  ;;  %18376 = vst [vmem:[#allocation138_spill] sm:$0xff] %v14669_v57  ;;  %v14696_v57 = vsub.f32 %v18381_v26, %v5105_v15  ;;  %v5359_v30 = vmul.f32 %v14651_v49, %v14651_v49  ;;  %v5107_v26 = vmul.f32 0.03125, %v14333_v16  ;;  %v14718_v15 = vsel %vm1004_vm2, %v5355_v28, 0.0 }
 0x2f9   : >> { %18379 = vst [vmem:[#allocation139_spill] sm:$0xff] %v14689_v5  ;;  %18380 = vst [vmem:[#allocation140_spill] sm:$0xff] %v14693_v50  ;;  %4999 = vadd.xlane.f32.xlu1 %v14528_v44  ;;  %v14722_v46 = vsel %vm1004_vm2, %v14664_v33, 0.0  ;;  %v14727_v60 = vsub.f32 %v18387_v7, %v5106_v48  ;;  %v14730_v24 = vadd.f32 %v11764_v10, %v14323_v22  ;;  %v14734_v16 = vsel %vm1004_vm2, %v14679_v31, 0.0 }
 0x2fa   : >> { %18382 = vst [vmem:[#allocation45_spill] sm:$0xff] %v14696_v57  ;;  %18384 = vst [vmem:[#allocation112_spill] sm:$0xff] %v14702_v4  ;;  %v14707_v56 = vpop.xlane.xlu1 %4891  ;;  %5543 = vadd.xlane.f32.xlu0 %v14547_v53  ;;  %v5360_v53 = vmul.f32 %v14667_v19, %v14667_v19  ;;  %v14737_v28 = vsel %vm1004_vm2, %v5356_v14, 0.0  ;;  %v14741_v49 = vsel %vm1004_vm2, %v5357_v62, 0.0  ;;  %v14745_v19 = vsel %vm1004_vm2, %v14693_v50, 0.0  ;;  %v18392_v50 = vld [vmem:[#allocation15_spill] sm:$0xff] }
 0x2fb   : >> { %18386 = vst [vmem:[#allocation115_spill] sm:$0xff] %v14705_v27  ;;  %v14715_v44 = vpop.xlane.xlu0 %4894  ;;  %18388 = vst [vmem:[#allocation14_spill] sm:$0xff] %v14727_v60  ;;  %v14749_v22 = vsel %vm1004_vm2, %v14689_v5, 0.0  ;;  %v5361_v48 = vmul.f32 %v14696_v57, %v14696_v57  ;;  %v14760_v14 = vsel %vm1004_vm2, %v5359_v30, 0.0  ;;  %v14764_v62 = vsel %vm1004_vm2, %v14705_v27, 0.0 }
 0x2fc   : >> { %18389 = vst [vmem:[#allocation141_spill] sm:$0xff] %v14730_v24  ;;  %18390 = vst [vmem:[#allocation142_spill] sm:$0xff] %v14764_v62  ;;  %v14768_v5 = vsel %vm1004_vm2, %v14702_v4, 0.0  ;;  %v14771_v57 = vadd.f32 %v11764_v10, %v14327_v32  ;;  %v14774_v33 = vsub.f32 %v18392_v50, %v5107_v26  ;;  %v14778_v30 = vsel %vm1004_vm2, %v5360_v53, 0.0 }
 0x2fd   : >> { %5546 = vadd.xlane.f32.xlu1 %v14559_v39  ;;  %v14757_v39 = vsel %vm1004_vm2, %v5358_v42, 0.0  ;;  %v5109_v31 = vmul.f32 0.03125, %v14354_v41  ;;  %v14783_v62 = vsel %vm1004_vm2, %v14730_v24, 0.0  ;;  %v5362_v32 = vmul.f32 %v14727_v60, %v14727_v60 }
 0x2fe   : >> { %v14753_v7 = vpop.xlane.xlu1 %4897  ;;  %5002 = vadd.xlane.f32.xlu0 %v14563_v36  ;;  %18391 = vst [vmem:[#allocation143_spill] sm:$0xff] %v14771_v57  ;;  %18393 = vst [vmem:[#allocation15_spill] sm:$0xff] %v14774_v33  ;;  %v5108_v36 = vmul.f32 0.03125, %v14335_v54  ;;  %v14788_v4 = vadd.f32 %v11764_v10, %v14338_v8  ;;  %v5110_v50 = vmul.f32 0.03125, %v14356_v51  ;;  %v5111_v54 = vmul.f32 0.03125, %v14371_v34  ;;  %v18396_v8 = vld [vmem:[#allocation16_spill] sm:$0xff] }
 0x2ff   : >> { %v5442_v42 = vpop.xlane.xlu0 %5441  ;;  %18394 = vst [vmem:[#allocation144_spill] sm:$0xff] %v14783_v62  ;;  %v14794_v26 = vsel %vm1004_vm2, %v5361_v48, 0.0  ;;  %v5112_v41 = vmul.f32 0.03125, %v14373_v0  ;;  %v5113_v53 = vmul.f32 0.03125, %v14389_v52  ;;  %v5363_v0 = vmul.f32 %v14774_v33, %v14774_v33  ;;  %v18399_v52 = vld [vmem:[#allocation17_spill] sm:$0xff] }
 0x300   : >> { %v5824_v27 = vmul.f32 0.03125, %v5442_v42  ;;  %18395 = vst [vmem:[#allocation145_spill] sm:$0xff] %v14788_v4  ;;  %v5114_v42 = vmul.f32 0.03125, %v14392_v47  ;;  %v14801_v62 = vsub.f32 %v18396_v8, %v5108_v36  ;;  %v14812_v48 = vsub.f32 %v18399_v52, %v5109_v31  ;;  %v18404_v8 = vld [vmem:[#allocation19_spill] sm:$0xff]  ;;  %v18406_v31 = vld [vmem:[#allocation20_spill] sm:$0xff] }
 0x301   : >> { %5005 = vadd.xlane.f32.xlu1 %v14551_v35  ;;  %v14807_v35 = vsel %vm1004_vm2, %v14771_v57, 0.0  ;;  %v5115_v47 = vmul.f32 0.03125, %v14410_v43  ;;  %v14825_v57 = vsub.f32 %v18404_v8, %v5111_v54  ;;  %v14829_v52 = vsub.f32 %v18406_v31, %v5112_v41  ;;  %v18408_v43 = vld [vmem:[#allocation21_spill] sm:$0xff] }
 0x302   : >> { %v5952_v24 = vadd.f32 1e-05, %v5824_v27  ;;  %v5445_v60 = vpop.xlane.xlu1 %5444  ;;  %5549 = vadd.xlane.f32.xlu0 %v14566_v2  ;;  %18397 = vst [vmem:[#allocation16_spill] sm:$0xff] %v14801_v62  ;;  %18398 = vst [vmem:[#allocation146_spill] sm:$0xff] %v14807_v35  ;;  %v14816_v27 = vsel %vm1004_vm2, %v5362_v32, 0.0  ;;  %v14819_v2 = vadd.f32 %v11764_v10, %v14351_v18  ;;  %v18410_v32 = vld [vmem:[#allocation22_spill] sm:$0xff]  ;;  %v5364_v41 = vmul.f32 %v14801_v62, %v14801_v62 }
 0x303   : >> { %v5825_v51 = vmul.f32 0.03125, %v5445_v60  ;;  %v14803_v34 = vpop.xlane.xlu0 %4900  ;;  %18400 = vst [vmem:[#allocation17_spill] sm:$0xff] %v14812_v48  ;;  %v18402_v60 = vld [vmem:[#allocation18_spill] sm:$0xff]  ;;  %18405 = vst [vmem:[#allocation19_spill] sm:$0xff] %v14825_v57  ;;  %v14835_v33 = vsub.f32 %v18410_v32, %v5114_v42  ;;  %v14842_v10 = vsel %vm1004_vm2, %v14788_v4, 0.0  ;;  %v14846_v54 = vsel %vm1004_vm2, %v5363_v0, 0.0 }
 0x304   : >> { %11251 = vrsqrt.f32 %v5952_v24  ;;  %18401 = vst [vmem:[#allocation147_spill] sm:$0xff] %v14819_v2  ;;  %v14822_v36 = vsub.f32 %v18402_v60, %v5110_v50  ;;  %18407 = vst [vmem:[#allocation20_spill] sm:$0xff] %v14829_v52  ;;  %v14832_v24 = vsub.f32 %v18408_v43, %v5113_v53  ;;  %v5116_v50 = vmul.f32 0.03125, %v14415_v20  ;;  %v18412_v53 = vld [vmem:[#allocation23_spill] sm:$0xff]  ;;  %v18414_v43 = vld [vmem:[#allocation24_spill] sm:$0xff] }
 0x305   : >> { %v5953_v35 = vadd.f32 1e-05, %v5825_v51  ;;  %5552 = vadd.xlane.f32.xlu1 %v14572_v3  ;;  %18411 = vst [vmem:[#allocation22_spill] sm:$0xff] %v14835_v33  ;;  %v14851_v42 = vsub.f32 %v18412_v53, %v5115_v47  ;;  %v5117_v51 = vmul.f32 0.03125, %v14441_v61  ;;  %v5365_v60 = vmul.f32 %v14812_v48, %v14812_v48 }
 0x306   : >> { %18403 = vst [vmem:[#allocation18_spill] sm:$0xff] %v14822_v36  ;;  %18409 = vst [vmem:[#allocation21_spill] sm:$0xff] %v14832_v24  ;;  %v14837_v18 = vpop.xlane.xlu1 %4903  ;;  %5008 = vadd.xlane.f32.xlu0 %v14597_v58  ;;  %v5118_v8 = vmul.f32 0.03125, %v14446_v13  ;;  %v14860_v20 = vsel %vm1004_vm2, %v14819_v2, 0.0  ;;  %v5367_v0 = vmul.f32 %v14825_v57, %v14825_v57  ;;  %v5368_v13 = vmul.f32 %v14829_v52, %v14829_v52  ;;  %v14886_v52 = vld [vmem:[%s12036_s24] ss:$0 sm:$0xff] }
 0x307   : >> { %11253 = vrsqrt.f32 %v5953_v35  ;;  %v5448_v3 = vpop.xlane.xlu0 %5447  ;;  %18413 = vst [vmem:[#allocation23_spill] sm:$0xff] %v14851_v42  ;;  %v5366_v35 = vmul.f32 %v14822_v36, %v14822_v36  ;;  %v5370_v31 = vmul.f32 %v14835_v33, %v14835_v33  ;;  %v14874_v32 = vsub.f32 %v18414_v43, %v5116_v50  ;;  %v18418_v43 = vld [vmem:[#allocation26_spill] sm:$0xff] }
 0x308   : >> { %v5826_v58 = vmul.f32 0.03125, %v5448_v3  ;;  %v5119_v3 = vmul.f32 0.03125, %v14473_v11  ;;  %v5371_v50 = vmul.f32 %v14851_v42, %v14851_v42  ;;  %v14894_v11 = vsub.f32 %v18418_v43, %v5118_v8 }
 0x309   : >> { %5011 = vadd.xlane.f32.xlu1 %v14576_v38  ;;  %v5369_v38 = vmul.f32 %v14832_v24, %v14832_v24  ;;  %18415 = vst [vmem:[#allocation24_spill] sm:$0xff] %v14874_v32  ;;  %v14889_v24 = vsel %vm1004_vm2, %v5365_v60, 0.0  ;;  %v5120_v60 = vmul.f32 0.03125, %v14486_v21  ;;  %v14908_v8 = vsel %vm1004_vm2, %v5368_v13, 0.0  ;;  %v14924_v13 = vld [vmem:[%s12041_s15] ss:$0 sm:$0xff] }
 0x30a   : >> { %v5954_v61 = vadd.f32 1e-05, %v5826_v58  ;;  %v5451_v47 = vpop.xlane.xlu1 %5450  ;;  %5555 = vadd.xlane.f32.xlu0 %v14622_v17  ;;  %v14880_v58 = vsel %vm1004_vm2, %v5364_v41, 0.0  ;;  %v18416_v17 = vld [vmem:[#allocation25_spill] sm:$0xff]  ;;  %18419 = vst [vmem:[#allocation26_spill] sm:$0xff] %v14894_v11  ;;  %v14898_v41 = vsel %vm1004_vm2, %v5366_v35, 0.0  ;;  %v5372_v42 = vmul.f32 %v14874_v32, %v14874_v32 }
 0x30b   : >> { %v5827_v53 = vmul.f32 0.03125, %v5451_v47  ;;  %v14877_v57 = vpop.xlane.xlu0 %4906  ;;  %v14883_v36 = vsub.f32 %v18416_v17, %v5117_v51  ;;  %v14901_v51 = vsel %vm1004_vm2, %v5367_v0, 0.0  ;;  %v18420_v35 = vld [vmem:[#allocation46_spill] sm:$0xff]  ;;  %v18423_v32 = vld [vmem:[#allocation47_spill] sm:$0xff] }
 0x30c   : >> { %11255 = vrsqrt.f32 %v5954_v61  ;;  %v14917_v43 = vsub.f32 %v18420_v35, %v5119_v3  ;;  %v5122_v35 = vmul.f32 0.03125, %v14524_v59 }
 0x30d   : >> { %18417 = vst [vmem:[#allocation25_spill] sm:$0xff] %v14883_v36  ;;  %v5955_v47 = vadd.f32 1e-05, %v5827_v53  ;;  %5558 = vadd.xlane.f32.xlu1 %v14628_v63  ;;  %v14911_v53 = vsel %vm1004_vm2, %v5369_v38, 0.0  ;;  %v14914_v63 = vsel %vm1004_vm2, %v5370_v31, 0.0  ;;  %v14927_v38 = vsel %vm1004_vm2, %v5371_v50, 0.0 }
 0x30e   : >> { %v11252_v61 = vpop.eup %11251  ;;  %v14904_v17 = vpop.xlane.xlu1 %4909  ;;  %5014 = vadd.xlane.f32.xlu0 %v14642_v12  ;;  %18421 = vst [vmem:[#allocation46_spill] sm:$0xff] %v14917_v43  ;;  %v5121_v12 = vmul.f32 0.03125, %v14511_v40  ;;  %v5373_v31 = vmul.f32 %v14883_v36, %v14883_v36  ;;  %v5374_v40 = vmul.f32 %v14894_v11, %v14894_v11  ;;  %v5124_v50 = vmul.f32 0.03125, %v14569_v37 }
 0x30f   : >> { %v6215_v0 = vmul.f32 %v11252_v61, %v14886_v52  ;;  %11257 = vrsqrt.f32 %v5955_v47  ;;  %v5454_v21 = vpop.xlane.xlu0 %5453  ;;  %v5123_v47 = vmul.f32 0.03125, %v14556_v25  ;;  %v18422_v61 = vld [vmem:[#allocation60_spill] sm:$0xff] }
 0x310   : >> { %v5828_v33 = vmul.f32 0.03125, %v5454_v21  ;;  %v14938_v21 = vsub.f32 %v18423_v32, %v5120_v60  ;;  %v5375_v32 = vmul.f32 %v14917_v43, %v14917_v43  ;;  %v18425_v60 = vld [vmem:[#allocation48_spill] sm:$0xff] }
 0x311   : >> { %v11254_v3 = vpop.eup %11253  ;;  %v6343_v48 = vmul.f32 %v6215_v0, %v18422_v61  ;;  %5017 = vadd.xlane.f32.xlu1 %v14632_v6  ;;  %v14949_v6 = vsel %vm1004_vm2, %v5372_v42, 0.0  ;;  %v14954_v37 = vsub.f32 %v18425_v60, %v5121_v12  ;;  %v18432_v12 = vld [vmem:[#allocation51_spill] sm:$0xff] }
 0x312   : >> { %18424 = vst [vmem:[#allocation60_spill] sm:$0xff] %v14938_v21  ;;  %v6216_v62 = vmul.f32 %v11254_v3, %v14886_v52  ;;  %v5956_v36 = vadd.f32 1e-05, %v5828_v33  ;;  %v5457_v4 = vpop.xlane.xlu1 %5456  ;;  %5561 = vadd.xlane.f32.xlu0 %v14645_v45  ;;  %v18427_v3 = vld [vmem:[#allocation58_spill] sm:$0xff]  ;;  %v14958_v45 = vsel %vm1004_vm2, %v5373_v31, 0.0  ;;  %v14969_v60 = vsub.f32 %v18432_v12, %v5124_v50  ;;  %v18436_v12 = vld [vmem:[#allocation61_spill] sm:$0xff] }
 0x313   : >> { %v14944_v59 = vadd.f32 %v14924_v13, %v6343_v48  ;;  %v5829_v25 = vmul.f32 0.03125, %v5457_v4  ;;  %v14946_v0 = vpop.xlane.xlu0 %4912  ;;  %18426 = vst [vmem:[#allocation47_spill] sm:$0xff] %v14954_v37  ;;  %v18428_v48 = vld [vmem:[#allocation49_spill] sm:$0xff]  ;;  %v18430_v4 = vld [vmem:[#allocation50_spill] sm:$0xff]  ;;  %v14978_v31 = vsel %vm1004_vm2, %v5374_v40, 0.0 }
 0x314   : >> { %v6344_v33 = vmul.f32 %v6216_v62, %v18427_v3  ;;  %11259 = vrsqrt.f32 %v5956_v36  ;;  %v14961_v61 = vsub.f32 %v18428_v48, %v5122_v35  ;;  %v14964_v11 = vsub.f32 %v18430_v4, %v5123_v47  ;;  %18433 = vst [vmem:[#allocation49_spill] sm:$0xff] %v14969_v60  ;;  %v18435_v48 = vld [vmem:[#allocation136_spill] sm:$0xff] }
 0x315   : >> { %v6734_v42 = vmul.f32 0.70710677, %v14944_v59  ;;  %v5957_v2 = vadd.f32 1e-05, %v5829_v25  ;;  %5564 = vadd.xlane.f32.xlu1 %v14656_v29  ;;  %v5376_v35 = vmul.f32 %v14938_v21, %v14938_v21  ;;  %v5125_v47 = vmul.f32 0.03125, %v14607_v9 }
 0x316   : >> { %18429 = vst [vmem:[#allocation48_spill] sm:$0xff] %v14961_v61  ;;  %18431 = vst [vmem:[#allocation58_spill] sm:$0xff] %v14964_v11  ;;  %v11256_v43 = vpop.eup %11255  ;;  %v14972_v62 = vadd.f32 %v14924_v13, %v6344_v33  ;;  %v14974_v36 = vpop.xlane.xlu1 %4915  ;;  %5020 = vadd.xlane.f32.xlu0 %v14673_v55  ;;  %v14985_v25 = vsel %vm1004_vm2, %v5375_v32, 0.0  ;;  %v5377_v55 = vmul.f32 %v14954_v37, %v14954_v37  ;;  %v5126_v4 = vmul.f32 0.03125, %v18435_v48  ;;  %v18437_v48 = vld [vmem:[#allocation52_spill] sm:$0xff] }
 0x317   : >> { %11261 = verf.f32 %v6734_v42  ;;  %v6217_v29 = vmul.f32 %v11256_v43, %v14886_v52  ;;  %v5460_v50 = vpop.xlane.xlu0 %5459  ;;  %18434 = vst [vmem:[#allocation50_spill] sm:$0xff] %v14985_v25  ;;  %v5378_v9 = vmul.f32 %v14961_v61, %v14961_v61  ;;  %v5379_v43 = vmul.f32 %v14964_v11, %v14964_v11 }
 0x318   : >> { %v6735_v3 = vmul.f32 0.70710677, %v14972_v62  ;;  %11263 = vrsqrt.f32 %v5957_v2  ;;  %v5830_v33 = vmul.f32 0.03125, %v5460_v50  ;;  %v5380_v50 = vmul.f32 %v14969_v60, %v14969_v60  ;;  %v18441_v60 = vld [vmem:[#allocation53_spill] sm:$0xff] }
 0x319   : >> { %v11258_v40 = vpop.eup %11257  ;;  %v6345_v21 = vmul.f32 %v6217_v29, %v18436_v12  ;;  %5023 = vadd.xlane.f32.xlu1 %v14660_v1  ;;  %v15002_v29 = vsub.f32 %v18437_v48, %v5125_v47  ;;  %v18439_v1 = vld [vmem:[#allocation137_spill] sm:$0xff]  ;;  %v15018_v47 = vsub.f32 %v18441_v60, %v5126_v4  ;;  %v18443_v48 = vld [vmem:[#allocation138_spill] sm:$0xff]  ;;  %v15033_v60 = vsel %vm1004_vm2, %v5379_v43, 0.0 }
 0x31a   : >> { %11265 = verf.f32 %v6735_v3  ;;  %v6218_v2 = vmul.f32 %v11258_v40, %v14886_v52  ;;  %v5958_v32 = vadd.f32 1e-05, %v5830_v33  ;;  %v5463_v42 = vpop.xlane.xlu1 %5462  ;;  %5567 = vadd.xlane.f32.xlu0 %v14683_v23  ;;  %v5127_v12 = vmul.f32 0.03125, %v18439_v1  ;;  %v18440_v3 = vld [vmem:[#allocation27_spill] sm:$0xff]  ;;  %18445 = vst [vmem:[#allocation52_spill] sm:$0xff] %v15033_v60 }
 0x31b   : >> { %18438 = vst [vmem:[#allocation51_spill] sm:$0xff] %v15002_v29  ;;  %v15006_v61 = vadd.f32 %v14924_v13, %v6345_v21  ;;  %v5831_v37 = vmul.f32 0.03125, %v5463_v42  ;;  %v15008_v11 = vpop.xlane.xlu0 %4918  ;;  %v15012_v33 = vsel %vm1004_vm2, %v5376_v35, 0.0  ;;  %v15015_v23 = vsel %vm1004_vm2, %v5377_v55, 0.0  ;;  %18442 = vst [vmem:[#allocation136_spill] sm:$0xff] %v15018_v47  ;;  %v18448_v60 = vld [vmem:[#allocation55_spill] sm:$0xff] }
 0x31c   : >> { %v6346_v40 = vmul.f32 %v6218_v2, %v18440_v3  ;;  %11267 = vrsqrt.f32 %v5958_v32  ;;  %v5128_v1 = vmul.f32 0.03125, %v18443_v48  ;;  %v15030_v35 = vsel %vm1004_vm2, %v5378_v9, 0.0 }
 0x31d   : >> { %v6736_v21 = vmul.f32 0.70710677, %v15006_v61  ;;  %v5959_v25 = vadd.f32 1e-05, %v5831_v37  ;;  %5570 = vadd.xlane.f32.xlu1 %v14718_v15  ;;  %18444 = vst [vmem:[#allocation61_spill] sm:$0xff] %v15030_v35  ;;  %v15036_v55 = vsel %vm1004_vm2, %v5380_v50, 0.0 }
 0x31e   : >> { %v11260_v42 = vpop.eup %11259  ;;  %v15024_v2 = vadd.f32 %v14924_v13, %v6346_v40  ;;  %v15026_v32 = vpop.xlane.xlu1 %4921  ;;  %5026 = vadd.xlane.f32.xlu0 %v14734_v16  ;;  %18446 = vst [vmem:[#allocation137_spill] sm:$0xff] %v15036_v55  ;;  %v18447_v37 = vld [vmem:[#allocation54_spill] sm:$0xff]  ;;  %v5381_v40 = vmul.f32 %v15002_v29, %v15002_v29  ;;  %v5129_v16 = vmul.f32 0.03125, %v14707_v56  ;;  %v15047_v50 = vsub.f32 %v18448_v60, %v5128_v1 }
 0x31f   : >> { %v15039_v4 = vsub.f32 %v18447_v37, %v5127_v12  ;;  %11269 = verf.f32 %v6736_v21  ;;  %v6219_v15 = vmul.f32 %v11260_v42, %v14886_v52  ;;  %v5466_v3 = vpop.xlane.xlu0 %5465  ;;  %v5130_v12 = vmul.f32 0.03125, %v14715_v44  ;;  %v18449_v37 = vld [vmem:[#allocation64_spill] sm:$0xff] }
 0x320   : >> { %v6737_v9 = vmul.f32 0.70710677, %v15024_v2  ;;  %11271 = vrsqrt.f32 %v5959_v25  ;;  %v5832_v43 = vmul.f32 0.03125, %v5466_v3  ;;  %v5382_v42 = vmul.f32 %v15018_v47, %v15018_v47  ;;  %v18451_v47 = vld [vmem:[#allocation56_spill] sm:$0xff] }
 0x321   : >> { %v11262_v48 = vpop.eup %11261  ;;  %v6347_v21 = vmul.f32 %v6219_v15, %v18449_v37  ;;  %5029 = vadd.xlane.f32.xlu1 %v14722_v46  ;;  %v6606_v56 = vmul.f32 0.5, %v14944_v59  ;;  %v15063_v46 = vsel %vm1004_vm2, %v5381_v40, 0.0  ;;  %v15066_v59 = vsub.f32 %v18451_v47, %v5129_v16 }
 0x322   : >> { %v11264_v29 = vpop.eup %11263  ;;  %v6990_v55 = vadd.f32 1.0, %v11262_v48  ;;  %11273 = verf.f32 %v6737_v9  ;;  %v5960_v25 = vadd.f32 1e-05, %v5832_v43  ;;  %v5469_v3 = vpop.xlane.xlu1 %5468  ;;  %5573 = vadd.xlane.f32.xlu0 %v14737_v28  ;;  %18450 = vst [vmem:[#allocation27_spill] sm:$0xff] %v15063_v46  ;;  %v5383_v28 = vmul.f32 %v15039_v4, %v15039_v4  ;;  %v18455_v46 = vld [vmem:[#allocation57_spill] sm:$0xff] }
 0x323   : >> { %v15057_v1 = vadd.f32 %v14924_v13, %v6347_v21  ;;  %v6220_v44 = vmul.f32 %v11264_v29, %v14886_v52  ;;  %v5833_v60 = vmul.f32 0.03125, %v5469_v3  ;;  %v15060_v15 = vpop.xlane.xlu0 %4924  ;;  %18452 = vst [vmem:[#allocation53_spill] sm:$0xff] %v15066_v59  ;;  %v6607_v43 = vmul.f32 0.5, %v14972_v62  ;;  %v18454_v21 = vld [vmem:[#allocation66_spill] sm:$0xff] }
 0x324   : >> { %v11266_v37 = vpop.eup %11265  ;;  %v15068_v9 = vmul.f32 %v6990_v55, %v6606_v56  ;;  %11275 = vrsqrt.f32 %v5960_v25  ;;  %v15077_v35 = vsub.f32 %v18455_v46, %v5130_v12  ;;  %v15083_v16 = vsel %vm1004_vm2, %v5382_v42, 0.0 }
 0x325   : >> { %v6991_v48 = vadd.f32 1.0, %v11266_v37  ;;  %v6738_v29 = vmul.f32 0.70710677, %v15057_v1  ;;  %v6348_v3 = vmul.f32 %v6220_v44, %v18454_v21  ;;  %5576 = vadd.xlane.f32.xlu1 %v14741_v49  ;;  %v5961_v47 = vadd.f32 1e-05, %v5833_v60  ;;  %v18458_v37 = vld [vmem:[#allocation68_spill] sm:$0xff] }
 0x326   : >> { %18453 = vst [vmem:[#allocation138_spill] sm:$0xff] %v15068_v9  ;;  %v11268_v40 = vpop.eup %11267  ;;  %18456 = vst [vmem:[#allocation54_spill] sm:$0xff] %v15077_v35  ;;  %v15079_v55 = vpop.xlane.xlu1 %4927  ;;  %5032 = vadd.xlane.f32.xlu0 %v14745_v19  ;;  %v5384_v62 = vmul.f32 %v15047_v50, %v15047_v50  ;;  %v5131_v44 = vmul.f32 0.03125, %v14753_v7  ;;  %v5132_v60 = vmul.f32 0.03125, %v14803_v34  ;;  %v6608_v7 = vmul.f32 0.5, %v15006_v61 }
 0x327   : >> { %v15087_v56 = vmul.f32 %v6991_v48, %v6607_v43  ;;  %11277 = verf.f32 %v6738_v29  ;;  %v15090_v49 = vadd.f32 %v14924_v13, %v6348_v3  ;;  %v6221_v12 = vmul.f32 %v11268_v40, %v14886_v52  ;;  %v5472_v25 = vpop.xlane.xlu0 %5471 }
 0x328   : >> { %11279 = vrsqrt.f32 %v5961_v47  ;;  %v5834_v19 = vmul.f32 0.03125, %v5472_v25  ;;  %v15099_v43 = vsel %vm1004_vm2, %v5383_v28, 0.0  ;;  %v5385_v48 = vmul.f32 %v15066_v59, %v15066_v59 }
 0x329   : >> { %18457 = vst [vmem:[#allocation55_spill] sm:$0xff] %v15087_v56  ;;  %v11270_v42 = vpop.eup %11269  ;;  %v6739_v46 = vmul.f32 0.70710677, %v15090_v49  ;;  %v6349_v21 = vmul.f32 %v6221_v12, %v18458_v37  ;;  %5035 = vadd.xlane.f32.xlu1 %v14749_v22  ;;  %v5386_v47 = vmul.f32 %v15077_v35, %v15077_v35  ;;  %v18459_v56 = vld [vmem:[#allocation59_spill] sm:$0xff]  ;;  %v18463_v35 = vld [vmem:[#allocation70_spill] sm:$0xff]  ;;  %v5133_v59 = vmul.f32 0.03125, %v14837_v18 }
 0x32a   : >> { %v11272_v29 = vpop.eup %11271  ;;  %v6992_v3 = vadd.f32 1.0, %v11270_v42  ;;  %v5962_v34 = vadd.f32 1e-05, %v5834_v19  ;;  %v5475_v40 = vpop.xlane.xlu1 %5474  ;;  %5579 = vadd.xlane.f32.xlu0 %v14757_v39  ;;  %v15114_v61 = vsub.f32 %v18459_v56, %v5131_v44  ;;  %v18460_v19 = vld [vmem:[#allocation62_spill] sm:$0xff] }
 0x32b   : >> { %11281 = verf.f32 %v6739_v46  ;;  %v15108_v22 = vadd.f32 %v14924_v13, %v6349_v21  ;;  %v6222_v28 = vmul.f32 %v11272_v29, %v14886_v52  ;;  %v5835_v12 = vmul.f32 0.03125, %v5475_v40  ;;  %v15111_v25 = vpop.xlane.xlu0 %4930 }
 0x32c   : >> { %v11274_v37 = vpop.eup %11273  ;;  %v15117_v42 = vsub.f32 %v18460_v19, %v5132_v60  ;;  %v15119_v39 = vmul.f32 %v6992_v3, %v6608_v7  ;;  %11283 = vrsqrt.f32 %v5962_v34  ;;  %v6609_v46 = vmul.f32 0.5, %v15024_v2  ;;  %v18464_v60 = vld [vmem:[#allocation142_spill] sm:$0xff] }
 0x32d   : >> { %v6993_v9 = vadd.f32 1.0, %v11274_v37  ;;  %v6740_v21 = vmul.f32 0.70710677, %v15108_v22  ;;  %v6350_v29 = vmul.f32 %v6222_v28, %v18463_v35  ;;  %5582 = vadd.xlane.f32.xlu1 %v14760_v14  ;;  %v5963_v56 = vadd.f32 1e-05, %v5835_v12  ;;  %v18466_v37 = vld [vmem:[#allocation72_spill] sm:$0xff] }
 0x32e   : >> { %18461 = vst [vmem:[#allocation64_spill] sm:$0xff] %v15117_v42  ;;  %18462 = vst [vmem:[#allocation56_spill] sm:$0xff] %v15119_v39  ;;  %v11276_v40 = vpop.eup %11275  ;;  %v15126_v44 = vpop.xlane.xlu1 %4933  ;;  %5038 = vadd.xlane.f32.xlu0 %v18464_v60  ;;  %v15130_v7 = vsel %vm1004_vm2, %v5384_v62, 0.0  ;;  %v15133_v2 = vsel %vm1004_vm2, %v5385_v48, 0.0  ;;  %v15142_v28 = vsel %vm1004_vm2, %v5386_v47, 0.0  ;;  %v5387_v62 = vmul.f32 %v15114_v61, %v15114_v61  ;;  %v18476_v39 = vld [vmem:[#allocation144_spill] sm:$0xff] }
 0x32f   : >> { %v15135_v3 = vmul.f32 %v6993_v9, %v6609_v46  ;;  %11285 = verf.f32 %v6740_v21  ;;  %v15138_v35 = vadd.f32 %v14924_v13, %v6350_v29  ;;  %v6223_v14 = vmul.f32 %v11276_v40, %v14886_v52  ;;  %v5478_v18 = vpop.xlane.xlu0 %5477  ;;  %v18467_v29 = vld [vmem:[#allocation63_spill] sm:$0xff] }
 0x330   : >> { %11287 = vrsqrt.f32 %v5963_v56  ;;  %v5836_v34 = vmul.f32 0.03125, %v5478_v18  ;;  %v5134_v48 = vmul.f32 0.03125, %v14877_v57  ;;  %v5388_v46 = vmul.f32 %v15117_v42, %v15117_v42  ;;  %v18477_v42 = vld [vmem:[#allocation69_spill] sm:$0xff] }
 0x331   : >> { %18465 = vst [vmem:[#allocation66_spill] sm:$0xff] %v15135_v3  ;;  %v11278_v12 = vpop.eup %11277  ;;  %v6741_v9 = vmul.f32 0.70710677, %v15138_v35  ;;  %v6351_v19 = vmul.f32 %v6223_v14, %v18466_v37  ;;  %5041 = vadd.xlane.f32.xlu1 %v14768_v5  ;;  %v15153_v40 = vsub.f32 %v18467_v29, %v5133_v59  ;;  %v6610_v47 = vmul.f32 0.5, %v15057_v1 }
 0x332   : >> { %v11280_v21 = vpop.eup %11279  ;;  %v6994_v56 = vadd.f32 1.0, %v11278_v12  ;;  %v5964_v60 = vadd.f32 1e-05, %v5836_v34  ;;  %v5481_v18 = vpop.xlane.xlu1 %5480  ;;  %5585 = vadd.xlane.f32.xlu0 %v14778_v30  ;;  %v5135_v3 = vmul.f32 0.03125, %v14904_v17  ;;  %v15167_v1 = vsel %vm1004_vm2, %v5387_v62, 0.0  ;;  %v18470_v12 = vld [vmem:[#allocation65_spill] sm:$0xff] }
 0x333   : >> { %18468 = vst [vmem:[#allocation57_spill] sm:$0xff] %v15153_v40  ;;  %11289 = verf.f32 %v6741_v9  ;;  %v15158_v57 = vadd.f32 %v14924_v13, %v6351_v19  ;;  %v6224_v5 = vmul.f32 %v11280_v21, %v14886_v52  ;;  %v5837_v14 = vmul.f32 0.03125, %v5481_v18  ;;  %v15161_v37 = vpop.xlane.xlu0 %4936  ;;  %v18471_v19 = vld [vmem:[#allocation74_spill] sm:$0xff] }
 0x334   : >> { %v15164_v59 = vmul.f32 %v6994_v56, %v6610_v47  ;;  %11291 = vrsqrt.f32 %v5964_v60  ;;  %v15170_v30 = vsub.f32 %v18470_v12, %v5134_v48  ;;  %v6611_v17 = vmul.f32 0.5, %v15090_v49  ;;  %v18472_v62 = vld [vmem:[#allocation146_spill] sm:$0xff] }
 0x335   : >> { %v11282_v34 = vpop.eup %11281  ;;  %v6742_v9 = vmul.f32 0.70710677, %v15158_v57  ;;  %v6352_v29 = vmul.f32 %v6224_v5, %v18471_v19  ;;  %v5965_v21 = vadd.f32 1e-05, %v5837_v14  ;;  %5588 = vadd.xlane.f32.xlu1 %v14794_v26  ;;  %v5136_v56 = vmul.f32 0.03125, %v14946_v0  ;;  %v18473_v14 = vld [vmem:[#allocation67_spill] sm:$0xff] }
 0x336   : >> { %18469 = vst [vmem:[#allocation68_spill] sm:$0xff] %v15164_v59  ;;  %v11284_v18 = vpop.eup %11283  ;;  %v6995_v47 = vadd.f32 1.0, %v11282_v34  ;;  %v15177_v60 = vpop.xlane.xlu1 %4939  ;;  %5044 = vadd.xlane.f32.xlu0 %v18472_v62  ;;  %v15181_v48 = vsel %vm1004_vm2, %v5388_v46, 0.0  ;;  %v5389_v49 = vmul.f32 %v15153_v40, %v15153_v40  ;;  %v15190_v34 = vsub.f32 %v18473_v14, %v5135_v3 }
 0x337   : >> { %11293 = verf.f32 %v6742_v9  ;;  %v15184_v12 = vadd.f32 %v14924_v13, %v6352_v29  ;;  %v6225_v5 = vmul.f32 %v11284_v18, %v14886_v52  ;;  %v5484_v26 = vpop.xlane.xlu0 %5483  ;;  %v5137_v46 = vmul.f32 0.03125, %v14974_v36  ;;  %v18475_v29 = vld [vmem:[#allocation76_spill] sm:$0xff] }
 0x338   : >> { %v15192_v0 = vmul.f32 %v6995_v47, %v6611_v17  ;;  %11295 = vrsqrt.f32 %v5965_v21  ;;  %v5838_v19 = vmul.f32 0.03125, %v5484_v26  ;;  %v5390_v18 = vmul.f32 %v15170_v30, %v15170_v30 }
 0x339   : >> { %v11286_v62 = vpop.eup %11285  ;;  %v6743_v9 = vmul.f32 0.70710677, %v15184_v12  ;;  %v6353_v59 = vmul.f32 %v6225_v5, %v18475_v29  ;;  %5047 = vadd.xlane.f32.xlu1 %v18476_v39  ;;  %v15201_v3 = vsub.f32 %v18477_v42, %v5136_v56  ;;  %v6612_v17 = vmul.f32 0.5, %v15108_v22 }
 0x33a   : >> { %18474 = vst [vmem:[#allocation59_spill] sm:$0xff] %v15192_v0  ;;  %v11288_v40 = vpop.eup %11287  ;;  %v6996_v21 = vadd.f32 1.0, %v11286_v62  ;;  %v5966_v47 = vadd.f32 1e-05, %v5838_v19  ;;  %v5487_v26 = vpop.xlane.xlu1 %5486  ;;  %5591 = vadd.xlane.f32.xlu0 %v14816_v27  ;;  %v15214_v42 = vsel %vm1004_vm2, %v5389_v49, 0.0  ;;  %v5391_v22 = vmul.f32 %v15190_v34, %v15190_v34  ;;  %v18479_v27 = vld [vmem:[#allocation71_spill] sm:$0xff] }
 0x33b   : >> { %11297 = verf.f32 %v6743_v9  ;;  %v15206_v36 = vadd.f32 %v14924_v13, %v6353_v59  ;;  %v6226_v39 = vmul.f32 %v11288_v40, %v14886_v52  ;;  %v5839_v5 = vmul.f32 0.03125, %v5487_v26  ;;  %v15209_v14 = vpop.xlane.xlu0 %4942  ;;  %v18481_v62 = vld [vmem:[#allocation78_spill] sm:$0xff]  ;;  %v18485_v0 = vld [vmem:[#allocation75_spill] sm:$0xff] }
 0x33c   : >> { %v15211_v29 = vmul.f32 %v6996_v21, %v6612_v17  ;;  %11299 = vrsqrt.f32 %v5966_v47  ;;  %v15219_v19 = vsub.f32 %v18479_v27, %v5137_v46  ;;  %v6613_v21 = vmul.f32 0.5, %v15138_v35 }
 0x33d   : >> { %v11290_v56 = vpop.eup %11289  ;;  %v6744_v59 = vmul.f32 0.70710677, %v15206_v36  ;;  %v6354_v40 = vmul.f32 %v6226_v39, %v18481_v62  ;;  %v5967_v9 = vadd.f32 1e-05, %v5839_v5  ;;  %5594 = vadd.xlane.f32.xlu1 %v14846_v54  ;;  %v5138_v49 = vmul.f32 0.03125, %v15008_v11  ;;  %v18483_v62 = vld [vmem:[#allocation80_spill] sm:$0xff] }
 0x33e   : >> { %18478 = vst [vmem:[#allocation62_spill] sm:$0xff] %v15211_v29  ;;  %18480 = vst [vmem:[#allocation70_spill] sm:$0xff] %v15219_v19  ;;  %v11292_v17 = vpop.eup %11291  ;;  %v6997_v47 = vadd.f32 1.0, %v11290_v56  ;;  %v15226_v26 = vpop.xlane.xlu1 %4945  ;;  %5050 = vadd.xlane.f32.xlu0 %v14860_v20  ;;  %v15230_v46 = vsel %vm1004_vm2, %v5390_v18, 0.0  ;;  %v5392_v35 = vmul.f32 %v15201_v3, %v15201_v3  ;;  %v5139_v11 = vmul.f32 0.03125, %v15026_v32 }
 0x33f   : >> { %11301 = verf.f32 %v6744_v59  ;;  %v15233_v27 = vadd.f32 %v14924_v13, %v6354_v40  ;;  %v6227_v39 = vmul.f32 %v11292_v17, %v14886_v52  ;;  %v5490_v54 = vpop.xlane.xlu0 %5489  ;;  %v15245_v40 = vsel %vm1004_vm2, %v5391_v22, 0.0 }
 0x340   : >> { %v15238_v5 = vmul.f32 %v6997_v47, %v6613_v21  ;;  %11303 = vrsqrt.f32 %v5967_v9  ;;  %v5840_v56 = vmul.f32 0.03125, %v5490_v54  ;;  %v5393_v17 = vmul.f32 %v15219_v19, %v15219_v19  ;;  %v18484_v21 = vld [vmem:[#allocation73_spill] sm:$0xff] }
 0x341   : >> { %v11294_v20 = vpop.eup %11293  ;;  %v6745_v18 = vmul.f32 0.70710677, %v15233_v27  ;;  %v6355_v59 = vmul.f32 %v6227_v39, %v18483_v62  ;;  %5053 = vadd.xlane.f32.xlu1 %v14842_v10  ;;  %v15250_v47 = vsub.f32 %v18484_v21, %v5138_v49  ;;  %v6614_v32 = vmul.f32 0.5, %v15158_v57 }
 0x342   : >> { %18482 = vst [vmem:[#allocation142_spill] sm:$0xff] %v15238_v5  ;;  %v11296_v29 = vpop.eup %11295  ;;  %v6998_v9 = vadd.f32 1.0, %v11294_v20  ;;  %v5968_v54 = vadd.f32 1e-05, %v5840_v56  ;;  %v5493_v5 = vpop.xlane.xlu1 %5492  ;;  %5597 = vadd.xlane.f32.xlu0 %v14880_v58  ;;  %v15261_v19 = vsub.f32 %v18485_v0, %v5139_v11  ;;  %v15266_v57 = vsel %vm1004_vm2, %v5392_v35, 0.0 }
 0x343   : >> { %11305 = verf.f32 %v6745_v18  ;;  %v15255_v10 = vadd.f32 %v14924_v13, %v6355_v59  ;;  %v6228_v22 = vmul.f32 %v11296_v29, %v14886_v52  ;;  %v5841_v39 = vmul.f32 0.03125, %v5493_v5  ;;  %v15258_v62 = vpop.xlane.xlu0 %4948  ;;  %v18487_v18 = vld [vmem:[#allocation83_spill] sm:$0xff] }
 0x344   : >> { %v15263_v49 = vmul.f32 %v6998_v9, %v6614_v32  ;;  %11307 = vrsqrt.f32 %v5968_v54  ;;  %v5140_v58 = vmul.f32 0.03125, %v15060_v15  ;;  %v6615_v0 = vmul.f32 0.5, %v15184_v12 }
 0x345   : >> { %v11298_v56 = vpop.eup %11297  ;;  %v6746_v20 = vmul.f32 0.70710677, %v15255_v10  ;;  %v6356_v59 = vmul.f32 %v6228_v22, %v18487_v18  ;;  %v5969_v29 = vadd.f32 1e-05, %v5841_v39  ;;  %5600 = vadd.xlane.f32.xlu1 %v14889_v24  ;;  %v5141_v21 = vmul.f32 0.03125, %v15079_v55  ;;  %v18489_v39 = vld [vmem:[#allocation77_spill] sm:$0xff] }
 0x346   : >> { %18486 = vst [vmem:[#allocation72_spill] sm:$0xff] %v15263_v49  ;;  %v11300_v5 = vpop.eup %11299  ;;  %v6999_v11 = vadd.f32 1.0, %v11298_v56  ;;  %v15274_v32 = vpop.xlane.xlu1 %4951  ;;  %5603 = vadd.xlane.f32.xlu0 %v14898_v41  ;;  %v15278_v35 = vsel %vm1004_vm2, %v5393_v17, 0.0  ;;  %v5394_v12 = vmul.f32 %v15250_v47, %v15250_v47  ;;  %v5142_v55 = vmul.f32 0.03125, %v15111_v25 }
 0x347   : >> { %11309 = verf.f32 %v6746_v20  ;;  %v15281_v15 = vadd.f32 %v14924_v13, %v6356_v59  ;;  %v6229_v9 = vmul.f32 %v11300_v5, %v14886_v52  ;;  %v5496_v24 = vpop.xlane.xlu0 %5495  ;;  %v15290_v17 = vsub.f32 %v18489_v39, %v5140_v58  ;;  %v18490_v20 = vld [vmem:[#allocation84_spill] sm:$0xff] }
 0x348   : >> { %v15286_v54 = vmul.f32 %v6999_v11, %v6615_v0  ;;  %11311 = vrsqrt.f32 %v5969_v29  ;;  %v5842_v22 = vmul.f32 0.03125, %v5496_v24  ;;  %v5395_v59 = vmul.f32 %v15261_v19, %v15261_v19  ;;  %v18491_v0 = vld [vmem:[#allocation79_spill] sm:$0xff] }
 0x349   : >> { %v11302_v41 = vpop.eup %11301  ;;  %v6747_v56 = vmul.f32 0.70710677, %v15281_v15  ;;  %v6357_v18 = vmul.f32 %v6229_v9, %v18490_v20  ;;  %5606 = vadd.xlane.f32.xlu1 %v14901_v51  ;;  %v15298_v11 = vsub.f32 %v18491_v0, %v5141_v21  ;;  %v6616_v25 = vmul.f32 0.5, %v15206_v36  ;;  %v18493_v21 = vld [vmem:[#allocation81_spill] sm:$0xff] }
 0x34a   : >> { %18488 = vst [vmem:[#allocation63_spill] sm:$0xff] %v15286_v54  ;;  %v11304_v5 = vpop.eup %11303  ;;  %v7000_v29 = vadd.f32 1.0, %v11302_v41  ;;  %v5970_v24 = vadd.f32 1e-05, %v5842_v22  ;;  %v5499_v54 = vpop.xlane.xlu1 %5498  ;;  %5609 = vadd.xlane.f32.xlu0 %v14908_v8  ;;  %v15311_v0 = vsub.f32 %v18493_v21, %v5142_v55  ;;  %v15314_v36 = vsel %vm1004_vm2, %v5394_v12, 0.0 }
 0x34b   : >> { %11313 = verf.f32 %v6747_v56  ;;  %v15303_v58 = vadd.f32 %v14924_v13, %v6357_v18  ;;  %v6230_v51 = vmul.f32 %v11304_v5, %v14886_v52  ;;  %v5843_v9 = vmul.f32 0.03125, %v5499_v54  ;;  %v15306_v39 = vpop.xlane.xlu0 %4954  ;;  %v18495_v56 = vld [vmem:[#allocation87_spill] sm:$0xff] }
 0x34c   : >> { %v15308_v20 = vmul.f32 %v7000_v29, %v6616_v25  ;;  %18494 = vst [vmem:[#allocation74_spill] sm:$0xff] %v15311_v0  ;;  %11315 = vrsqrt.f32 %v5970_v24  ;;  %v5143_v8 = vmul.f32 0.03125, %v15126_v44  ;;  %v6617_v25 = vmul.f32 0.5, %v15233_v27 }
 0x34d   : >> { %v11306_v22 = vpop.eup %11305  ;;  %v6748_v41 = vmul.f32 0.70710677, %v15303_v58  ;;  %v6358_v18 = vmul.f32 %v6230_v51, %v18495_v56  ;;  %v5971_v5 = vadd.f32 1e-05, %v5843_v9  ;;  %5612 = vadd.xlane.f32.xlu1 %v14911_v53  ;;  %v15325_v12 = vsel %vm1004_vm2, %v5395_v59, 0.0 }
 0x34e   : >> { %18492 = vst [vmem:[#allocation65_spill] sm:$0xff] %v15308_v20  ;;  %v11308_v54 = vpop.eup %11307  ;;  %v7001_v29 = vadd.f32 1.0, %v11306_v22  ;;  %v15321_v55 = vpop.xlane.xlu1 %4957  ;;  %5615 = vadd.xlane.f32.xlu0 %v14914_v63  ;;  %v5396_v44 = vmul.f32 %v15290_v17, %v15290_v17  ;;  %v5397_v27 = vmul.f32 %v15298_v11, %v15298_v11  ;;  %v5398_v59 = vmul.f32 %v15311_v0, %v15311_v0  ;;  %v18497_v22 = vld [vmem:[#allocation82_spill] sm:$0xff] }
 0x34f   : >> { %11317 = verf.f32 %v6748_v41  ;;  %v15330_v24 = vadd.f32 %v14924_v13, %v6358_v18  ;;  %v6231_v53 = vmul.f32 %v11308_v54, %v14886_v52  ;;  %v5502_v51 = vpop.xlane.xlu0 %5501  ;;  %v15340_v56 = vsub.f32 %v18497_v22, %v5143_v8  ;;  %v18499_v54 = vld [vmem:[#allocation89_spill] sm:$0xff] }
 0x350   : >> { %v15335_v9 = vmul.f32 %v7001_v29, %v6617_v25  ;;  %11319 = vrsqrt.f32 %v5971_v5  ;;  %v5844_v63 = vmul.f32 0.03125, %v5502_v51  ;;  %v5144_v41 = vmul.f32 0.03125, %v15161_v37 }
 0x351   : >> { %v11310_v21 = vpop.eup %11309  ;;  %18498 = vst [vmem:[#allocation67_spill] sm:$0xff] %v15340_v56  ;;  %v6749_v18 = vmul.f32 0.70710677, %v15330_v24  ;;  %v6359_v20 = vmul.f32 %v6231_v53, %v18499_v54  ;;  %5618 = vadd.xlane.f32.xlu1 %v14927_v38  ;;  %v6618_v25 = vmul.f32 0.5, %v15255_v10  ;;  %v5145_v29 = vmul.f32 0.03125, %v15177_v60 }
 0x352   : >> { %18496 = vst [vmem:[#allocation146_spill] sm:$0xff] %v15335_v9  ;;  %v11312_v49 = vpop.eup %11311  ;;  %v7002_v5 = vadd.f32 1.0, %v11310_v21  ;;  %v5972_v51 = vadd.f32 1e-05, %v5844_v63  ;;  %v5505_v9 = vpop.xlane.xlu1 %5504  ;;  %5621 = vadd.xlane.f32.xlu0 %v14949_v6  ;;  %v15358_v10 = vsel %vm1004_vm2, %v5396_v44, 0.0  ;;  %v15361_v60 = vsel %vm1004_vm2, %v5397_v27, 0.0 }
 0x353   : >> { %11321 = verf.f32 %v6749_v18  ;;  %v15350_v8 = vadd.f32 %v14924_v13, %v6359_v20  ;;  %v6232_v37 = vmul.f32 %v11312_v49, %v14886_v52  ;;  %v5845_v22 = vmul.f32 0.03125, %v5505_v9  ;;  %v15353_v53 = vpop.xlane.xlu0 %4960  ;;  %v18501_v6 = vld [vmem:[#allocation85_spill] sm:$0xff]  ;;  %v18504_v44 = vld [vmem:[#allocation86_spill] sm:$0xff] }
 0x354   : >> { %v15355_v38 = vmul.f32 %v7002_v5, %v6618_v25  ;;  %11323 = vrsqrt.f32 %v5972_v51  ;;  %v15364_v21 = vsub.f32 %v18501_v6, %v5144_v41  ;;  %v18503_v18 = vld [vmem:[#allocation93_spill] sm:$0xff]  ;;  %v6619_v25 = vmul.f32 0.5, %v15281_v15 }
 0x355   : >> { %v11314_v63 = vpop.eup %11313  ;;  %v6750_v20 = vmul.f32 0.70710677, %v15350_v8  ;;  %v6360_v49 = vmul.f32 %v6232_v37, %v18503_v18  ;;  %v5973_v9 = vadd.f32 1e-05, %v5845_v22  ;;  %5624 = vadd.xlane.f32.xlu1 %v14958_v45  ;;  %v15371_v51 = vsub.f32 %v18504_v44, %v5145_v29  ;;  %v18507_v18 = vld [vmem:[#allocation95_spill] sm:$0xff]  ;;  %v18508_v44 = vld [vmem:[#allocation50_spill] sm:$0xff] }
 0x356   : >> { %18500 = vst [vmem:[#allocation76_spill] sm:$0xff] %v15355_v38  ;;  %18502 = vst [vmem:[#allocation144_spill] sm:$0xff] %v15364_v21  ;;  %v11316_v54 = vpop.eup %11315  ;;  %v7003_v5 = vadd.f32 1.0, %v11314_v63  ;;  %v15373_v27 = vpop.xlane.xlu1 %4963  ;;  %5627 = vadd.xlane.f32.xlu0 %v14978_v31  ;;  %v15377_v41 = vsel %vm1004_vm2, %v5398_v59, 0.0  ;;  %v5399_v15 = vmul.f32 %v15340_v56, %v15340_v56  ;;  %v5146_v29 = vmul.f32 0.03125, %v15209_v14  ;;  %v18520_v56 = vld [vmem:[#allocation137_spill] sm:$0xff] }
 0x357   : >> { %18505 = vst [vmem:[#allocation69_spill] sm:$0xff] %v15371_v51  ;;  %11325 = verf.f32 %v6750_v20  ;;  %v15380_v37 = vadd.f32 %v14924_v13, %v6360_v49  ;;  %v6233_v45 = vmul.f32 %v11316_v54, %v14886_v52  ;;  %v5508_v22 = vpop.xlane.xlu0 %5507  ;;  %v5147_v59 = vmul.f32 0.03125, %v15226_v26 }
 0x358   : >> { %v15385_v63 = vmul.f32 %v7003_v5, %v6619_v25  ;;  %11327 = vrsqrt.f32 %v5973_v9  ;;  %v5846_v6 = vmul.f32 0.03125, %v5508_v22  ;;  %v5400_v54 = vmul.f32 %v15364_v21, %v15364_v21  ;;  %v18514_v21 = vld [vmem:[#allocation99_spill] sm:$0xff] }
 0x359   : >> { %v11318_v31 = vpop.eup %11317  ;;  %v6751_v20 = vmul.f32 0.70710677, %v15380_v37  ;;  %v6361_v49 = vmul.f32 %v6233_v45, %v18507_v18  ;;  %5630 = vadd.xlane.f32.xlu1 %v18508_v44  ;;  %v6620_v25 = vmul.f32 0.5, %v15303_v58  ;;  %v5401_v26 = vmul.f32 %v15371_v51, %v15371_v51  ;;  %v18510_v58 = vld [vmem:[#allocation90_spill] sm:$0xff]  ;;  %v18512_v51 = vld [vmem:[#allocation92_spill] sm:$0xff] }
 0x35a   : >> { %18506 = vst [vmem:[#allocation71_spill] sm:$0xff] %v15385_v63  ;;  %v11320_v38 = vpop.eup %11319  ;;  %v7004_v5 = vadd.f32 1.0, %v11318_v31  ;;  %v5974_v63 = vadd.f32 1e-05, %v5846_v6  ;;  %v5511_v14 = vpop.xlane.xlu1 %5510  ;;  %5633 = vadd.xlane.f32.xlu0 %v15012_v33  ;;  %v15407_v31 = vsub.f32 %v18510_v58, %v5146_v29  ;;  %v15410_v33 = vsel %vm1004_vm2, %v5399_v15, 0.0  ;;  %v18515_v15 = vld [vmem:[#allocation61_spill] sm:$0xff] }
 0x35b   : >> { %11329 = verf.f32 %v6751_v20  ;;  %v15399_v9 = vadd.f32 %v14924_v13, %v6361_v49  ;;  %v6234_v45 = vmul.f32 %v11320_v38, %v14886_v52  ;;  %v5847_v22 = vmul.f32 0.03125, %v5511_v14  ;;  %v15402_v18 = vpop.xlane.xlu0 %4966 }
 0x35c   : >> { %v15404_v44 = vmul.f32 %v7004_v5, %v6620_v25  ;;  %18511 = vst [vmem:[#allocation80_spill] sm:$0xff] %v15407_v31  ;;  %11331 = vrsqrt.f32 %v5974_v63  ;;  %v15413_v20 = vsub.f32 %v18512_v51, %v5147_v59  ;;  %v6621_v5 = vmul.f32 0.5, %v15330_v24 }
 0x35d   : >> { %v11322_v6 = vpop.eup %11321  ;;  %v6752_v49 = vmul.f32 0.70710677, %v15399_v9  ;;  %v6362_v38 = vmul.f32 %v6234_v45, %v18514_v21  ;;  %v5975_v14 = vadd.f32 1e-05, %v5847_v22  ;;  %5636 = vadd.xlane.f32.xlu1 %v15015_v23  ;;  %v5148_v63 = vmul.f32 0.03125, %v15258_v62 }
 0x35e   : >> { %18509 = vst [vmem:[#allocation78_spill] sm:$0xff] %v15404_v44  ;;  %18513 = vst [vmem:[#allocation73_spill] sm:$0xff] %v15413_v20  ;;  %v11324_v25 = vpop.eup %11323  ;;  %v7005_v29 = vadd.f32 1.0, %v11322_v6  ;;  %v15420_v58 = vpop.xlane.xlu1 %4969  ;;  %5639 = vadd.xlane.f32.xlu0 %v18515_v15  ;;  %v15424_v51 = vsel %vm1004_vm2, %v5400_v54, 0.0  ;;  %v15431_v45 = vsel %vm1004_vm2, %v5401_v26, 0.0  ;;  %v5402_v22 = vmul.f32 %v15407_v31, %v15407_v31  ;;  %v18518_v44 = vld [vmem:[#allocation52_spill] sm:$0xff] }
 0x35f   : >> { %11333 = verf.f32 %v6752_v49  ;;  %v15427_v59 = vadd.f32 %v14924_v13, %v6362_v38  ;;  %v6235_v21 = vmul.f32 %v11324_v25, %v14886_v52  ;;  %v5514_v23 = vpop.xlane.xlu0 %5513  ;;  %v5149_v54 = vmul.f32 0.03125, %v15274_v32  ;;  %v18517_v38 = vld [vmem:[#allocation101_spill] sm:$0xff] }
 0x360   : >> { %v15433_v24 = vmul.f32 %v7005_v29, %v6621_v5  ;;  %11335 = vrsqrt.f32 %v5975_v14  ;;  %v5848_v62 = vmul.f32 0.03125, %v5514_v23  ;;  %v5403_v26 = vmul.f32 %v15413_v20, %v15413_v20  ;;  %v18519_v29 = vld [vmem:[#allocation96_spill] sm:$0xff] }
 0x361   : >> { %v11326_v6 = vpop.eup %11325  ;;  %v6753_v49 = vmul.f32 0.70710677, %v15427_v59  ;;  %v6363_v15 = vmul.f32 %v6235_v21, %v18517_v38  ;;  %5642 = vadd.xlane.f32.xlu1 %v18518_v44  ;;  %v6622_v5 = vmul.f32 0.5, %v15350_v8  ;;  %v15445_v23 = vsub.f32 %v18519_v29, %v5148_v63 }
 0x362   : >> { %18516 = vst [vmem:[#allocation75_spill] sm:$0xff] %v15433_v24  ;;  %v11328_v25 = vpop.eup %11327  ;;  %v7006_v14 = vadd.f32 1.0, %v11326_v6  ;;  %v5976_v24 = vadd.f32 1e-05, %v5848_v62  ;;  %v5517_v31 = vpop.xlane.xlu1 %5516  ;;  %5645 = vadd.xlane.f32.xlu0 %v18520_v56  ;;  %v5150_v8 = vmul.f32 0.03125, %v15306_v39  ;;  %v15458_v63 = vsel %vm1004_vm2, %v5402_v22, 0.0 }
 0x363   : >> { %11337 = verf.f32 %v6753_v49  ;;  %v15449_v32 = vadd.f32 %v14924_v13, %v6363_v15  ;;  %v6236_v44 = vmul.f32 %v11328_v25, %v14886_v52  ;;  %v5849_v21 = vmul.f32 0.03125, %v5517_v31  ;;  %v15452_v38 = vpop.xlane.xlu0 %4972  ;;  %v18522_v6 = vld [vmem:[#allocation98_spill] sm:$0xff]  ;;  %v18523_v15 = vld [vmem:[#allocation105_spill] sm:$0xff]  ;;  %v18524_v31 = vld [vmem:[#allocation27_spill] sm:$0xff] }
 0x364   : >> { %v15454_v20 = vmul.f32 %v7006_v14, %v6622_v5  ;;  %11339 = vrsqrt.f32 %v5976_v24  ;;  %v15461_v56 = vsub.f32 %v18522_v6, %v5149_v54  ;;  %v6623_v5 = vmul.f32 0.5, %v15380_v37 }
 0x365   : >> { %v11330_v62 = vpop.eup %11329  ;;  %v6754_v49 = vmul.f32 0.70710677, %v15449_v32  ;;  %v6364_v29 = vmul.f32 %v6236_v44, %v18523_v15  ;;  %v5977_v25 = vadd.f32 1e-05, %v5849_v21  ;;  %5648 = vadd.xlane.f32.xlu1 %v18524_v31  ;;  %v5151_v39 = vmul.f32 0.03125, %v15321_v55  ;;  %v18526_v55 = vld [vmem:[#allocation102_spill] sm:$0xff] }
 0x366   : >> { %18521 = vst [vmem:[#allocation83_spill] sm:$0xff] %v15454_v20  ;;  %v11332_v0 = vpop.eup %11331  ;;  %v7007_v14 = vadd.f32 1.0, %v11330_v62  ;;  %v15468_v24 = vpop.xlane.xlu1 %4975  ;;  %5651 = vadd.xlane.f32.xlu0 %v15083_v16  ;;  %v15472_v22 = vsel %vm1004_vm2, %v5403_v26, 0.0  ;;  %v5404_v37 = vmul.f32 %v15445_v23, %v15445_v23  ;;  %v15483_v6 = vsub.f32 %v18526_v55, %v5150_v8 }
 0x367   : >> { %11341 = verf.f32 %v6754_v49  ;;  %v15475_v54 = vadd.f32 %v14924_v13, %v6364_v29  ;;  %v6237_v44 = vmul.f32 %v11332_v0, %v14886_v52  ;;  %v5520_v21 = vpop.xlane.xlu0 %5519  ;;  %v5152_v15 = vmul.f32 0.03125, %v15353_v53  ;;  %v18527_v29 = vld [vmem:[#allocation107_spill] sm:$0xff] }
 0x368   : >> { %v15480_v62 = vmul.f32 %v7007_v14, %v6623_v5  ;;  %11343 = vrsqrt.f32 %v5977_v25  ;;  %v5850_v16 = vmul.f32 0.03125, %v5520_v21  ;;  %v5405_v52 = vmul.f32 %v15461_v56, %v15461_v56  ;;  %v18528_v14 = vld [vmem:[#allocation104_spill] sm:$0xff] }
 0x369   : >> { %v11334_v26 = vpop.eup %11333  ;;  %v6755_v49 = vmul.f32 0.70710677, %v15475_v54  ;;  %v6365_v31 = vmul.f32 %v6237_v44, %v18527_v29  ;;  %5654 = vadd.xlane.f32.xlu1 %v15099_v43  ;;  %v6624_v5 = vmul.f32 0.5, %v15399_v9  ;;  %v15493_v25 = vsub.f32 %v18528_v14, %v5151_v39  ;;  %v15500_v44 = vld [vmem:[%s12036_s24] ss:$0 sm:$0xff] }
 0x36a   : >> { %18525 = vst [vmem:[#allocation77_spill] sm:$0xff] %v15480_v62  ;;  %v11336_v0 = vpop.eup %11335  ;;  %v7008_v8 = vadd.f32 1.0, %v11334_v26  ;;  %v5978_v21 = vadd.f32 1e-05, %v5850_v16  ;;  %v5523_v55 = vpop.xlane.xlu1 %5522  ;;  %5657 = vadd.xlane.f32.xlu0 %v15130_v7  ;;  %v15508_v39 = vsel %vm1004_vm2, %v5404_v37, 0.0  ;;  %v5406_v7 = vmul.f32 %v15483_v6, %v15483_v6 }
 0x36b   : >> { %11345 = verf.f32 %v6755_v49  ;;  %v15497_v53 = vadd.f32 %v14924_v13, %v6365_v31  ;;  %v6238_v43 = vmul.f32 %v15500_v44, %v11336_v0  ;;  %v5851_v29 = vmul.f32 0.03125, %v5523_v55  ;;  %v15503_v62 = vpop.xlane.xlu0 %4978  ;;  %v18530_v13 = vld [vmem:[#allocation108_spill] sm:$0xff]  ;;  %v18532_v31 = vld [vmem:[#allocation111_spill] sm:$0xff] }
 0x36c   : >> { %v15505_v9 = vmul.f32 %v7008_v8, %v6624_v5  ;;  %11347 = vrsqrt.f32 %v5978_v21  ;;  %v15513_v26 = vsub.f32 %v18530_v13, %v5152_v15  ;;  %v6625_v8 = vmul.f32 0.5, %v15427_v59  ;;  %v15527_v13 = vld [vmem:[%s12041_s15] ss:$0 sm:$0xff] }
 0x36d   : >> { %v11338_v16 = vpop.eup %11337  ;;  %v6756_v49 = vmul.f32 0.70710677, %v15497_v53  ;;  %v6366_v0 = vmul.f32 %v6238_v43, %v18532_v31  ;;  %v5979_v14 = vadd.f32 1e-05, %v5851_v29  ;;  %5660 = vadd.xlane.f32.xlu1 %v15133_v2  ;;  %v5153_v21 = vmul.f32 0.03125, %v15373_v27  ;;  %v18534_v31 = vld [vmem:[#allocation113_spill] sm:$0xff] }
 0x36e   : >> { %18529 = vst [vmem:[#allocation84_spill] sm:$0xff] %v15505_v9  ;;  %18531 = vst [vmem:[#allocation79_spill] sm:$0xff] %v15513_v26  ;;  %v11340_v5 = vpop.eup %11339  ;;  %v7009_v37 = vadd.f32 1.0, %v11338_v16  ;;  %v15520_v55 = vpop.xlane.xlu1 %4981  ;;  %5663 = vadd.xlane.f32.xlu0 %v15142_v28  ;;  %v15524_v15 = vsel %vm1004_vm2, %v5405_v52, 0.0  ;;  %v5407_v59 = vmul.f32 %v15493_v25, %v15493_v25  ;;  %v5154_v16 = vmul.f32 0.03125, %v15402_v18  ;;  %v18535_v18 = vld [vmem:[#allocation110_spill] sm:$0xff] }
 0x36f   : >> { %11349 = verf.f32 %v6756_v49  ;;  %v15530_v43 = vadd.f32 %v15527_v13, %v6366_v0  ;;  %v6239_v2 = vmul.f32 %v15500_v44, %v11340_v5  ;;  %v5526_v29 = vpop.xlane.xlu0 %5525  ;;  %v15542_v0 = vsel %vm1004_vm2, %v5406_v7, 0.0 }
 0x370   : >> { %v15535_v27 = vmul.f32 %v7009_v37, %v6625_v8  ;;  %11351 = vrsqrt.f32 %v5979_v14  ;;  %v5852_v28 = vmul.f32 0.03125, %v5526_v29  ;;  %v5408_v5 = vmul.f32 %v15513_v26, %v15513_v26 }
 0x371   : >> { %v11342_v52 = vpop.eup %11341  ;;  %v6757_v49 = vmul.f32 0.70710677, %v15530_v43  ;;  %v6367_v9 = vmul.f32 %v6239_v2, %v18534_v31  ;;  %5666 = vadd.xlane.f32.xlu1 %v15167_v1  ;;  %v6626_v8 = vmul.f32 0.5, %v15449_v32  ;;  %v15548_v14 = vsub.f32 %v18535_v18, %v5153_v21  ;;  %v18537_v32 = vld [vmem:[#allocation114_spill] sm:$0xff] }
 0x372   : >> { %18533 = vst [vmem:[#allocation81_spill] sm:$0xff] %v15535_v27  ;;  %v11344_v20 = vpop.eup %11343  ;;  %v7010_v37 = vadd.f32 1.0, %v11342_v52  ;;  %v5980_v29 = vadd.f32 1e-05, %v5852_v28  ;;  %v5529_v27 = vpop.xlane.xlu1 %5528  ;;  %5669 = vadd.xlane.f32.xlu0 %v15181_v48  ;;  %v15560_v52 = vsub.f32 %v18537_v32, %v5154_v16  ;;  %v15563_v21 = vsel %vm1004_vm2, %v5407_v59, 0.0 }
 0x373   : >> { %11353 = verf.f32 %v6757_v49  ;;  %v15552_v1 = vadd.f32 %v15527_v13, %v6367_v9  ;;  %v6240_v7 = vmul.f32 %v15500_v44, %v11344_v20  ;;  %v5853_v2 = vmul.f32 0.03125, %v5529_v27  ;;  %v15555_v31 = vpop.xlane.xlu0 %4984  ;;  %v18538_v49 = vld [vmem:[#allocation117_spill] sm:$0xff] }
 0x374   : >> { %v15557_v26 = vmul.f32 %v7010_v37, %v6626_v8  ;;  %11355 = vrsqrt.f32 %v5980_v29  ;;  %v5155_v48 = vmul.f32 0.03125, %v15420_v58  ;;  %v6627_v8 = vmul.f32 0.5, %v15475_v54 }
 0x375   : >> { %v11346_v28 = vpop.eup %11345  ;;  %v6758_v9 = vmul.f32 0.70710677, %v15552_v1  ;;  %v6368_v18 = vmul.f32 %v6240_v7, %v18538_v49  ;;  %v5981_v20 = vadd.f32 1e-05, %v5853_v2  ;;  %5672 = vadd.xlane.f32.xlu1 %v15214_v42  ;;  %v5156_v16 = vmul.f32 0.03125, %v15452_v38  ;;  %v18541_v49 = vld [vmem:[#allocation118_spill] sm:$0xff] }
 0x376   : >> { %18536 = vst [vmem:[#allocation87_spill] sm:$0xff] %v15557_v26  ;;  %v11348_v27 = vpop.eup %11347  ;;  %v7011_v37 = vadd.f32 1.0, %v11346_v28  ;;  %v15571_v29 = vpop.xlane.xlu1 %4987  ;;  %5675 = vadd.xlane.f32.xlu0 %v15230_v46  ;;  %v15575_v59 = vsel %vm1004_vm2, %v5408_v5, 0.0  ;;  %v5409_v54 = vmul.f32 %v15548_v14, %v15548_v14  ;;  %v5157_v38 = vmul.f32 0.03125, %v15468_v24  ;;  %v18540_v28 = vld [vmem:[#allocation116_spill] sm:$0xff]  ;;  %v18542_v24 = vld [vmem:[#allocation119_spill] sm:$0xff] }
 0x377   : >> { %11357 = verf.f32 %v6758_v9  ;;  %v15578_v58 = vadd.f32 %v15527_v13, %v6368_v18  ;;  %v6241_v7 = vmul.f32 %v15500_v44, %v11348_v27  ;;  %v5532_v42 = vpop.xlane.xlu0 %5531  ;;  %v15587_v5 = vsub.f32 %v18540_v28, %v5155_v48 }
 0x378   : >> { %v15583_v2 = vmul.f32 %v7011_v37, %v6627_v8  ;;  %11359 = vrsqrt.f32 %v5981_v20  ;;  %v5854_v32 = vmul.f32 0.03125, %v5532_v42  ;;  %v5410_v27 = vmul.f32 %v15560_v52, %v15560_v52 }
 0x379   : >> { %v11350_v46 = vpop.eup %11349  ;;  %v6759_v9 = vmul.f32 0.70710677, %v15578_v58  ;;  %v6369_v18 = vmul.f32 %v6241_v7, %v18541_v49  ;;  %5678 = vadd.xlane.f32.xlu1 %v15245_v40  ;;  %v6628_v8 = vmul.f32 0.5, %v15497_v53  ;;  %v15596_v20 = vsub.f32 %v18542_v24, %v5156_v16  ;;  %v18545_v53 = vld [vmem:[#allocation120_spill] sm:$0xff] }
 0x37a   : >> { %18539 = vst [vmem:[#allocation82_spill] sm:$0xff] %v15583_v2  ;;  %v11352_v26 = vpop.eup %11351  ;;  %v7012_v37 = vadd.f32 1.0, %v11350_v46  ;;  %v5982_v42 = vadd.f32 1e-05, %v5854_v32  ;;  %v5535_v2 = vpop.xlane.xlu1 %5534  ;;  %5681 = vadd.xlane.f32.xlu0 %v15266_v57  ;;  %v15608_v46 = vsub.f32 %v18545_v53, %v5157_v38  ;;  %v15611_v16 = vsel %vm1004_vm2, %v5409_v54, 0.0 }
 0x37b   : >> { %18543 = vst [vmem:[#allocation89_spill] sm:$0xff] %v15596_v20  ;;  %11361 = verf.f32 %v6759_v9  ;;  %v15600_v48 = vadd.f32 %v15527_v13, %v6369_v18  ;;  %v6242_v40 = vmul.f32 %v15500_v44, %v11352_v26  ;;  %v5855_v7 = vmul.f32 0.03125, %v5535_v2  ;;  %v15603_v28 = vpop.xlane.xlu0 %4990  ;;  %v18546_v9 = vld [vmem:[#allocation121_spill] sm:$0xff] }
 0x37c   : >> { %v15605_v49 = vmul.f32 %v7012_v37, %v6628_v8  ;;  %11363 = vrsqrt.f32 %v5982_v42  ;;  %v5158_v24 = vmul.f32 0.03125, %v15503_v62  ;;  %v6629_v8 = vmul.f32 0.5, %v15530_v43 }
 0x37d   : >> { %v11354_v32 = vpop.eup %11353  ;;  %v6760_v57 = vmul.f32 0.70710677, %v15600_v48  ;;  %v6370_v18 = vmul.f32 %v6242_v40, %v18546_v9  ;;  %v5983_v26 = vadd.f32 1e-05, %v5855_v7  ;;  %5684 = vadd.xlane.f32.xlu1 %v15278_v35  ;;  %v15622_v54 = vsel %vm1004_vm2, %v5410_v27, 0.0 }
 0x37e   : >> { %18544 = vst [vmem:[#allocation85_spill] sm:$0xff] %v15605_v49  ;;  %v11356_v2 = vpop.eup %11355  ;;  %v7013_v37 = vadd.f32 1.0, %v11354_v32  ;;  %v15618_v38 = vpop.xlane.xlu1 %4993  ;;  %5687 = vadd.xlane.f32.xlu0 %v15314_v36  ;;  %v5411_v42 = vmul.f32 %v15587_v5, %v15587_v5  ;;  %v5412_v43 = vmul.f32 %v15596_v20, %v15596_v20  ;;  %v5413_v27 = vmul.f32 %v15608_v46, %v15608_v46 }
 0x37f   : >> { %11365 = verf.f32 %v6760_v57  ;;  %v15627_v62 = vadd.f32 %v15527_v13, %v6370_v18  ;;  %v6243_v35 = vmul.f32 %v15500_v44, %v11356_v2  ;;  %v5538_v40 = vpop.xlane.xlu0 %5537  ;;  %v18548_v57 = vld [vmem:[#allocation123_spill] sm:$0xff]  ;;  %v5159_v18 = vmul.f32 0.03125, %v15520_v55  ;;  %v18549_v2 = vld [vmem:[#allocation122_spill] sm:$0xff] }
 0x380   : >> { %v15632_v7 = vmul.f32 %v7013_v37, %v6629_v8  ;;  %11367 = vrsqrt.f32 %v5983_v26  ;;  %v5856_v36 = vmul.f32 0.03125, %v5538_v40  ;;  %v15638_v9 = vsub.f32 %v18548_v57, %v5158_v24 }
 0x381   : >> { %v11358_v53 = vpop.eup %11357  ;;  %v6761_v32 = vmul.f32 0.70710677, %v15627_v62  ;;  %v6371_v49 = vmul.f32 %v6243_v35, %v18549_v2  ;;  %5690 = vadd.xlane.f32.xlu1 %v15325_v12  ;;  %v6630_v8 = vmul.f32 0.5, %v15552_v1  ;;  %v5160_v37 = vmul.f32 0.03125, %v15555_v31 }
 0x382   : >> { %18547 = vst [vmem:[#allocation93_spill] sm:$0xff] %v15632_v7  ;;  %v11360_v20 = vpop.eup %11359  ;;  %v7014_v26 = vadd.f32 1.0, %v11358_v53  ;;  %v5984_v40 = vadd.f32 1e-05, %v5856_v36  ;;  %v5541_v7 = vpop.xlane.xlu1 %5540  ;;  %5693 = vadd.xlane.f32.xlu0 %v15358_v10  ;;  %v15655_v1 = vsel %vm1004_vm2, %v5411_v42, 0.0  ;;  %v15658_v31 = vsel %vm1004_vm2, %v5412_v43, 0.0 }
 0x383   : >> { %11369 = verf.f32 %v6761_v32  ;;  %v15647_v24 = vadd.f32 %v15527_v13, %v6371_v49  ;;  %v6244_v55 = vmul.f32 %v15500_v44, %v11360_v20  ;;  %v5857_v57 = vmul.f32 0.03125, %v5541_v7  ;;  %v15650_v35 = vpop.xlane.xlu0 %4996  ;;  %v18551_v10 = vld [vmem:[#allocation124_spill] sm:$0xff]  ;;  %v18553_v32 = vld [vmem:[#allocation125_spill] sm:$0xff] }
 0x384   : >> { %v15652_v12 = vmul.f32 %v7014_v26, %v6630_v8  ;;  %11371 = vrsqrt.f32 %v5984_v40  ;;  %v15661_v53 = vsub.f32 %v18551_v10, %v5159_v18  ;;  %v6631_v8 = vmul.f32 0.5, %v15578_v58  ;;  %v18554_v42 = vld [vmem:[#allocation129_spill] sm:$0xff] }
 0x385   : >> { %v11362_v36 = vpop.eup %11361  ;;  %v6762_v49 = vmul.f32 0.70710677, %v15647_v24  ;;  %v6372_v20 = vmul.f32 %v6244_v55, %v18553_v32  ;;  %v5985_v7 = vadd.f32 1e-05, %v5857_v57  ;;  %5696 = vadd.xlane.f32.xlu1 %v15361_v60  ;;  %v15668_v40 = vsub.f32 %v18554_v42, %v5160_v37  ;;  %v18557_v32 = vld [vmem:[#allocation126_spill] sm:$0xff] }
 0x386   : >> { %18550 = vst [vmem:[#allocation86_spill] sm:$0xff] %v15652_v12  ;;  %18552 = vst [vmem:[#allocation95_spill] sm:$0xff] %v15661_v53  ;;  %v11364_v2 = vpop.eup %11363  ;;  %v7015_v26 = vadd.f32 1.0, %v11362_v36  ;;  %v15670_v43 = vpop.xlane.xlu1 %4999  ;;  %5699 = vadd.xlane.f32.xlu0 %v15377_v41  ;;  %v15674_v18 = vsel %vm1004_vm2, %v5413_v27, 0.0  ;;  %v5414_v58 = vmul.f32 %v15638_v9, %v15638_v9  ;;  %v5161_v37 = vmul.f32 0.03125, %v15571_v29  ;;  %v18559_v12 = vld [vmem:[#allocation128_spill] sm:$0xff] }
 0x387   : >> { %18555 = vst [vmem:[#allocation50_spill] sm:$0xff] %v15668_v40  ;;  %11373 = verf.f32 %v6762_v49  ;;  %v15677_v55 = vadd.f32 %v15527_v13, %v6372_v20  ;;  %v6245_v60 = vmul.f32 %v15500_v44, %v11364_v2  ;;  %v5544_v57 = vpop.xlane.xlu0 %5543  ;;  %v5162_v20 = vmul.f32 0.03125, %v15603_v28 }
 0x388   : >> { %v15682_v36 = vmul.f32 %v7015_v26, %v6631_v8  ;;  %11375 = vrsqrt.f32 %v5985_v7  ;;  %v5858_v10 = vmul.f32 0.03125, %v5544_v57  ;;  %v5415_v2 = vmul.f32 %v15661_v53, %v15661_v53 }
 0x389   : >> { %v11366_v41 = vpop.eup %11365  ;;  %v6763_v27 = vmul.f32 0.70710677, %v15677_v55  ;;  %v6373_v49 = vmul.f32 %v6245_v60, %v18557_v32  ;;  %5702 = vadd.xlane.f32.xlu1 %v15410_v33  ;;  %v6632_v8 = vmul.f32 0.5, %v15600_v48  ;;  %v5416_v7 = vmul.f32 %v15668_v40, %v15668_v40 }
 0x38a   : >> { %18556 = vst [vmem:[#allocation90_spill] sm:$0xff] %v15682_v36  ;;  %v11368_v42 = vpop.eup %11367  ;;  %v7016_v26 = vadd.f32 1.0, %v11366_v41  ;;  %v5986_v36 = vadd.f32 1e-05, %v5858_v10  ;;  %v5547_v29 = vpop.xlane.xlu1 %5546  ;;  %5705 = vadd.xlane.f32.xlu0 %v15424_v51  ;;  %v15702_v48 = vsub.f32 %v18559_v12, %v5161_v37  ;;  %v15705_v10 = vsel %vm1004_vm2, %v5414_v58, 0.0 }
 0x38b   : >> { %11377 = verf.f32 %v6763_v27  ;;  %v15696_v60 = vadd.f32 %v15527_v13, %v6373_v49  ;;  %v6246_v33 = vmul.f32 %v15500_v44, %v11368_v42  ;;  %v5859_v28 = vmul.f32 0.03125, %v5547_v29  ;;  %v5003_v57 = vpop.xlane.xlu0 %5002  ;;  %v18560_v27 = vld [vmem:[#allocation127_spill] sm:$0xff] }
 0x38c   : >> { %v15699_v32 = vmul.f32 %v7016_v26, %v6632_v8  ;;  %11379 = vrsqrt.f32 %v5986_v36  ;;  %v18561_v49 = vld [vmem:[#allocation91_spill] sm:$0xff]  ;;  %v6633_v26 = vmul.f32 0.5, %v15627_v62  ;;  %v5163_v36 = vmul.f32 0.03125, %v15618_v38 }
 0x38d   : >> { %v11370_v51 = vpop.eup %11369  ;;  %v6764_v41 = vmul.f32 0.70710677, %v15696_v60  ;;  %v6374_v40 = vmul.f32 %v6246_v33, %v18560_v27  ;;  %v15710_v53 = vsub.f32 %v18561_v49, %v5162_v20  ;;  %v5987_v42 = vadd.f32 1e-05, %v5859_v28  ;;  %5708 = vadd.xlane.f32.xlu1 %v15431_v45 }
 0x38e   : >> { %18558 = vst [vmem:[#allocation92_spill] sm:$0xff] %v15699_v32  ;;  %v11372_v8 = vpop.eup %11371  ;;  %v7017_v12 = vadd.f32 1.0, %v11370_v51  ;;  %v5006_v37 = vpop.xlane.xlu1 %5005  ;;  %5711 = vadd.xlane.f32.xlu0 %v15458_v63  ;;  %v15717_v58 = vsel %vm1004_vm2, %v5415_v2, 0.0  ;;  %v15724_v45 = vsel %vm1004_vm2, %v5416_v7, 0.0  ;;  %v5417_v63 = vmul.f32 %v15702_v48, %v15702_v48  ;;  %v18563_v51 = vld [vmem:[#allocation28_spill] sm:$0xff] }
 0x38f   : >> { %11381 = verf.f32 %v6764_v41  ;;  %v15720_v29 = vadd.f32 %v15527_v13, %v6374_v40  ;;  %v6247_v20 = vmul.f32 %v15500_v44, %v11372_v8  ;;  %v5550_v33 = vpop.xlane.xlu0 %5549  ;;  %v5164_v40 = vmul.f32 0.03125, %v15650_v35  ;;  %v18564_v8 = vld [vmem:[#allocation88_spill] sm:$0xff] }
 0x390   : >> { %v15726_v62 = vmul.f32 %v7017_v12, %v6633_v26  ;;  %11383 = vrsqrt.f32 %v5987_v42  ;;  %v5860_v38 = vmul.f32 0.03125, %v5550_v33  ;;  %v5418_v7 = vmul.f32 %v15710_v53, %v15710_v53 }
 0x391   : >> { %v11374_v28 = vpop.eup %11373  ;;  %v6765_v2 = vmul.f32 0.70710677, %v15720_v29  ;;  %v6375_v41 = vmul.f32 %v6247_v20, %v18563_v51  ;;  %5714 = vadd.xlane.f32.xlu1 %v15472_v22  ;;  %v6634_v49 = vmul.f32 0.5, %v15647_v24  ;;  %v15738_v26 = vsub.f32 %v18564_v8, %v5163_v36  ;;  %v18567_v8 = vld [vmem:[#allocation131_spill] sm:$0xff] }
 0x392   : >> { %18562 = vst [vmem:[#allocation99_spill] sm:$0xff] %v15726_v62  ;;  %v11376_v27 = vpop.eup %11375  ;;  %v7018_v42 = vadd.f32 1.0, %v11374_v28  ;;  %v5988_v12 = vadd.f32 1e-05, %v5860_v38  ;;  %v5553_v33 = vpop.xlane.xlu1 %5552  ;;  %5717 = vadd.xlane.f32.xlu0 %v15508_v39  ;;  %v5165_v24 = vmul.f32 0.03125, %v15670_v43  ;;  %v15749_v36 = vsel %vm1004_vm2, %v5417_v63, 0.0 }
 0x393   : >> { %11385 = verf.f32 %v6765_v2  ;;  %v15742_v20 = vadd.f32 %v15527_v13, %v6375_v41  ;;  %v6248_v22 = vmul.f32 %v15500_v44, %v11376_v27  ;;  %v5861_v35 = vmul.f32 0.03125, %v5553_v33  ;;  %v5009_v51 = vpop.xlane.xlu0 %5008  ;;  %v18566_v39 = vld [vmem:[#allocation29_spill] sm:$0xff] }
 0x394   : >> { %v15745_v62 = vmul.f32 %v7018_v42, %v6634_v49  ;;  %11387 = vrsqrt.f32 %v5988_v12  ;;  %v15754_v41 = vsub.f32 %v18567_v8, %v5164_v40  ;;  %v6635_v49 = vmul.f32 0.5, %v15677_v55  ;;  %v18569_v55 = vld [vmem:[#allocation130_spill] sm:$0xff] }
 0x395   : >> { %v11378_v38 = vpop.eup %11377  ;;  %v6766_v28 = vmul.f32 0.70710677, %v15742_v20  ;;  %v6376_v2 = vmul.f32 %v6248_v22, %v18566_v39  ;;  %v5989_v32 = vadd.f32 1e-05, %v5861_v35  ;;  %5720 = vadd.xlane.f32.xlu1 %v15524_v15  ;;  %v5166_v43 = vmul.f32 0.03125, %v5003_v57 }
 0x396   : >> { %18565 = vst [vmem:[#allocation61_spill] sm:$0xff] %v15745_v62  ;;  %v11380_v27 = vpop.eup %11379  ;;  %v7019_v42 = vadd.f32 1.0, %v11378_v38  ;;  %v5012_v12 = vpop.xlane.xlu1 %5011  ;;  %5723 = vadd.xlane.f32.xlu0 %v15542_v0  ;;  %v15760_v63 = vsel %vm1004_vm2, %v5418_v7, 0.0  ;;  %v5419_v15 = vmul.f32 %v15738_v26, %v15738_v26  ;;  %v15771_v57 = vsub.f32 %v18569_v55, %v5165_v24 }
 0x397   : >> { %11389 = verf.f32 %v6766_v28  ;;  %v15763_v33 = vadd.f32 %v15527_v13, %v6376_v2  ;;  %v6249_v40 = vmul.f32 %v15500_v44, %v11380_v27  ;;  %v5556_v22 = vpop.xlane.xlu0 %5555  ;;  %v18570_v28 = vld [vmem:[#allocation30_spill] sm:$0xff]  ;;  %v5167_v2 = vmul.f32 0.03125, %v5006_v37 }
 0x398   : >> { %v15768_v35 = vmul.f32 %v7019_v42, %v6635_v49  ;;  %11391 = vrsqrt.f32 %v5989_v32  ;;  %v5862_v0 = vmul.f32 0.03125, %v5556_v22  ;;  %v5420_v8 = vmul.f32 %v15754_v41, %v15754_v41 }
 0x399   : >> { %v11382_v38 = vpop.eup %11381  ;;  %v6767_v7 = vmul.f32 0.70710677, %v15763_v33  ;;  %v6377_v39 = vmul.f32 %v6249_v40, %v18570_v28  ;;  %5726 = vadd.xlane.f32.xlu1 %v15563_v21  ;;  %v6636_v49 = vmul.f32 0.5, %v15696_v60  ;;  %v15790_v60 = vsel %vm1004_vm2, %v5419_v15, 0.0 }
 0x39a   : >> { %18568 = vst [vmem:[#allocation101_spill] sm:$0xff] %v15768_v35  ;;  %v11384_v27 = vpop.eup %11383  ;;  %v7020_v42 = vadd.f32 1.0, %v11382_v38  ;;  %v18571_v35 = vld [vmem:[#allocation97_spill] sm:$0xff]  ;;  %v5990_v32 = vadd.f32 1e-05, %v5862_v0  ;;  %v5559_v22 = vpop.xlane.xlu1 %5558  ;;  %5729 = vadd.xlane.f32.xlu0 %v15575_v59  ;;  %v18573_v0 = vld [vmem:[#allocation31_spill] sm:$0xff] }
 0x39b   : >> { %v15780_v24 = vsub.f32 %v18571_v35, %v5166_v43  ;;  %11393 = verf.f32 %v6767_v7  ;;  %v15784_v40 = vadd.f32 %v15527_v13, %v6377_v39  ;;  %v6250_v21 = vmul.f32 %v15500_v44, %v11384_v27  ;;  %v5015_v55 = vpop.xlane.xlu0 %5014  ;;  %v18574_v7 = vld [vmem:[#allocation94_spill] sm:$0xff] }
 0x39c   : >> { %v5863_v37 = vmul.f32 0.03125, %v5559_v22  ;;  %v15787_v28 = vmul.f32 %v7020_v42, %v6636_v49  ;;  %11395 = vrsqrt.f32 %v5990_v32  ;;  %v5421_v43 = vmul.f32 %v15771_v57, %v15771_v57 }
 0x39d   : >> { %v11386_v35 = vpop.eup %11385  ;;  %v6768_v59 = vmul.f32 0.70710677, %v15784_v40  ;;  %v6378_v38 = vmul.f32 %v6250_v21, %v18573_v0  ;;  %v15797_v39 = vsub.f32 %v18574_v7, %v5167_v2  ;;  %5732 = vadd.xlane.f32.xlu1 %v15611_v16  ;;  %v6637_v42 = vmul.f32 0.5, %v15720_v29 }
 0x39e   : >> { %18572 = vst [vmem:[#allocation52_spill] sm:$0xff] %v15787_v28  ;;  %v5991_v27 = vadd.f32 1e-05, %v5863_v37  ;;  %v11388_v49 = vpop.eup %11387  ;;  %v7021_v32 = vadd.f32 1.0, %v11386_v35  ;;  %v5168_v15 = vmul.f32 0.03125, %v5009_v51  ;;  %v5018_v22 = vpop.xlane.xlu1 %5017  ;;  %5735 = vadd.xlane.f32.xlu0 %v15622_v54  ;;  %v15803_v28 = vsel %vm1004_vm2, %v5420_v8, 0.0 }
 0x39f   : >> { %18575 = vst [vmem:[#allocation96_spill] sm:$0xff] %v15797_v39  ;;  %11397 = verf.f32 %v6768_v59  ;;  %v15806_v21 = vadd.f32 %v15527_v13, %v6378_v38  ;;  %v6251_v2 = vmul.f32 %v15500_v44, %v11388_v49  ;;  %v5562_v37 = vpop.xlane.xlu0 %5561  ;;  %v5422_v16 = vmul.f32 %v15780_v24, %v15780_v24  ;;  %v18577_v8 = vld [vmem:[#allocation32_spill] sm:$0xff] }
 0x3a0   : >> { %v15811_v0 = vmul.f32 %v7021_v32, %v6637_v42  ;;  %v5169_v29 = vmul.f32 0.03125, %v5012_v12  ;;  %11399 = vrsqrt.f32 %v5991_v27  ;;  %v5864_v51 = vmul.f32 0.03125, %v5562_v37  ;;  %v18578_v12 = vld [vmem:[#allocation133_spill] sm:$0xff] }
 0x3a1   : >> { %v11390_v35 = vpop.eup %11389  ;;  %v6769_v54 = vmul.f32 0.70710677, %v15806_v21  ;;  %v6379_v7 = vmul.f32 %v6251_v2, %v18577_v8  ;;  %5738 = vadd.xlane.f32.xlu1 %v15655_v1  ;;  %v15817_v59 = vsel %vm1004_vm2, %v5421_v43, 0.0  ;;  %v5423_v38 = vmul.f32 %v15797_v39, %v15797_v39  ;;  %v18581_v39 = vld [vmem:[#allocation132_spill] sm:$0xff] }
 0x3a2   : >> { %18576 = vst [vmem:[#allocation137_spill] sm:$0xff] %v15811_v0  ;;  %v11392_v49 = vpop.eup %11391  ;;  %v6638_v42 = vmul.f32 0.5, %v15742_v20  ;;  %v7022_v32 = vadd.f32 1.0, %v11390_v35  ;;  %v15823_v27 = vsub.f32 %v18578_v12, %v5168_v15  ;;  %v5992_v37 = vadd.f32 1e-05, %v5864_v51  ;;  %v5565_v0 = vpop.xlane.xlu1 %5564  ;;  %5741 = vadd.xlane.f32.xlu0 %v15658_v31  ;;  %v18583_v35 = vld [vmem:[#allocation33_spill] sm:$0xff] }
 0x3a3   : >> { %11401 = verf.f32 %v6769_v54  ;;  %v15827_v1 = vadd.f32 %v15527_v13, %v6379_v7  ;;  %v6252_v43 = vmul.f32 %v15500_v44, %v11392_v49  ;;  %v5865_v2 = vmul.f32 0.03125, %v5565_v0  ;;  %v5021_v8 = vpop.xlane.xlu0 %5020 }
 0x3a4   : >> { %18579 = vst [vmem:[#allocation98_spill] sm:$0xff] %v15823_v27  ;;  %v15830_v62 = vmul.f32 %v7022_v32, %v6638_v42  ;;  %v15833_v20 = vsub.f32 %v18581_v39, %v5169_v29  ;;  %11403 = vrsqrt.f32 %v5992_v37  ;;  %v15836_v15 = vsel %vm1004_vm2, %v5422_v16, 0.0 }
 0x3a5   : >> { %v11394_v51 = vpop.eup %11393  ;;  %v6770_v31 = vmul.f32 0.70710677, %v15827_v1  ;;  %v6380_v54 = vmul.f32 %v6252_v43, %v18583_v35  ;;  %v5993_v7 = vadd.f32 1e-05, %v5865_v2  ;;  %5744 = vadd.xlane.f32.xlu1 %v15674_v18  ;;  %v15842_v0 = vsel %vm1004_vm2, %v5423_v38, 0.0 }
 0x3a6   : >> { %18580 = vst [vmem:[#allocation105_spill] sm:$0xff] %v15830_v62  ;;  %18582 = vst [vmem:[#allocation27_spill] sm:$0xff] %v15833_v20  ;;  %v11396_v49 = vpop.eup %11395  ;;  %v6639_v42 = vmul.f32 0.5, %v15763_v33  ;;  %v7023_v39 = vadd.f32 1.0, %v11394_v51  ;;  %v5170_v29 = vmul.f32 0.03125, %v5015_v55  ;;  %v5171_v32 = vmul.f32 0.03125, %v5018_v22  ;;  %v5024_v12 = vpop.xlane.xlu1 %5023  ;;  %5747 = vadd.xlane.f32.xlu0 %v15705_v10 }
 0x3a7   : >> { %11405 = verf.f32 %v6770_v31  ;;  %v15847_v16 = vadd.f32 %v15527_v13, %v6380_v54  ;;  %v6253_v37 = vmul.f32 %v15500_v44, %v11396_v49  ;;  %v5568_v43 = vpop.xlane.xlu0 %5567  ;;  %v5424_v18 = vmul.f32 %v15823_v27, %v15823_v27  ;;  %v18585_v51 = vld [vmem:[#allocation34_spill] sm:$0xff]  ;;  %v18586_v62 = vld [vmem:[#allocation103_spill] sm:$0xff] }
 0x3a8   : >> { %v15852_v38 = vmul.f32 %v7023_v39, %v6639_v42  ;;  %11407 = vrsqrt.f32 %v5993_v7  ;;  %v5866_v33 = vmul.f32 0.03125, %v5568_v43  ;;  %v5425_v55 = vmul.f32 %v15833_v20, %v15833_v20  ;;  %v18588_v7 = vld [vmem:[#allocation100_spill] sm:$0xff] }
 0x3a9   : >> { %v11398_v22 = vpop.eup %11397  ;;  %v6640_v10 = vmul.f32 0.5, %v15784_v40  ;;  %v6771_v2 = vmul.f32 0.70710677, %v15847_v16  ;;  %v6381_v31 = vmul.f32 %v6253_v37, %v18585_v51  ;;  %v5172_v35 = vmul.f32 0.03125, %v5021_v8  ;;  %5750 = vadd.xlane.f32.xlu1 %v15717_v58 }
 0x3aa   : >> { %18584 = vst [vmem:[#allocation102_spill] sm:$0xff] %v15852_v38  ;;  %v11400_v54 = vpop.eup %11399  ;;  %v7024_v49 = vadd.f32 1.0, %v11398_v22  ;;  %v15861_v42 = vsub.f32 %v18586_v62, %v5170_v29  ;;  %v15864_v39 = vsub.f32 %v18588_v7, %v5171_v32  ;;  %v5994_v43 = vadd.f32 1e-05, %v5866_v33  ;;  %v5571_v38 = vpop.xlane.xlu1 %5570  ;;  %5753 = vadd.xlane.f32.xlu0 %v15724_v45  ;;  %v18591_v33 = vld [vmem:[#allocation35_spill] sm:$0xff] }
 0x3ab   : >> { %11409 = verf.f32 %v6771_v2  ;;  %v15868_v40 = vadd.f32 %v15527_v13, %v6381_v31  ;;  %v6254_v8 = vmul.f32 %v15500_v44, %v11400_v54  ;;  %v5867_v37 = vmul.f32 0.03125, %v5571_v38  ;;  %v5027_v58 = vpop.xlane.xlu0 %5026  ;;  %v18592_v2 = vld [vmem:[#allocation135_spill] sm:$0xff] }
 0x3ac   : >> { %18587 = vst [vmem:[#allocation107_spill] sm:$0xff] %v15861_v42  ;;  %18589 = vst [vmem:[#allocation104_spill] sm:$0xff] %v15864_v39  ;;  %v15871_v51 = vmul.f32 %v7024_v49, %v6640_v10  ;;  %11411 = vrsqrt.f32 %v5994_v43  ;;  %v15874_v62 = vsel %vm1004_vm2, %v5424_v18, 0.0  ;;  %v15877_v29 = vsel %vm1004_vm2, %v5425_v55, 0.0 }
 0x3ad   : >> { %v11402_v32 = vpop.eup %11401  ;;  %v6772_v45 = vmul.f32 0.70710677, %v15868_v40  ;;  %v6382_v22 = vmul.f32 %v6254_v8, %v18591_v33  ;;  %v15882_v31 = vsub.f32 %v18592_v2, %v5172_v35  ;;  %v5995_v54 = vadd.f32 1e-05, %v5867_v37  ;;  %5756 = vadd.xlane.f32.xlu1 %v15749_v36  ;;  %v18595_v33 = vld [vmem:[#allocation36_spill] sm:$0xff] }
 0x3ae   : >> { %18590 = vst [vmem:[#allocation108_spill] sm:$0xff] %v15871_v51  ;;  %v11404_v38 = vpop.eup %11403  ;;  %v6641_v10 = vmul.f32 0.5, %v15806_v21  ;;  %v7025_v49 = vadd.f32 1.0, %v11402_v32  ;;  %v5173_v18 = vmul.f32 0.03125, %v5024_v12  ;;  %v5030_v7 = vpop.xlane.xlu1 %5029  ;;  %5759 = vadd.xlane.f32.xlu0 %v15760_v63  ;;  %v5426_v55 = vmul.f32 %v15861_v42, %v15861_v42 }
 0x3af   : >> { %18593 = vst [vmem:[#allocation111_spill] sm:$0xff] %v15882_v31  ;;  %11413 = verf.f32 %v6772_v45  ;;  %v15890_v43 = vadd.f32 %v15527_v13, %v6382_v22  ;;  %v6255_v35 = vmul.f32 %v15500_v44, %v11404_v38  ;;  %v5574_v8 = vpop.xlane.xlu0 %5573  ;;  %v5427_v36 = vmul.f32 %v15864_v39, %v15864_v39  ;;  %v18596_v39 = vld [vmem:[#allocation134_spill] sm:$0xff] }
 0x3b0   : >> { %v15895_v37 = vmul.f32 %v7025_v49, %v6641_v10  ;;  %v6642_v21 = vmul.f32 0.5, %v15827_v1  ;;  %11415 = vrsqrt.f32 %v5995_v54  ;;  %v5868_v12 = vmul.f32 0.03125, %v5574_v8 }
 0x3b1   : >> { %v11406_v63 = vpop.eup %11405  ;;  %v6773_v32 = vmul.f32 0.70710677, %v15890_v43  ;;  %v6383_v45 = vmul.f32 %v6255_v35, %v18595_v33  ;;  %v5174_v2 = vmul.f32 0.03125, %v5027_v58  ;;  %5762 = vadd.xlane.f32.xlu1 %v15790_v60  ;;  %v5428_v22 = vmul.f32 %v15882_v31, %v15882_v31 }
 0x3b2   : >> { %18594 = vst [vmem:[#allocation113_spill] sm:$0xff] %v15895_v37  ;;  %v11408_v38 = vpop.eup %11407  ;;  %v7026_v51 = vadd.f32 1.0, %v11406_v63  ;;  %v15904_v10 = vsub.f32 %v18596_v39, %v5173_v18  ;;  %v5175_v49 = vmul.f32 0.03125, %v5030_v7  ;;  %v5996_v1 = vadd.f32 1e-05, %v5868_v12  ;;  %v5577_v54 = vpop.xlane.xlu1 %5576  ;;  %5765 = vadd.xlane.f32.xlu0 %v15803_v28  ;;  %v18599_v12 = vld [vmem:[#allocation37_spill] sm:$0xff] }
 0x3b3   : >> { %11417 = verf.f32 %v6773_v32  ;;  %v6518_v8 = vadd.f32 %v15527_v13, %v6383_v45  ;;  %v6256_v58 = vmul.f32 %v15500_v44, %v11408_v38  ;;  %v5869_v35 = vmul.f32 0.03125, %v5577_v54  ;;  %v5033_v60 = vpop.xlane.xlu0 %5032  ;;  %v18600_v28 = vld [vmem:[#allocation109_spill] sm:$0xff] }
 0x3b4   : >> { %18597 = vst [vmem:[#allocation110_spill] sm:$0xff] %v15904_v10  ;;  %v15909_v33 = vmul.f32 %v7026_v51, %v6642_v21  ;;  %11419 = vrsqrt.f32 %v5996_v1  ;;  %v5782_v63 = vsel %vm1004_vm2, %v5426_v55, 0.0  ;;  %v15913_v39 = vsel %vm1004_vm2, %v5427_v36, 0.0  ;;  %v18602_v1 = vld [vmem:[#allocation106_spill] sm:$0xff] }
 0x3b5   : >> { %v11410_v18 = vpop.eup %11409  ;;  %v6774_v7 = vmul.f32 0.70710677, %v6518_v8  ;;  %v6384_v37 = vmul.f32 %v6256_v58, %v18599_v12  ;;  %v15917_v32 = vsub.f32 %v18600_v28, %v5174_v2  ;;  %v5997_v45 = vadd.f32 1e-05, %v5869_v35  ;;  %5768 = vadd.xlane.f32.xlu1 %v15817_v59 }
 0x3b6   : >> { %18598 = vst [vmem:[#allocation114_spill] sm:$0xff] %v15909_v33  ;;  %v11412_v38 = vpop.eup %11411  ;;  %v6643_v51 = vmul.f32 0.5, %v15847_v16  ;;  %v7027_v21 = vadd.f32 1.0, %v11410_v18  ;;  %v15922_v54 = vsub.f32 %v18602_v1, %v5175_v49  ;;  %v5036_v55 = vpop.xlane.xlu1 %5035  ;;  %5771 = vadd.xlane.f32.xlu0 %v15836_v15  ;;  %v15926_v36 = vsel %vm1004_vm2, %v5428_v22, 0.0  ;;  %v18605_v22 = vld [vmem:[#allocation38_spill] sm:$0xff] }
 0x3b7   : >> { %18601 = vst [vmem:[#allocation117_spill] sm:$0xff] %v15917_v32  ;;  %11421 = verf.f32 %v6774_v7  ;;  %v6519_v2 = vadd.f32 %v15527_v13, %v6384_v37  ;;  %v6257_v58 = vmul.f32 %v15500_v44, %v11412_v38  ;;  %v5580_v35 = vpop.xlane.xlu0 %5579  ;;  %v5429_v59 = vmul.f32 %v15904_v10, %v15904_v10 }
 0x3b8   : >> { %18603 = vst [vmem:[#allocation116_spill] sm:$0xff] %v15922_v54  ;;  %v15932_v16 = vmul.f32 %v7027_v21, %v6643_v51  ;;  %11423 = vrsqrt.f32 %v5997_v45  ;;  %v5176_v49 = vmul.f32 0.03125, %v5033_v60  ;;  %v5870_v18 = vmul.f32 0.03125, %v5580_v35  ;;  %v18607_v35 = vld [vmem:[#allocation140_spill] sm:$0xff] }
 0x3b9   : >> { %v11414_v12 = vpop.eup %11413  ;;  %v6644_v15 = vmul.f32 0.5, %v15868_v40  ;;  %v6775_v28 = vmul.f32 0.70710677, %v6519_v2  ;;  %v6385_v1 = vmul.f32 %v6257_v58, %v18605_v22  ;;  %5774 = vadd.xlane.f32.xlu1 %v15842_v0  ;;  %v5430_v37 = vmul.f32 %v15917_v32, %v15917_v32  ;;  %v18656_v32 = vld [vmem:[#allocation26_spill] sm:$0xff] }
 0x3ba   : >> { %18604 = vst [vmem:[#allocation118_spill] sm:$0xff] %v15932_v16  ;;  %v11416_v7 = vpop.eup %11415  ;;  %v7028_v38 = vadd.f32 1.0, %v11414_v12  ;;  %v5177_v33 = vmul.f32 0.03125, %v5036_v55  ;;  %v5998_v10 = vadd.f32 1e-05, %v5870_v18  ;;  %v5583_v51 = vpop.xlane.xlu1 %5582  ;;  %5777 = vadd.xlane.f32.xlu0 %v15874_v62  ;;  %v5431_v60 = vmul.f32 %v15922_v54, %v15922_v54  ;;  %v18609_v16 = vld [vmem:[#allocation39_spill] sm:$0xff] }
 0x3bb   : >> { %11425 = verf.f32 %v6775_v28  ;;  %v6520_v40 = vadd.f32 %v15527_v13, %v6385_v1  ;;  %v6258_v45 = vmul.f32 %v15500_v44, %v11416_v7  ;;  %v5871_v21 = vmul.f32 0.03125, %v5583_v51  ;;  %v5039_v0 = vpop.xlane.xlu0 %5038 }
 0x3bc   : >> { %v15944_v58 = vmul.f32 %v7028_v38, %v6644_v15  ;;  %v15947_v22 = vsub.f32 %v18607_v35, %v5176_v49  ;;  %11427 = vrsqrt.f32 %v5998_v10  ;;  %v5791_v55 = vsel %vm1004_vm2, %v5429_v59, 0.0  ;;  %v18610_v15 = vld [vmem:[#allocation139_spill] sm:$0xff] }
 0x3bd   : >> { %v11418_v18 = vpop.eup %11417  ;;  %v6645_v62 = vmul.f32 0.5, %v15890_v43  ;;  %v6776_v12 = vmul.f32 0.70710677, %v6520_v40  ;;  %v6386_v28 = vmul.f32 %v6258_v45, %v18609_v16  ;;  %v5999_v54 = vadd.f32 1e-05, %v5871_v21  ;;  %5780 = vadd.xlane.f32.xlu1 %v15877_v29 }
 0x3be   : >> { %18606 = vst [vmem:[#allocation119_spill] sm:$0xff] %v15944_v58  ;;  %18608 = vst [vmem:[#allocation120_spill] sm:$0xff] %v15947_v22  ;;  %v11420_v1 = vpop.eup %11419  ;;  %v7029_v7 = vadd.f32 1.0, %v11418_v18  ;;  %v6646_v51 = vmul.f32 0.5, %v6518_v8  ;;  %v15954_v38 = vsub.f32 %v18610_v15, %v5177_v33  ;;  %v5042_v49 = vpop.xlane.xlu1 %5041  ;;  %5783 = vadd.xlane.f32.xlu0 %v5782_v63  ;;  %v5794_v10 = vsel %vm1004_vm2, %v5430_v37, 0.0  ;;  %v18613_v18 = vld [vmem:[#allocation40_spill] sm:$0xff] }
 0x3bf   : >> { %11429 = verf.f32 %v6776_v12  ;;  %v6521_v59 = vadd.f32 %v15527_v13, %v6386_v28  ;;  %v6259_v43 = vmul.f32 %v15500_v44, %v11420_v1  ;;  %v5586_v35 = vpop.xlane.xlu0 %5585  ;;  %v5797_v16 = vsel %vm1004_vm2, %v5431_v60, 0.0 }
 0x3c0   : >> { %18611 = vst [vmem:[#allocation121_spill] sm:$0xff] %v15954_v38  ;;  %v15960_v45 = vmul.f32 %v7029_v7, %v6645_v62  ;;  %11431 = vrsqrt.f32 %v5999_v54  ;;  %v5872_v29 = vmul.f32 0.03125, %v5586_v35  ;;  %v5432_v8 = vmul.f32 %v15947_v22, %v15947_v22 }
 0x3c1   : >> { %v11422_v33 = vpop.eup %11421  ;;  %v6647_v21 = vmul.f32 0.5, %v6519_v2  ;;  %v6777_v63 = vmul.f32 0.70710677, %v6521_v59  ;;  %v6387_v37 = vmul.f32 %v6259_v43, %v18613_v18  ;;  %v5178_v12 = vmul.f32 0.03125, %v5039_v0  ;;  %5786 = vadd.xlane.f32.xlu1 %v15913_v39  ;;  %v18616_v18 = vld [vmem:[#allocation115_spill] sm:$0xff] }
 0x3c2   : >> { %18612 = vst [vmem:[#allocation123_spill] sm:$0xff] %v15960_v45  ;;  %v11424_v28 = vpop.eup %11423  ;;  %v7030_v1 = vadd.f32 1.0, %v11422_v33  ;;  %v5179_v15 = vmul.f32 0.03125, %v5042_v49  ;;  %v6000_v58 = vadd.f32 1e-05, %v5872_v29  ;;  %v5589_v60 = vpop.xlane.xlu1 %5588  ;;  %5789 = vadd.xlane.f32.xlu0 %v15926_v36  ;;  %v5433_v54 = vmul.f32 %v15954_v38, %v15954_v38  ;;  %v18615_v29 = vld [vmem:[#allocation41_spill] sm:$0xff] }
 0x3c3   : >> { %11433 = verf.f32 %v6777_v63  ;;  %v15970_v62 = vadd.f32 %v15527_v13, %v6387_v37  ;;  %v6260_v2 = vmul.f32 %v15500_v44, %v11424_v28  ;;  %v5873_v7 = vmul.f32 0.03125, %v5589_v60  ;;  %v5045_v0 = vpop.xlane.xlu0 %5044  ;;  %v18618_v38 = vld [vmem:[#allocation112_spill] sm:$0xff] }
 0x3c4   : >> { %v15973_v43 = vmul.f32 %v7030_v1, %v6646_v51  ;;  %11435 = vrsqrt.f32 %v6000_v58  ;;  %v5180_v39 = vmul.f32 0.03125, %v5045_v0  ;;  %v5800_v49 = vsel %vm1004_vm2, %v5432_v8, 0.0 }
 0x3c5   : >> { %v11426_v35 = vpop.eup %11425  ;;  %v6778_v36 = vmul.f32 0.70710677, %v15970_v62  ;;  %v6388_v33 = vmul.f32 %v6260_v2, %v18615_v29  ;;  %v15979_v63 = vsub.f32 %v18616_v18, %v5178_v12  ;;  %v6001_v37 = vadd.f32 1e-05, %v5873_v7  ;;  %5792 = vadd.xlane.f32.xlu1 %v5791_v55  ;;  %v18621_v55 = vld [vmem:[#allocation143_spill] sm:$0xff] }
 0x3c6   : >> { %18614 = vst [vmem:[#allocation122_spill] sm:$0xff] %v15973_v43  ;;  %v11428_v45 = vpop.eup %11427  ;;  %v7031_v28 = vadd.f32 1.0, %v11426_v35  ;;  %v6648_v60 = vmul.f32 0.5, %v6520_v40  ;;  %v15982_v51 = vsub.f32 %v18618_v38, %v5179_v15  ;;  %v5048_v58 = vpop.xlane.xlu1 %5047  ;;  %5795 = vadd.xlane.f32.xlu0 %v5794_v10  ;;  %v5803_v8 = vsel %vm1004_vm2, %v5433_v54, 0.0  ;;  %v18623_v35 = vld [vmem:[#allocation42_spill] sm:$0xff] }
 0x3c7   : >> { %18617 = vst [vmem:[#allocation124_spill] sm:$0xff] %v15979_v63  ;;  %11437 = verf.f32 %v6778_v36  ;;  %v15986_v1 = vadd.f32 %v15527_v13, %v6388_v33  ;;  %v6261_v2 = vmul.f32 %v15500_v44, %v11428_v45  ;;  %v5181_v12 = vmul.f32 0.03125, %v5048_v58  ;;  %v5592_v0 = vpop.xlane.xlu0 %5591 }
 0x3c8   : >> { %18619 = vst [vmem:[#allocation125_spill] sm:$0xff] %v15982_v51  ;;  %v15989_v7 = vmul.f32 %v7031_v28, %v6647_v21  ;;  %11439 = vrsqrt.f32 %v6001_v37  ;;  %v15992_v40 = vsub.f32 %v18621_v55, %v5180_v39  ;;  %v5874_v38 = vmul.f32 0.03125, %v5592_v0  ;;  %v18624_v21 = vld [vmem:[#allocation141_spill] sm:$0xff] }
 0x3c9   : >> { %v11430_v15 = vpop.eup %11429  ;;  %v6649_v10 = vmul.f32 0.5, %v6521_v59  ;;  %v6779_v54 = vmul.f32 0.70710677, %v15986_v1  ;;  %v6389_v36 = vmul.f32 %v6261_v2, %v18623_v35  ;;  %5798 = vadd.xlane.f32.xlu1 %v5797_v16  ;;  %v5434_v44 = vmul.f32 %v15979_v63, %v15979_v63  ;;  %v16007_v28 = vld [vmem:[%s12036_s24] ss:$0 sm:$0xff]  ;;  %v18653_v63 = vld [vmem:[#allocation24_spill] sm:$0xff] }
 0x3ca   : >> { %18620 = vst [vmem:[#allocation129_spill] sm:$0xff] %v15989_v7  ;;  %18622 = vst [vmem:[#allocation126_spill] sm:$0xff] %v15992_v40  ;;  %v11432_v45 = vpop.eup %11431  ;;  %v7032_v29 = vadd.f32 1.0, %v11430_v15  ;;  %v15999_v33 = vsub.f32 %v18624_v21, %v5181_v12  ;;  %v6002_v18 = vadd.f32 1e-05, %v5874_v38  ;;  %v5595_v39 = vpop.xlane.xlu1 %5594  ;;  %5801 = vadd.xlane.f32.xlu0 %v5800_v49  ;;  %v5435_v37 = vmul.f32 %v15982_v51, %v15982_v51  ;;  %v18627_v15 = vld [vmem:[#allocation43_spill] sm:$0xff] }
 0x3cb   : >> { %11441 = verf.f32 %v6779_v54  ;;  %v16004_v59 = vadd.f32 %v15527_v13, %v6389_v36  ;;  %v6262_v16 = vmul.f32 %v16007_v28, %v11432_v45  ;;  %v5875_v58 = vmul.f32 0.03125, %v5595_v39  ;;  %v5051_v2 = vpop.xlane.xlu0 %5050  ;;  %v18628_v21 = vld [vmem:[#allocation147_spill] sm:$0xff] }
 0x3cc   : >> { %18625 = vst [vmem:[#allocation128_spill] sm:$0xff] %v15999_v33  ;;  %v16010_v0 = vmul.f32 %v7032_v29, %v6648_v60  ;;  %11443 = vrsqrt.f32 %v6002_v18  ;;  %v5182_v12 = vmul.f32 0.03125, %v5051_v2  ;;  %v5436_v49 = vmul.f32 %v15992_v40, %v15992_v40  ;;  %v16024_v2 = vld [vmem:[%s12041_s15] ss:$0 sm:$0xff] }
 0x3cd   : >> { %v11434_v55 = vpop.eup %11433  ;;  %v6780_v38 = vmul.f32 0.70710677, %v16004_v59  ;;  %v6390_v13 = vmul.f32 %v6262_v16, %v18627_v15  ;;  %v6003_v54 = vadd.f32 1e-05, %v5875_v58  ;;  %5804 = vadd.xlane.f32.xlu1 %v5803_v8  ;;  %v5806_v35 = vsel %vm1004_vm2, %v5434_v44, 0.0 }
 0x3ce   : >> { %18626 = vst [vmem:[#allocation127_spill] sm:$0xff] %v16010_v0  ;;  %v11436_v36 = vpop.eup %11435  ;;  %v7033_v45 = vadd.f32 1.0, %v11434_v55  ;;  %v16018_v60 = vsub.f32 %v18628_v21, %v5182_v12  ;;  %v5054_v29 = vpop.xlane.xlu1 %5053  ;;  %5807 = vadd.xlane.f32.xlu0 %v5806_v35  ;;  %v5809_v18 = vsel %vm1004_vm2, %v5435_v37, 0.0  ;;  %v5437_v39 = vmul.f32 %v15999_v33, %v15999_v33  ;;  %v18631_v21 = vld [vmem:[#allocation44_spill] sm:$0xff]  ;;  %v18632_v0 = vld [vmem:[#allocation145_spill] sm:$0xff]  ;;  %v18650_v33 = vld [vmem:[#allocation22_spill] sm:$0xff] }
 0x3cf   : >> { %11445 = verf.f32 %v6780_v38  ;;  %v16027_v16 = vadd.f32 %v16024_v2, %v6390_v13  ;;  %v6263_v8 = vmul.f32 %v16007_v28, %v11436_v36  ;;  %v5183_v44 = vmul.f32 0.03125, %v5054_v29  ;;  %v5598_v58 = vpop.xlane.xlu0 %5597 }
 0x3d0   : >> { %18629 = vst [vmem:[#allocation91_spill] sm:$0xff] %v16018_v60  ;;  %v16030_v55 = vmul.f32 %v7033_v45, %v6649_v10  ;;  %11447 = vrsqrt.f32 %v6003_v54  ;;  %v5876_v12 = vmul.f32 0.03125, %v5598_v58  ;;  %v5812_v15 = vsel %vm1004_vm2, %v5436_v49, 0.0 }
 0x3d1   : >> { %v11438_v37 = vpop.eup %11437  ;;  %v6781_v35 = vmul.f32 0.70710677, %v16027_v16  ;;  %v6391_v38 = vmul.f32 %v6263_v8, %v18631_v21  ;;  %v16036_v7 = vsub.f32 %v18632_v0, %v5183_v44  ;;  %5810 = vadd.xlane.f32.xlu1 %v5809_v18  ;;  %v5438_v13 = vmul.f32 %v16018_v60, %v16018_v60 }
 0x3d2   : >> { %18630 = vst [vmem:[#allocation28_spill] sm:$0xff] %v16030_v55  ;;  %v11440_v36 = vpop.eup %11439  ;;  %v6650_v10 = vmul.f32 0.5, %v15970_v62  ;;  %v7034_v45 = vadd.f32 1.0, %v11438_v37  ;;  %v6004_v54 = vadd.f32 1e-05, %v5876_v12  ;;  %v5601_v29 = vpop.xlane.xlu1 %5600  ;;  %5813 = vadd.xlane.f32.xlu0 %v5812_v15  ;;  %v5815_v49 = vsel %vm1004_vm2, %v5437_v39, 0.0 }
 0x3d3   : >> { %18633 = vst [vmem:[#allocation88_spill] sm:$0xff] %v16036_v7  ;;  %11449 = verf.f32 %v6781_v35  ;;  %v6526_v58 = vadd.f32 %v16024_v2, %v6391_v38  ;;  %v6264_v8 = vmul.f32 %v16007_v28, %v11440_v36  ;;  %v5877_v0 = vmul.f32 0.03125, %v5601_v29  ;;  %v5604_v44 = vpop.xlane.xlu0 %5603  ;;  %v18635_v55 = vld [vmem:[#allocation45_spill] sm:$0xff] }
 0x3d4   : >> { %v16044_v18 = vmul.f32 %v7034_v45, %v6650_v10  ;;  %11451 = vrsqrt.f32 %v6004_v54  ;;  %v5878_v21 = vmul.f32 0.03125, %v5604_v44  ;;  %v5439_v62 = vmul.f32 %v16036_v7, %v16036_v7 }
 0x3d5   : >> { %v11442_v37 = vpop.eup %11441  ;;  %v6782_v12 = vmul.f32 0.70710677, %v6526_v58  ;;  %v6392_v15 = vmul.f32 %v6264_v8, %v18635_v55  ;;  %v6005_v43 = vadd.f32 1e-05, %v5877_v0  ;;  %5816 = vadd.xlane.f32.xlu1 %v5815_v49  ;;  %v5818_v39 = vsel %vm1004_vm2, %v5438_v13, 0.0 }
 0x3d6   : >> { %18634 = vst [vmem:[#allocation29_spill] sm:$0xff] %v16044_v18  ;;  %v11444_v35 = vpop.eup %11443  ;;  %v6651_v38 = vmul.f32 0.5, %v15986_v1  ;;  %v7035_v36 = vadd.f32 1.0, %v11442_v37  ;;  %v6006_v29 = vadd.f32 1e-05, %v5878_v21  ;;  %v5607_v10 = vpop.xlane.xlu1 %5606  ;;  %5819 = vadd.xlane.f32.xlu0 %v5818_v39  ;;  %v5821_v13 = vsel %vm1004_vm2, %v5439_v62, 0.0 }
 0x3d7   : >> { %11453 = verf.f32 %v6782_v12  ;;  %v6527_v45 = vadd.f32 %v16024_v2, %v6392_v15  ;;  %v6265_v54 = vmul.f32 %v16007_v28, %v11444_v35  ;;  %v5879_v44 = vmul.f32 0.03125, %v5607_v10  ;;  %v5610_v18 = vpop.xlane.xlu0 %5609  ;;  %v18637_v1 = vld [vmem:[#allocation14_spill] sm:$0xff] }
 0x3d8   : >> { %v16053_v7 = vmul.f32 %v7035_v36, %v6651_v38  ;;  %11455 = vrsqrt.f32 %v6005_v43  ;;  %v5880_v55 = vmul.f32 0.03125, %v5610_v18  ;;  %v6652_v37 = vmul.f32 0.5, %v16004_v59  ;;  %v18639_v59 = vld [vmem:[#allocation15_spill] sm:$0xff] }
 0x3d9   : >> { %v11446_v49 = vpop.eup %11445  ;;  %v6783_v8 = vmul.f32 0.70710677, %v6527_v45  ;;  %v6393_v0 = vmul.f32 %v6265_v54, %v18637_v1  ;;  %11457 = vrsqrt.f32 %v6006_v29  ;;  %5822 = vadd.xlane.f32.xlu1 %v5821_v13  ;;  %v6007_v15 = vadd.f32 1e-05, %v5879_v44 }
 0x3da   : >> { %18636 = vst [vmem:[#allocation131_spill] sm:$0xff] %v16053_v7  ;;  %v11448_v21 = vpop.eup %11447  ;;  %v7036_v12 = vadd.f32 1.0, %v11446_v49  ;;  %v6008_v39 = vadd.f32 1e-05, %v5880_v55  ;;  %v5613_v35 = vpop.xlane.xlu1 %5612  ;;  %v6653_v54 = vmul.f32 0.5, %v16027_v16  ;;  %v6655_v16 = vmul.f32 0.5, %v6527_v45 }
 0x3db   : >> { %11459 = verf.f32 %v6783_v8  ;;  %v6528_v38 = vadd.f32 %v16024_v2, %v6393_v0  ;;  %v6266_v43 = vmul.f32 %v16007_v28, %v11448_v21  ;;  %v5881_v18 = vmul.f32 0.03125, %v5613_v35  ;;  %v5616_v62 = vpop.xlane.xlu0 %5615 }
 0x3dc   : >> { %v16060_v36 = vmul.f32 %v7036_v12, %v6652_v37  ;;  %11461 = vrsqrt.f32 %v6007_v15  ;;  %v5882_v10 = vmul.f32 0.03125, %v5616_v62  ;;  %v6654_v8 = vmul.f32 0.5, %v6526_v58 }
 0x3dd   : >> { %v11450_v29 = vpop.eup %11449  ;;  %v6784_v13 = vmul.f32 0.70710677, %v6528_v38  ;;  %v6394_v49 = vmul.f32 %v6266_v43, %v18639_v59  ;;  %11463 = vrsqrt.f32 %v6008_v39  ;;  %v6009_v1 = vadd.f32 1e-05, %v5881_v18 }
 0x3de   : >> { %18638 = vst [vmem:[#allocation130_spill] sm:$0xff] %v16060_v36  ;;  %v11452_v44 = vpop.eup %11451  ;;  %v7037_v55 = vadd.f32 1.0, %v11450_v29  ;;  %v6010_v0 = vadd.f32 1e-05, %v5882_v10  ;;  %v5619_v7 = vpop.xlane.xlu1 %5618  ;;  %v6656_v39 = vmul.f32 0.5, %v6528_v38  ;;  %v18641_v29 = vld [vmem:[#allocation16_spill] sm:$0xff] }
 0x3df   : >> { %11465 = verf.f32 %v6784_v13  ;;  %v6529_v21 = vadd.f32 %v16024_v2, %v6394_v49  ;;  %v6267_v37 = vmul.f32 %v16007_v28, %v11452_v44  ;;  %v5883_v12 = vmul.f32 0.03125, %v5619_v7  ;;  %v5622_v15 = vpop.xlane.xlu0 %5621 }
 0x3e0   : >> { %v16066_v35 = vmul.f32 %v7037_v55, %v6653_v54  ;;  %11467 = vrsqrt.f32 %v6009_v1  ;;  %v5884_v62 = vmul.f32 0.03125, %v5622_v15 }
 0x3e1   : >> { %v11454_v43 = vpop.eup %11453  ;;  %v6785_v59 = vmul.f32 0.70710677, %v6529_v21  ;;  %v6395_v58 = vmul.f32 %v6267_v37, %v18641_v29  ;;  %11469 = vrsqrt.f32 %v6010_v0  ;;  %v16069_v13 = vmul.f32 0.5, %v6529_v21 }
 0x3e2   : >> { %18640 = vst [vmem:[#allocation30_spill] sm:$0xff] %v16066_v35  ;;  %v11456_v18 = vpop.eup %11455  ;;  %v7038_v10 = vadd.f32 1.0, %v11454_v43  ;;  %v6011_v49 = vadd.f32 1e-05, %v5883_v12  ;;  %v6012_v36 = vadd.f32 1e-05, %v5884_v62  ;;  %v5625_v44 = vpop.xlane.xlu1 %5624 }
 0x3e3   : >> { %v11458_v7 = vpop.eup %11457  ;;  %11471 = verf.f32 %v6785_v59  ;;  %v6530_v54 = vadd.f32 %v16024_v2, %v6395_v58  ;;  %v6268_v45 = vmul.f32 %v16007_v28, %v11456_v18  ;;  %v5885_v55 = vmul.f32 0.03125, %v5625_v44  ;;  %v5628_v1 = vpop.xlane.xlu0 %5627  ;;  %v18643_v62 = vld [vmem:[#allocation17_spill] sm:$0xff]  ;;  %v18644_v58 = vld [vmem:[#allocation18_spill] sm:$0xff] }
 0x3e4   : >> { %v16073_v38 = vmul.f32 %v7038_v10, %v6654_v8  ;;  %v6269_v37 = vmul.f32 %v16007_v28, %v11458_v7  ;;  %11473 = vrsqrt.f32 %v6011_v49  ;;  %v5886_v0 = vmul.f32 0.03125, %v5628_v1 }
 0x3e5   : >> { %v11460_v15 = vpop.eup %11459  ;;  %v16076_v21 = vmul.f32 0.5, %v6530_v54  ;;  %v6786_v12 = vmul.f32 0.70710677, %v6530_v54  ;;  %v6396_v43 = vmul.f32 %v6268_v45, %v18643_v62  ;;  %11475 = vrsqrt.f32 %v6012_v36 }
 0x3e6   : >> { %18642 = vst [vmem:[#allocation97_spill] sm:$0xff] %v16073_v38  ;;  %v11462_v59 = vpop.eup %11461  ;;  %v7039_v29 = vadd.f32 1.0, %v11460_v15  ;;  %v6397_v35 = vmul.f32 %v6269_v37, %v18644_v58  ;;  %v6013_v18 = vadd.f32 1e-05, %v5885_v55  ;;  %v6014_v44 = vadd.f32 1e-05, %v5886_v0  ;;  %v5631_v60 = vpop.xlane.xlu1 %5630 }
 0x3e7   : >> { %v11464_v8 = vpop.eup %11463  ;;  %11477 = verf.f32 %v6786_v12  ;;  %v6531_v10 = vadd.f32 %v16024_v2, %v6396_v43  ;;  %v6270_v49 = vmul.f32 %v16007_v28, %v11462_v59  ;;  %v5887_v7 = vmul.f32 0.03125, %v5631_v60  ;;  %v5634_v1 = vpop.xlane.xlu0 %5633  ;;  %v18646_v0 = vld [vmem:[#allocation19_spill] sm:$0xff]  ;;  %v18647_v59 = vld [vmem:[#allocation20_spill] sm:$0xff] }
 0x3e8   : >> { %v16082_v38 = vmul.f32 %v7039_v29, %v6655_v16  ;;  %v6532_v54 = vadd.f32 %v16024_v2, %v6397_v35  ;;  %v6271_v36 = vmul.f32 %v16007_v28, %v11464_v8  ;;  %11479 = vrsqrt.f32 %v6013_v18 }
 0x3e9   : >> { %v11466_v45 = vpop.eup %11465  ;;  %v16086_v37 = vmul.f32 0.5, %v6531_v10  ;;  %v6787_v55 = vmul.f32 0.70710677, %v6531_v10  ;;  %v6398_v15 = vmul.f32 %v6270_v49, %v18646_v0  ;;  %11481 = vrsqrt.f32 %v6014_v44  ;;  %v18649_v0 = vld [vmem:[#allocation21_spill] sm:$0xff] }
 0x3ea   : >> { %18645 = vst [vmem:[#allocation31_spill] sm:$0xff] %v16082_v38  ;;  %v11468_v12 = vpop.eup %11467  ;;  %v7040_v62 = vadd.f32 1.0, %v11466_v45  ;;  %v16089_v43 = vmul.f32 0.5, %v6532_v54  ;;  %v6788_v60 = vmul.f32 0.70710677, %v6532_v54  ;;  %v6399_v16 = vmul.f32 %v6271_v36, %v18647_v59  ;;  %v5637_v29 = vpop.xlane.xlu1 %5636 }
 0x3eb   : >> { %v11470_v58 = vpop.eup %11469  ;;  %11483 = verf.f32 %v6787_v55  ;;  %v6533_v35 = vadd.f32 %v16024_v2, %v6398_v15  ;;  %v6272_v18 = vmul.f32 %v16007_v28, %v11468_v12  ;;  %v6015_v8 = vadd.f32 1e-05, %v5887_v7  ;;  %v16094_v38 = vpop.xlane.xlu0 %5639 }
 0x3ec   : >> { %v16096_v10 = vmul.f32 %v7040_v62, %v6656_v39  ;;  %11485 = verf.f32 %v6788_v60  ;;  %v6534_v44 = vadd.f32 %v16024_v2, %v6399_v16  ;;  %v6273_v49 = vmul.f32 %v16007_v28, %v11470_v58 }
 0x3ed   : >> { %v11472_v54 = vpop.eup %11471  ;;  %v16100_v45 = vmul.f32 0.5, %v6533_v35  ;;  %v6789_v36 = vmul.f32 0.70710677, %v6533_v35  ;;  %v6400_v55 = vmul.f32 %v6272_v18, %v18649_v0  ;;  %11487 = vrsqrt.f32 %v6015_v8 }
 0x3ee   : >> { %18648 = vst [vmem:[#allocation94_spill] sm:$0xff] %v16096_v10  ;;  %v11474_v15 = vpop.eup %11473  ;;  %v7041_v59 = vadd.f32 1.0, %v11472_v54  ;;  %v16103_v12 = vmul.f32 0.5, %v6534_v44  ;;  %v6790_v7 = vmul.f32 0.70710677, %v6534_v44  ;;  %v6401_v39 = vmul.f32 %v6273_v49, %v18650_v33  ;;  %v16106_v62 = vpop.xlane.xlu1 %5642 }
 0x3ef   : >> { %v11476_v60 = vpop.eup %11475  ;;  %11489 = verf.f32 %v6789_v36  ;;  %v6535_v16 = vadd.f32 %v16024_v2, %v6400_v55  ;;  %v6274_v58 = vmul.f32 %v16007_v28, %v11474_v15  ;;  %v5888_v10 = vmul.f32 0.03125, %v5634_v1  ;;  %v16110_v35 = vpop.xlane.xlu0 %5645  ;;  %v18652_v36 = vld [vmem:[#allocation23_spill] sm:$0xff] }
 0x3f0   : >> { %v16113_v18 = vmul.f32 %v7041_v59, %v16069_v13  ;;  %11491 = verf.f32 %v6790_v7  ;;  %v6536_v8 = vadd.f32 %v16024_v2, %v6401_v39  ;;  %v6275_v44 = vmul.f32 %v16007_v28, %v11476_v60 }
 0x3f1   : >> { %v11478_v33 = vpop.eup %11477  ;;  %v16117_v49 = vmul.f32 0.5, %v6535_v16  ;;  %v6791_v54 = vmul.f32 0.70710677, %v6535_v16  ;;  %v6402_v0 = vmul.f32 %v6274_v58, %v18652_v36  ;;  %v6016_v55 = vadd.f32 1e-05, %v5888_v10 }
 0x3f2   : >> { %18651 = vst [vmem:[#allocation32_spill] sm:$0xff] %v16113_v18  ;;  %v11480_v40 = vpop.eup %11479  ;;  %v7042_v15 = vadd.f32 1.0, %v11478_v33  ;;  %v16120_v1 = vmul.f32 0.5, %v6536_v8  ;;  %v6792_v51 = vmul.f32 0.70710677, %v6536_v8  ;;  %v6403_v13 = vmul.f32 %v6275_v44, %v18653_v63  ;;  %v5649_v59 = vpop.xlane.xlu1 %5648  ;;  %v18655_v44 = vld [vmem:[#allocation25_spill] sm:$0xff] }
 0x3f3   : >> { %v11482_v7 = vpop.eup %11481  ;;  %11493 = verf.f32 %v6791_v54  ;;  %v6537_v39 = vadd.f32 %v16024_v2, %v6402_v0  ;;  %v6276_v60 = vmul.f32 %v16007_v28, %v11480_v40  ;;  %v5889_v18 = vmul.f32 0.03125, %v5637_v29  ;;  %v5652_v22 = vpop.xlane.xlu0 %5651 }
 0x3f4   : >> { %v16126_v16 = vmul.f32 %v7042_v15, %v16076_v21  ;;  %11495 = verf.f32 %v6792_v51  ;;  %v6538_v10 = vadd.f32 %v16024_v2, %v6403_v13  ;;  %v6277_v58 = vmul.f32 %v16007_v28, %v11482_v7 }
 0x3f5   : >> { %v11484_v8 = vpop.eup %11483  ;;  %v16130_v33 = vmul.f32 0.5, %v6537_v39  ;;  %v6793_v63 = vmul.f32 0.70710677, %v6537_v39  ;;  %v6404_v54 = vmul.f32 %v6276_v60, %v18655_v44  ;;  %11497 = vrsqrt.f32 %v6016_v55 }
 0x3f6   : >> { %18654 = vst [vmem:[#allocation133_spill] sm:$0xff] %v16126_v16  ;;  %v11486_v36 = vpop.eup %11485  ;;  %v7043_v0 = vadd.f32 1.0, %v11484_v8  ;;  %v16133_v40 = vmul.f32 0.5, %v6538_v10  ;;  %v6794_v29 = vmul.f32 0.70710677, %v6538_v10  ;;  %v6405_v21 = vmul.f32 %v6277_v58, %v18656_v32  ;;  %v5655_v15 = vpop.xlane.xlu1 %5654 }
 0x3f7   : >> { %v11488_v51 = vpop.eup %11487  ;;  %v7044_v16 = vadd.f32 1.0, %v11486_v36  ;;  %11499 = verf.f32 %v6793_v63  ;;  %v6539_v13 = vadd.f32 %v16024_v2, %v6404_v54  ;;  %v6017_v7 = vadd.f32 1e-05, %v5889_v18  ;;  %v5658_v31 = vpop.xlane.xlu0 %5657 }
 0x3f8   : >> { %v16138_v39 = vmul.f32 %v7043_v0, %v16086_v37  ;;  %11501 = verf.f32 %v6794_v29  ;;  %v6540_v55 = vadd.f32 %v16024_v2, %v6405_v21  ;;  %v6278_v60 = vmul.f32 %v16007_v28, %v11488_v51  ;;  %v18659_v37 = vld [vmem:[#allocation46_spill] sm:$0xff] }
 0x3f9   : >> { %v11490_v8 = vpop.eup %11489  ;;  %v16143_v10 = vmul.f32 %v7044_v16, %v16089_v43  ;;  %v16145_v32 = vmul.f32 0.5, %v6539_v13  ;;  %v6795_v58 = vmul.f32 0.70710677, %v6539_v13  ;;  %11503 = vrsqrt.f32 %v6017_v7 }
 0x3fa   : >> { %18657 = vst [vmem:[#allocation132_spill] sm:$0xff] %v16138_v39  ;;  %v11492_v63 = vpop.eup %11491  ;;  %v7045_v44 = vadd.f32 1.0, %v11490_v8  ;;  %v16147_v18 = vmul.f32 0.5, %v6540_v55  ;;  %v6796_v54 = vmul.f32 0.70710677, %v6540_v55  ;;  %v6406_v36 = vmul.f32 %v6278_v60, %v18659_v37  ;;  %v5661_v0 = vpop.xlane.xlu1 %5660 }
 0x3fb   : >> { %18658 = vst [vmem:[#allocation33_spill] sm:$0xff] %v16143_v10  ;;  %v7046_v29 = vadd.f32 1.0, %v11492_v63  ;;  %11505 = verf.f32 %v6795_v58  ;;  %v5890_v21 = vmul.f32 0.03125, %v16094_v38  ;;  %v5891_v51 = vmul.f32 0.03125, %v16106_v62  ;;  %v5664_v43 = vpop.xlane.xlu0 %5663 }
 0x3fc   : >> { %v16153_v16 = vmul.f32 %v7045_v44, %v16100_v45  ;;  %11507 = verf.f32 %v6796_v54  ;;  %v6541_v13 = vadd.f32 %v16024_v2, %v6406_v36  ;;  %v5892_v7 = vmul.f32 0.03125, %v16110_v35 }
 0x3fd   : >> { %v11494_v8 = vpop.eup %11493  ;;  %v16158_v55 = vmul.f32 %v7046_v29, %v16103_v12  ;;  %v6018_v60 = vadd.f32 1e-05, %v5890_v21  ;;  %v6019_v63 = vadd.f32 1e-05, %v5891_v51  ;;  %v5893_v58 = vmul.f32 0.03125, %v5649_v59 }
 0x3fe   : >> { %18660 = vst [vmem:[#allocation34_spill] sm:$0xff] %v16153_v16  ;;  %v11496_v37 = vpop.eup %11495  ;;  %v7047_v38 = vadd.f32 1.0, %v11494_v8  ;;  %v16160_v10 = vmul.f32 0.5, %v6541_v13  ;;  %v6797_v62 = vmul.f32 0.70710677, %v6541_v13  ;;  %v5667_v45 = vpop.xlane.xlu1 %5666  ;;  %v5894_v16 = vmul.f32 0.03125, %v5652_v22 }
 0x3ff   : >> { %18661 = vst [vmem:[#allocation103_spill] sm:$0xff] %v16158_v55  ;;  %v6020_v39 = vadd.f32 1e-05, %v5892_v7  ;;  %v11498_v44 = vpop.eup %11497  ;;  %v7048_v54 = vadd.f32 1.0, %v11496_v37  ;;  %11509 = vrsqrt.f32 %v6018_v60  ;;  %v6021_v36 = vadd.f32 1e-05, %v5893_v58  ;;  %v5670_v35 = vpop.xlane.xlu0 %5669 }
 0x400   : >> { %v16163_v42 = vmul.f32 %v7047_v38, %v16117_v49  ;;  %11511 = verf.f32 %v6797_v62  ;;  %v6279_v12 = vmul.f32 %v16007_v28, %v11498_v44  ;;  %v5895_v59 = vmul.f32 0.03125, %v5655_v15  ;;  %v18664_v60 = vld [vmem:[#allocation60_spill] sm:$0xff] }
 0x401   : >> { %v11500_v29 = vpop.eup %11499  ;;  %v16167_v21 = vmul.f32 %v7048_v54, %v16120_v1  ;;  %11513 = vrsqrt.f32 %v6019_v63  ;;  %v6022_v51 = vadd.f32 1e-05, %v5894_v16  ;;  %v5896_v13 = vmul.f32 0.03125, %v5658_v31 }
 0x402   : >> { %18662 = vst [vmem:[#allocation100_spill] sm:$0xff] %v16163_v42  ;;  %v11502_v7 = vpop.eup %11501  ;;  %v7049_v8 = vadd.f32 1.0, %v11500_v29  ;;  %v6407_v58 = vmul.f32 %v6279_v12, %v18664_v60  ;;  %11515 = vrsqrt.f32 %v6020_v39  ;;  %v6023_v22 = vadd.f32 1e-05, %v5895_v59  ;;  %v5673_v37 = vpop.xlane.xlu1 %5672  ;;  %v18667_v29 = vld [vmem:[#allocation47_spill] sm:$0xff] }
 0x403   : >> { %18663 = vst [vmem:[#allocation35_spill] sm:$0xff] %v16167_v21  ;;  %v11504_v49 = vpop.eup %11503  ;;  %v7050_v38 = vadd.f32 1.0, %v11502_v7  ;;  %11517 = vrsqrt.f32 %v6021_v36  ;;  %v6024_v62 = vadd.f32 1e-05, %v5896_v13  ;;  %v5897_v44 = vmul.f32 0.03125, %v5661_v0  ;;  %v5676_v15 = vpop.xlane.xlu0 %5675 }
 0x404   : >> { %v16171_v42 = vmul.f32 %v7049_v8, %v16130_v33  ;;  %v6542_v1 = vadd.f32 %v16024_v2, %v6407_v58  ;;  %v6280_v31 = vmul.f32 %v16007_v28, %v11504_v49  ;;  %11519 = vrsqrt.f32 %v6022_v51 }
 0x405   : >> { %v11506_v16 = vpop.eup %11505  ;;  %v16176_v63 = vmul.f32 %v7050_v38, %v16133_v40  ;;  %11521 = vrsqrt.f32 %v6023_v22  ;;  %v6025_v39 = vadd.f32 1e-05, %v5897_v44  ;;  %v5898_v54 = vmul.f32 0.03125, %v5664_v43 }
 0x406   : >> { %18665 = vst [vmem:[#allocation135_spill] sm:$0xff] %v16171_v42  ;;  %v11508_v12 = vpop.eup %11507  ;;  %v7051_v36 = vadd.f32 1.0, %v11506_v16  ;;  %v16178_v59 = vmul.f32 0.5, %v6542_v1  ;;  %v6798_v0 = vmul.f32 0.70710677, %v6542_v1  ;;  %v6408_v33 = vmul.f32 %v6280_v31, %v18667_v29  ;;  %v5679_v13 = vpop.xlane.xlu1 %5678 }
 0x407   : >> { %18666 = vst [vmem:[#allocation36_spill] sm:$0xff] %v16176_v63  ;;  %v7052_v7 = vadd.f32 1.0, %v11508_v12  ;;  %11523 = vrsqrt.f32 %v6024_v62  ;;  %v6026_v8 = vadd.f32 1e-05, %v5898_v54  ;;  %v5899_v60 = vmul.f32 0.03125, %v5667_v45  ;;  %v16181_v51 = vpop.xlane.xlu0 %5681 }
 0x408   : >> { %v16184_v40 = vmul.f32 %v7051_v36, %v16145_v32  ;;  %11525 = verf.f32 %v6798_v0  ;;  %v6543_v43 = vadd.f32 %v16024_v2, %v6408_v33  ;;  %v5900_v58 = vmul.f32 0.03125, %v5670_v35 }
 0x409   : >> { %v11510_v22 = vpop.eup %11509  ;;  %v16188_v49 = vmul.f32 %v7052_v7, %v16147_v18  ;;  %11527 = vrsqrt.f32 %v6025_v39  ;;  %v6027_v38 = vadd.f32 1e-05, %v5899_v60  ;;  %v5901_v44 = vmul.f32 0.03125, %v5673_v37  ;;  %v18670_v39 = vld [vmem:[#allocation48_spill] sm:$0xff] }
 0x40a   : >> { %18668 = vst [vmem:[#allocation134_spill] sm:$0xff] %v16184_v40  ;;  %v11512_v1 = vpop.eup %11511  ;;  %v16190_v62 = vmul.f32 0.5, %v6543_v43  ;;  %v6799_v45 = vmul.f32 0.70710677, %v6543_v43  ;;  %v6281_v31 = vmul.f32 %v16007_v28, %v11510_v22  ;;  %11529 = vrsqrt.f32 %v6026_v8  ;;  %v16193_v32 = vpop.xlane.xlu1 %5684  ;;  %v18672_v22 = vld [vmem:[#allocation58_spill] sm:$0xff] }
 0x40b   : >> { %18669 = vst [vmem:[#allocation37_spill] sm:$0xff] %v16188_v49  ;;  %v11514_v16 = vpop.eup %11513  ;;  %v7053_v54 = vadd.f32 1.0, %v11512_v1  ;;  %11531 = vrsqrt.f32 %v6027_v38  ;;  %v6028_v35 = vadd.f32 1e-05, %v5900_v58  ;;  %v6029_v12 = vadd.f32 1e-05, %v5901_v44  ;;  %v16195_v36 = vpop.xlane.xlu0 %5687 }
 0x40c   : >> { %v11516_v18 = vpop.eup %11515  ;;  %11533 = verf.f32 %v6799_v45  ;;  %v6409_v37 = vmul.f32 %v6281_v31, %v18670_v39  ;;  %v6282_v0 = vmul.f32 %v16007_v28, %v11514_v16  ;;  %v5902_v29 = vmul.f32 0.03125, %v5676_v15  ;;  %v18673_v15 = vld [vmem:[#allocation49_spill] sm:$0xff]  ;;  %v18674_v39 = vld [vmem:[#allocation51_spill] sm:$0xff] }
 0x40d   : >> { %v11518_v33 = vpop.eup %11517  ;;  %v16200_v7 = vmul.f32 %v7053_v54, %v16160_v10  ;;  %v6283_v8 = vmul.f32 %v16007_v28, %v11516_v18  ;;  %11535 = vrsqrt.f32 %v6028_v35  ;;  %v5903_v60 = vmul.f32 0.03125, %v5679_v13 }
 0x40e   : >> { %v11520_v43 = vpop.eup %11519  ;;  %v6544_v58 = vadd.f32 %v16024_v2, %v6409_v37  ;;  %v6410_v38 = vmul.f32 %v6282_v0, %v18672_v22  ;;  %v6284_v44 = vmul.f32 %v16007_v28, %v11518_v33  ;;  %11537 = vrsqrt.f32 %v6029_v12  ;;  %v16206_v1 = vpop.xlane.xlu1 %5690  ;;  %v18675_v22 = vld [vmem:[#allocation136_spill] sm:$0xff] }
 0x40f   : >> { %18671 = vst [vmem:[#allocation109_spill] sm:$0xff] %v16200_v7  ;;  %v11522_v45 = vpop.eup %11521  ;;  %v6411_v31 = vmul.f32 %v6283_v8, %v18673_v15  ;;  %v6285_v10 = vmul.f32 %v16007_v28, %v11520_v43  ;;  %v6030_v16 = vadd.f32 1e-05, %v5902_v29  ;;  %v6031_v54 = vadd.f32 1e-05, %v5903_v60  ;;  %v16214_v0 = vpop.xlane.xlu0 %5693 }
 0x410   : >> { %v16210_v18 = vmul.f32 0.5, %v6544_v58  ;;  %v6800_v13 = vmul.f32 0.70710677, %v6544_v58  ;;  %v6545_v35 = vadd.f32 %v16024_v2, %v6410_v38  ;;  %v6412_v37 = vmul.f32 %v6284_v44, %v18674_v39 }
 0x411   : >> { %v11524_v33 = vpop.eup %11523  ;;  %v6546_v12 = vadd.f32 %v16024_v2, %v6411_v31  ;;  %v6413_v7 = vmul.f32 %v6285_v10, %v18675_v22  ;;  %v6286_v8 = vmul.f32 %v16007_v28, %v11522_v45  ;;  %11539 = vrsqrt.f32 %v6030_v16 }
 0x412   : >> { %v11526_v43 = vpop.eup %11525  ;;  %11541 = verf.f32 %v6800_v13  ;;  %v16219_v29 = vmul.f32 0.5, %v6545_v35  ;;  %v6801_v60 = vmul.f32 0.70710677, %v6545_v35  ;;  %v6547_v58 = vadd.f32 %v16024_v2, %v6412_v37  ;;  %v16225_v31 = vpop.xlane.xlu1 %5696 }
 0x413   : >> { %v11528_v38 = vpop.eup %11527  ;;  %v7054_v15 = vadd.f32 1.0, %v11526_v43  ;;  %v16222_v44 = vmul.f32 0.5, %v6546_v12  ;;  %v6802_v39 = vmul.f32 0.70710677, %v6546_v12  ;;  %v6548_v49 = vadd.f32 %v16024_v2, %v6413_v7  ;;  %v16238_v63 = vpop.xlane.xlu0 %5699 }
 0x414   : >> { %v11530_v10 = vpop.eup %11529  ;;  %11543 = verf.f32 %v6801_v60  ;;  %v16227_v45 = vmul.f32 0.5, %v6547_v58  ;;  %v6803_v16 = vmul.f32 0.70710677, %v6547_v58  ;;  %v6414_v13 = vmul.f32 %v6286_v8, %v15039_v4 }
 0x415   : >> { %v11532_v22 = vpop.eup %11531  ;;  %v16231_v35 = vmul.f32 %v7054_v15, %v16178_v59  ;;  %11545 = verf.f32 %v6802_v39  ;;  %v16233_v37 = vmul.f32 0.5, %v6548_v49  ;;  %v6804_v43 = vmul.f32 0.70710677, %v6548_v49 }
 0x416   : >> { %v11534_v12 = vpop.eup %11533  ;;  %11547 = verf.f32 %v6803_v16  ;;  %v6549_v7 = vadd.f32 %v16024_v2, %v6414_v13  ;;  %v6287_v40 = vmul.f32 %v16007_v28, %v11524_v33  ;;  %v6288_v60 = vmul.f32 %v16007_v28, %v11528_v38  ;;  %v18677_v13 = vld [vmem:[#allocation53_spill] sm:$0xff]  ;;  %v18679_v38 = vld [vmem:[#allocation54_spill] sm:$0xff] }
 0x417   : >> { %18676 = vst [vmem:[#allocation106_spill] sm:$0xff] %v16231_v35  ;;  %v11536_v58 = vpop.eup %11535  ;;  %v7055_v4 = vadd.f32 1.0, %v11534_v12  ;;  %11549 = verf.f32 %v6804_v43  ;;  %v6289_v59 = vmul.f32 %v16007_v28, %v11530_v10  ;;  %v6290_v8 = vmul.f32 %v16007_v28, %v11532_v22  ;;  %v16252_v10 = vpop.xlane.xlu1 %5702 }
 0x418   : >> { %v11538_v15 = vpop.eup %11537  ;;  %v16242_v39 = vmul.f32 0.5, %v6549_v7  ;;  %v6805_v49 = vmul.f32 0.70710677, %v6549_v7  ;;  %v6415_v16 = vmul.f32 %v6287_v40, %v15047_v50  ;;  %v6416_v35 = vmul.f32 %v6288_v60, %v18677_v13 }
 0x419   : >> { %v16247_v33 = vmul.f32 %v7055_v4, %v16190_v62  ;;  %v6417_v42 = vmul.f32 %v6289_v59, %v18679_v38  ;;  %v6418_v12 = vmul.f32 %v6290_v8, %v15114_v61  ;;  %v6291_v43 = vmul.f32 %v16007_v28, %v11536_v58  ;;  %v18680_v4 = vld [vmem:[#allocation64_spill] sm:$0xff] }
 0x41a   : >> { %11551 = verf.f32 %v6805_v49  ;;  %v6550_v22 = vadd.f32 %v16024_v2, %v6415_v16  ;;  %v6551_v7 = vadd.f32 %v16024_v2, %v6416_v35  ;;  %v6292_v50 = vmul.f32 %v16007_v28, %v11538_v15  ;;  %v16264_v16 = vpop.xlane.xlu0 %5705 }
 0x41b   : >> { %18678 = vst [vmem:[#allocation38_spill] sm:$0xff] %v16247_v33  ;;  %v11540_v40 = vpop.eup %11539  ;;  %v6552_v60 = vadd.f32 %v16024_v2, %v6417_v42  ;;  %v6553_v62 = vadd.f32 %v16024_v2, %v6418_v12  ;;  %v6419_v59 = vmul.f32 %v6291_v43, %v18680_v4  ;;  %11553 = vrsqrt.f32 %v6031_v54  ;;  %v18681_v43 = vld [vmem:[#allocation57_spill] sm:$0xff]  ;;  %v16276_v55 = vpop.xlane.xlu1 %5708 }
 0x41c   : >> { %v11542_v61 = vpop.eup %11541  ;;  %v16260_v8 = vmul.f32 0.5, %v6550_v22  ;;  %v6806_v58 = vmul.f32 0.70710677, %v6550_v22  ;;  %v16262_v13 = vmul.f32 0.5, %v6551_v7  ;;  %v6807_v49 = vmul.f32 0.70710677, %v6551_v7 }
 0x41d   : >> { %v7056_v35 = vadd.f32 1.0, %v11542_v61  ;;  %v16266_v38 = vmul.f32 0.5, %v6552_v60  ;;  %v6808_v15 = vmul.f32 0.70710677, %v6552_v60  ;;  %v16268_v33 = vmul.f32 0.5, %v6553_v62 }
 0x41e   : >> { %v11544_v42 = vpop.eup %11543  ;;  %11555 = verf.f32 %v6806_v58  ;;  %v6809_v12 = vmul.f32 0.70710677, %v6553_v62  ;;  %v6554_v54 = vadd.f32 %v16024_v2, %v6419_v59  ;;  %v6420_v4 = vmul.f32 %v6292_v50, %v18681_v43 }
 0x41f   : >> { %v11546_v21 = vpop.eup %11545  ;;  %v16273_v22 = vmul.f32 %v7056_v35, %v16210_v18  ;;  %v7057_v7 = vadd.f32 1.0, %v11544_v42  ;;  %11557 = verf.f32 %v6807_v49  ;;  %v6293_v61 = vmul.f32 %v16007_v28, %v11540_v40 }
 0x420   : >> { %v11548_v60 = vpop.eup %11547  ;;  %v7058_v20 = vadd.f32 1.0, %v11546_v21  ;;  %11559 = verf.f32 %v6808_v15  ;;  %v16278_v27 = vmul.f32 0.5, %v6554_v54  ;;  %v6810_v62 = vmul.f32 0.70710677, %v6554_v54  ;;  %v16288_v21 = vpop.xlane.xlu0 %5711 }
 0x421   : >> { %v11550_v58 = vpop.eup %11549  ;;  %v16281_v59 = vmul.f32 %v7057_v7, %v16219_v29  ;;  %v7059_v50 = vadd.f32 1.0, %v11548_v60  ;;  %11561 = verf.f32 %v6809_v12  ;;  %v6555_v18 = vadd.f32 %v16024_v2, %v6420_v4  ;;  %v5715_v60 = vpop.xlane.xlu1 %5714  ;;  %9806 = vst.msk [vmem:[%s16731_s1 + $0x431] sm:$0xff] (!%p9738_p5), %vm1004_vm2, %v16273_v22 }
 0x422   : >> { %v16285_v49 = vmul.f32 %v7058_v20, %v16222_v44  ;;  %v7060_v40 = vadd.f32 1.0, %v11550_v58  ;;  %11563 = verf.f32 %v6810_v62  ;;  %v6421_v35 = vmul.f32 %v6293_v61, %v15170_v30 }
 0x423   : >> { %v16291_v15 = vmul.f32 %v7059_v50, %v16227_v45  ;;  %v16293_v42 = vmul.f32 0.5, %v6555_v18  ;;  %v6811_v29 = vmul.f32 0.70710677, %v6555_v18  ;;  %v5904_v54 = vmul.f32 0.03125, %v16181_v51  ;;  %9807 = vst.msk [vmem:[%s16731_s1 + $0x439] sm:$0xff] (!%p9738_p5), %vm1004_vm2, %v16281_v59 }
 0x424   : >> { %v11552_v12 = vpop.eup %11551  ;;  %v16297_v43 = vmul.f32 %v7060_v40, %v16233_v37  ;;  %v6556_v20 = vadd.f32 %v16024_v2, %v6421_v35  ;;  %v5905_v44 = vmul.f32 0.03125, %v16193_v32  ;;  %v5906_v30 = vmul.f32 0.03125, %v16195_v36  ;;  %9808 = vst.msk [vmem:[%s16731_s1 + $0x441] sm:$0xff] (!%p9738_p5), %vm1004_vm2, %v16285_v49 }
 0x425   : >> { %v11554_v4 = vpop.eup %11553  ;;  %v7061_v7 = vadd.f32 1.0, %v11552_v12  ;;  %11565 = verf.f32 %v6811_v29  ;;  %v6032_v45 = vadd.f32 1e-05, %v5904_v54  ;;  %v5907_v61 = vmul.f32 0.03125, %v16206_v1  ;;  %v5718_v29 = vpop.xlane.xlu0 %5717  ;;  %9809 = vst.msk [vmem:[%s16731_s1 + $0x449] sm:$0xff] (!%p9738_p5), %vm1004_vm2, %v16291_v15 }
 0x426   : >> { %v16303_v62 = vmul.f32 0.5, %v6556_v20  ;;  %v6812_v51 = vmul.f32 0.70710677, %v6556_v20  ;;  %v6294_v58 = vmul.f32 %v16007_v28, %v11554_v4  ;;  %v6033_v37 = vadd.f32 1e-05, %v5905_v44  ;;  %9810 = vst.msk [vmem:[%s16731_s1 + $0x451] sm:$0xff] (!%p9738_p5), %vm1004_vm2, %v16297_v43 }
 0x427   : >> { %v16307_v50 = vmul.f32 %v7061_v7, %v16242_v39  ;;  %11567 = vrsqrt.f32 %v6032_v45  ;;  %v6034_v32 = vadd.f32 1e-05, %v5906_v30  ;;  %v6035_v18 = vadd.f32 1e-05, %v5907_v61  ;;  %v5721_v45 = vpop.xlane.xlu1 %5720 }
 0x428   : >> { %v11556_v36 = vpop.eup %11555  ;;  %11569 = verf.f32 %v6812_v51  ;;  %v6422_v40 = vmul.f32 %v6294_v58, %v15190_v34  ;;  %v5908_v35 = vmul.f32 0.03125, %v16214_v0  ;;  %v5909_v1 = vmul.f32 0.03125, %v16225_v31 }
 0x429   : >> { %v11558_v54 = vpop.eup %11557  ;;  %v7062_v12 = vadd.f32 1.0, %v11556_v36  ;;  %11571 = vrsqrt.f32 %v6033_v37  ;;  %v5910_v28 = vmul.f32 0.03125, %v16238_v63  ;;  %v5911_v39 = vmul.f32 0.03125, %v16252_v10  ;;  %9811 = vst.msk [vmem:[%s16731_s1 + $0x459] sm:$0xff] (!%p9738_p5), %vm1004_vm2, %v16307_v50 }
 0x42a   : >> { %v11560_v20 = vpop.eup %11559  ;;  %v7063_v44 = vadd.f32 1.0, %v11558_v54  ;;  %v6557_v30 = vadd.f32 %v16024_v2, %v6422_v40  ;;  %11573 = vrsqrt.f32 %v6034_v32  ;;  %v6036_v4 = vadd.f32 1e-05, %v5908_v35  ;;  %v5724_v40 = vpop.xlane.xlu0 %5723 }
 0x42b   : >> { %v11562_v7 = vpop.eup %11561  ;;  %v16316_v34 = vmul.f32 %v7062_v12, %v16260_v8  ;;  %v7064_v0 = vadd.f32 1.0, %v11560_v20  ;;  %11575 = vrsqrt.f32 %v6035_v18  ;;  %v6037_v31 = vadd.f32 1e-05, %v5909_v1 }
 0x42c   : >> { %v11564_v61 = vpop.eup %11563  ;;  %v16319_v51 = vmul.f32 %v7063_v44, %v16262_v13  ;;  %v7065_v63 = vadd.f32 1.0, %v11562_v7  ;;  %v16321_v10 = vmul.f32 0.5, %v6557_v30  ;;  %v6813_v58 = vmul.f32 0.70710677, %v6557_v30  ;;  %v5727_v44 = vpop.xlane.xlu1 %5726 }
 0x42d   : >> { %v16324_v2 = vmul.f32 %v7064_v0, %v16266_v38  ;;  %v7066_v37 = vadd.f32 1.0, %v11564_v61  ;;  %11577 = vrsqrt.f32 %v6036_v4  ;;  %v6038_v32 = vadd.f32 1e-05, %v5910_v28  ;;  %v16339_v4 = vld [vmem:[%s12036_s24] ss:$0 sm:$0xff]  ;;  %9812 = vst.msk [vmem:[%s16731_s1 + $0x461] sm:$0xff] (!%p9738_p5), %vm1004_vm2, %v16316_v34 }
 0x42e   : >> { %18682 = vst [vmem:[#allocation140_spill] sm:$0xff] %v16319_v51  ;;  %v16327_v8 = vmul.f32 %v7065_v63, %v16268_v33  ;;  %11579 = verf.f32 %v6813_v58  ;;  %v6039_v18 = vadd.f32 1e-05, %v5911_v39  ;;  %v5912_v36 = vmul.f32 0.03125, %v16264_v16  ;;  %v16344_v58 = vpop.xlane.xlu0 %5729 }
 0x42f   : >> { %18683 = vst [vmem:[#allocation39_spill] sm:$0xff] %v16324_v2  ;;  %v11566_v13 = vpop.eup %11565  ;;  %v16331_v35 = vmul.f32 %v7066_v37, %v16278_v27  ;;  %11581 = vrsqrt.f32 %v6037_v31  ;;  %v5913_v38 = vmul.f32 0.03125, %v16276_v55  ;;  %v5914_v1 = vmul.f32 0.03125, %v16288_v21 }
 0x430   : >> { %18684 = vst [vmem:[#allocation139_spill] sm:$0xff] %v16327_v8  ;;  %v7067_v54 = vadd.f32 1.0, %v11566_v13  ;;  %11583 = vrsqrt.f32 %v6038_v32  ;;  %v6040_v12 = vadd.f32 1e-05, %v5912_v36  ;;  %v5915_v33 = vmul.f32 0.03125, %v5715_v60 }
 0x431   : >> { %18685 = vst [vmem:[#allocation40_spill] sm:$0xff] %v16331_v35  ;;  %v11568_v28 = vpop.eup %11567  ;;  %11585 = vrsqrt.f32 %v6039_v18  ;;  %v6041_v39 = vadd.f32 1e-05, %v5913_v38  ;;  %v6042_v20 = vadd.f32 1e-05, %v5914_v1  ;;  %v5916_v16 = vmul.f32 0.03125, %v5718_v29 }
 0x432   : >> { %v11570_v30 = vpop.eup %11569  ;;  %v16336_v27 = vmul.f32 %v7067_v54, %v16293_v42  ;;  %v6295_v55 = vmul.f32 %v16339_v4, %v11568_v28  ;;  %11587 = vrsqrt.f32 %v6040_v12  ;;  %v6043_v21 = vadd.f32 1e-05, %v5915_v33  ;;  %v16351_v13 = vld [vmem:[%s12041_s15] ss:$0 sm:$0xff]  ;;  %v18688_v38 = vld [vmem:[#allocation70_spill] sm:$0xff]  ;;  %v16359_v33 = vpop.xlane.xlu1 %5732 }
 0x433   : >> { %v11572_v7 = vpop.eup %11571  ;;  %v7068_v0 = vadd.f32 1.0, %v11570_v30  ;;  %11589 = vrsqrt.f32 %v6041_v39  ;;  %v6044_v60 = vadd.f32 1e-05, %v5916_v16  ;;  %v5917_v31 = vmul.f32 0.03125, %v5721_v45 }
 0x434   : >> { %18686 = vst [vmem:[#allocation41_spill] sm:$0xff] %v16336_v27  ;;  %v11574_v61 = vpop.eup %11573  ;;  %v6423_v29 = vmul.f32 %v6295_v55, %v15201_v3  ;;  %v6296_v63 = vmul.f32 %v16339_v4, %v11572_v7  ;;  %11591 = vrsqrt.f32 %v6042_v20  ;;  %v5918_v42 = vmul.f32 0.03125, %v5724_v40 }
 0x435   : >> { %v11576_v37 = vpop.eup %11575  ;;  %v16347_v32 = vmul.f32 %v7068_v0, %v16303_v62  ;;  %v6297_v18 = vmul.f32 %v16339_v4, %v11574_v61  ;;  %11593 = vrsqrt.f32 %v6043_v21  ;;  %v6045_v36 = vadd.f32 1e-05, %v5917_v31  ;;  %v16370_v61 = vpop.xlane.xlu0 %5735 }
 0x436   : >> { %v6558_v45 = vadd.f32 %v16351_v13, %v6423_v29  ;;  %v6424_v3 = vmul.f32 %v6296_v63, %v18688_v38  ;;  %v6298_v1 = vmul.f32 %v16339_v4, %v11576_v37  ;;  %11595 = vrsqrt.f32 %v6044_v60 }
 0x437   : >> { %18687 = vst [vmem:[#allocation115_spill] sm:$0xff] %v16347_v32  ;;  %v11578_v40 = vpop.eup %11577  ;;  %v6425_v54 = vmul.f32 %v6297_v18, %v15250_v47  ;;  %11597 = vrsqrt.f32 %v6045_v36  ;;  %v6046_v12 = vadd.f32 1e-05, %v5918_v42  ;;  %v16357_v62 = vmul.f32 0.03125, %v5727_v44 }
 0x438   : >> { %v11580_v28 = vpop.eup %11579  ;;  %v16361_v39 = vmul.f32 0.5, %v6558_v45  ;;  %v6814_v20 = vmul.f32 0.70710677, %v6558_v45  ;;  %v6559_v16 = vadd.f32 %v16351_v13, %v6424_v3  ;;  %v6426_v30 = vmul.f32 %v6298_v1, %v15261_v19 }
 0x439   : >> { %v11582_v55 = vpop.eup %11581  ;;  %v7069_v21 = vadd.f32 1.0, %v11580_v28  ;;  %v6560_v7 = vadd.f32 %v16351_v13, %v6425_v54  ;;  %v6299_v47 = vmul.f32 %v16339_v4, %v11578_v40  ;;  %11599 = vrsqrt.f32 %v6046_v12  ;;  %v16384_v54 = vpop.xlane.xlu1 %5738 }
 0x43a   : >> { %v11584_v0 = vpop.eup %11583  ;;  %11601 = verf.f32 %v6814_v20  ;;  %v16367_v44 = vmul.f32 0.5, %v6559_v16  ;;  %v6815_v60 = vmul.f32 0.70710677, %v6559_v16  ;;  %v6561_v31 = vadd.f32 %v16351_v13, %v6426_v30 }
 0x43b   : >> { %v11586_v29 = vpop.eup %11585  ;;  %v16373_v63 = vmul.f32 %v7069_v21, %v16321_v10  ;;  %v16375_v19 = vmul.f32 0.5, %v6560_v7  ;;  %v6816_v42 = vmul.f32 0.70710677, %v6560_v7  ;;  %v6427_v37 = vmul.f32 %v6299_v47, %v15290_v17  ;;  %v18690_v21 = vld [vmem:[#allocation74_spill] sm:$0xff]  ;;  %v18691_v47 = vld [vmem:[#allocation67_spill] sm:$0xff] }
 0x43c   : >> { %v11588_v18 = vpop.eup %11587  ;;  %11603 = verf.f32 %v6815_v60  ;;  %v16378_v36 = vmul.f32 0.5, %v6561_v31  ;;  %v6817_v45 = vmul.f32 0.70710677, %v6561_v31  ;;  %v6300_v38 = vmul.f32 %v16339_v4, %v11582_v55 }
 0x43d   : >> { %18689 = vst [vmem:[#allocation112_spill] sm:$0xff] %v16373_v63  ;;  %v11590_v3 = vpop.eup %11589  ;;  %11605 = verf.f32 %v6816_v42  ;;  %v6562_v1 = vadd.f32 %v16351_v13, %v6427_v37  ;;  %v6301_v40 = vmul.f32 %v16339_v4, %v11584_v0  ;;  %v6302_v10 = vmul.f32 %v16339_v4, %v11586_v29  ;;  %v18692_v29 = vld [vmem:[#allocation144_spill] sm:$0xff]  ;;  %v18693_v37 = vld [vmem:[#allocation69_spill] sm:$0xff] }
 0x43e   : >> { %v11592_v12 = vpop.eup %11591  ;;  %11607 = verf.f32 %v6817_v45  ;;  %v6428_v17 = vmul.f32 %v6300_v38, %v15298_v11  ;;  %v6303_v28 = vmul.f32 %v16339_v4, %v11588_v18  ;;  %v6304_v20 = vmul.f32 %v16339_v4, %v11590_v3  ;;  %v16397_v18 = vpop.xlane.xlu0 %5741 }
 0x43f   : >> { %v11594_v16 = vpop.eup %11593  ;;  %v16389_v30 = vmul.f32 0.5, %v6562_v1  ;;  %v6818_v55 = vmul.f32 0.70710677, %v6562_v1  ;;  %v6429_v7 = vmul.f32 %v6301_v40, %v18690_v21  ;;  %v6430_v0 = vmul.f32 %v6302_v10, %v18691_v47 }
 0x440   : >> { %v11596_v60 = vpop.eup %11595  ;;  %v6563_v31 = vadd.f32 %v16351_v13, %v6428_v17  ;;  %v6431_v42 = vmul.f32 %v6303_v28, %v18692_v29  ;;  %v6432_v45 = vmul.f32 %v6304_v20, %v18693_v37  ;;  %v6305_v11 = vmul.f32 %v16339_v4, %v11592_v12  ;;  %v16410_v37 = vpop.xlane.xlu1 %5744 }
 0x441   : >> { %v11598_v38 = vpop.eup %11597  ;;  %11609 = verf.f32 %v6818_v55  ;;  %v6564_v3 = vadd.f32 %v16351_v13, %v6429_v7  ;;  %v6565_v1 = vadd.f32 %v16351_v13, %v6430_v0  ;;  %v6306_v40 = vmul.f32 %v16339_v4, %v11594_v16 }
 0x442   : >> { %v16402_v10 = vmul.f32 0.5, %v6563_v31  ;;  %v6819_v21 = vmul.f32 0.70710677, %v6563_v31  ;;  %v6566_v17 = vadd.f32 %v16351_v13, %v6431_v42  ;;  %v6567_v28 = vadd.f32 %v16351_v13, %v6432_v45  ;;  %v18694_v45 = vld [vmem:[#allocation80_spill] sm:$0xff]  ;;  %v16420_v2 = vpop.xlane.xlu0 %5747 }
 0x443   : >> { %v11600_v20 = vpop.eup %11599  ;;  %v16406_v47 = vmul.f32 0.5, %v6564_v3  ;;  %v6820_v12 = vmul.f32 0.70710677, %v6564_v3  ;;  %v16408_v29 = vmul.f32 0.5, %v6565_v1  ;;  %v6821_v55 = vmul.f32 0.70710677, %v6565_v1 }
 0x444   : >> { %v11602_v7 = vpop.eup %11601  ;;  %11611 = verf.f32 %v6819_v21  ;;  %v16412_v0 = vmul.f32 0.5, %v6566_v17  ;;  %v6822_v16 = vmul.f32 0.70710677, %v6566_v17  ;;  %v16414_v63 = vmul.f32 0.5, %v6567_v28  ;;  %v18695_v3 = vld [vmem:[#allocation73_spill] sm:$0xff] }
 0x445   : >> { %v7070_v31 = vadd.f32 1.0, %v11602_v7  ;;  %11613 = verf.f32 %v6820_v12  ;;  %v6823_v42 = vmul.f32 0.70710677, %v6567_v28  ;;  %v6433_v32 = vmul.f32 %v6305_v11, %v18694_v45 }
 0x446   : >> { %v11604_v27 = vpop.eup %11603  ;;  %11615 = verf.f32 %v6821_v55  ;;  %v6434_v35 = vmul.f32 %v6306_v40, %v18695_v3  ;;  %v6307_v1 = vmul.f32 %v16339_v4, %v11596_v60  ;;  %v6308_v8 = vmul.f32 %v16339_v4, %v11598_v38 }
 0x447   : >> { %v11606_v21 = vpop.eup %11605  ;;  %v16423_v17 = vmul.f32 %v7070_v31, %v16361_v39  ;;  %v7071_v51 = vadd.f32 1.0, %v11604_v27  ;;  %11617 = verf.f32 %v6822_v16  ;;  %v6568_v28 = vadd.f32 %v16351_v13, %v6433_v32  ;;  %v16433_v39 = vpop.xlane.xlu1 %5750 }
 0x448   : >> { %v11608_v12 = vpop.eup %11607  ;;  %v7072_v11 = vadd.f32 1.0, %v11606_v21  ;;  %11619 = verf.f32 %v6823_v42  ;;  %v6569_v55 = vadd.f32 %v16351_v13, %v6434_v35  ;;  %v6435_v40 = vmul.f32 %v6307_v1, %v15445_v23  ;;  %v5754_v1 = vpop.xlane.xlu0 %5753 }
 0x449   : >> { %v16429_v60 = vmul.f32 %v7071_v51, %v16367_v44  ;;  %v7073_v38 = vadd.f32 1.0, %v11608_v12  ;;  %v16431_v7 = vmul.f32 0.5, %v6568_v28  ;;  %v6824_v45 = vmul.f32 0.70710677, %v6568_v28  ;;  %9820 = vst.msk [vmem:[%s16731_s1 + $0x529] sm:$0xff] (!%p9738_p5), %vm1004_vm2, %v16423_v17 }
 0x44a   : >> { %v16436_v27 = vmul.f32 %v7072_v11, %v16375_v19  ;;  %v16438_v32 = vmul.f32 0.5, %v6569_v55  ;;  %v6825_v16 = vmul.f32 0.70710677, %v6569_v55  ;;  %v6570_v31 = vadd.f32 %v16351_v13, %v6435_v40 }
 0x44b   : >> { %v11610_v35 = vpop.eup %11609  ;;  %v16442_v23 = vmul.f32 %v7073_v38, %v16378_v36  ;;  %11621 = verf.f32 %v6824_v45  ;;  %v6436_v51 = vmul.f32 %v6308_v8, %v15461_v56  ;;  %v6309_v44 = vmul.f32 %v16339_v4, %v11600_v20  ;;  %9821 = vst.msk [vmem:[%s16731_s1 + $0x531] sm:$0xff] (!%p9738_p5), %vm1004_vm2, %v16429_v60 }
 0x44c   : >> { %v7074_v42 = vadd.f32 1.0, %v11610_v35  ;;  %11623 = verf.f32 %v6825_v16  ;;  %v16446_v3 = vmul.f32 0.5, %v6570_v31  ;;  %v6826_v19 = vmul.f32 0.70710677, %v6570_v31  ;;  %v5757_v16 = vpop.xlane.xlu1 %5756  ;;  %9822 = vst.msk [vmem:[%s16731_s1 + $0x539] sm:$0xff] (!%p9738_p5), %vm1004_vm2, %v16436_v27 }
 0x44d   : >> { %v6571_v21 = vadd.f32 %v16351_v13, %v6436_v51  ;;  %v6437_v28 = vmul.f32 %v6309_v44, %v15483_v6  ;;  %v6047_v12 = vadd.f32 1e-05, %v16357_v62  ;;  %v5920_v36 = vmul.f32 0.03125, %v16344_v58  ;;  %9823 = vst.msk [vmem:[%s16731_s1 + $0x541] sm:$0xff] (!%p9738_p5), %vm1004_vm2, %v16442_v23 }
 0x44e   : >> { %v11612_v11 = vpop.eup %11611  ;;  %v16453_v55 = vmul.f32 %v7074_v42, %v16389_v30  ;;  %11625 = verf.f32 %v6826_v19  ;;  %v5921_v56 = vmul.f32 0.03125, %v16359_v33  ;;  %v5922_v8 = vmul.f32 0.03125, %v16370_v61 }
 0x44f   : >> { %v11614_v20 = vpop.eup %11613  ;;  %v7075_v40 = vadd.f32 1.0, %v11612_v11  ;;  %v16457_v38 = vmul.f32 0.5, %v6571_v21  ;;  %v6827_v45 = vmul.f32 0.70710677, %v6571_v21  ;;  %v6572_v6 = vadd.f32 %v16351_v13, %v6437_v28  ;;  %v5760_v28 = vpop.xlane.xlu0 %5759 }
 0x450   : >> { %v11616_v62 = vpop.eup %11615  ;;  %v7076_v31 = vadd.f32 1.0, %v11614_v20  ;;  %11627 = vrsqrt.f32 %v6047_v12  ;;  %v6048_v58 = vadd.f32 1e-05, %v5920_v36  ;;  %v6049_v35 = vadd.f32 1e-05, %v5921_v56  ;;  %9824 = vst.msk [vmem:[%s16731_s1 + $0x549] sm:$0xff] (!%p9738_p5), %vm1004_vm2, %v16453_v55 }
 0x451   : >> { %v11618_v30 = vpop.eup %11617  ;;  %v16461_v51 = vmul.f32 %v7075_v40, %v16402_v10  ;;  %v7077_v33 = vadd.f32 1.0, %v11616_v62  ;;  %11629 = verf.f32 %v6827_v45  ;;  %v16463_v61 = vmul.f32 0.5, %v6572_v6 }
 0x452   : >> { %v11620_v44 = vpop.eup %11619  ;;  %v16466_v42 = vmul.f32 %v7076_v31, %v16406_v47  ;;  %v7078_v19 = vadd.f32 1.0, %v11618_v30  ;;  %v6828_v21 = vmul.f32 0.70710677, %v6572_v6  ;;  %11631 = vrsqrt.f32 %v6048_v58  ;;  %v5763_v6 = vpop.xlane.xlu1 %5762 }
 0x453   : >> { %v16469_v12 = vmul.f32 %v7077_v33, %v16408_v29  ;;  %v7079_v36 = vadd.f32 1.0, %v11620_v44  ;;  %11633 = vrsqrt.f32 %v6049_v35  ;;  %v6050_v11 = vadd.f32 1e-05, %v5922_v8  ;;  %9825 = vst.msk [vmem:[%s16731_s1 + $0x551] sm:$0xff] (!%p9738_p5), %vm1004_vm2, %v16461_v51 }
 0x454   : >> { %v16472_v10 = vmul.f32 %v7078_v19, %v16412_v0  ;;  %11635 = verf.f32 %v6828_v21  ;;  %v5923_v56 = vmul.f32 0.03125, %v16384_v54  ;;  %v5924_v20 = vmul.f32 0.03125, %v16397_v18  ;;  %v5766_v19 = vpop.xlane.xlu0 %5765  ;;  %9826 = vst.msk [vmem:[%s16731_s1 + $0x559] sm:$0xff] (!%p9738_p5), %vm1004_vm2, %v16466_v42 }
 0x455   : >> { %v11622_v47 = vpop.eup %11621  ;;  %v16477_v40 = vmul.f32 %v7079_v36, %v16414_v63  ;;  %11637 = vrsqrt.f32 %v6050_v11  ;;  %v5925_v45 = vmul.f32 0.03125, %v16410_v37  ;;  %v5926_v29 = vmul.f32 0.03125, %v16420_v2  ;;  %9827 = vst.msk [vmem:[%s16731_s1 + $0x561] sm:$0xff] (!%p9738_p5), %vm1004_vm2, %v16469_v12 }
 0x456   : >> { %v11624_v62 = vpop.eup %11623  ;;  %v7080_v8 = vadd.f32 1.0, %v11622_v47  ;;  %v6051_v31 = vadd.f32 1e-05, %v5923_v56  ;;  %v6052_v0 = vadd.f32 1e-05, %v5924_v20  ;;  %v5927_v58 = vmul.f32 0.03125, %v16433_v39 }
 0x457   : >> { %v7081_v35 = vadd.f32 1.0, %v11624_v62  ;;  %v6053_v54 = vadd.f32 1e-05, %v5925_v45  ;;  %v6054_v30 = vadd.f32 1e-05, %v5926_v29  ;;  %v5928_v18 = vmul.f32 0.03125, %v5754_v1  ;;  %v5769_v45 = vpop.xlane.xlu1 %5768 }
 0x458   : >> { %v11626_v33 = vpop.eup %11625  ;;  %v16483_v63 = vmul.f32 %v7080_v8, %v16431_v7  ;;  %11639 = vrsqrt.f32 %v6051_v31  ;;  %v6055_v44 = vadd.f32 1e-05, %v5927_v58  ;;  %v5929_v37 = vmul.f32 0.03125, %v5757_v16  ;;  %9828 = vst.msk [vmem:[%s16731_s1 + $0x569] sm:$0xff] (!%p9738_p5), %vm1004_vm2, %v16472_v10  ;;  %9829 = vst.msk [vmem:[%s16731_s1 + $0x571] sm:$0xff] (!%p9738_p5), %vm1004_vm2, %v16477_v40 }
 0x459   : >> { %v16486_v2 = vmul.f32 %v7081_v35, %v16438_v32  ;;  %v7082_v21 = vadd.f32 1.0, %v11626_v33  ;;  %11641 = vrsqrt.f32 %v6052_v0  ;;  %v6056_v36 = vadd.f32 1e-05, %v5928_v18 }
 0x45a   : >> { %v11628_v11 = vpop.eup %11627  ;;  %11643 = vrsqrt.f32 %v6053_v54  ;;  %v6057_v39 = vadd.f32 1e-05, %v5929_v37  ;;  %v5930_v56 = vmul.f32 0.03125, %v5760_v28  ;;  %v5931_v20 = vmul.f32 0.03125, %v5763_v6  ;;  %v18697_v37 = vld [vmem:[#allocation79_spill] sm:$0xff]  ;;  %9830 = vst.msk [vmem:[%s16731_s1 + $0x579] sm:$0xff] (!%p9738_p5), %vm1004_vm2, %v16483_v63 }
 0x45b   : >> { %v11630_v1 = vpop.eup %11629  ;;  %v16489_v47 = vmul.f32 %v7082_v21, %v16446_v3  ;;  %v6310_v7 = vmul.f32 %v16339_v4, %v11628_v11  ;;  %11645 = vrsqrt.f32 %v6054_v30  ;;  %v5932_v16 = vmul.f32 0.03125, %v5766_v19  ;;  %v5772_v30 = vpop.xlane.xlu0 %5771  ;;  %9831 = vst.msk [vmem:[%s16731_s1 + $0x581] sm:$0xff] (!%p9738_p5), %vm1004_vm2, %v16486_v2 }
 0x45c   : >> { %v11632_v29 = vpop.eup %11631  ;;  %v7083_v32 = vadd.f32 1.0, %v11630_v1  ;;  %11647 = vrsqrt.f32 %v6055_v44  ;;  %v6058_v62 = vadd.f32 1e-05, %v5930_v56  ;;  %v6059_v8 = vadd.f32 1e-05, %v5931_v20 }
 0x45d   : >> { %v11634_v31 = vpop.eup %11633  ;;  %v6438_v0 = vmul.f32 %v6310_v7, %v15493_v25  ;;  %v6311_v28 = vmul.f32 %v16339_v4, %v11632_v29  ;;  %11649 = vrsqrt.f32 %v6056_v36  ;;  %v6060_v6 = vadd.f32 1e-05, %v5932_v16  ;;  %v5775_v29 = vpop.xlane.xlu1 %5774  ;;  %9832 = vst.msk [vmem:[%s16731_s1 + $0x589] sm:$0xff] (!%p9738_p5), %vm1004_vm2, %v16489_v47 }
 0x45e   : >> { %v11636_v58 = vpop.eup %11635  ;;  %v16495_v3 = vmul.f32 %v7083_v32, %v16457_v38  ;;  %v6312_v35 = vmul.f32 %v16339_v4, %v11634_v31  ;;  %11651 = vrsqrt.f32 %v6057_v39  ;;  %v5933_v54 = vmul.f32 0.03125, %v5769_v45 }
 0x45f   : >> { %v11638_v18 = vpop.eup %11637  ;;  %v7084_v33 = vadd.f32 1.0, %v11636_v58  ;;  %v6573_v44 = vadd.f32 %v16351_v13, %v6438_v0  ;;  %v6439_v19 = vmul.f32 %v6311_v28, %v18697_v37  ;;  %11653 = vrsqrt.f32 %v6058_v62  ;;  %v16517_v28 = vpop.xlane.xlu0 %5777 }
 0x460   : >> { %18696 = vst [vmem:[#allocation143_spill] sm:$0xff] %v16495_v3  ;;  %v6440_v25 = vmul.f32 %v6312_v35, %v15548_v14  ;;  %v6313_v21 = vmul.f32 %v16339_v4, %v11638_v18  ;;  %11655 = vrsqrt.f32 %v6059_v8  ;;  %v16506_v39 = vadd.f32 1e-05, %v5933_v54  ;;  %v18699_v18 = vld [vmem:[#allocation89_spill] sm:$0xff] }
 0x461   : >> { %v16503_v38 = vmul.f32 %v7084_v33, %v16463_v61  ;;  %v6829_v36 = vmul.f32 0.70710677, %v6573_v44  ;;  %v6574_v11 = vadd.f32 %v16351_v13, %v6439_v19  ;;  %11657 = vrsqrt.f32 %v6060_v6 }
 0x462   : >> { %v11640_v56 = vpop.eup %11639  ;;  %v6575_v20 = vadd.f32 %v16351_v13, %v6440_v25  ;;  %v6441_v1 = vmul.f32 %v6313_v21, %v15560_v52  ;;  %v5934_v7 = vmul.f32 0.03125, %v5772_v30  ;;  %v16510_v14 = vmul.f32 0.5, %v6573_v44 }
 0x463   : >> { %18698 = vst [vmem:[#allocation42_spill] sm:$0xff] %v16503_v38  ;;  %v11642_v16 = vpop.eup %11641  ;;  %11659 = verf.f32 %v6829_v36  ;;  %v6830_v45 = vmul.f32 0.70710677, %v6574_v11  ;;  %v6314_v61 = vmul.f32 %v16339_v4, %v11640_v56  ;;  %v16513_v62 = vmul.f32 0.5, %v6574_v11 }
 0x464   : >> { %v11644_v32 = vpop.eup %11643  ;;  %v6831_v8 = vmul.f32 0.70710677, %v6575_v20  ;;  %v6576_v31 = vadd.f32 %v16351_v13, %v6441_v1  ;;  %v6315_v0 = vmul.f32 %v16339_v4, %v11642_v16  ;;  %v16519_v6 = vmul.f32 0.5, %v6575_v20 }
 0x465   : >> { %v11646_v52 = vpop.eup %11645  ;;  %11661 = verf.f32 %v6830_v45  ;;  %v6442_v58 = vmul.f32 %v6314_v61, %v15587_v5  ;;  %v6316_v35 = vmul.f32 %v16339_v4, %v11644_v32  ;;  %v16524_v44 = vadd.f32 1e-05, %v5934_v7 }
 0x466   : >> { %v11648_v54 = vpop.eup %11647  ;;  %11663 = verf.f32 %v6831_v8  ;;  %v6832_v30 = vmul.f32 0.70710677, %v6576_v31  ;;  %v6443_v33 = vmul.f32 %v6315_v0, %v18699_v18  ;;  %v6317_v21 = vmul.f32 %v16339_v4, %v11646_v52 }
 0x467   : >> { %v11650_v37 = vpop.eup %11649  ;;  %v6577_v19 = vadd.f32 %v16351_v13, %v6442_v58  ;;  %v6444_v25 = vmul.f32 %v6316_v35, %v15608_v46  ;;  %v6318_v36 = vmul.f32 %v16339_v4, %v11648_v54  ;;  %v16530_v5 = vmul.f32 0.5, %v6576_v31  ;;  %v16536_v46 = vpop.xlane.xlu1 %5780  ;;  %v18700_v31 = vld [vmem:[#allocation95_spill] sm:$0xff]  ;;  %v18701_v58 = vld [vmem:[#allocation50_spill] sm:$0xff] }
 0x468   : >> { %v11652_v11 = vpop.eup %11651  ;;  %11665 = verf.f32 %v6832_v30  ;;  %v6578_v56 = vadd.f32 %v16351_v13, %v6443_v33  ;;  %v6319_v20 = vmul.f32 %v16339_v4, %v11650_v37  ;;  %v6445_v45 = vmul.f32 %v6317_v21, %v15638_v9  ;;  %v16542_v54 = vpop.xlane.xlu0 %5783 }
 0x469   : >> { %v11654_v1 = vpop.eup %11653  ;;  %v6833_v7 = vmul.f32 0.70710677, %v6577_v19  ;;  %v6579_v16 = vadd.f32 %v16351_v13, %v6444_v25  ;;  %v5935_v61 = vmul.f32 0.03125, %v5775_v29  ;;  %v16538_v8 = vmul.f32 0.5, %v6577_v19 }
 0x46a   : >> { %v11656_v32 = vpop.eup %11655  ;;  %v6834_v0 = vmul.f32 0.70710677, %v6578_v56  ;;  %v6446_v52 = vmul.f32 %v6318_v36, %v18700_v31  ;;  %v6447_v35 = vmul.f32 %v6319_v20, %v18701_v58  ;;  %v16544_v30 = vmul.f32 0.5, %v6578_v56 }
 0x46b   : >> { %11667 = verf.f32 %v6833_v7  ;;  %v6835_v18 = vmul.f32 0.70710677, %v6579_v16  ;;  %v6580_v33 = vadd.f32 %v16351_v13, %v6445_v45  ;;  %v11658_v9 = vpop.eup %11657  ;;  %v6320_v19 = vmul.f32 %v16339_v4, %v11652_v11 }
 0x46c   : >> { %11669 = verf.f32 %v6834_v0  ;;  %v6581_v29 = vadd.f32 %v16351_v13, %v6446_v52  ;;  %v6582_v37 = vadd.f32 %v16351_v13, %v6447_v35  ;;  %v16550_v21 = vmul.f32 0.5, %v6579_v16  ;;  %v5787_v35 = vpop.xlane.xlu1 %5786 }
 0x46d   : >> { %v11660_v25 = vpop.eup %11659  ;;  %11671 = verf.f32 %v6835_v18  ;;  %v6836_v36 = vmul.f32 0.70710677, %v6580_v33  ;;  %v6321_v20 = vmul.f32 %v16339_v4, %v11654_v1  ;;  %v16553_v7 = vmul.f32 0.5, %v6580_v33  ;;  %v5790_v33 = vpop.xlane.xlu0 %5789 }
 0x46e   : >> { %v7085_v56 = vadd.f32 1.0, %v11660_v25  ;;  %v16555_v31 = vmul.f32 0.5, %v6581_v29  ;;  %v6837_v45 = vmul.f32 0.70710677, %v6581_v29  ;;  %v6838_v52 = vmul.f32 0.70710677, %v6582_v37 }
 0x46f   : >> { %v11662_v0 = vpop.eup %11661  ;;  %11673 = verf.f32 %v6836_v36  ;;  %v6448_v58 = vmul.f32 %v6320_v19, %v15702_v48  ;;  %v6449_v11 = vmul.f32 %v6321_v20, %v15710_v53  ;;  %v6322_v1 = vmul.f32 %v16339_v4, %v11656_v32 }
 0x470   : >> { %v11664_v16 = vpop.eup %11663  ;;  %v16560_v18 = vmul.f32 %v7085_v56, %v16510_v14  ;;  %v7086_v38 = vadd.f32 1.0, %v11662_v0  ;;  %11675 = verf.f32 %v6837_v45  ;;  %v6323_v14 = vmul.f32 %v16339_v4, %v11658_v9 }
 0x471   : >> { %v7087_v25 = vadd.f32 1.0, %v11664_v16  ;;  %11677 = verf.f32 %v6838_v52  ;;  %v6583_v29 = vadd.f32 %v16351_v13, %v6448_v58  ;;  %v6584_v36 = vadd.f32 %v16351_v13, %v6449_v11  ;;  %v5796_v16 = vpop.xlane.xlu0 %5795 }
 0x472   : >> { %18702 = vst [vmem:[#allocation141_spill] sm:$0xff] %v16560_v18  ;;  %v11666_v3 = vpop.eup %11665  ;;  %v16566_v48 = vmul.f32 %v7086_v38, %v16513_v62  ;;  %v6450_v53 = vmul.f32 %v6322_v1, %v15738_v26  ;;  %11679 = vrsqrt.f32 %v16506_v39  ;;  %v6710_v20 = vmul.f32 0.5, %v6582_v37  ;;  %9835 = vst.msk [vmem:[%s16731_s1 + $0x5a1] sm:$0xff] (!%p9738_p5), %vm1004_vm2, %v16560_v18 }
 0x473   : >> { %v16572_v19 = vmul.f32 %v7087_v25, %v16519_v6  ;;  %v7088_v32 = vadd.f32 1.0, %v11666_v3  ;;  %v6839_v56 = vmul.f32 0.70710677, %v6583_v29  ;;  %v16574_v45 = vmul.f32 0.5, %v6583_v29  ;;  %v5793_v6 = vpop.xlane.xlu1 %5792 }
 0x474   : >> { %v6840_v0 = vmul.f32 0.70710677, %v6584_v36  ;;  %v6585_v52 = vadd.f32 %v16351_v13, %v6450_v53  ;;  %v6451_v38 = vmul.f32 %v6323_v14, %v15754_v41  ;;  %v6063_v9 = vadd.f32 1e-05, %v5935_v61  ;;  %9836 = vst.msk [vmem:[%s16731_s1 + $0x631] sm:$0xff] (!%p9738_p5), %vm1004_vm2, %v16566_v48 }
 0x475   : >> { %v11668_v62 = vpop.eup %11667  ;;  %v16579_v26 = vmul.f32 %v7088_v32, %v16530_v5  ;;  %11681 = verf.f32 %v6839_v56  ;;  %v5936_v39 = vmul.f32 0.03125, %v16517_v28  ;;  %v16582_v37 = vmul.f32 0.5, %v6584_v36  ;;  %9837 = vst.msk [vmem:[%s16731_s1 + $0x639] sm:$0xff] (!%p9738_p5), %vm1004_vm2, %v16572_v19 }
 0x476   : >> { %v11670_v58 = vpop.eup %11669  ;;  %v7089_v3 = vadd.f32 1.0, %v11668_v62  ;;  %11683 = verf.f32 %v6840_v0  ;;  %v6841_v11 = vmul.f32 0.70710677, %v6585_v52  ;;  %v6586_v41 = vadd.f32 %v16351_v13, %v6451_v38 }
 0x477   : >> { %v11672_v1 = vpop.eup %11671  ;;  %v7090_v25 = vadd.f32 1.0, %v11670_v58  ;;  %11685 = vrsqrt.f32 %v16524_v44  ;;  %v6064_v5 = vadd.f32 1e-05, %v5936_v39  ;;  %v5937_v28 = vmul.f32 0.03125, %v16536_v46  ;;  %v5799_v58 = vpop.xlane.xlu1 %5798  ;;  %9838 = vst.msk [vmem:[%s16731_s1 + $0x641] sm:$0xff] (!%p9738_p5), %vm1004_vm2, %v16579_v26 }
 0x478   : >> { %v16587_v29 = vmul.f32 %v7089_v3, %v16538_v8  ;;  %v7091_v61 = vadd.f32 1.0, %v11672_v1  ;;  %11687 = verf.f32 %v6841_v11  ;;  %v6713_v14 = vmul.f32 0.5, %v6585_v52  ;;  %v5802_v11 = vpop.xlane.xlu0 %5801 }
 0x479   : >> { %v11674_v53 = vpop.eup %11673  ;;  %v16591_v36 = vmul.f32 %v7090_v25, %v16544_v30  ;;  %v6842_v32 = vmul.f32 0.70710677, %v6586_v41  ;;  %11689 = vrsqrt.f32 %v6063_v9  ;;  %v6065_v38 = vadd.f32 1e-05, %v5937_v28 }
 0x47a   : >> { %v11676_v56 = vpop.eup %11675  ;;  %v16594_v0 = vmul.f32 %v7091_v61, %v16550_v21  ;;  %v7092_v44 = vadd.f32 1.0, %v11674_v53  ;;  %11691 = vrsqrt.f32 %v6064_v5  ;;  %v5938_v39 = vmul.f32 0.03125, %v16542_v54  ;;  %9839 = vst.msk [vmem:[%s16731_s1 + $0x649] sm:$0xff] (!%p9738_p5), %vm1004_vm2, %v16587_v29 }
 0x47b   : >> { %v11678_v8 = vpop.eup %11677  ;;  %v7093_v62 = vadd.f32 1.0, %v11676_v56  ;;  %11693 = verf.f32 %v6842_v32  ;;  %v5939_v46 = vmul.f32 0.03125, %v5787_v35  ;;  %v5940_v9 = vmul.f32 0.03125, %v5790_v33  ;;  %9840 = vst.msk [vmem:[%s16731_s1 + $0x651] sm:$0xff] (!%p9738_p5), %vm1004_vm2, %v16591_v36 }
 0x47c   : >> { %v11680_v3 = vpop.eup %11679  ;;  %v16598_v30 = vmul.f32 %v7092_v44, %v16553_v7  ;;  %v7094_v52 = vadd.f32 1.0, %v11678_v8  ;;  %11695 = vrsqrt.f32 %v6065_v38  ;;  %v6066_v25 = vadd.f32 1e-05, %v5938_v39  ;;  %9841 = vst.msk [vmem:[%s16731_s1 + $0x659] sm:$0xff] (!%p9738_p5), %vm1004_vm2, %v16594_v0 }
 0x47d   : >> { %v16601_v21 = vmul.f32 %v7093_v62, %v16555_v31  ;;  %v6324_v1 = vmul.f32 %v16339_v4, %v11680_v3  ;;  %v6067_v5 = vadd.f32 1e-05, %v5939_v46  ;;  %v6068_v54 = vadd.f32 1e-05, %v5940_v9  ;;  %v5805_v46 = vpop.xlane.xlu1 %5804  ;;  %v5808_v3 = vpop.xlane.xlu0 %5807 }
 0x47e   : >> { %v16604_v61 = vmul.f32 %v7094_v52, %v6710_v20  ;;  %v5941_v35 = vmul.f32 0.03125, %v5793_v6  ;;  %v5942_v28 = vmul.f32 0.03125, %v5796_v16  ;;  %11697 = vrsqrt.f32 %v6066_v25  ;;  %9842 = vst.msk [vmem:[%s16731_s1 + $0x661] sm:$0xff] (!%p9738_p5), %vm1004_vm2, %v16598_v30 }
 0x47f   : >> { %v11682_v53 = vpop.eup %11681  ;;  %v6452_v7 = vmul.f32 %v6324_v1, %v15771_v57  ;;  %v5943_v32 = vmul.f32 0.03125, %v5799_v58  ;;  %v5944_v56 = vmul.f32 0.03125, %v5802_v11  ;;  %11699 = vrsqrt.f32 %v6067_v5  ;;  %9843 = vst.msk [vmem:[%s16731_s1 + $0x669] sm:$0xff] (!%p9738_p5), %vm1004_vm2, %v16601_v21 }
 0x480   : >> { %18703 = vst [vmem:[#allocation43_spill] sm:$0xff] %v16604_v61  ;;  %v11684_v33 = vpop.eup %11683  ;;  %v7095_v44 = vadd.f32 1.0, %v11682_v53  ;;  %v6069_v31 = vadd.f32 1e-05, %v5941_v35  ;;  %v6070_v38 = vadd.f32 1e-05, %v5942_v28  ;;  %11701 = vrsqrt.f32 %v6068_v54 }
 0x481   : >> { %v11686_v8 = vpop.eup %11685  ;;  %v7096_v62 = vadd.f32 1.0, %v11684_v33  ;;  %v6714_v39 = vmul.f32 0.5, %v6586_v41  ;;  %v6587_v20 = vadd.f32 %v16351_v13, %v6452_v7  ;;  %v6071_v58 = vadd.f32 1e-05, %v5943_v32 }
 0x482   : >> { %v11688_v6 = vpop.eup %11687  ;;  %v16609_v16 = vmul.f32 %v7095_v44, %v16574_v45  ;;  %v6325_v57 = vmul.f32 %v16339_v4, %v11686_v8  ;;  %11703 = vrsqrt.f32 %v6069_v31  ;;  %v6072_v41 = vadd.f32 1e-05, %v5944_v56  ;;  %v18707_v44 = vld [vmem:[#allocation96_spill] sm:$0xff]  ;;  %v18708_v31 = vld [vmem:[#allocation98_spill] sm:$0xff] }
 0x483   : >> { %v11690_v52 = vpop.eup %11689  ;;  %v16613_v9 = vmul.f32 %v7096_v62, %v16582_v37  ;;  %v7097_v11 = vadd.f32 1.0, %v11688_v6  ;;  %v6843_v1 = vmul.f32 0.70710677, %v6587_v20  ;;  %11705 = vrsqrt.f32 %v6070_v38 }
 0x484   : >> { %18704 = vst [vmem:[#allocation147_spill] sm:$0xff] %v16609_v16  ;;  %v11692_v25 = vpop.eup %11691  ;;  %v6453_v5 = vmul.f32 %v6325_v57, %v15780_v24  ;;  %v6326_v54 = vmul.f32 %v16339_v4, %v11690_v52  ;;  %v5945_v45 = vmul.f32 0.03125, %v5805_v46  ;;  %v5946_v7 = vmul.f32 0.03125, %v5808_v3  ;;  %v18710_v3 = vld [vmem:[#allocation27_spill] sm:$0xff] }
 0x485   : >> { %18705 = vst [vmem:[#allocation44_spill] sm:$0xff] %v16613_v9  ;;  %v11694_v35 = vpop.eup %11693  ;;  %v16617_v28 = vmul.f32 %v7097_v11, %v6713_v14  ;;  %11707 = verf.f32 %v6843_v1  ;;  %v6327_v53 = vmul.f32 %v16339_v4, %v11692_v25 }
 0x486   : >> { %v11696_v32 = vpop.eup %11695  ;;  %v7098_v37 = vadd.f32 1.0, %v11694_v35  ;;  %v6588_v33 = vadd.f32 %v16351_v13, %v6453_v5  ;;  %v6454_v56 = vmul.f32 %v6326_v54, %v18707_v44  ;;  %11709 = vrsqrt.f32 %v6071_v58 }
 0x487   : >> { %18706 = vst [vmem:[#allocation145_spill] sm:$0xff] %v16617_v28  ;;  %v6455_v24 = vmul.f32 %v6327_v53, %v18708_v31  ;;  %v6328_v8 = vmul.f32 %v16339_v4, %v11696_v32  ;;  %11711 = vrsqrt.f32 %v6072_v41  ;;  %v6073_v38 = vadd.f32 1e-05, %v5945_v45  ;;  %v18711_v53 = vld [vmem:[#allocation107_spill] sm:$0xff]  ;;  %v18712_v31 = vld [vmem:[#allocation104_spill] sm:$0xff]  ;;  %v18719_v28 = vld [vmem:[#allocation121_spill] sm:$0xff] }
 0x488   : >> { %v16624_v62 = vmul.f32 %v7098_v37, %v6714_v39  ;;  %v6844_v14 = vmul.f32 0.70710677, %v6588_v33  ;;  %v6589_v46 = vadd.f32 %v16351_v13, %v6454_v56  ;;  %v11698_v6 = vpop.eup %11697  ;;  %v6074_v25 = vadd.f32 1e-05, %v5946_v7 }
 0x489   : >> { %v6590_v57 = vadd.f32 %v16351_v13, %v6455_v24  ;;  %v6456_v52 = vmul.f32 %v6328_v8, %v18710_v3  ;;  %11713 = vrsqrt.f32 %v6073_v38  ;;  %v11700_v11 = vpop.eup %11699  ;;  %v6329_v1 = vmul.f32 %v16339_v4, %v11698_v6  ;;  %v5811_v8 = vpop.xlane.xlu1 %5810 }
 0x48a   : >> { %18709 = vst [vmem:[#allocation45_spill] sm:$0xff] %v16624_v62  ;;  %11715 = verf.f32 %v6844_v14  ;;  %v6845_v58 = vmul.f32 0.70710677, %v6589_v46  ;;  %v11702_v5 = vpop.eup %11701  ;;  %v6330_v54 = vmul.f32 %v16339_v4, %v11700_v11  ;;  %v6715_v35 = vmul.f32 0.5, %v6587_v20  ;;  %v18713_v14 = vld [vmem:[#allocation111_spill] sm:$0xff] }
 0x48b   : >> { %v6846_v41 = vmul.f32 0.70710677, %v6590_v57  ;;  %v6591_v39 = vadd.f32 %v16351_v13, %v6456_v52  ;;  %v6457_v32 = vmul.f32 %v6329_v1, %v18711_v53  ;;  %v6331_v37 = vmul.f32 %v16339_v4, %v11702_v5 }
 0x48c   : >> { %v11704_v45 = vpop.eup %11703  ;;  %11717 = verf.f32 %v6845_v58  ;;  %v6716_v44 = vmul.f32 0.5, %v6588_v33  ;;  %v6458_v24 = vmul.f32 %v6330_v54, %v18712_v31  ;;  %v6717_v52 = vmul.f32 0.5, %v6589_v46 }
 0x48d   : >> { %11719 = verf.f32 %v6846_v41  ;;  %v6847_v56 = vmul.f32 0.70710677, %v6591_v39  ;;  %v11706_v7 = vpop.eup %11705  ;;  %v6592_v38 = vadd.f32 %v16351_v13, %v6457_v32  ;;  %v6459_v6 = vmul.f32 %v6331_v37, %v18713_v14  ;;  %v18714_v37 = vld [vmem:[#allocation110_spill] sm:$0xff] }
 0x48e   : >> { %v6332_v3 = vmul.f32 %v16339_v4, %v11704_v45  ;;  %11721 = vrsqrt.f32 %v6074_v25  ;;  %v6593_v11 = vadd.f32 %v16351_v13, %v6458_v24  ;;  %v6333_v33 = vmul.f32 %v16339_v4, %v11706_v7  ;;  %v18715_v45 = vld [vmem:[#allocation117_spill] sm:$0xff] }
 0x48f   : >> { %v11708_v20 = vpop.eup %11707  ;;  %11723 = verf.f32 %v6847_v56  ;;  %v6848_v5 = vmul.f32 0.70710677, %v6592_v38  ;;  %v6594_v41 = vadd.f32 %v16351_v13, %v6459_v6  ;;  %v5947_v54 = vmul.f32 0.03125, %v5811_v8 }
 0x490   : >> { %v11710_v58 = vpop.eup %11709  ;;  %v7099_v1 = vadd.f32 1.0, %v11708_v20  ;;  %v6718_v32 = vmul.f32 0.5, %v6590_v57  ;;  %v6849_v31 = vmul.f32 0.70710677, %v6593_v11  ;;  %v6460_v14 = vmul.f32 %v6332_v3, %v18714_v37 }
 0x491   : >> { %v11712_v53 = vpop.eup %11711  ;;  %v6461_v25 = vmul.f32 %v6333_v33, %v18715_v45  ;;  %v6719_v46 = vmul.f32 0.5, %v6591_v39  ;;  %11725 = verf.f32 %v6848_v5  ;;  %v6850_v56 = vmul.f32 0.70710677, %v6594_v41  ;;  %v5814_v39 = vpop.xlane.xlu0 %5813 }
 0x492   : >> { %v16643_v62 = vmul.f32 %v7099_v1, %v6715_v35  ;;  %11727 = verf.f32 %v6849_v31  ;;  %v16646_v7 = vadd.f32 %v16351_v13, %v6460_v14  ;;  %v6334_v57 = vmul.f32 %v16339_v4, %v11710_v58  ;;  %v5817_v33 = vpop.xlane.xlu1 %5816  ;;  %v18718_v58 = vld [vmem:[#allocation120_spill] sm:$0xff] }
 0x493   : >> { %v11714_v24 = vpop.eup %11713  ;;  %v16649_v6 = vadd.f32 %v16351_v13, %v6461_v25  ;;  %11729 = verf.f32 %v6850_v56  ;;  %v6335_v3 = vmul.f32 %v16339_v4, %v11712_v53  ;;  %v6075_v20 = vadd.f32 1e-05, %v5947_v54  ;;  %v18717_v25 = vld [vmem:[#allocation116_spill] sm:$0xff] }
 0x494   : >> { %18716 = vst [vmem:[#allocation14_spill] sm:$0xff] %v16643_v62  ;;  %v11716_v8 = vpop.eup %11715  ;;  %v6336_v35 = vmul.f32 %v16339_v4, %v11714_v24  ;;  %v6720_v5 = vmul.f32 0.5, %v6592_v38  ;;  %v6721_v31 = vmul.f32 0.5, %v6593_v11  ;;  %v6851_v37 = vmul.f32 0.70710677, %v16646_v7 }
 0x495   : >> { %v7100_v1 = vadd.f32 1.0, %v11716_v8  ;;  %v6852_v45 = vmul.f32 0.70710677, %v16649_v6  ;;  %v6462_v62 = vmul.f32 %v6334_v57, %v18717_v25  ;;  %v6463_v56 = vmul.f32 %v6335_v3, %v18718_v58  ;;  %v16667_v25 = vld [vmem:[%s12036_s24] ss:$0 sm:$0xff] }
 0x496   : >> { %v11718_v14 = vpop.eup %11717  ;;  %v6464_v53 = vmul.f32 %v6336_v35, %v18719_v28  ;;  %11731 = verf.f32 %v6851_v37  ;;  %v5948_v24 = vmul.f32 0.03125, %v5814_v39  ;;  %v6722_v39 = vmul.f32 0.5, %v6594_v41  ;;  %v5823_v37 = vpop.xlane.xlu1 %5822 }
 0x497   : >> { %v11720_v9 = vpop.eup %11719  ;;  %v16659_v4 = vmul.f32 %v7100_v1, %v6716_v44  ;;  %v7101_v54 = vadd.f32 1.0, %v11718_v14  ;;  %11733 = verf.f32 %v6852_v45  ;;  %v6597_v8 = vadd.f32 %v16351_v13, %v6462_v62  ;;  %v5820_v1 = vpop.xlane.xlu0 %5819 }
 0x498   : >> { %v11722_v38 = vpop.eup %11721  ;;  %v7102_v11 = vadd.f32 1.0, %v11720_v9  ;;  %v6598_v16 = vadd.f32 %v16351_v13, %v6463_v56  ;;  %v6599_v3 = vadd.f32 %v16351_v13, %v6464_v53  ;;  %11735 = vrsqrt.f32 %v6075_v20  ;;  %v18723_v13 = vld [vmem:[#allocation124_spill] sm:$0xff] }
 0x499   : >> { %18720 = vst [vmem:[#allocation15_spill] sm:$0xff] %v16659_v4  ;;  %v11724_v61 = vpop.eup %11723  ;;  %v16663_v57 = vmul.f32 %v7101_v54, %v6717_v52  ;;  %v6337_v28 = vmul.f32 %v16667_v25, %v11722_v38  ;;  %v6853_v9 = vmul.f32 0.70710677, %v6597_v8  ;;  %v6076_v45 = vadd.f32 1e-05, %v5948_v24  ;;  %9850 = vst.msk [vmem:[%s16731_s1 + $0x6a1] sm:$0xff] (!%p9738_p5), %vm1004_vm2, %v16659_v4 }
 0x49a   : >> { %v16670_v44 = vmul.f32 %v7102_v11, %v6718_v32  ;;  %v7103_v35 = vadd.f32 1.0, %v11724_v61  ;;  %v6854_v62 = vmul.f32 0.70710677, %v6598_v16  ;;  %v6855_v14 = vmul.f32 0.70710677, %v6599_v3 }
 0x49b   : >> { %18721 = vst [vmem:[#allocation16_spill] sm:$0xff] %v16663_v57  ;;  %v11726_v52 = vpop.eup %11725  ;;  %11737 = verf.f32 %v6853_v9  ;;  %v6465_v56 = vmul.f32 %v6337_v28, %v18723_v13  ;;  %v5949_v53 = vmul.f32 0.03125, %v5817_v33  ;;  %v5950_v32 = vmul.f32 0.03125, %v5820_v1  ;;  %v16676_v11 = vld [vmem:[%s12041_s15] ss:$0 sm:$0xff] }
 0x49c   : >> { %18722 = vst [vmem:[#allocation17_spill] sm:$0xff] %v16670_v44  ;;  %v16672_v58 = vmul.f32 %v7103_v35, %v6719_v46  ;;  %v11728_v54 = vpop.eup %11727  ;;  %v7104_v20 = vadd.f32 1.0, %v11726_v52  ;;  %11739 = verf.f32 %v6854_v62  ;;  %v5951_v61 = vmul.f32 0.03125, %v5823_v37 }
 0x49d   : >> { %v11730_v41 = vpop.eup %11729  ;;  %v7105_v38 = vadd.f32 1.0, %v11728_v54  ;;  %11741 = verf.f32 %v6855_v14  ;;  %v6600_v44 = vadd.f32 %v16676_v11, %v6465_v56  ;;  %v6077_v24 = vadd.f32 1e-05, %v5949_v53  ;;  %v18724_v54 = vld [vmem:[#allocation125_spill] sm:$0xff] }
 0x49e   : >> { %v16679_v57 = vmul.f32 %v7104_v20, %v6720_v5  ;;  %v7106_v46 = vadd.f32 1.0, %v11730_v41  ;;  %11743 = vrsqrt.f32 %v6076_v45  ;;  %v6078_v35 = vadd.f32 1e-05, %v5950_v32  ;;  %9853 = vst.msk [vmem:[%s16731_s1 + $0x741] sm:$0xff] (!%p9738_p5), %vm1004_vm2, %v16672_v58 }
 0x49f   : >> { %v16681_v28 = vmul.f32 %v7105_v38, %v6721_v31  ;;  %v6856_v33 = vmul.f32 0.70710677, %v6600_v44  ;;  %11745 = vrsqrt.f32 %v6077_v24  ;;  %v6079_v37 = vadd.f32 1e-05, %v5951_v61 }
 0x4a0   : >> { %v11732_v9 = vpop.eup %11731  ;;  %v16683_v1 = vmul.f32 %v7106_v46, %v6722_v39  ;;  %11747 = vrsqrt.f32 %v6078_v35  ;;  %v6723_v14 = vmul.f32 0.5, %v16646_v7  ;;  %v6724_v5 = vmul.f32 0.5, %v16649_v6  ;;  %9854 = vst.msk [vmem:[%s16731_s1 + $0x749] sm:$0xff] (!%p9738_p5), %vm1004_vm2, %v16679_v57 }
 0x4a1   : >> { %v11734_v62 = vpop.eup %11733  ;;  %v7107_v52 = vadd.f32 1.0, %v11732_v9  ;;  %11749 = verf.f32 %v6856_v33  ;;  %v6725_v61 = vmul.f32 0.5, %v6597_v8  ;;  %v6726_v38 = vmul.f32 0.5, %v6598_v16  ;;  %9855 = vst.msk [vmem:[%s16731_s1 + $0x751] sm:$0xff] (!%p9738_p5), %vm1004_vm2, %v16681_v28 }
 0x4a2   : >> { %v11736_v13 = vpop.eup %11735  ;;  %v7108_v56 = vadd.f32 1.0, %v11734_v62  ;;  %11751 = vrsqrt.f32 %v6079_v37  ;;  %v6727_v33 = vmul.f32 0.5, %v6599_v3  ;;  %v6728_v3 = vmul.f32 0.5, %v6600_v44  ;;  %9856 = vst.msk [vmem:[%s16731_s1 + $0x759] sm:$0xff] (!%p9738_p5), %vm1004_vm2, %v16683_v1 }
 0x4a3   : >> { %v16687_v45 = vmul.f32 %v7107_v52, %v6723_v14  ;;  %v6338_v31 = vmul.f32 %v16667_v25, %v11736_v13 }
 0x4a4   : >> { %v16690_v53 = vmul.f32 %v7108_v56, %v6724_v5  ;;  %v18725_v56 = vld [vmem:[#allocation126_spill] sm:$0xff] }
 0x4a5   : >> { %v11738_v39 = vpop.eup %11737  ;;  %v6466_v20 = vmul.f32 %v6338_v31, %v18724_v54  ;;  %9857 = vst.msk [vmem:[%s16731_s1 + $0x761] sm:$0xff] (!%p9738_p5), %vm1004_vm2, %v16687_v45 }
 0x4a6   : >> { %v11740_v32 = vpop.eup %11739  ;;  %v7109_v41 = vadd.f32 1.0, %v11738_v39  ;;  %9858 = vst.msk [vmem:[%s16731_s1 + $0x769] sm:$0xff] (!%p9738_p5), %vm1004_vm2, %v16690_v53 }
 0x4a7   : >> { %v11742_v7 = vpop.eup %11741  ;;  %v7110_v24 = vadd.f32 1.0, %v11740_v32  ;;  %v6601_v46 = vadd.f32 %v16676_v11, %v6466_v20  ;;  %v18726_v32 = vld [vmem:[#allocation128_spill] sm:$0xff] }
 0x4a8   : >> { %v11744_v6 = vpop.eup %11743  ;;  %v16694_v35 = vmul.f32 %v7109_v41, %v6725_v61  ;;  %v7111_v9 = vadd.f32 1.0, %v11742_v7  ;;  %v18727_v7 = vld [vmem:[#allocation91_spill] sm:$0xff] }
 0x4a9   : >> { %v11746_v37 = vpop.eup %11745  ;;  %v16696_v62 = vmul.f32 %v7110_v24, %v6726_v38  ;;  %v6857_v14 = vmul.f32 0.70710677, %v6601_v46  ;;  %v6339_v52 = vmul.f32 %v16667_v25, %v11744_v6 }
 0x4aa   : >> { %v11748_v13 = vpop.eup %11747  ;;  %v16699_v5 = vmul.f32 %v7111_v9, %v6727_v33  ;;  %v6340_v8 = vmul.f32 %v16667_v25, %v11746_v37  ;;  %9859 = vst.msk [vmem:[%s16731_s1 + $0x771] sm:$0xff] (!%p9738_p5), %vm1004_vm2, %v16694_v35 }
 0x4ab   : >> { %v11750_v16 = vpop.eup %11749  ;;  %11753 = verf.f32 %v6857_v14  ;;  %v6467_v31 = vmul.f32 %v6339_v52, %v18725_v56  ;;  %v6341_v39 = vmul.f32 %v16667_v25, %v11748_v13  ;;  %v18728_v14 = vld [vmem:[#allocation88_spill] sm:$0xff]  ;;  %9860 = vst.msk [vmem:[%s16731_s1 + $0x779] sm:$0xff] (!%p9738_p5), %vm1004_vm2, %v16696_v62 }
 0x4ac   : >> { %v11752_v54 = vpop.eup %11751  ;;  %v7112_v20 = vadd.f32 1.0, %v11750_v16  ;;  %v6468_v61 = vmul.f32 %v6340_v8, %v18726_v32  ;;  %9861 = vst.msk [vmem:[%s16731_s1 + $0x781] sm:$0xff] (!%p9738_p5), %vm1004_vm2, %v16699_v5 }
 0x4ad   : >> { %v6602_v41 = vadd.f32 %v16676_v11, %v6467_v31  ;;  %v6469_v38 = vmul.f32 %v6341_v39, %v18727_v7  ;;  %v6342_v24 = vmul.f32 %v16667_v25, %v11752_v54  ;;  %v6729_v25 = vmul.f32 0.5, %v6601_v46 }
 0x4ae   : >> { %v16708_v6 = vmul.f32 %v7112_v20, %v6728_v3  ;;  %v6603_v33 = vadd.f32 %v16676_v11, %v6468_v61 }
 0x4af   : >> { %v6858_v9 = vmul.f32 0.70710677, %v6602_v41  ;;  %v6604_v37 = vadd.f32 %v16676_v11, %v6469_v38  ;;  %v6470_v52 = vmul.f32 %v6342_v24, %v18728_v14  ;;  %v6730_v20 = vmul.f32 0.5, %v6602_v41  ;;  %v18731_v41 = vld [vmem:[#allocation138_spill] sm:$0xff] (!%p9738_p5) }
 0x4b0   : >> { %v6859_v13 = vmul.f32 0.70710677, %v6603_v33  ;;  %v6731_v7 = vmul.f32 0.5, %v6603_v33  ;;  %9740 = vst.msk [vmem:[%s16731_s1 + $0x1] sm:$0xff] (!%p9738_p5), %vm1004_vm2, %v18731_v41  ;;  %v18732_v33 = vld [vmem:[#allocation55_spill] sm:$0xff] (!%p9738_p5)  ;;  %v18750_v41 = vld [vmem:[#allocation81_spill] sm:$0xff] (!%p9738_p5) }
 0x4b1   : >> { %11755 = verf.f32 %v6858_v9  ;;  %v6860_v44 = vmul.f32 0.70710677, %v6604_v37  ;;  %v6605_v8 = vadd.f32 %v16676_v11, %v6470_v52  ;;  %v6732_v9 = vmul.f32 0.5, %v6604_v37  ;;  %9741 = vst.msk [vmem:[%s16731_s1 + $0x9] sm:$0xff] (!%p9738_p5), %vm1004_vm2, %v18732_v33  ;;  %v18733_v37 = vld [vmem:[#allocation56_spill] sm:$0xff] (!%p9738_p5)  ;;  %9759 = vst.msk [vmem:[%s16731_s1 + $0x121] sm:$0xff] (!%p9738_p5), %vm1004_vm2, %v18750_v41 }
 0x4b2   : >> { %11757 = verf.f32 %v6859_v13  ;;  %9742 = vst.msk [vmem:[%s16731_s1 + $0x11] sm:$0xff] (!%p9738_p5), %vm1004_vm2, %v18733_v37  ;;  %v18751_v33 = vld [vmem:[#allocation87_spill] sm:$0xff] (!%p9738_p5)  ;;  %v18752_v37 = vld [vmem:[#allocation82_spill] sm:$0xff] (!%p9738_p5)  ;;  %9862 = vst.msk [vmem:[%s16731_s1 + $0x789] sm:$0xff] (!%p9738_p5), %vm1004_vm2, %v16708_v6 }
 0x4b3   : >> { %11759 = verf.f32 %v6860_v44  ;;  %v6861_v16 = vmul.f32 0.70710677, %v6605_v8  ;;  %v6733_v46 = vmul.f32 0.5, %v6605_v8  ;;  %v18734_v8 = vld [vmem:[#allocation66_spill] sm:$0xff] (!%p9738_p5)  ;;  %9760 = vst.msk [vmem:[%s16731_s1 + $0x129] sm:$0xff] (!%p9738_p5), %vm1004_vm2, %v18751_v33  ;;  %9761 = vst.msk [vmem:[%s16731_s1 + $0x131] sm:$0xff] (!%p9738_p5), %vm1004_vm2, %v18752_v37 }
 0x4b4   : >> { %9743 = vst.msk [vmem:[%s16731_s1 + $0x19] sm:$0xff] (!%p9738_p5), %vm1004_vm2, %v18734_v8  ;;  %v18753_v8 = vld [vmem:[#allocation85_spill] sm:$0xff] (!%p9738_p5)  ;;  %v18769_v41 = vld [vmem:[#allocation119_spill] sm:$0xff] (!%p9738_p5)  ;;  %v18771_v37 = vld [vmem:[#allocation122_spill] sm:$0xff] (!%p9738_p5) }
 0x4b5   : >> { %v11754_v56 = vpop.eup %11753  ;;  %11761 = verf.f32 %v6861_v16  ;;  %9762 = vst.msk [vmem:[%s16731_s1 + $0x139] sm:$0xff] (!%p9738_p5), %vm1004_vm2, %v18753_v8  ;;  %9778 = vst.msk [vmem:[%s16731_s1 + $0x241] sm:$0xff] (!%p9738_p5), %vm1004_vm2, %v18769_v41  ;;  %v18770_v33 = vld [vmem:[#allocation123_spill] sm:$0xff] (!%p9738_p5)  ;;  %v18772_v8 = vld [vmem:[#allocation129_spill] sm:$0xff] (!%p9738_p5) }
 0x4b6   : >> { %v7113_v31 = vadd.f32 1.0, %v11754_v56  ;;  %v18735_v56 = vld [vmem:[#allocation68_spill] sm:$0xff] (!%p9738_p5)  ;;  %9779 = vst.msk [vmem:[%s16731_s1 + $0x249] sm:$0xff] (!%p9738_p5), %vm1004_vm2, %v18770_v33  ;;  %9780 = vst.msk [vmem:[%s16731_s1 + $0x251] sm:$0xff] (!%p9738_p5), %vm1004_vm2, %v18771_v37  ;;  %v18789_v33 = vld [vmem:[#allocation35_spill] sm:$0xff] (!%p9738_p5) }
 0x4b7   : >> { %9744 = vst.msk [vmem:[%s16731_s1 + $0x21] sm:$0xff] (!%p9738_p5), %vm1004_vm2, %v18735_v56  ;;  %v18754_v56 = vld [vmem:[#allocation93_spill] sm:$0xff] (!%p9738_p5)  ;;  %9781 = vst.msk [vmem:[%s16731_s1 + $0x259] sm:$0xff] (!%p9738_p5), %vm1004_vm2, %v18772_v8  ;;  %v18788_v41 = vld [vmem:[#allocation100_spill] sm:$0xff] (!%p9738_p5) }
 0x4b8   : >> { %v16714_v39 = vmul.f32 %v7113_v31, %v6729_v25  ;;  %v18736_v25 = vld [vmem:[#allocation59_spill] sm:$0xff] (!%p9738_p5)  ;;  %v18737_v31 = vld [vmem:[#allocation62_spill] sm:$0xff] (!%p9738_p5)  ;;  %9763 = vst.msk [vmem:[%s16731_s1 + $0x141] sm:$0xff] (!%p9738_p5), %vm1004_vm2, %v18754_v56  ;;  %9797 = vst.msk [vmem:[%s16731_s1 + $0x361] sm:$0xff] (!%p9738_p5), %vm1004_vm2, %v18788_v41 }
 0x4b9   : >> { %9745 = vst.msk [vmem:[%s16731_s1 + $0x29] sm:$0xff] (!%p9738_p5), %vm1004_vm2, %v18736_v25  ;;  %9746 = vst.msk [vmem:[%s16731_s1 + $0x31] sm:$0xff] (!%p9738_p5), %vm1004_vm2, %v18737_v31  ;;  %v18755_v25 = vld [vmem:[#allocation86_spill] sm:$0xff] (!%p9738_p5)  ;;  %v18773_v56 = vld [vmem:[#allocation127_spill] sm:$0xff] (!%p9738_p5) }
 0x4ba   : >> { %9764 = vst.msk [vmem:[%s16731_s1 + $0x149] sm:$0xff] (!%p9738_p5), %vm1004_vm2, %v18755_v25  ;;  %v18756_v31 = vld [vmem:[#allocation90_spill] sm:$0xff] (!%p9738_p5)  ;;  %9782 = vst.msk [vmem:[%s16731_s1 + $0x261] sm:$0xff] (!%p9738_p5), %vm1004_vm2, %v18773_v56  ;;  %v18774_v25 = vld [vmem:[#allocation28_spill] sm:$0xff] (!%p9738_p5) }
 0x4bb   : >> { %v11756_v54 = vpop.eup %11755  ;;  %9765 = vst.msk [vmem:[%s16731_s1 + $0x151] sm:$0xff] (!%p9738_p5), %vm1004_vm2, %v18756_v31  ;;  %9783 = vst.msk [vmem:[%s16731_s1 + $0x269] sm:$0xff] (!%p9738_p5), %vm1004_vm2, %v18774_v25  ;;  %v18775_v31 = vld [vmem:[#allocation29_spill] sm:$0xff] (!%p9738_p5)  ;;  %v18790_v37 = vld [vmem:[#allocation135_spill] sm:$0xff] (!%p9738_p5) }
 0x4bc   : >> { %v11758_v3 = vpop.eup %11757  ;;  %v7114_v32 = vadd.f32 1.0, %v11756_v54  ;;  %v18738_v54 = vld [vmem:[#allocation142_spill] sm:$0xff] (!%p9738_p5)  ;;  %9784 = vst.msk [vmem:[%s16731_s1 + $0x271] sm:$0xff] (!%p9738_p5), %vm1004_vm2, %v18775_v31  ;;  %9798 = vst.msk [vmem:[%s16731_s1 + $0x369] sm:$0xff] (!%p9738_p5), %vm1004_vm2, %v18789_v33  ;;  %v18791_v8 = vld [vmem:[#allocation36_spill] sm:$0xff] (!%p9738_p5) }
 0x4bd   : >> { %v11760_v61 = vpop.eup %11759  ;;  %v7115_v38 = vadd.f32 1.0, %v11758_v3  ;;  %9747 = vst.msk [vmem:[%s16731_s1 + $0x39] sm:$0xff] (!%p9738_p5), %vm1004_vm2, %v18738_v54  ;;  %v18739_v3 = vld [vmem:[#allocation72_spill] sm:$0xff] (!%p9738_p5)  ;;  %9799 = vst.msk [vmem:[%s16731_s1 + $0x371] sm:$0xff] (!%p9738_p5), %vm1004_vm2, %v18790_v37  ;;  %v18792_v56 = vld [vmem:[#allocation134_spill] sm:$0xff] (!%p9738_p5) }
 0x4be   : >> { %v16716_v24 = vmul.f32 %v7114_v32, %v6730_v20  ;;  %v7116_v11 = vadd.f32 1.0, %v11760_v61  ;;  %7249 = sbr.rel (%p9738_p5) target bundleno = 1247 (0x4df), region = 74  ;;  %9748 = vst.msk [vmem:[%s16731_s1 + $0x41] sm:$0xff] (!%p9738_p5), %vm1004_vm2, %v18739_v3  ;;  %v18740_v20 = vld [vmem:[#allocation63_spill] sm:$0xff] (!%p9738_p5)  ;;  %v18741_v32 = vld [vmem:[#allocation65_spill] sm:$0xff] (!%p9738_p5)  ;;  %v18742_v61 = vld [vmem:[#allocation146_spill] sm:$0xff] (!%p9738_p5) }
 0x4bf   : >> { %v11762_v14 = vpop.eup %11761  ;;  %v16718_v52 = vmul.f32 %v7115_v38, %v6731_v7  ;;  %9749 = vst.msk [vmem:[%s16731_s1 + $0x49] sm:$0xff] (!%p9738_p5), %vm1004_vm2, %v18740_v20  ;;  %9750 = vst.msk [vmem:[%s16731_s1 + $0x51] sm:$0xff] (!%p9738_p5), %vm1004_vm2, %v18741_v32  ;;  %v18743_v7 = vld [vmem:[#allocation76_spill] sm:$0xff] (!%p9738_p5)  ;;  %v18744_v38 = vld [vmem:[#allocation71_spill] sm:$0xff] (!%p9738_p5) }
 0x4c0   : >> { %v16720_v13 = vmul.f32 %v7116_v11, %v6732_v9  ;;  %v7117_v44 = vadd.f32 1.0, %v11762_v14  ;;  %9751 = vst.msk [vmem:[%s16731_s1 + $0x59] sm:$0xff] (!%p9738_p5), %vm1004_vm2, %v18742_v61  ;;  %9752 = vst.msk [vmem:[%s16731_s1 + $0x61] sm:$0xff] (!%p9738_p5), %vm1004_vm2, %v18743_v7  ;;  %v18745_v9 = vld [vmem:[#allocation78_spill] sm:$0xff] (!%p9738_p5)  ;;  %v18746_v11 = vld [vmem:[#allocation75_spill] sm:$0xff] (!%p9738_p5) }
 0x4c1   : >> { %9753 = vst.msk [vmem:[%s16731_s1 + $0x69] sm:$0xff] (!%p9738_p5), %vm1004_vm2, %v18744_v38  ;;  %9754 = vst.msk [vmem:[%s16731_s1 + $0x71] sm:$0xff] (!%p9738_p5), %vm1004_vm2, %v18745_v9  ;;  %v18747_v14 = vld [vmem:[#allocation83_spill] sm:$0xff] (!%p9738_p5)  ;;  %v18757_v54 = vld [vmem:[#allocation92_spill] sm:$0xff] (!%p9738_p5) }
 0x4c2   : >> { %18729 = vst [vmem:[#allocation18_spill] sm:$0xff] %v16720_v13  ;;  %v16722_v16 = vmul.f32 %v7117_v44, %v6733_v46  ;;  %9755 = vst.msk [vmem:[%s16731_s1 + $0x79] sm:$0xff] (!%p9738_p5), %vm1004_vm2, %v18746_v11  ;;  %v18748_v46 = vld [vmem:[#allocation77_spill] sm:$0xff] (!%p9738_p5)  ;;  %v18749_v44 = vld [vmem:[#allocation84_spill] sm:$0xff] (!%p9738_p5) }
 0x4c3   : >> { %9756 = vst.msk [vmem:[%s16731_s1 + $0x109] sm:$0xff] (!%p9738_p5), %vm1004_vm2, %v18747_v14  ;;  %9757 = vst.msk [vmem:[%s16731_s1 + $0x111] sm:$0xff] (!%p9738_p5), %vm1004_vm2, %v18748_v46  ;;  %v18758_v3 = vld [vmem:[#allocation99_spill] sm:$0xff] (!%p9738_p5)  ;;  %v18759_v20 = vld [vmem:[#allocation61_spill] sm:$0xff] (!%p9738_p5) }
 0x4c4   : >> { %18730 = vst [vmem:[#allocation19_spill] sm:$0xff] %v16722_v16  ;;  %9758 = vst.msk [vmem:[%s16731_s1 + $0x119] sm:$0xff] (!%p9738_p5), %vm1004_vm2, %v18749_v44  ;;  %v18760_v32 = vld [vmem:[#allocation101_spill] sm:$0xff] (!%p9738_p5)  ;;  %v18761_v61 = vld [vmem:[#allocation52_spill] sm:$0xff] (!%p9738_p5) }
 0x4c5   : >> { %9766 = vst.msk [vmem:[%s16731_s1 + $0x159] sm:$0xff] %vm1004_vm2, %v18757_v54  ;;  %9767 = vst.msk [vmem:[%s16731_s1 + $0x161] sm:$0xff] %vm1004_vm2, %v18758_v3  ;;  %v18762_v7 = vld [vmem:[#allocation137_spill] sm:$0xff]  ;;  %v18764_v9 = vld [vmem:[#allocation102_spill] sm:$0xff] }
 0x4c6   : >> { %9768 = vst.msk [vmem:[%s16731_s1 + $0x169] sm:$0xff] %vm1004_vm2, %v18759_v20  ;;  %9769 = vst.msk [vmem:[%s16731_s1 + $0x171] sm:$0xff] %vm1004_vm2, %v18760_v32  ;;  %v18763_v38 = vld [vmem:[#allocation105_spill] sm:$0xff]  ;;  %v18765_v11 = vld [vmem:[#allocation108_spill] sm:$0xff] }
 0x4c7   : >> { %9770 = vst.msk [vmem:[%s16731_s1 + $0x179] sm:$0xff] %vm1004_vm2, %v18761_v61  ;;  %9771 = vst.msk [vmem:[%s16731_s1 + $0x181] sm:$0xff] %vm1004_vm2, %v18762_v7  ;;  %v18766_v14 = vld [vmem:[#allocation113_spill] sm:$0xff]  ;;  %v18767_v46 = vld [vmem:[#allocation114_spill] sm:$0xff] }
 0x4c8   : >> { %9772 = vst.msk [vmem:[%s16731_s1 + $0x211] sm:$0xff] %vm1004_vm2, %v18763_v38  ;;  %9773 = vst.msk [vmem:[%s16731_s1 + $0x219] sm:$0xff] %vm1004_vm2, %v18764_v9  ;;  %v18768_v44 = vld [vmem:[#allocation118_spill] sm:$0xff]  ;;  %v18776_v54 = vld [vmem:[#allocation131_spill] sm:$0xff] }
 0x4c9   : >> { %9774 = vst.msk [vmem:[%s16731_s1 + $0x221] sm:$0xff] %vm1004_vm2, %v18765_v11  ;;  %9775 = vst.msk [vmem:[%s16731_s1 + $0x229] sm:$0xff] %vm1004_vm2, %v18766_v14  ;;  %v18777_v3 = vld [vmem:[#allocation130_spill] sm:$0xff]  ;;  %v18779_v32 = vld [vmem:[#allocation97_spill] sm:$0xff] }
 0x4ca   : >> { %9776 = vst.msk [vmem:[%s16731_s1 + $0x231] sm:$0xff] %vm1004_vm2, %v18767_v46  ;;  %9777 = vst.msk [vmem:[%s16731_s1 + $0x239] sm:$0xff] %vm1004_vm2, %v18768_v44  ;;  %v18778_v20 = vld [vmem:[#allocation30_spill] sm:$0xff]  ;;  %v18780_v61 = vld [vmem:[#allocation31_spill] sm:$0xff] }
 0x4cb   : >> { %9785 = vst.msk [vmem:[%s16731_s1 + $0x279] sm:$0xff] %vm1004_vm2, %v18776_v54  ;;  %9786 = vst.msk [vmem:[%s16731_s1 + $0x281] sm:$0xff] %vm1004_vm2, %v18777_v3  ;;  %v18781_v7 = vld [vmem:[#allocation94_spill] sm:$0xff]  ;;  %v18782_v38 = vld [vmem:[#allocation32_spill] sm:$0xff] }
 0x4cc   : >> { %9787 = vst.msk [vmem:[%s16731_s1 + $0x289] sm:$0xff] %vm1004_vm2, %v18778_v20  ;;  %9788 = vst.msk [vmem:[%s16731_s1 + $0x319] sm:$0xff] %vm1004_vm2, %v18779_v32  ;;  %v18783_v9 = vld [vmem:[#allocation133_spill] sm:$0xff]  ;;  %v18784_v11 = vld [vmem:[#allocation132_spill] sm:$0xff] }
 0x4cd   : >> { %9789 = vst.msk [vmem:[%s16731_s1 + $0x321] sm:$0xff] %vm1004_vm2, %v18780_v61  ;;  %9790 = vst.msk [vmem:[%s16731_s1 + $0x329] sm:$0xff] %vm1004_vm2, %v18781_v7  ;;  %v18785_v14 = vld [vmem:[#allocation33_spill] sm:$0xff]  ;;  %v18786_v46 = vld [vmem:[#allocation34_spill] sm:$0xff] }
 0x4ce   : >> { %9791 = vst.msk [vmem:[%s16731_s1 + $0x331] sm:$0xff] %vm1004_vm2, %v18782_v38  ;;  %9792 = vst.msk [vmem:[%s16731_s1 + $0x339] sm:$0xff] %vm1004_vm2, %v18783_v9  ;;  %v18787_v44 = vld [vmem:[#allocation103_spill] sm:$0xff]  ;;  %v18793_v25 = vld [vmem:[#allocation37_spill] sm:$0xff] }
 0x4cf   : >> { %9793 = vst.msk [vmem:[%s16731_s1 + $0x341] sm:$0xff] %vm1004_vm2, %v18784_v11  ;;  %9794 = vst.msk [vmem:[%s16731_s1 + $0x349] sm:$0xff] %vm1004_vm2, %v18785_v14  ;;  %v18794_v31 = vld [vmem:[#allocation109_spill] sm:$0xff]  ;;  %v18795_v54 = vld [vmem:[#allocation106_spill] sm:$0xff] }
 0x4d0   : >> { %9795 = vst.msk [vmem:[%s16731_s1 + $0x351] sm:$0xff] %vm1004_vm2, %v18786_v46  ;;  %9796 = vst.msk [vmem:[%s16731_s1 + $0x359] sm:$0xff] %vm1004_vm2, %v18787_v44  ;;  %v18796_v3 = vld [vmem:[#allocation38_spill] sm:$0xff]  ;;  %v18797_v20 = vld [vmem:[#allocation140_spill] sm:$0xff] }
 0x4d1   : >> { %9800 = vst.msk [vmem:[%s16731_s1 + $0x379] sm:$0xff] %vm1004_vm2, %v18791_v8  ;;  %9801 = vst.msk [vmem:[%s16731_s1 + $0x381] sm:$0xff] %vm1004_vm2, %v18792_v56  ;;  %v18798_v32 = vld [vmem:[#allocation39_spill] sm:$0xff]  ;;  %v18800_v7 = vld [vmem:[#allocation40_spill] sm:$0xff] }
 0x4d2   : >> { %9802 = vst.msk [vmem:[%s16731_s1 + $0x389] sm:$0xff] %vm1004_vm2, %v18793_v25  ;;  %9803 = vst.msk [vmem:[%s16731_s1 + $0x391] sm:$0xff] %vm1004_vm2, %v18794_v31  ;;  %v18799_v61 = vld [vmem:[#allocation139_spill] sm:$0xff]  ;;  %v18801_v38 = vld [vmem:[#allocation41_spill] sm:$0xff] }
 0x4d3   : >> { %9804 = vst.msk [vmem:[%s16731_s1 + $0x421] sm:$0xff] %vm1004_vm2, %v18795_v54  ;;  %9805 = vst.msk [vmem:[%s16731_s1 + $0x429] sm:$0xff] %vm1004_vm2, %v18796_v3  ;;  %v18802_v9 = vld [vmem:[#allocation115_spill] sm:$0xff]  ;;  %v18803_v11 = vld [vmem:[#allocation112_spill] sm:$0xff] }
 0x4d4   : >> { %9813 = vst.msk [vmem:[%s16731_s1 + $0x469] sm:$0xff] %vm1004_vm2, %v18797_v20  ;;  %9814 = vst.msk [vmem:[%s16731_s1 + $0x471] sm:$0xff] %vm1004_vm2, %v18798_v32  ;;  %v18804_v14 = vld [vmem:[#allocation143_spill] sm:$0xff]  ;;  %v18805_v46 = vld [vmem:[#allocation42_spill] sm:$0xff] }
 0x4d5   : >> { %9815 = vst.msk [vmem:[%s16731_s1 + $0x479] sm:$0xff] %vm1004_vm2, %v18799_v61  ;;  %9816 = vst.msk [vmem:[%s16731_s1 + $0x481] sm:$0xff] %vm1004_vm2, %v18800_v7  ;;  %v18806_v44 = vld [vmem:[#allocation43_spill] sm:$0xff]  ;;  %v18808_v33 = vld [vmem:[#allocation44_spill] sm:$0xff] }
 0x4d6   : >> { %9817 = vst.msk [vmem:[%s16731_s1 + $0x489] sm:$0xff] %vm1004_vm2, %v18801_v38  ;;  %9818 = vst.msk [vmem:[%s16731_s1 + $0x491] sm:$0xff] %vm1004_vm2, %v18802_v9  ;;  %v18807_v41 = vld [vmem:[#allocation147_spill] sm:$0xff]  ;;  %v18809_v37 = vld [vmem:[#allocation145_spill] sm:$0xff] }
 0x4d7   : >> { %9819 = vst.msk [vmem:[%s16731_s1 + $0x499] sm:$0xff] %vm1004_vm2, %v18803_v11  ;;  %9833 = vst.msk [vmem:[%s16731_s1 + $0x591] sm:$0xff] %vm1004_vm2, %v18804_v14  ;;  %v18810_v8 = vld [vmem:[#allocation45_spill] sm:$0xff]  ;;  %v18811_v56 = vld [vmem:[#allocation14_spill] sm:$0xff] }
 0x4d8   : >> { %9834 = vst.msk [vmem:[%s16731_s1 + $0x599] sm:$0xff] %vm1004_vm2, %v18805_v46  ;;  %9844 = vst.msk [vmem:[%s16731_s1 + $0x671] sm:$0xff] %vm1004_vm2, %v18806_v44  ;;  %v18812_v25 = vld [vmem:[#allocation16_spill] sm:$0xff]  ;;  %v18813_v31 = vld [vmem:[#allocation17_spill] sm:$0xff] }
 0x4d9   : >> { %9845 = vst.msk [vmem:[%s16731_s1 + $0x679] sm:$0xff] %vm1004_vm2, %v18807_v41  ;;  %9846 = vst.msk [vmem:[%s16731_s1 + $0x681] sm:$0xff] %vm1004_vm2, %v18808_v33 }
 0x4da   : >> { %9847 = vst.msk [vmem:[%s16731_s1 + $0x689] sm:$0xff] %vm1004_vm2, %v18809_v37  ;;  %9848 = vst.msk [vmem:[%s16731_s1 + $0x691] sm:$0xff] %vm1004_vm2, %v18810_v8 }
 0x4db   : >> { %9849 = vst.msk [vmem:[%s16731_s1 + $0x699] sm:$0xff] %vm1004_vm2, %v18811_v56  ;;  %9851 = vst.msk [vmem:[%s16731_s1 + $0x6a9] sm:$0xff] %vm1004_vm2, %v18812_v25 }
 0x4dc   : >> { %9852 = vst.msk [vmem:[%s16731_s1 + $0x739] sm:$0xff] %vm1004_vm2, %v18813_v31  ;;  %9863 = vst.msk [vmem:[%s16731_s1 + $0x791] sm:$0xff] %vm1004_vm2, %v16714_v39 }
 0x4dd   : >> { %9864 = vst.msk [vmem:[%s16731_s1 + $0x799] sm:$0xff] %vm1004_vm2, %v16716_v24  ;;  %9865 = vst.msk [vmem:[%s16731_s1 + $0x7a1] sm:$0xff] %vm1004_vm2, %v16718_v52 }
 0x4de   : >> { %9866 = vst.msk [vmem:[%s16731_s1 + $0x7a9] sm:$0xff] %vm1004_vm2, %v16720_v13  ;;  %9867 = vst.msk [vmem:[%s16731_s1 + $0x7b1] sm:$0xff] %vm1004_vm2, %v16722_v16 }
 0x4df PF: >> { %p9868_p6 = scmp.ne.s32.totalorder %s11861_s10, 2 }
 0x4e0   : >> { %v17121_v54 = vld [vmem:[%s17950_s6] ss:$0 sm:$0xff] (!%p9868_p6)  ;;  %v18814_v3 = vld [vmem:[#allocation56_spill] sm:$0xff] (!%p9868_p6)  ;;  %v18815_v32 = vld [vmem:[#allocation138_spill] sm:$0xff] (!%p9868_p6)  ;;  %vm8051_vm3 = vcmask (!%p9868_p6), 130112   ;;  %vm8058_vm4 = vcmask (!%p9868_p6), 195712   ;;  %s7903_s28 = scalar_lea.vmem (!%p9868_p6), %s12026_s16, %s11885_s27  ;;  %s8738_s12 = scalar_lea.vmem (!%p9868_p6), %s379_s7, %s11885_s27 [#allocation4] }
 0x4e1   : >> { %7383 = sbr.rel (%p9868_p6) target bundleno = 1662 (0x67e), region = 78  ;;  %v7393_v20 = vmul.f32 (!%p9868_p6), %v17121_v54, %v18814_v3  ;;  %v7391_v61 = vmul.f32 (!%p9868_p6), %v17121_v54, %v18815_v32  ;;  %v18816_v7 = vld [vmem:[#allocation66_spill] sm:$0xff] (!%p9868_p6)  ;;  %v18817_v9 = vld [vmem:[#allocation55_spill] sm:$0xff] (!%p9868_p6)  ;;  %v18819_v8 = vld [vmem:[#allocation68_spill] sm:$0xff] (!%p9868_p6)  ;;  %vm8065_vm5 = vcmask (!%p9868_p6), 261312   ;;  %vm8072_vm6 = vcmask (!%p9868_p6), 326912  }
 0x4e2   : >> { %v7394_v38 = vmul.f32 (!%p9868_p6), %v17121_v54, %v18816_v7  ;;  %v7392_v11 = vmul.f32 (!%p9868_p6), %v17121_v54, %v18817_v9  ;;  %v18818_v33 = vld [vmem:[#allocation59_spill] sm:$0xff] (!%p9868_p6)  ;;  %v7395_v56 = vmul.f32 (!%p9868_p6), %v17121_v54, %v18819_v8  ;;  %v18820_v3 = vld [vmem:[#allocation142_spill] sm:$0xff] (!%p9868_p6)  ;;  %v18825_v8 = vld [vmem:[#allocation65_spill] sm:$0xff] (!%p9868_p6)  ;;  %vm8079_vm7 = vcmask (!%p9868_p6), 392512  }
 0x4e3   : >> { %v7525_v14 = vsel (!%p9868_p6), %vm1004_vm2, %v7393_v20, 0.0  ;;  %v7519_v46 = vsel (!%p9868_p6), %vm1004_vm2, %v7391_v61, 0.0  ;;  %v7396_v37 = vmul.f32 (!%p9868_p6), %v17121_v54, %v18818_v33  ;;  %v7398_v20 = vmul.f32 (!%p9868_p6), %v17121_v54, %v18820_v3  ;;  %v18821_v32 = vld [vmem:[#allocation62_spill] sm:$0xff] (!%p9868_p6)  ;;  %v18822_v9 = vld [vmem:[#allocation63_spill] sm:$0xff] (!%p9868_p6) }
 0x4e4   : >> { %7526 = vadd.xlane.f32.xlu1 (!%p9868_p6), %v7525_v14  ;;  %7520 = vadd.xlane.f32.xlu0 (!%p9868_p6), %v7519_v46  ;;  %v7528_v44 = vsel (!%p9868_p6), %vm1004_vm2, %v7394_v38, 0.0  ;;  %v7522_v41 = vsel (!%p9868_p6), %vm1004_vm2, %v7392_v11, 0.0  ;;  %v7531_v31 = vsel (!%p9868_p6), %vm1004_vm2, %v7395_v56, 0.0  ;;  %v7397_v61 = vmul.f32 (!%p9868_p6), %v17121_v54, %v18821_v32  ;;  %v18823_v14 = vld [vmem:[#allocation72_spill] sm:$0xff] (!%p9868_p6)  ;;  %v18824_v33 = vld [vmem:[#allocation146_spill] sm:$0xff] (!%p9868_p6)  ;;  %v18826_v3 = vld [vmem:[#allocation71_spill] sm:$0xff] (!%p9868_p6) }
 0x4e5   : >> { %v7534_v25 = vsel (!%p9868_p6), %vm1004_vm2, %v7396_v37, 0.0  ;;  %v7540_v7 = vsel (!%p9868_p6), %vm1004_vm2, %v7398_v20, 0.0  ;;  %v7400_v11 = vmul.f32 (!%p9868_p6), %v17121_v54, %v18822_v9  ;;  %v7399_v46 = vmul.f32 (!%p9868_p6), %v17121_v54, %v18823_v14  ;;  %v18827_v32 = vld [vmem:[#allocation76_spill] sm:$0xff] (!%p9868_p6)  ;;  %v18828_v9 = vld [vmem:[#allocation75_spill] sm:$0xff] (!%p9868_p6)  ;;  %v18829_v14 = vld [vmem:[#allocation78_spill] sm:$0xff] (!%p9868_p6) }
 0x4e6   : >> { %v7537_v38 = vsel (!%p9868_p6), %vm1004_vm2, %v7397_v61, 0.0  ;;  %v7402_v37 = vmul.f32 (!%p9868_p6), %v17121_v54, %v18824_v33  ;;  %v7401_v56 = vmul.f32 (!%p9868_p6), %v17121_v54, %v18825_v8  ;;  %v7404_v20 = vmul.f32 (!%p9868_p6), %v17121_v54, %v18826_v3  ;;  %v18830_v33 = vld [vmem:[#allocation77_spill] sm:$0xff] (!%p9868_p6)  ;;  %v18831_v8 = vld [vmem:[#allocation83_spill] sm:$0xff] (!%p9868_p6) }
 0x4e7   : >> { %v7403_v61 = vmul.f32 (!%p9868_p6), %v17121_v54, %v18827_v32  ;;  %v18832_v3 = vld [vmem:[#allocation81_spill] sm:$0xff] (!%p9868_p6)  ;;  %v18833_v32 = vld [vmem:[#allocation84_spill] sm:$0xff] (!%p9868_p6)  ;;  %v18886_v16 = vld [vmem:[#allocation115_spill] sm:$0xff] (!%p9868_p6)  ;;  %vm8086_vm8 = vcmask (!%p9868_p6), 458112   ;;  %vm8093_vm9 = vcmask (!%p9868_p6), 523712   ;;  %vm8100_vm10 = vcmask (!%p9868_p6), 589312  }
 0x4e8   : >> { %7529 = vadd.xlane.f32.xlu1 %v7528_v44  ;;  %7523 = vadd.xlane.f32.xlu0 %v7522_v41  ;;  %v7546_v44 = vsel %vm1004_vm2, %v7400_v11, 0.0  ;;  %v7543_v41 = vsel %vm1004_vm2, %v7399_v46, 0.0  ;;  %v7406_v11 = vmul.f32 %v17121_v54, %v18828_v9  ;;  %v7405_v46 = vmul.f32 %v17121_v54, %v18829_v14  ;;  %v18834_v9 = vld [vmem:[#allocation82_spill] sm:$0xff]  ;;  %v18835_v14 = vld [vmem:[#allocation87_spill] sm:$0xff] }
 0x4e9   : >> { %vm8107_vm11 = vcmask 654912   ;;  %vm8114_vm12 = vcmask 720512   ;;  %vm8121_vm13 = vcmask 786112   ;;  %vm8128_vm14 = vcmask 851712  }
 0x4ea   : >> { %vm8135_vm15 = vcmask 917312   ;;  %vm8142_vm0 = vcmask 982912   ;;  %vm8149_vm1 = vcmask 1048512  }
 0x4ec   : >> { %7535 = vadd.xlane.f32.xlu1 %v7534_v25  ;;  %7532 = vadd.xlane.f32.xlu0 %v7531_v31  ;;  %v7552_v25 = vsel %vm1004_vm2, %v7402_v37, 0.0  ;;  %v7549_v31 = vsel %vm1004_vm2, %v7401_v56, 0.0  ;;  %v7408_v37 = vmul.f32 %v17121_v54, %v18830_v33  ;;  %v7407_v56 = vmul.f32 %v17121_v54, %v18831_v8  ;;  %v18836_v33 = vld [vmem:[#allocation93_spill] sm:$0xff] }
 0x4ed   : >> { %v18837_v8 = vld [vmem:[#allocation85_spill] sm:$0xff] }
 0x4f0   : >> { %7541 = vadd.xlane.f32.xlu1 %v7540_v7  ;;  %7538 = vadd.xlane.f32.xlu0 %v7537_v38  ;;  %v7558_v7 = vsel %vm1004_vm2, %v7404_v20, 0.0  ;;  %v7555_v38 = vsel %vm1004_vm2, %v7403_v61, 0.0  ;;  %v7410_v20 = vmul.f32 %v17121_v54, %v18832_v3  ;;  %v7409_v61 = vmul.f32 %v17121_v54, %v18833_v32  ;;  %v18838_v3 = vld [vmem:[#allocation90_spill] sm:$0xff] }
 0x4f1   : >> { %v18839_v32 = vld [vmem:[#allocation86_spill] sm:$0xff] }
 0x4f4   : >> { %7547 = vadd.xlane.f32.xlu1 %v7546_v44  ;;  %7544 = vadd.xlane.f32.xlu0 %v7543_v41  ;;  %v7564_v44 = vsel %vm1004_vm2, %v7406_v11, 0.0  ;;  %v7561_v41 = vsel %vm1004_vm2, %v7405_v46, 0.0  ;;  %v7412_v11 = vmul.f32 %v17121_v54, %v18834_v9  ;;  %v7411_v46 = vmul.f32 %v17121_v54, %v18835_v14  ;;  %v18840_v9 = vld [vmem:[#allocation99_spill] sm:$0xff]  ;;  %v18841_v14 = vld [vmem:[#allocation92_spill] sm:$0xff] }
 0x4f8   : >> { %7553 = vadd.xlane.f32.xlu1 %v7552_v25  ;;  %7550 = vadd.xlane.f32.xlu0 %v7549_v31  ;;  %v7570_v25 = vsel %vm1004_vm2, %v7408_v37, 0.0  ;;  %v7567_v31 = vsel %vm1004_vm2, %v7407_v56, 0.0  ;;  %v7414_v37 = vmul.f32 %v17121_v54, %v18836_v33  ;;  %v7413_v56 = vmul.f32 %v17121_v54, %v18837_v8  ;;  %v18842_v33 = vld [vmem:[#allocation101_spill] sm:$0xff] }
 0x4f9   : >> { %v18843_v8 = vld [vmem:[#allocation61_spill] sm:$0xff] }
 0x4fc   : >> { %7559 = vadd.xlane.f32.xlu1 %v7558_v7  ;;  %7556 = vadd.xlane.f32.xlu0 %v7555_v38  ;;  %v7576_v7 = vsel %vm1004_vm2, %v7410_v20, 0.0  ;;  %v7573_v38 = vsel %vm1004_vm2, %v7409_v61, 0.0  ;;  %v7416_v20 = vmul.f32 %v17121_v54, %v18838_v3  ;;  %v7415_v61 = vmul.f32 %v17121_v54, %v18839_v32  ;;  %v18844_v3 = vld [vmem:[#allocation137_spill] sm:$0xff]  ;;  %v18845_v32 = vld [vmem:[#allocation52_spill] sm:$0xff] }
 0x500   : >> { %7565 = vadd.xlane.f32.xlu1 %v7564_v44  ;;  %7562 = vadd.xlane.f32.xlu0 %v7561_v41  ;;  %v7582_v44 = vsel %vm1004_vm2, %v7412_v11, 0.0  ;;  %v7579_v41 = vsel %vm1004_vm2, %v7411_v46, 0.0  ;;  %v7418_v11 = vmul.f32 %v17121_v54, %v18840_v9  ;;  %v7417_v46 = vmul.f32 %v17121_v54, %v18841_v14  ;;  %v18846_v9 = vld [vmem:[#allocation102_spill] sm:$0xff]  ;;  %v18847_v14 = vld [vmem:[#allocation105_spill] sm:$0xff] }
 0x504   : >> { %7571 = vadd.xlane.f32.xlu1 %v7570_v25  ;;  %7568 = vadd.xlane.f32.xlu0 %v7567_v31  ;;  %v7588_v25 = vsel %vm1004_vm2, %v7414_v37, 0.0  ;;  %v7585_v31 = vsel %vm1004_vm2, %v7413_v56, 0.0  ;;  %v7420_v37 = vmul.f32 %v17121_v54, %v18842_v33  ;;  %v7419_v56 = vmul.f32 %v17121_v54, %v18843_v8  ;;  %v18848_v33 = vld [vmem:[#allocation113_spill] sm:$0xff]  ;;  %v18849_v8 = vld [vmem:[#allocation108_spill] sm:$0xff] }
 0x508   : >> { %7577 = vadd.xlane.f32.xlu1 %v7576_v7  ;;  %7574 = vadd.xlane.f32.xlu0 %v7573_v38  ;;  %v7594_v7 = vsel %vm1004_vm2, %v7416_v20, 0.0  ;;  %v7591_v38 = vsel %vm1004_vm2, %v7415_v61, 0.0  ;;  %v7422_v20 = vmul.f32 %v17121_v54, %v18844_v3  ;;  %v7421_v61 = vmul.f32 %v17121_v54, %v18845_v32  ;;  %v18850_v3 = vld [vmem:[#allocation118_spill] sm:$0xff] }
 0x509   : >> { %v18851_v32 = vld [vmem:[#allocation114_spill] sm:$0xff] }
 0x50c   : >> { %7583 = vadd.xlane.f32.xlu1 %v7582_v44  ;;  %7580 = vadd.xlane.f32.xlu0 %v7579_v41  ;;  %v7600_v44 = vsel %vm1004_vm2, %v7418_v11, 0.0  ;;  %v7597_v41 = vsel %vm1004_vm2, %v7417_v46, 0.0  ;;  %v7424_v11 = vmul.f32 %v17121_v54, %v18846_v9  ;;  %v7423_v46 = vmul.f32 %v17121_v54, %v18847_v14  ;;  %v18852_v9 = vld [vmem:[#allocation123_spill] sm:$0xff] }
 0x50d   : >> { %v18853_v14 = vld [vmem:[#allocation119_spill] sm:$0xff] }
 0x510   : >> { %7589 = vadd.xlane.f32.xlu1 %v7588_v25  ;;  %7586 = vadd.xlane.f32.xlu0 %v7585_v31  ;;  %v7606_v25 = vsel %vm1004_vm2, %v7420_v37, 0.0  ;;  %v7603_v31 = vsel %vm1004_vm2, %v7419_v56, 0.0  ;;  %v7426_v37 = vmul.f32 %v17121_v54, %v18848_v33  ;;  %v7425_v56 = vmul.f32 %v17121_v54, %v18849_v8  ;;  %v18854_v33 = vld [vmem:[#allocation129_spill] sm:$0xff]  ;;  %v18855_v8 = vld [vmem:[#allocation122_spill] sm:$0xff] }
 0x514   : >> { %7595 = vadd.xlane.f32.xlu1 %v7594_v7  ;;  %7592 = vadd.xlane.f32.xlu0 %v7591_v38  ;;  %v7612_v7 = vsel %vm1004_vm2, %v7422_v20, 0.0  ;;  %v7609_v38 = vsel %vm1004_vm2, %v7421_v61, 0.0  ;;  %v7428_v20 = vmul.f32 %v17121_v54, %v18850_v3  ;;  %v7427_v61 = vmul.f32 %v17121_v54, %v18851_v32  ;;  %v18856_v3 = vld [vmem:[#allocation28_spill] sm:$0xff]  ;;  %v18857_v32 = vld [vmem:[#allocation127_spill] sm:$0xff] }
 0x518   : >> { %7601 = vadd.xlane.f32.xlu1 %v7600_v44  ;;  %7598 = vadd.xlane.f32.xlu0 %v7597_v41  ;;  %v7618_v44 = vsel %vm1004_vm2, %v7424_v11, 0.0  ;;  %v7615_v41 = vsel %vm1004_vm2, %v7423_v46, 0.0  ;;  %v7430_v11 = vmul.f32 %v17121_v54, %v18852_v9  ;;  %v7429_v46 = vmul.f32 %v17121_v54, %v18853_v14  ;;  %v18858_v9 = vld [vmem:[#allocation131_spill] sm:$0xff]  ;;  %v18859_v14 = vld [vmem:[#allocation29_spill] sm:$0xff] }
 0x51c   : >> { %7607 = vadd.xlane.f32.xlu1 %v7606_v25  ;;  %7604 = vadd.xlane.f32.xlu0 %v7603_v31  ;;  %v7624_v25 = vsel %vm1004_vm2, %v7426_v37, 0.0  ;;  %v7621_v31 = vsel %vm1004_vm2, %v7425_v56, 0.0  ;;  %v7432_v37 = vmul.f32 %v17121_v54, %v18854_v33  ;;  %v7431_v56 = vmul.f32 %v17121_v54, %v18855_v8  ;;  %v18860_v33 = vld [vmem:[#allocation30_spill] sm:$0xff] }
 0x51d   : >> { %v18861_v8 = vld [vmem:[#allocation130_spill] sm:$0xff] }
 0x520   : >> { %7613 = vadd.xlane.f32.xlu1 %v7612_v7  ;;  %7610 = vadd.xlane.f32.xlu0 %v7609_v38  ;;  %v7630_v7 = vsel %vm1004_vm2, %v7428_v20, 0.0  ;;  %v7627_v38 = vsel %vm1004_vm2, %v7427_v61, 0.0  ;;  %v7434_v20 = vmul.f32 %v17121_v54, %v18856_v3  ;;  %v7433_v61 = vmul.f32 %v17121_v54, %v18857_v32  ;;  %v18862_v3 = vld [vmem:[#allocation31_spill] sm:$0xff]  ;;  %v18863_v32 = vld [vmem:[#allocation97_spill] sm:$0xff] }
 0x524   : >> { %7619 = vadd.xlane.f32.xlu1 %v7618_v44  ;;  %7616 = vadd.xlane.f32.xlu0 %v7615_v41  ;;  %v7636_v44 = vsel %vm1004_vm2, %v7430_v11, 0.0  ;;  %v7633_v41 = vsel %vm1004_vm2, %v7429_v46, 0.0  ;;  %v7436_v11 = vmul.f32 %v17121_v54, %v18858_v9  ;;  %v7435_v46 = vmul.f32 %v17121_v54, %v18859_v14  ;;  %v18864_v9 = vld [vmem:[#allocation32_spill] sm:$0xff]  ;;  %v18865_v14 = vld [vmem:[#allocation94_spill] sm:$0xff] }
 0x528   : >> { %7625 = vadd.xlane.f32.xlu1 %v7624_v25  ;;  %7622 = vadd.xlane.f32.xlu0 %v7621_v31  ;;  %v7642_v25 = vsel %vm1004_vm2, %v7432_v37, 0.0  ;;  %v7639_v31 = vsel %vm1004_vm2, %v7431_v56, 0.0  ;;  %v7438_v37 = vmul.f32 %v17121_v54, %v18860_v33  ;;  %v7437_v56 = vmul.f32 %v17121_v54, %v18861_v8  ;;  %v18866_v33 = vld [vmem:[#allocation132_spill] sm:$0xff]  ;;  %v18867_v8 = vld [vmem:[#allocation133_spill] sm:$0xff] }
 0x52c   : >> { %7631 = vadd.xlane.f32.xlu1 %v7630_v7  ;;  %7628 = vadd.xlane.f32.xlu0 %v7627_v38  ;;  %v7648_v7 = vsel %vm1004_vm2, %v7434_v20, 0.0  ;;  %v7645_v38 = vsel %vm1004_vm2, %v7433_v61, 0.0  ;;  %v7440_v20 = vmul.f32 %v17121_v54, %v18862_v3  ;;  %v7439_v61 = vmul.f32 %v17121_v54, %v18863_v32  ;;  %v18868_v3 = vld [vmem:[#allocation34_spill] sm:$0xff]  ;;  %v18869_v32 = vld [vmem:[#allocation33_spill] sm:$0xff] }
 0x530   : >> { %7637 = vadd.xlane.f32.xlu1 %v7636_v44  ;;  %7634 = vadd.xlane.f32.xlu0 %v7633_v41  ;;  %v7654_v44 = vsel %vm1004_vm2, %v7436_v11, 0.0  ;;  %v7651_v41 = vsel %vm1004_vm2, %v7435_v46, 0.0  ;;  %v7442_v11 = vmul.f32 %v17121_v54, %v18864_v9  ;;  %v7441_v46 = vmul.f32 %v17121_v54, %v18865_v14  ;;  %v18870_v9 = vld [vmem:[#allocation100_spill] sm:$0xff]  ;;  %v18871_v14 = vld [vmem:[#allocation103_spill] sm:$0xff] }
 0x534   : >> { %7643 = vadd.xlane.f32.xlu1 %v7642_v25  ;;  %7640 = vadd.xlane.f32.xlu0 %v7639_v31  ;;  %v7660_v25 = vsel %vm1004_vm2, %v7438_v37, 0.0  ;;  %v7657_v31 = vsel %vm1004_vm2, %v7437_v56, 0.0  ;;  %v7444_v37 = vmul.f32 %v17121_v54, %v18866_v33  ;;  %v7443_v56 = vmul.f32 %v17121_v54, %v18867_v8  ;;  %v18872_v33 = vld [vmem:[#allocation135_spill] sm:$0xff] }
 0x535   : >> { %v18873_v8 = vld [vmem:[#allocation35_spill] sm:$0xff] }
 0x538   : >> { %7649 = vadd.xlane.f32.xlu1 %v7648_v7  ;;  %7646 = vadd.xlane.f32.xlu0 %v7645_v38  ;;  %v7666_v7 = vsel %vm1004_vm2, %v7440_v20, 0.0  ;;  %v7663_v38 = vsel %vm1004_vm2, %v7439_v61, 0.0  ;;  %v7446_v20 = vmul.f32 %v17121_v54, %v18868_v3  ;;  %v7445_v61 = vmul.f32 %v17121_v54, %v18869_v32  ;;  %v18874_v3 = vld [vmem:[#allocation134_spill] sm:$0xff]  ;;  %v18875_v32 = vld [vmem:[#allocation36_spill] sm:$0xff] }
 0x53c   : >> { %7655 = vadd.xlane.f32.xlu1 %v7654_v44  ;;  %7652 = vadd.xlane.f32.xlu0 %v7651_v41  ;;  %v7672_v44 = vsel %vm1004_vm2, %v7442_v11, 0.0  ;;  %v7669_v41 = vsel %vm1004_vm2, %v7441_v46, 0.0  ;;  %v7448_v11 = vmul.f32 %v17121_v54, %v18870_v9  ;;  %v7447_v46 = vmul.f32 %v17121_v54, %v18871_v14  ;;  %v18876_v9 = vld [vmem:[#allocation109_spill] sm:$0xff] }
 0x53d   : >> { %v18877_v14 = vld [vmem:[#allocation37_spill] sm:$0xff] }
 0x540   : >> { %7661 = vadd.xlane.f32.xlu1 %v7660_v25  ;;  %7658 = vadd.xlane.f32.xlu0 %v7657_v31  ;;  %v7678_v25 = vsel %vm1004_vm2, %v7444_v37, 0.0  ;;  %v7675_v31 = vsel %vm1004_vm2, %v7443_v56, 0.0  ;;  %v7450_v37 = vmul.f32 %v17121_v54, %v18872_v33  ;;  %v7449_v56 = vmul.f32 %v17121_v54, %v18873_v8  ;;  %v18878_v33 = vld [vmem:[#allocation38_spill] sm:$0xff] }
 0x541   : >> { %v18879_v8 = vld [vmem:[#allocation106_spill] sm:$0xff] }
 0x544   : >> { %7667 = vadd.xlane.f32.xlu1 %v7666_v7  ;;  %7664 = vadd.xlane.f32.xlu0 %v7663_v38  ;;  %v7684_v7 = vsel %vm1004_vm2, %v7446_v20, 0.0  ;;  %v7681_v38 = vsel %vm1004_vm2, %v7445_v61, 0.0  ;;  %v7452_v20 = vmul.f32 %v17121_v54, %v18874_v3  ;;  %v7451_v61 = vmul.f32 %v17121_v54, %v18875_v32 }
 0x545   : >> { %v7458_v3 = vmul.f32 %v17121_v54, %v16281_v59 }
 0x547   : >> { %v7720_v32 = vsel %vm1004_vm2, %v7458_v3, 0.0  ;;  %v18882_v3 = vld [vmem:[#allocation39_spill] sm:$0xff] }
 0x548   : >> { %7673 = vadd.xlane.f32.xlu1 %v7672_v44  ;;  %7670 = vadd.xlane.f32.xlu0 %v7669_v41  ;;  %v7690_v44 = vsel %vm1004_vm2, %v7448_v11, 0.0  ;;  %v7687_v41 = vsel %vm1004_vm2, %v7447_v46, 0.0  ;;  %v7454_v11 = vmul.f32 %v17121_v54, %v18876_v9  ;;  %v7453_v46 = vmul.f32 %v17121_v54, %v18877_v14 }
 0x549   : >> { %v8040_v9 = vlaneseq  ;;  %v7461_v14 = vmul.f32 %v17121_v54, %v16297_v43 }
 0x54c   : >> { %7679 = vadd.xlane.f32.xlu1 %v7678_v25  ;;  %7676 = vadd.xlane.f32.xlu0 %v7675_v31  ;;  %v7696_v25 = vsel %vm1004_vm2, %v7450_v37, 0.0  ;;  %v7693_v31 = vsel %vm1004_vm2, %v7449_v56, 0.0  ;;  %v7456_v37 = vmul.f32 %v17121_v54, %v18878_v33  ;;  %v7455_v56 = vmul.f32 %v17121_v54, %v18879_v8 }
 0x550   : >> { %7685 = vadd.xlane.f32.xlu1 %v7684_v7  ;;  %7682 = vadd.xlane.f32.xlu0 %v7681_v38  ;;  %v7702_v7 = vsel %vm1004_vm2, %v7452_v20, 0.0  ;;  %v7699_v38 = vsel %vm1004_vm2, %v7451_v61, 0.0  ;;  %v7457_v20 = vmul.f32 %v17121_v54, %v16273_v22  ;;  %v7462_v22 = vmul.f32 %v17121_v54, %v16307_v50 }
 0x551   : >> { %v17346_v50 = vshrl.u32 %v8040_v9, 7 }
 0x552   : >> { %v7717_v61 = vsel %vm1004_vm2, %v7457_v20, 0.0  ;;  %v7465_v20 = vmul.f32 %v17121_v54, %v18882_v3 }
 0x554   : >> { %7691 = vadd.xlane.f32.xlu1 %v7690_v44  ;;  %7688 = vadd.xlane.f32.xlu0 %v7687_v41  ;;  %v7708_v44 = vsel %vm1004_vm2, %v7454_v11, 0.0  ;;  %v7705_v41 = vsel %vm1004_vm2, %v7453_v46, 0.0  ;;  %v17337_v46 = vand.u32 127, %v8040_v9 }
 0x556   : >> { %v8053_v33 = vadd.s32 4294967280, %v17337_v46  ;;  %v8060_v43 = vadd.s32 4294967272, %v17337_v46  ;;  %v8046_v8 = vadd.s32 4294967288, %v17337_v46  ;;  %v8067_v9 = vadd.s32 4294967264, %v17337_v46 }
 0x558   : >> { %7697 = vadd.xlane.f32.xlu1 %v7696_v25  ;;  %7694 = vadd.xlane.f32.xlu0 %v7693_v31  ;;  %v7714_v25 = vsel %vm1004_vm2, %v7456_v37, 0.0  ;;  %v7711_v31 = vsel %vm1004_vm2, %v7455_v56, 0.0  ;;  %v7463_v37 = vmul.f32 %v17121_v54, %v16316_v34  ;;  %v17382_v3 = vsub.s32 %v8067_v9, %v17346_v50 }
 0x55c   : >> { %7703 = vadd.xlane.f32.xlu1 %v7702_v7  ;;  %7700 = vadd.xlane.f32.xlu0 %v7699_v38  ;;  %v7460_v7 = vmul.f32 %v17121_v54, %v16291_v15  ;;  %v7459_v38 = vmul.f32 %v17121_v54, %v16285_v49  ;;  %v18880_v15 = vld [vmem:[#allocation140_spill] sm:$0xff] }
 0x55d   : >> { %v7464_v49 = vmul.f32 %v17121_v54, %v18880_v15 }
 0x55e   : >> { %v7726_v59 = vsel %vm1004_vm2, %v7460_v7, 0.0  ;;  %v7723_v11 = vsel %vm1004_vm2, %v7459_v38, 0.0  ;;  %v7735_v7 = vsel %vm1004_vm2, %v7463_v37, 0.0  ;;  %v8074_v38 = vadd.s32 4294967256, %v17337_v46 }
 0x55f   : >> { %v7738_v56 = vsel %vm1004_vm2, %v7464_v49, 0.0  ;;  %v18884_v49 = vld [vmem:[#allocation40_spill] sm:$0xff] }
 0x560   : >> { %7709 = vadd.xlane.f32.xlu1 %v7708_v44  ;;  %7706 = vadd.xlane.f32.xlu0 %v7705_v41  ;;  %v7732_v44 = vsel %vm1004_vm2, %v7462_v22, 0.0  ;;  %v7729_v41 = vsel %vm1004_vm2, %v7461_v14, 0.0  ;;  %v17369_v22 = vsub.s32 %v8046_v8, %v17346_v50  ;;  %v18883_v14 = vld [vmem:[#allocation41_spill] sm:$0xff]  ;;  %v17379_v8 = vsub.s32 %v8074_v38, %v17346_v50 }
 0x561   : >> { %v7468_v15 = vmul.f32 %v17121_v54, %v18883_v14  ;;  %v8088_v14 = vadd.s32 4294967240, %v17337_v46 }
 0x563   : >> { %v17398_v4 = vsub.s32 %v8088_v14, %v17346_v50 }
 0x564   : >> { %7715 = vadd.xlane.f32.xlu1 %v7714_v25  ;;  %7712 = vadd.xlane.f32.xlu0 %v7711_v31  ;;  %v18881_v25 = vld [vmem:[#allocation139_spill] sm:$0xff] }
 0x565   : >> { %v7466_v31 = vmul.f32 %v17121_v54, %v18881_v25 }
 0x568   : >> { %7721 = vadd.xlane.f32.xlu1 %v7720_v32  ;;  %7718 = vadd.xlane.f32.xlu0 %v7717_v61  ;;  %v17356_v32 = vsub.s32 %v8053_v33, %v17346_v50  ;;  %v7741_v33 = vsel %vm1004_vm2, %v7465_v20, 0.0 }
 0x56c   : >> { %7727 = vadd.xlane.f32.xlu1 %v7726_v59  ;;  %7724 = vadd.xlane.f32.xlu0 %v7723_v11  ;;  %v17363_v59 = vsub.s32 %v17337_v46, %v17346_v50  ;;  %v17366_v11 = vsub.s32 %v8060_v43, %v17346_v50 }
 0x570   : >> { %7733 = vadd.xlane.f32.xlu1 %v7732_v44  ;;  %7730 = vadd.xlane.f32.xlu0 %v7729_v41  ;;  %v7467_v44 = vmul.f32 %v17121_v54, %v18884_v49  ;;  %v7744_v41 = vsel %vm1004_vm2, %v7466_v31, 0.0  ;;  %v11888_v49 = vmov 0  }
 0x571   : >> { %v7527_v34 = vpop.xlane.xlu1 %7526  ;;  %v7521_v61 = vpop.xlane.xlu0 %7520  ;;  %11773 = vset.pattern.permute.xlu0 %v11888_v49  ;;  %v18885_v49 = vld [vmem:[#allocation112_spill] sm:$0xff] }
 0x572   : >> { %v8057_v37 = vrot.slane %v7527_v34, %v17356_v32  ;;  %v8081_v34 = vadd.s32 4294967248, %v17337_v46  ;;  %v7747_v38 = vsel %vm1004_vm2, %v7467_v44, 0.0  ;;  %v8095_v44 = vadd.s32 4294967232, %v17337_v46 }
 0x574   : >> { %7739 = vadd.xlane.f32.xlu1 %v7738_v56  ;;  %7736 = vadd.xlane.f32.xlu0 %v7735_v7  ;;  %v8045_v56 = vrot.slane %v7521_v61, %v17363_v59  ;;  %v7750_v7 = vsel %vm1004_vm2, %v7468_v15, 0.0  ;;  %v7470_v61 = vmul.f32 %v17121_v54, %v18885_v49  ;;  %v8102_v15 = vadd.s32 4294967224, %v17337_v46 }
 0x575   : >> { %v7530_v43 = vpop.xlane.xlu1 %7529  ;;  %v7524_v25 = vpop.xlane.xlu0 %7523  ;;  %v7471_v49 = vmul.f32 %v17121_v54, %v16423_v17  ;;  %v7474_v17 = vmul.f32 %v17121_v54, %v16442_v23 }
 0x576   : >> { %v8064_v31 = vrot.slane %v7530_v43, %v17366_v11  ;;  %v8050_v20 = vrot.slane %v7524_v25, %v17369_v22  ;;  %v7469_v43 = vmul.f32 %v17121_v54, %v18886_v16  ;;  %v7472_v16 = vmul.f32 %v17121_v54, %v16429_v60 }
 0x577   : >> { %v7756_v14 = vsel %vm1004_vm2, %v7470_v61, 0.0  ;;  %v8116_v60 = vadd.s32 4294967208, %v17337_v46  ;;  %v17423_v61 = vsub.s32 %v8095_v44, %v17346_v50 }
 0x578   : >> { %v8052_v9 = vsel %vm8051_vm3, %v8050_v20, %v8045_v56  ;;  %7745 = vadd.xlane.f32.xlu1 %v7744_v41  ;;  %7742 = vadd.xlane.f32.xlu0 %v7741_v33  ;;  %v17406_v20 = vsub.s32 %v8081_v34, %v17346_v50  ;;  %v17415_v34 = vsub.s32 %v8102_v15, %v17346_v50 }
 0x579   : >> { %v8059_v25 = vsel %vm8058_vm4, %v8057_v37, %v8052_v9  ;;  %v7536_v13 = vpop.xlane.xlu1 %7535  ;;  %v7533_v18 = vpop.xlane.xlu0 %7532  ;;  %v7753_v9 = vsel %vm1004_vm2, %v7469_v43, 0.0  ;;  %v8109_v43 = vadd.s32 4294967216, %v17337_v46 }
 0x57a   : >> { %v8078_v41 = vrot.slane %v7536_v13, %v17379_v8  ;;  %v8066_v33 = vsel %vm8065_vm5, %v8064_v31, %v8059_v25  ;;  %v8071_v56 = vrot.slane %v7533_v18, %v17382_v3  ;;  %v7762_v25 = vsel %vm1004_vm2, %v7472_v16, 0.0 }
 0x57b   : >> { %v8130_v16 = vadd.s32 4294967192, %v17337_v46  ;;  %v17441_v23 = vsub.s32 %v8109_v43, %v17346_v50 }
 0x57c   : >> { %v8073_v37 = vsel %vm8072_vm6, %v8071_v56, %v8066_v33  ;;  %7751 = vadd.xlane.f32.xlu1 %v7750_v7  ;;  %7748 = vadd.xlane.f32.xlu0 %v7747_v38 }
 0x57d   : >> { %v7542_v13 = vpop.xlane.xlu1 %7541  ;;  %v8080_v31 = vsel %vm8079_vm7, %v8078_v41, %v8073_v37  ;;  %v7539_v18 = vpop.xlane.xlu0 %7538  ;;  %v7473_v41 = vmul.f32 %v17121_v54, %v16436_v27  ;;  %v7759_v37 = vsel %vm1004_vm2, %v7471_v49, 0.0  ;;  %v8123_v27 = vadd.s32 4294967200, %v17337_v46 }
 0x57e   : >> { %v8092_v7 = vrot.slane %v7542_v13, %v17398_v4  ;;  %v8085_v38 = vrot.slane %v7539_v18, %v17406_v20  ;;  %v17435_v13 = vsub.s32 %v8116_v60, %v17346_v50  ;;  %v7768_v18 = vsel %vm1004_vm2, %v7474_v17, 0.0 }
 0x57f   : >> { %v7765_v49 = vsel %vm1004_vm2, %v7473_v41, 0.0  ;;  %v7476_v60 = vmul.f32 %v17121_v54, %v16461_v51  ;;  %v17459_v41 = vsub.s32 %v8123_v27, %v17346_v50  ;;  %v8137_v51 = vadd.s32 4294967184, %v17337_v46 }
 0x580   : >> { %v8087_v15 = vsel %vm8086_vm8, %v8085_v38, %v8080_v31  ;;  %7757 = vadd.xlane.f32.xlu1 %v7756_v14  ;;  %7754 = vadd.xlane.f32.xlu0 %v7753_v9  ;;  %v7478_v27 = vmul.f32 %v17121_v54, %v16469_v12  ;;  %v7480_v12 = vmul.f32 %v17121_v54, %v16477_v40 }
 0x581   : >> { %v7548_v33 = vpop.xlane.xlu1 %7547  ;;  %v8094_v44 = vsel %vm8093_vm9, %v8092_v7, %v8087_v15  ;;  %v7545_v56 = vpop.xlane.xlu0 %7544  ;;  %v17451_v15 = vsub.s32 %v8130_v16, %v17346_v50  ;;  %v7482_v40 = vmul.f32 %v17121_v54, %v16486_v2  ;;  %v7487_v2 = vmul.f32 %v17121_v54, %v16566_v48 }
 0x582   : >> { %v8106_v14 = vrot.slane %v7548_v33, %v17415_v34  ;;  %v8099_v9 = vrot.slane %v7545_v56, %v17423_v61  ;;  %v7475_v33 = vmul.f32 %v17121_v54, %v16453_v55 }
 0x584   : >> { %v8101_v31 = vsel %vm8100_vm10, %v8099_v9, %v8094_v44  ;;  %7763 = vadd.xlane.f32.xlu1 %v7762_v25  ;;  %7760 = vadd.xlane.f32.xlu0 %v7759_v37  ;;  %v8144_v25 = vadd.s32 4294967176, %v17337_v46  ;;  %v7774_v37 = vsel %vm1004_vm2, %v7476_v60, 0.0  ;;  %v7771_v9 = vsel %vm1004_vm2, %v7475_v33, 0.0 }
 0x585   : >> { %v7554_v7 = vpop.xlane.xlu1 %7553  ;;  %v8108_v38 = vsel %vm8107_vm11, %v8106_v14, %v8101_v31  ;;  %v7551_v43 = vpop.xlane.xlu0 %7550  ;;  %v7477_v46 = vmul.f32 %v17121_v54, %v16466_v42  ;;  %v17476_v60 = vsub.s32 %v8137_v51, %v17346_v50  ;;  %v7780_v33 = vsel %vm1004_vm2, %v7478_v27, 0.0 }
 0x586   : >> { %v8120_v44 = vrot.slane %v7554_v7, %v17435_v13  ;;  %v8113_v17 = vrot.slane %v7551_v43, %v17441_v23 }
 0x588   : >> { %v8115_v56 = vsel %vm8114_vm12, %v8113_v17, %v8108_v38  ;;  %7769 = vadd.xlane.f32.xlu1 %v7768_v18  ;;  %7766 = vadd.xlane.f32.xlu0 %v7765_v49  ;;  %v17473_v49 = vsub.s32 %v8144_v25, %v17346_v50  ;;  %v7777_v25 = vsel %vm1004_vm2, %v7477_v46, 0.0 }
 0x589   : >> { %v7560_v55 = vpop.xlane.xlu1 %7559  ;;  %v8122_v16 = vsel %vm8121_vm13, %v8120_v44, %v8115_v56  ;;  %v7557_v14 = vpop.xlane.xlu0 %7556  ;;  %v7479_v44 = vmul.f32 %v17121_v54, %v16472_v10 }
 0x58a   : >> { %v8134_v31 = vrot.slane %v7560_v55, %v17451_v15  ;;  %v8127_v18 = vrot.slane %v7557_v14, %v17459_v41  ;;  %v7786_v14 = vsel %vm1004_vm2, %v7480_v12, 0.0  ;;  %v7792_v12 = vsel %vm1004_vm2, %v7482_v40, 0.0 }
 0x58b   : >> { %v7783_v10 = vsel %vm1004_vm2, %v7479_v44, 0.0 }
 0x58c   : >> { %v8129_v7 = vsel %vm8128_vm14, %v8127_v18, %v8122_v16  ;;  %7775 = vadd.xlane.f32.xlu1 %v7774_v37  ;;  %7772 = vadd.xlane.f32.xlu0 %v7771_v9  ;;  %v7481_v9 = vmul.f32 %v17121_v54, %v16483_v63  ;;  %v7483_v63 = vmul.f32 %v17121_v54, %v16489_v47 }
 0x58d   : >> { %v7566_v38 = vpop.xlane.xlu1 %7565  ;;  %v8136_v42 = vsel %vm8135_vm15, %v8134_v31, %v8129_v7  ;;  %v7563_v43 = vpop.xlane.xlu0 %7562  ;;  %v7488_v47 = vmul.f32 %v17121_v54, %v16572_v19  ;;  %v7504_v19 = vmul.f32 %v17121_v54, %v16672_v58  ;;  %v7505_v58 = vmul.f32 %v17121_v54, %v16679_v57 }
 0x58e   : >> { %v8148_v17 = vrot.slane %v7566_v38, %v17473_v49  ;;  %v8141_v51 = vrot.slane %v7563_v43, %v17476_v60  ;;  %v7789_v38 = vsel %vm1004_vm2, %v7481_v9, 0.0  ;;  %v7506_v57 = vmul.f32 %v17121_v54, %v16681_v28 }
 0x58f   : >> { %v7507_v28 = vmul.f32 %v17121_v54, %v16683_v1  ;;  %v7508_v1 = vmul.f32 %v17121_v54, %v16687_v45  ;;  %v7494_v45 = vmul.f32 %v17121_v54, %v16601_v21 }
 0x590   : >> { %v8143_v56 = vsel %vm8142_vm0, %v8141_v51, %v8136_v42  ;;  %7781 = vadd.xlane.f32.xlu1 %v7780_v33  ;;  %7778 = vadd.xlane.f32.xlu0 %v7777_v25  ;;  %v7807_v25 = vsel %vm1004_vm2, %v7487_v2, 0.0  ;;  %v7795_v51 = vsel %vm1004_vm2, %v7483_v63, 0.0  ;;  %v7810_v2 = vsel %vm1004_vm2, %v7488_v47, 0.0 }
 0x591   : >> { %v17492_v37 = vsel %vm8149_vm1, %v8148_v17, %v8143_v56  ;;  %v7572_v55 = vpop.xlane.xlu1 %7571  ;;  %v7569_v16 = vpop.xlane.xlu0 %7568  ;;  %v18887_v56 = vld [vmem:[#allocation17_spill] sm:$0xff]  ;;  %v7861_v47 = vsel %vm1004_vm2, %v7505_v58, 0.0 }
 0x592   : >> { %v8158_v27 = vrot.slane %v7572_v55, %v17369_v22  ;;  %v8154_v46 = vrot.slane %v7569_v16, %v17363_v59  ;;  %v7503_v40 = vmul.f32 %v17121_v54, %v18887_v56 }
 0x594   : >> { %v8159_v31 = vsel %vm8051_vm3, %v8158_v27, %v8154_v46  ;;  %7787 = vadd.xlane.f32.xlu1 %v7786_v14  ;;  %7784 = vadd.xlane.f32.xlu0 %v7783_v10  ;;  %v7489_v10 = vmul.f32 %v17121_v54, %v16579_v26 }
 0x595   : >> { %v7578_v18 = vpop.xlane.xlu1 %7577  ;;  %v7575_v7 = vpop.xlane.xlu0 %7574 }
 0x596   : >> { %v8168_v42 = vrot.slane %v7578_v18, %v17366_v11  ;;  %v8163_v43 = vrot.slane %v7575_v7, %v17356_v32  ;;  %v7813_v26 = vsel %vm1004_vm2, %v7489_v10, 0.0 }
 0x598   : >> { %v8164_v33 = vsel %vm8058_vm4, %v8163_v43, %v8159_v31  ;;  %7793 = vadd.xlane.f32.xlu1 %v7792_v12  ;;  %7790 = vadd.xlane.f32.xlu0 %v7789_v38  ;;  %v7855_v31 = vsel %vm1004_vm2, %v7503_v40, 0.0  ;;  %v7858_v43 = vsel %vm1004_vm2, %v7504_v19, 0.0 }
 0x599   : >> { %v7584_v48 = vpop.xlane.xlu1 %7583  ;;  %v8169_v44 = vsel %vm8065_vm5, %v8168_v42, %v8164_v33  ;;  %v7581_v17 = vpop.xlane.xlu0 %7580  ;;  %v7490_v33 = vmul.f32 %v17121_v54, %v16587_v29 }
 0x59a   : >> { %v8178_v55 = vrot.slane %v7584_v48, %v17379_v8  ;;  %v8173_v16 = vrot.slane %v7581_v17, %v17382_v3  ;;  %v7491_v17 = vmul.f32 %v17121_v54, %v16591_v36 }
 0x59b   : >> { %v7816_v29 = vsel %vm1004_vm2, %v7490_v33, 0.0 }
 0x59c   : >> { %v8174_v14 = vsel %vm8072_vm6, %v8173_v16, %v8169_v44  ;;  %7808 = vadd.xlane.f32.xlu1 %v7807_v25  ;;  %7796 = vadd.xlane.f32.xlu0 %v7795_v51  ;;  %v7819_v36 = vsel %vm1004_vm2, %v7491_v17, 0.0  ;;  %v7509_v17 = vmul.f32 %v17121_v54, %v16690_v53  ;;  %v7510_v53 = vmul.f32 %v17121_v54, %v16694_v35 }
 0x59d   : >> { %v7590_v9 = vpop.xlane.xlu1 %7589  ;;  %v8179_v27 = vsel %vm8079_vm7, %v8178_v55, %v8174_v14  ;;  %v7587_v46 = vpop.xlane.xlu0 %7586  ;;  %v7511_v35 = vmul.f32 %v17121_v54, %v16696_v62  ;;  %v7512_v62 = vmul.f32 %v17121_v54, %v16699_v5  ;;  %v17619_v5 = vld [vmem:[%s17950_s6] ss:$0 sm:$0xff] }
 0x59e   : >> { %v8188_v18 = vrot.slane %v7590_v9, %v17398_v4  ;;  %v8183_v7 = vrot.slane %v7587_v46, %v17406_v20  ;;  %v7864_v46 = vsel %vm1004_vm2, %v7506_v57, 0.0  ;;  %v7873_v21 = vsel %vm1004_vm2, %v7509_v17, 0.0 }
 0x5a0   : >> { %v8184_v12 = vsel %vm8086_vm8, %v8183_v7, %v8179_v27  ;;  %7856 = vadd.xlane.f32.xlu1 %v7855_v31  ;;  %7811 = vadd.xlane.f32.xlu0 %v7810_v2  ;;  %v7492_v31 = vmul.f32 %v17121_v54, %v16594_v0  ;;  %v7493_v7 = vmul.f32 %v17121_v54, %v16598_v30 }
 0x5a1   : >> { %v7596_v38 = vpop.xlane.xlu1 %7595  ;;  %v8189_v63 = vsel %vm8093_vm9, %v8188_v18, %v8184_v12  ;;  %v7593_v42 = vpop.xlane.xlu0 %7592 }
 0x5a2   : >> { %v8198_v25 = vrot.slane %v7596_v38, %v17415_v34  ;;  %v8193_v48 = vrot.slane %v7593_v42, %v17423_v61  ;;  %v7822_v0 = vsel %vm1004_vm2, %v7492_v31, 0.0  ;;  %v7825_v30 = vsel %vm1004_vm2, %v7493_v7, 0.0 }
 0x5a4   : >> { %v8194_v44 = vsel %vm8100_vm10, %v8193_v48, %v8189_v63  ;;  %7814 = vadd.xlane.f32.xlu1 %v7813_v26  ;;  %7859 = vadd.xlane.f32.xlu0 %v7858_v43  ;;  %v7867_v63 = vsel %vm1004_vm2, %v7507_v28, 0.0  ;;  %v7876_v28 = vsel %vm1004_vm2, %v7510_v53, 0.0 }
 0x5a5   : >> { %v7602_v51 = vpop.xlane.xlu1 %7601  ;;  %v8199_v56 = vsel %vm8107_vm11, %v8198_v25, %v8194_v44  ;;  %v7599_v40 = vpop.xlane.xlu0 %7598  ;;  %v7870_v44 = vsel %vm1004_vm2, %v7508_v1, 0.0 }
 0x5a6   : >> { %v8208_v55 = vrot.slane %v7602_v51, %v17435_v13  ;;  %v8203_v16 = vrot.slane %v7599_v40, %v17441_v23 }
 0x5a8   : >> { %v8204_v14 = vsel %vm8114_vm12, %v8203_v16, %v8199_v56  ;;  %7817 = vadd.xlane.f32.xlu1 %v7816_v29  ;;  %7862 = vadd.xlane.f32.xlu0 %v7861_v47  ;;  %v18888_v29 = vld [vmem:[#allocation43_spill] sm:$0xff]  ;;  %v7828_v16 = vsel %vm1004_vm2, %v7494_v45, 0.0 }
 0x5a9   : >> { %v7608_v10 = vpop.xlane.xlu1 %7607  ;;  %v8209_v9 = vsel %vm8121_vm13, %v8208_v55, %v8204_v14  ;;  %v7605_v27 = vpop.xlane.xlu0 %7604  ;;  %v7495_v47 = vmul.f32 %v17121_v54, %v18888_v29  ;;  %v7513_v29 = vmul.f32 %v17619_v5, %v16708_v6  ;;  %v7514_v6 = vmul.f32 %v17619_v5, %v16714_v39 }
 0x5aa   : >> { %v8218_v2 = vrot.slane %v7608_v10, %v17451_v15  ;;  %v8213_v19 = vrot.slane %v7605_v27, %v17459_v41  ;;  %v7515_v39 = vmul.f32 %v17619_v5, %v16716_v24  ;;  %v18894_v24 = vld [vmem:[#allocation14_spill] sm:$0xff] }
 0x5ac   : >> { %v8214_v18 = vsel %vm8128_vm14, %v8213_v19, %v8209_v9  ;;  %7820 = vadd.xlane.f32.xlu1 %v7819_v36  ;;  %7865 = vadd.xlane.f32.xlu0 %v7864_v46  ;;  %v7831_v9 = vsel %vm1004_vm2, %v7495_v47, 0.0 }
 0x5ad   : >> { %v7614_v12 = vpop.xlane.xlu1 %7613  ;;  %v8219_v26 = vsel %vm8135_vm15, %v8218_v2, %v8214_v18  ;;  %v7611_v38 = vpop.xlane.xlu0 %7610  ;;  %v18889_v2 = vld [vmem:[#allocation147_spill] sm:$0xff] }
 0x5ae   : >> { %v8228_v42 = vrot.slane %v7614_v12, %v17473_v49  ;;  %v8223_v43 = vrot.slane %v7611_v38, %v17476_v60  ;;  %v7496_v19 = vmul.f32 %v17121_v54, %v18889_v2 }
 0x5b0   : >> { %v8224_v33 = vsel %vm8142_vm0, %v8223_v43, %v8219_v26  ;;  %7823 = vadd.xlane.f32.xlu1 %v7822_v0  ;;  %7868 = vadd.xlane.f32.xlu0 %v7867_v63  ;;  %v18890_v26 = vld [vmem:[#allocation44_spill] sm:$0xff]  ;;  %v7879_v43 = vsel %vm1004_vm2, %v7511_v35, 0.0  ;;  %v7888_v35 = vsel %vm1004_vm2, %v7514_v6, 0.0  ;;  %v18898_v6 = vld [vmem:[#allocation18_spill] sm:$0xff] }
 0x5b1   : >> { %v17572_v58 = vsel %vm8149_vm1, %v8228_v42, %v8224_v33  ;;  %v7620_v25 = vpop.xlane.xlu1 %7619  ;;  %v7617_v48 = vpop.xlane.xlu0 %7616  ;;  %v7497_v38 = vmul.f32 %v17121_v54, %v18890_v26  ;;  %v7834_v42 = vsel %vm1004_vm2, %v7496_v19, 0.0 }
 0x5b2   : >> { %v8237_v51 = vrot.slane %v7620_v25, %v17369_v22  ;;  %v8233_v56 = vrot.slane %v7617_v48, %v17363_v59 }
 0x5b3   : >> { %v7837_v48 = vsel %vm1004_vm2, %v7497_v38, 0.0 }
 0x5b4   : >> { %v8238_v40 = vsel %vm8051_vm3, %v8237_v51, %v8233_v56  ;;  %7826 = vadd.xlane.f32.xlu1 %v7825_v30  ;;  %7871 = vadd.xlane.f32.xlu0 %v7870_v44  ;;  %v7882_v51 = vsel %vm1004_vm2, %v7512_v62, 0.0  ;;  %v18891_v56 = vld [vmem:[#allocation145_spill] sm:$0xff]  ;;  %v7891_v62 = vsel %vm1004_vm2, %v7515_v39, 0.0 }
 0x5b5   : >> { %v7626_v57 = vpop.xlane.xlu1 %7625  ;;  %v7623_v55 = vpop.xlane.xlu0 %7622 }
 0x5b6   : >> { %v8247_v14 = vrot.slane %v7626_v57, %v17366_v11  ;;  %v8242_v36 = vrot.slane %v7623_v55, %v17356_v32 }
 0x5b8   : >> { %v8243_v10 = vsel %vm8058_vm4, %v8242_v36, %v8238_v40  ;;  %7829 = vadd.xlane.f32.xlu1 %v7828_v16  ;;  %7874 = vadd.xlane.f32.xlu0 %v7873_v21  ;;  %v7498_v40 = vmul.f32 %v17121_v54, %v18891_v56  ;;  %v18892_v16 = vld [vmem:[#allocation45_spill] sm:$0xff]  ;;  %v18895_v56 = vld [vmem:[#allocation15_spill] sm:$0xff] }
 0x5b9   : >> { %v7632_v27 = vpop.xlane.xlu1 %7631  ;;  %v8248_v46 = vsel %vm8065_vm5, %v8247_v14, %v8243_v10  ;;  %v7629_v31 = vpop.xlane.xlu0 %7628  ;;  %v7499_v21 = vmul.f32 %v17619_v5, %v18892_v16  ;;  %v7885_v10 = vsel %vm1004_vm2, %v7513_v29, 0.0  ;;  %v18896_v29 = vld [vmem:[#allocation42_spill] sm:$0xff] }
 0x5ba   : >> { %v8257_v18 = vrot.slane %v7632_v27, %v17379_v8  ;;  %v8252_v7 = vrot.slane %v7629_v31, %v17382_v3  ;;  %v7840_v36 = vsel %vm1004_vm2, %v7498_v40, 0.0  ;;  %v7501_v40 = vmul.f32 %v17619_v5, %v18895_v56 }
 0x5bb   : >> { %v7843_v31 = vsel %vm1004_vm2, %v7499_v21, 0.0  ;;  %v18897_v21 = vld [vmem:[#allocation141_spill] sm:$0xff] }
 0x5bc   : >> { %v8253_v12 = vsel %vm8072_vm6, %v8252_v7, %v8248_v46  ;;  %7832 = vadd.xlane.f32.xlu1 %v7831_v9  ;;  %7877 = vadd.xlane.f32.xlu0 %v7876_v28 }
 0x5bd   : >> { %v7638_v0 = vpop.xlane.xlu1 %7637  ;;  %v8258_v63 = vsel %vm8079_vm7, %v8257_v18, %v8253_v12  ;;  %v7635_v1 = vpop.xlane.xlu0 %7634  ;;  %v18893_v18 = vld [vmem:[#allocation143_spill] sm:$0xff] }
 0x5be   : >> { %v8267_v33 = vrot.slane %v7638_v0, %v17398_v4  ;;  %v8262_v30 = vrot.slane %v7635_v1, %v17406_v20  ;;  %v7484_v7 = vmul.f32 %v17619_v5, %v18893_v18  ;;  %v7516_v0 = vmul.f32 %v17619_v5, %v16718_v52 }
 0x5c0   : >> { %v8263_v25 = vsel %vm8086_vm8, %v8262_v30, %v8258_v63  ;;  %7835 = vadd.xlane.f32.xlu1 %v7834_v42  ;;  %7880 = vadd.xlane.f32.xlu0 %v7879_v43  ;;  %v7798_v43 = vsel %vm1004_vm2, %v7484_v7, 0.0  ;;  %v7894_v52 = vsel %vm1004_vm2, %v7516_v0, 0.0  ;;  %v18899_v7 = vld [vmem:[#allocation19_spill] sm:$0xff] }
 0x5c1   : >> { %v7644_v44 = vpop.xlane.xlu1 %7643  ;;  %v8268_v45 = vsel %vm8093_vm9, %v8267_v33, %v8263_v25  ;;  %v7641_v17 = vpop.xlane.xlu0 %7640  ;;  %v7500_v33 = vmul.f32 %v17619_v5, %v18894_v24  ;;  %v7518_v39 = vmul.f32 %v17619_v5, %v18899_v7  ;;  %v8720_v7 = vld [vmem:[#allocation3] sm:$0x1] }
 0x5c2   : >> { %v8277_v47 = vrot.slane %v7644_v44, %v17415_v34  ;;  %v8272_v57 = vrot.slane %v7641_v17, %v17423_v61 }
 0x5c4   : >> { %v8273_v55 = vsel %vm8100_vm10, %v8272_v57, %v8268_v45  ;;  %7838 = vadd.xlane.f32.xlu1 %v7837_v48  ;;  %7883 = vadd.xlane.f32.xlu0 %v7882_v51  ;;  %v7846_v51 = vsel %vm1004_vm2, %v7500_v33, 0.0 }
 0x5c5   : >> { %v7650_v54 = vpop.xlane.xlu1 %7649  ;;  %v8278_v53 = vsel %vm8107_vm11, %v8277_v47, %v8273_v55  ;;  %v7647_v14 = vpop.xlane.xlu0 %7646  ;;  %v7485_v47 = vmul.f32 %v17619_v5, %v18896_v29 }
 0x5c6   : >> { %v8287_v9 = vrot.slane %v7650_v54, %v17435_v13  ;;  %v8282_v27 = vrot.slane %v7647_v14, %v17441_v23  ;;  %v7486_v54 = vmul.f32 %v17619_v5, %v18897_v21 }
 0x5c8   : >> { %v8283_v46 = vsel %vm8114_vm12, %v8282_v27, %v8278_v53  ;;  %7841 = vadd.xlane.f32.xlu1 %v7840_v36  ;;  %7886 = vadd.xlane.f32.xlu0 %v7885_v10  ;;  %v7849_v36 = vsel %vm1004_vm2, %v7501_v40, 0.0  ;;  %v7801_v10 = vsel %vm1004_vm2, %v7485_v47, 0.0 }
 0x5c9   : >> { %v7656_v28 = vpop.xlane.xlu1 %7655  ;;  %v8288_v2 = vsel %vm8121_vm13, %v8287_v9, %v8283_v46  ;;  %v7653_v19 = vpop.xlane.xlu0 %7652  ;;  %v7517_v9 = vmul.f32 %v17619_v5, %v18898_v6 }
 0x5ca   : >> { %v8297_v12 = vrot.slane %v7656_v28, %v17451_v15  ;;  %v8292_v26 = vrot.slane %v7653_v19, %v17459_v41  ;;  %v7804_v28 = vsel %vm1004_vm2, %v7486_v54, 0.0 }
 0x5cb   : >> { %v7897_v18 = vsel %vm1004_vm2, %v7517_v9, 0.0 }
 0x5cc   : >> { %v8293_v38 = vsel %vm8128_vm14, %v8292_v26, %v8288_v2  ;;  %7844 = vadd.xlane.f32.xlu1 %v7843_v31  ;;  %7889 = vadd.xlane.f32.xlu0 %v7888_v35 }
 0x5cd   : >> { %v7662_v63 = vpop.xlane.xlu1 %7661  ;;  %v8298_v1 = vsel %vm8135_vm15, %v8297_v12, %v8293_v38  ;;  %v7659_v42 = vpop.xlane.xlu0 %7658  ;;  %v18900_v12 = vld [vmem:[#allocation16_spill] sm:$0xff] }
 0x5ce   : >> { %v8307_v30 = vrot.slane %v7662_v63, %v17473_v49  ;;  %v8302_v25 = vrot.slane %v7659_v42, %v17476_v60  ;;  %v7502_v26 = vmul.f32 %v17619_v5, %v18900_v12 }
 0x5d0   : >> { %v8303_v48 = vsel %vm8142_vm0, %v8302_v25, %v8298_v1  ;;  %7799 = vadd.xlane.f32.xlu1 %v7798_v43  ;;  %7892 = vadd.xlane.f32.xlu0 %v7891_v62  ;;  %v7900_v62 = vsel %vm1004_vm2, %v7518_v39, 0.0  ;;  %v7852_v24 = vsel %vm1004_vm2, %v7502_v26, 0.0 }
 0x5d1   : >> { %v17658_v44 = vsel %vm8149_vm1, %v8307_v30, %v8303_v48  ;;  %v7668_v45 = vpop.xlane.xlu1 %7667  ;;  %v7665_v17 = vpop.xlane.xlu0 %7664 }
 0x5d2   : >> { %v8316_v57 = vrot.slane %v7668_v45, %v17369_v22  ;;  %v8312_v55 = vrot.slane %v7665_v17, %v17363_v59 }
 0x5d4   : >> { %v8317_v16 = vsel %vm8051_vm3, %v8316_v57, %v8312_v55  ;;  %7895 = vadd.xlane.f32.xlu1 %v7894_v52  ;;  %7847 = vadd.xlane.f32.xlu0 %v7846_v51 }
 0x5d5   : >> { %v7674_v53 = vpop.xlane.xlu1 %7673  ;;  %v7671_v14 = vpop.xlane.xlu0 %7670 }
 0x5d6   : >> { %v8326_v27 = vrot.slane %v7674_v53, %v17366_v11  ;;  %v8321_v46 = vrot.slane %v7671_v14, %v17356_v32 }
 0x5d8   : >> { %v8322_v31 = vsel %vm8058_vm4, %v8321_v46, %v8317_v16  ;;  %7850 = vadd.xlane.f32.xlu1 %v7849_v36  ;;  %7802 = vadd.xlane.f32.xlu0 %v7801_v10 }
 0x5d9   : >> { %v7680_v2 = vpop.xlane.xlu1 %7679  ;;  %v8327_v19 = vsel %vm8065_vm5, %v8326_v27, %v8322_v31  ;;  %v7677_v35 = vpop.xlane.xlu0 %7676 }
 0x5da   : >> { %v8336_v38 = vrot.slane %v7680_v2, %v17379_v8  ;;  %v8331_v0 = vrot.slane %v7677_v35, %v17382_v3 }
 0x5dc   : >> { %v8332_v63 = vsel %vm8072_vm6, %v8331_v0, %v8327_v19  ;;  %7805 = vadd.xlane.f32.xlu1 %v7804_v28  ;;  %7898 = vadd.xlane.f32.xlu0 %v7897_v18 }
 0x5dd   : >> { %v7686_v1 = vpop.xlane.xlu1 %7685  ;;  %v8337_v42 = vsel %vm8079_vm7, %v8336_v38, %v8332_v63  ;;  %v7683_v43 = vpop.xlane.xlu0 %7682 }
 0x5de   : >> { %v8346_v33 = vrot.slane %v7686_v1, %v17398_v4  ;;  %v8341_v5 = vrot.slane %v7683_v43, %v17406_v20 }
 0x5e0   : >> { %v8342_v30 = vsel %vm8086_vm8, %v8341_v5, %v8337_v42  ;;  %7901 = vadd.xlane.f32.xlu1 %v7900_v62  ;;  %7853 = vadd.xlane.f32.xlu0 %v7852_v24 }
 0x5e1   : >> { %v7692_v25 = vpop.xlane.xlu1 %7691  ;;  %v8347_v48 = vsel %vm8093_vm9, %v8346_v33, %v8342_v30  ;;  %v7689_v52 = vpop.xlane.xlu0 %7688 }
 0x5e2   : >> { %v8356_v45 = vrot.slane %v7692_v25, %v17415_v34  ;;  %v8351_v17 = vrot.slane %v7689_v52, %v17423_v61 }
 0x5e4   : >> { %v8352_v51 = vsel %vm8100_vm10, %v8351_v17, %v8347_v48 }
 0x5e5   : >> { %v7698_v56 = vpop.xlane.xlu1 %7697  ;;  %v8357_v40 = vsel %vm8107_vm11, %v8356_v45, %v8352_v51  ;;  %v7695_v29 = vpop.xlane.xlu0 %7694 }
 0x5e6   : >> { %v8366_v47 = vrot.slane %v7698_v56, %v17435_v13  ;;  %v8361_v57 = vrot.slane %v7695_v29, %v17441_v23 }
 0x5e8   : >> { %v8362_v55 = vsel %vm8114_vm12, %v8361_v57, %v8357_v40 }
 0x5e9   : >> { %v7704_v16 = vpop.xlane.xlu1 %7703  ;;  %v8367_v21 = vsel %vm8121_vm13, %v8366_v47, %v8362_v55  ;;  %v7701_v54 = vpop.xlane.xlu0 %7700 }
 0x5ea   : >> { %v8376_v53 = vrot.slane %v7704_v16, %v17451_v15  ;;  %v8371_v14 = vrot.slane %v7701_v54, %v17459_v41 }
 0x5ec   : >> { %v8372_v36 = vsel %vm8128_vm14, %v8371_v14, %v8367_v21 }
 0x5ed   : >> { %v7710_v10 = vpop.xlane.xlu1 %7709  ;;  %v8377_v6 = vsel %vm8135_vm15, %v8376_v53, %v8372_v36  ;;  %v7707_v9 = vpop.xlane.xlu0 %7706 }
 0x5ee   : >> { %v8386_v27 = vrot.slane %v7710_v10, %v17473_v49  ;;  %v8381_v46 = vrot.slane %v7707_v9, %v17476_v60 }
 0x5f0   : >> { %v8382_v31 = vsel %vm8142_vm0, %v8381_v46, %v8377_v6 }
 0x5f1   : >> { %v17710_v28 = vsel %vm8149_vm1, %v8386_v27, %v8382_v31  ;;  %v7716_v2 = vpop.xlane.xlu1 %7715  ;;  %v7713_v19 = vpop.xlane.xlu0 %7712 }
 0x5f2   : >> { %v8395_v35 = vrot.slane %v7716_v2, %v17369_v22  ;;  %v8391_v18 = vrot.slane %v7713_v19, %v17363_v59 }
 0x5f4   : >> { %v8396_v39 = vsel %vm8051_vm3, %v8395_v35, %v8391_v18 }
 0x5f5   : >> { %v7722_v12 = vpop.xlane.xlu1 %7721  ;;  %v7719_v26 = vpop.xlane.xlu0 %7718 }
 0x5f6   : >> { %v8405_v38 = vrot.slane %v7722_v12, %v17366_v11  ;;  %v8400_v0 = vrot.slane %v7719_v26, %v17356_v32  ;;  %8723 = vperm.xlu0 %11773, %v8720_v7  }
 0x5f8   : >> { %v8401_v63 = vsel %vm8058_vm4, %v8400_v0, %v8396_v39 }
 0x5f9   : >> { %v7728_v1 = vpop.xlane.xlu1 %7727  ;;  %v8406_v42 = vsel %vm8065_vm5, %v8405_v38, %v8401_v63  ;;  %v7725_v43 = vpop.xlane.xlu0 %7724 }
 0x5fa   : >> { %v8415_v62 = vrot.slane %v7728_v1, %v17379_v8  ;;  %v8410_v24 = vrot.slane %v7725_v43, %v17382_v3 }
 0x5fc   : >> { %v8411_v33 = vsel %vm8072_vm6, %v8410_v24, %v8406_v42 }
 0x5fd   : >> { %v7734_v5 = vpop.xlane.xlu1 %7733  ;;  %v8416_v30 = vsel %vm8079_vm7, %v8415_v62, %v8411_v33  ;;  %v7731_v25 = vpop.xlane.xlu0 %7730 }
 0x5fe   : >> { %v8425_v48 = vrot.slane %v7734_v5, %v17398_v4  ;;  %v8420_v52 = vrot.slane %v7731_v25, %v17406_v20 }
 0x600   : >> { %v8421_v45 = vsel %vm8086_vm8, %v8420_v52, %v8416_v30 }
 0x601   : >> { %v7740_v17 = vpop.xlane.xlu1 %7739  ;;  %v8426_v51 = vsel %vm8093_vm9, %v8425_v48, %v8421_v45  ;;  %v7737_v56 = vpop.xlane.xlu0 %7736 }
 0x602   : >> { %v8435_v40 = vrot.slane %v7740_v17, %v17415_v34  ;;  %v8430_v29 = vrot.slane %v7737_v56, %v17423_v61 }
 0x604   : >> { %v8431_v47 = vsel %vm8100_vm10, %v8430_v29, %v8426_v51 }
 0x605   : >> { %v7746_v57 = vpop.xlane.xlu1 %7745  ;;  %v8436_v55 = vsel %vm8107_vm11, %v8435_v40, %v8431_v47  ;;  %v7743_v16 = vpop.xlane.xlu0 %7742 }
 0x606   : >> { %v8445_v21 = vrot.slane %v7746_v57, %v17435_v13  ;;  %v8440_v54 = vrot.slane %v7743_v16, %v17441_v23 }
 0x608   : >> { %v8441_v53 = vsel %vm8114_vm12, %v8440_v54, %v8436_v55 }
 0x609   : >> { %v7752_v14 = vpop.xlane.xlu1 %7751  ;;  %v8446_v36 = vsel %vm8121_vm13, %v8445_v21, %v8441_v53  ;;  %v7749_v10 = vpop.xlane.xlu0 %7748 }
 0x60a   : >> { %v8455_v6 = vrot.slane %v7752_v14, %v17451_v15  ;;  %v8450_v9 = vrot.slane %v7749_v10, %v17459_v41 }
 0x60c   : >> { %v8451_v27 = vsel %vm8128_vm14, %v8450_v9, %v8446_v36 }
 0x60d   : >> { %v7758_v46 = vpop.xlane.xlu1 %7757  ;;  %v8456_v31 = vsel %vm8135_vm15, %v8455_v6, %v8451_v27  ;;  %v7755_v2 = vpop.xlane.xlu0 %7754 }
 0x60e   : >> { %v8465_v19 = vrot.slane %v7758_v46, %v17473_v49  ;;  %v8460_v35 = vrot.slane %v7755_v2, %v17476_v60 }
 0x610   : >> { %v8461_v18 = vsel %vm8142_vm0, %v8460_v35, %v8456_v31 }
 0x611   : >> { %v17743_v7 = vsel %vm8149_vm1, %v8465_v19, %v8461_v18  ;;  %v7764_v39 = vpop.xlane.xlu1 %7763  ;;  %v7761_v12 = vpop.xlane.xlu0 %7760 }
 0x612   : >> { %v8474_v26 = vrot.slane %v7764_v39, %v17369_v22  ;;  %v8470_v38 = vrot.slane %v7761_v12, %v17363_v59 }
 0x614   : >> { %v8475_v0 = vsel %vm8051_vm3, %v8474_v26, %v8470_v38 }
 0x615   : >> { %v7770_v63 = vpop.xlane.xlu1 %7769  ;;  %v7767_v1 = vpop.xlane.xlu0 %7766 }
 0x616   : >> { %v8484_v42 = vrot.slane %v7770_v63, %v17366_v11  ;;  %v8479_v43 = vrot.slane %v7767_v1, %v17356_v32 }
 0x618   : >> { %v8480_v62 = vsel %vm8058_vm4, %v8479_v43, %v8475_v0 }
 0x619   : >> { %v7776_v24 = vpop.xlane.xlu1 %7775  ;;  %v8485_v33 = vsel %vm8065_vm5, %v8484_v42, %v8480_v62  ;;  %v7773_v5 = vpop.xlane.xlu0 %7772 }
 0x61a   : >> { %v8494_v30 = vrot.slane %v7776_v24, %v17379_v8  ;;  %v8489_v25 = vrot.slane %v7773_v5, %v17382_v3 }
 0x61c   : >> { %v8490_v48 = vsel %vm8072_vm6, %v8489_v25, %v8485_v33 }
 0x61d   : >> { %v7782_v52 = vpop.xlane.xlu1 %7781  ;;  %v8495_v45 = vsel %vm8079_vm7, %v8494_v30, %v8490_v48  ;;  %v7779_v17 = vpop.xlane.xlu0 %7778 }
 0x61e   : >> { %v8504_v51 = vrot.slane %v7782_v52, %v17398_v4  ;;  %v8499_v56 = vrot.slane %v7779_v17, %v17406_v20 }
 0x620   : >> { %v8500_v40 = vsel %vm8086_vm8, %v8499_v56, %v8495_v45 }
 0x621   : >> { %v7788_v29 = vpop.xlane.xlu1 %7787  ;;  %v8505_v47 = vsel %vm8093_vm9, %v8504_v51, %v8500_v40  ;;  %v7785_v57 = vpop.xlane.xlu0 %7784 }
 0x622   : >> { %v8514_v55 = vrot.slane %v7788_v29, %v17415_v34  ;;  %v8509_v16 = vrot.slane %v7785_v57, %v17423_v61 }
 0x624   : >> { %v8510_v21 = vsel %vm8100_vm10, %v8509_v16, %v8505_v47 }
 0x625   : >> { %v7794_v54 = vpop.xlane.xlu1 %7793  ;;  %v8515_v53 = vsel %vm8107_vm11, %v8514_v55, %v8510_v21  ;;  %v7791_v14 = vpop.xlane.xlu0 %7790 }
 0x626   : >> { %v8524_v36 = vrot.slane %v7794_v54, %v17435_v13  ;;  %v8519_v10 = vrot.slane %v7791_v14, %v17441_v23 }
 0x628   : >> { %v8520_v6 = vsel %vm8114_vm12, %v8519_v10, %v8515_v53 }
 0x629   : >> { %v7809_v9 = vpop.xlane.xlu1 %7808  ;;  %v8525_v27 = vsel %vm8121_vm13, %v8524_v36, %v8520_v6  ;;  %v7797_v46 = vpop.xlane.xlu0 %7796 }
 0x62a   : >> { %v8529_v31 = vrot.slane %v7797_v46, %v17459_v41  ;;  %v8549_v47 = vrot.slane %v7809_v9, %v17363_v59 }
 0x62c   : >> { %v17770_v2 = vsel %vm8128_vm14, %v8529_v31, %v8525_v27 }
 0x62d   : >> { %v7857_v19 = vpop.xlane.xlu1 %7856  ;;  %v7812_v35 = vpop.xlane.xlu0 %7811 }
 0x62e   : >> { %v8553_v57 = vrot.slane %v7812_v35, %v17369_v22  ;;  %v8628_v55 = vrot.slane %v7857_v19, %v17363_v59 }
 0x630   : >> { %v8554_v9 = vsel %vm8051_vm3, %v8553_v57, %v8549_v47 }
 0x631   : >> { %v7815_v18 = vpop.xlane.xlu1 %7814  ;;  %v7860_v39 = vpop.xlane.xlu0 %7859 }
 0x632   : >> { %v8558_v16 = vrot.slane %v7815_v18, %v17356_v32  ;;  %v8632_v21 = vrot.slane %v7860_v39, %v17369_v22 }
 0x634   : >> { %v8559_v22 = vsel %vm8058_vm4, %v8558_v16, %v8554_v9  ;;  %v8633_v46 = vsel %vm8051_vm3, %v8632_v21, %v8628_v55 }
 0x635   : >> { %v7818_v12 = vpop.xlane.xlu1 %7817  ;;  %v7863_v26 = vpop.xlane.xlu0 %7862 }
 0x636   : >> { %v8563_v14 = vrot.slane %v7818_v12, %v17366_v11  ;;  %v8637_v36 = vrot.slane %v7863_v26, %v17356_v32 }
 0x638   : >> { %v8564_v18 = vsel %vm8065_vm5, %v8563_v14, %v8559_v22 }
 0x639   : >> { %v7821_v38 = vpop.xlane.xlu1 %7820  ;;  %v7866_v0 = vpop.xlane.xlu0 %7865 }
 0x63a   : >> { %v8568_v10 = vrot.slane %v7821_v38, %v17382_v3  ;;  %v8642_v6 = vrot.slane %v7866_v0, %v17366_v11  ;;  %v8638_v11 = vsel %vm8058_vm4, %v8637_v36, %v8633_v46 }
 0x63c   : >> { %v8643_v26 = vsel %vm8065_vm5, %v8642_v6, %v8638_v11 }
 0x63d   : >> { %v7824_v63 = vpop.xlane.xlu1 %7823  ;;  %v7869_v1 = vpop.xlane.xlu0 %7868 }
 0x63e   : >> { %v8573_v59 = vrot.slane %v7824_v63, %v17379_v8  ;;  %v8647_v27 = vrot.slane %v7869_v1, %v17382_v3  ;;  %v8569_v3 = vsel %vm8072_vm6, %v8568_v10, %v8564_v18 }
 0x640   : >> { %v8648_v63 = vsel %vm8072_vm6, %v8647_v27, %v8643_v26  ;;  %v7905_v27 = vld [vmem:[%s7903_s28 + $0x2] sm:$0x1]  ;;  %v7910_v26 = vld [vmem:[%s7903_s28 + $0xc] sm:$0x1] }
 0x641   : >> { %v7827_v42 = vpop.xlane.xlu1 %7826  ;;  %v7872_v43 = vpop.xlane.xlu0 %7871 }
 0x642   : >> { %v8578_v31 = vrot.slane %v7827_v42, %v17406_v20  ;;  %v8652_v19 = vrot.slane %v7872_v43, %v17379_v8  ;;  %v8574_v8 = vsel %vm8079_vm7, %v8573_v59, %v8569_v3 }
 0x644   : >> { %v8579_v43 = vsel %vm8086_vm8, %v8578_v31, %v8574_v8  ;;  %v8728_v31 = vsub.s32 0, %v17346_v50  ;;  %v8713_v8 = vmul.f32 %v17572_v58, %v7905_v27 }
 0x645   : >> { %v7830_v62 = vpop.xlane.xlu1 %7829  ;;  %v7875_v24 = vpop.xlane.xlu0 %7874 }
 0x646   : >> { %v8583_v39 = vrot.slane %v7830_v62, %v17398_v4  ;;  %v8657_v12 = vrot.slane %v7875_v24, %v17406_v20  ;;  %v8653_v20 = vsel %vm8079_vm7, %v8652_v19, %v8648_v63  ;;  %v7906_v19 = vld [vmem:[%s7903_s28 + $0x4] sm:$0x1] }
 0x647   : >> { %v8714_v63 = vmul.f32 %v17658_v44, %v7906_v19 }
 0x649   : >> { %v7833_v33 = vpop.xlane.xlu1 %7832  ;;  %v7878_v5 = vpop.xlane.xlu0 %7877 }
 0x64a   : >> { %v8588_v38 = vrot.slane %v7833_v33, %v17423_v61  ;;  %v8662_v0 = vrot.slane %v7878_v5, %v17398_v4  ;;  %v8584_v4 = vsel %vm8093_vm9, %v8583_v39, %v8579_v43  ;;  %v8658_v5 = vsel %vm8086_vm8, %v8657_v12, %v8653_v20  ;;  %v7909_v39 = vld [vmem:[%s7903_s28 + $0xa] sm:$0x1]  ;;  %v7911_v12 = vld [vmem:[%s7903_s28 + $0xe] sm:$0x1] }
 0x64d   : >> { %v7836_v30 = vpop.xlane.xlu1 %7835  ;;  %v7881_v25 = vpop.xlane.xlu0 %7880 }
 0x64e   : >> { %v8593_v1 = vrot.slane %v7836_v30, %v17415_v34  ;;  %v8667_v42 = vrot.slane %v7881_v25, %v17423_v61  ;;  %v8589_v30 = vsel %vm8100_vm10, %v8588_v38, %v8584_v4  ;;  %v8663_v61 = vsel %vm8093_vm9, %v8662_v0, %v8658_v5 }
 0x651   : >> { %v7839_v48 = vpop.xlane.xlu1 %7838  ;;  %v7884_v52 = vpop.xlane.xlu0 %7883 }
 0x652   : >> { %v8598_v62 = vrot.slane %v7839_v48, %v17441_v23  ;;  %v8672_v24 = vrot.slane %v7884_v52, %v17415_v34  ;;  %v8594_v48 = vsel %vm8107_vm11, %v8593_v1, %v8589_v30  ;;  %v8668_v34 = vsel %vm8100_vm10, %v8667_v42, %v8663_v61 }
 0x654   : >> { %v8599_v55 = vsel %vm8114_vm12, %v8598_v62, %v8594_v48 }
 0x655   : >> { %v7842_v45 = vpop.xlane.xlu1 %7841  ;;  %v17772_v17 = vpop.xlane.xlu0 %7886 }
 0x656   : >> { %v8603_v57 = vrot.slane %v7842_v45, %v17435_v13  ;;  %v8677_v25 = vrot.slane %v17772_v17, %v17441_v23  ;;  %v8673_v45 = vsel %vm8107_vm11, %v8672_v24, %v8668_v34 }
 0x658   : >> { %v8604_v23 = vsel %vm8121_vm13, %v8603_v57, %v8599_v55  ;;  %v8678_v10 = vsel %vm8114_vm12, %v8677_v25, %v8673_v45 }
 0x659   : >> { %v17774_v51 = vpop.xlane.xlu1 %7844  ;;  %v17776_v56 = vpop.xlane.xlu0 %7889 }
 0x65a   : >> { %v8682_v52 = vrot.slane %v17776_v56, %v17435_v13  ;;  %v8608_v16 = vrot.slane %v17774_v51, %v17459_v41 }
 0x65c   : >> { %v8683_v6 = vsel %vm8121_vm13, %v8682_v52, %v8678_v10  ;;  %v8609_v59 = vsel %vm8128_vm14, %v8608_v16, %v8604_v23 }
 0x65d   : >> { %v17778_v40 = vpop.xlane.xlu1 %7799  ;;  %v17780_v29 = vpop.xlane.xlu0 %7892 }
 0x65e   : >> { %v8687_v21 = vrot.slane %v17780_v29, %v17459_v41  ;;  %v8534_v17 = vrot.slane %v17778_v40, %v17451_v15 }
 0x660   : >> { %v8535_v22 = vsel %vm8135_vm15, %v8534_v17, %v17770_v2 }
 0x661   : >> { %v17787_v54 = vpop.xlane.xlu1 %7895  ;;  %v17789_v53 = vpop.xlane.xlu0 %7847 }
 0x662   : >> { %v8692_v13 = vrot.slane %v17787_v54, %v17451_v15  ;;  %v8613_v56 = vrot.slane %v17789_v53, %v17451_v15  ;;  %v8688_v15 = vsel %vm8128_vm14, %v8687_v21, %v8683_v6  ;;  %v7904_v53 = vld [vmem:[%s7903_s28] sm:$0x1] }
 0x663   : >> { %v8712_v38 = vmul.f32 %v17492_v37, %v7904_v53 }
 0x664   : >> { %v8693_v46 = vsel %vm8135_vm15, %v8692_v13, %v8688_v15 }
 0x665   : >> { %v7851_v35 = vpop.xlane.xlu1 %7850  ;;  %v7803_v32 = vpop.xlane.xlu0 %7802 }
 0x666   : >> { %v8618_v51 = vrot.slane %v7851_v35, %v17476_v60  ;;  %v8539_v41 = vrot.slane %v7803_v32, %v17476_v60  ;;  %v7907_v35 = vld [vmem:[%s7903_s28 + $0x6] sm:$0x1]  ;;  %v7908_v32 = vld [vmem:[%s7903_s28 + $0x8] sm:$0x1] }
 0x667   : >> { %v8715_v1 = vmul.f32 %v17710_v28, %v7907_v35  ;;  %v8716_v43 = vmul.f32 %v17743_v7, %v7908_v32 }
 0x668   : >> { %v8540_v18 = vsel %vm8142_vm0, %v8539_v41, %v8535_v22 }
 0x669   : >> { %v7806_v47 = vpop.xlane.xlu1 %7805  ;;  %v7899_v33 = vpop.xlane.xlu0 %7898 }
 0x66a   : >> { %v8697_v29 = vrot.slane %v7899_v33, %v17476_v60  ;;  %v8544_v9 = vrot.slane %v7806_v47, %v17473_v49  ;;  %v8614_v60 = vsel %vm8135_vm15, %v8613_v56, %v8609_v59 }
 0x66c   : >> { %v8698_v11 = vsel %vm8142_vm0, %v8697_v29, %v8693_v46  ;;  %v8545_v2 = vsel %vm8149_vm1, %v8544_v9, %v8540_v18 }
 0x66d   : >> { %v7902_v14 = vpop.xlane.xlu1 %7901  ;;  %v7854_v36 = vpop.xlane.xlu0 %7853  ;;  %v8717_v20 = vmul.f32 %v8545_v2, %v7909_v39 }
 0x66e   : >> { %v8702_v40 = vrot.slane %v7902_v14, %v17473_v49  ;;  %v8623_v54 = vrot.slane %v7854_v36, %v17473_v49  ;;  %v8619_v49 = vsel %vm8142_vm0, %v8618_v51, %v8614_v60 }
 0x670   : >> { %v8703_v3 = vsel %vm8149_vm1, %v8702_v40, %v8698_v11  ;;  %v8624_v50 = vsel %vm8149_vm1, %v8623_v54, %v8619_v49 }
 0x671   : >> { %v8719_v62 = vmul.f32 %v8703_v3, %v7911_v12  ;;  %v8718_v24 = vmul.f32 %v8624_v50, %v7910_v26 }
 0x675   : >> { %v8724_v0 = vpop.permute.xlu0 %8723 }
 0x676   : >> { %v8729_v42 = vrot.slane %v8724_v0, %v8728_v31 }
 0x678   : >> { %v8730_v47 = vadd.f32 %v8729_v42, %v8712_v38  ;;  %v8731_v33 = vadd.f32 %v8729_v42, %v8713_v8  ;;  %v8732_v4 = vadd.f32 %v8729_v42, %v8714_v63  ;;  %v8733_v5 = vadd.f32 %v8729_v42, %v8715_v1 }
 0x679   : >> { %v8734_v37 = vadd.f32 %v8729_v42, %v8716_v43  ;;  %v8735_v57 = vadd.f32 %v8729_v42, %v8717_v20  ;;  %v8736_v30 = vadd.f32 %v8729_v42, %v8718_v24  ;;  %v8737_v58 = vadd.f32 %v8729_v42, %v8719_v62 }
 0x67a   : >> { %8739 = vst [vmem:[%s8738_s12] sm:$0x1] %v8730_v47  ;;  %8740 = vst [vmem:[%s8738_s12 + $0x2] sm:$0x1] %v8731_v33 }
 0x67b   : >> { %8741 = vst [vmem:[%s8738_s12 + $0x4] sm:$0x1] %v8732_v4  ;;  %8742 = vst [vmem:[%s8738_s12 + $0x6] sm:$0x1] %v8733_v5 }
 0x67c   : >> { %8743 = vst [vmem:[%s8738_s12 + $0x8] sm:$0x1] %v8734_v37  ;;  %8744 = vst [vmem:[%s8738_s12 + $0xa] sm:$0x1] %v8735_v57 }
 0x67d   : >> { %8745 = vst [vmem:[%s8738_s12 + $0xc] sm:$0x1] %v8736_v30  ;;  %8746 = vst [vmem:[%s8738_s12 + $0xe] sm:$0x1] %v8737_v58 }
 0x67e PF: >> { %s731_s27 = sadd.s32 1, %s11885_s27  }
 0x67f   : >> { %p728_p7 = scmp.ge.s32.totalorder %s731_s27, 2  }
 0x681   : > { %730 = sbr.rel (!%p728_p7) target bundleno = 116 (0x74), region = 154 }
 0x688   : > { %8750 = sbr.rel (%p9738_p5) target bundleno = 1680 (0x690), region = 82  ;;  %vm8753_vm2 = vcmask (!%p9738_p5), 253952   ;;  %v11889_v44 = vmov (!%p9738_p5), 0.0  }
 0x689   : > { %s8751_s13 = smul.u32 (!%p9738_p5), 2112, %s420_s19 }
 0x68b   : > { %s8752_s0 = scalar_lea.vmem (!%p9738_p5), [#allocation2], %s8751_s13 }
 0x68c   : > { %8754 = vst.msk [vmem:[%s8752_s0 + $0xc9] sm:$0x1] (!%p9738_p5), %vm8753_vm2, %v11889_v44  ;;  %8755 = vst.msk [vmem:[%s8752_s0 + $0x1d1] sm:$0x1] (!%p9738_p5), %vm8753_vm2, %v11889_v44 }
 0x68d   : > { %8756 = vst.msk [vmem:[%s8752_s0 + $0x2d9] sm:$0x1] (!%p9738_p5), %vm8753_vm2, %v11889_v44  ;;  %8757 = vst.msk [vmem:[%s8752_s0 + $0x3e1] sm:$0x1] (!%p9738_p5), %vm8753_vm2, %v11889_v44 }
 0x68e   : > { %8758 = vst.msk [vmem:[%s8752_s0 + $0x4e9] sm:$0x1] (!%p9738_p5), %vm8753_vm2, %v11889_v44  ;;  %8759 = vst.msk [vmem:[%s8752_s0 + $0x5f1] sm:$0x1] (!%p9738_p5), %vm8753_vm2, %v11889_v44 }
 0x68f   : > { %8760 = vst.msk [vmem:[%s8752_s0 + $0x6f9] sm:$0x1] %vm8753_vm2, %v11889_v44  ;;  %8761 = vst.msk [vmem:[%s8752_s0 + $0x801] sm:$0x1] %vm8753_vm2, %v11889_v44 }
 0x690 PF: > { %s9877_s10 = sshll.u32 %s11865_s11, 8  ;;  %s8776_s15 = sshll.u32 %s379_s7, 4  ;;  %s17888_s15 = int_to_ptr.vmem [resolvable:$true] %s8776_s15 }
 0x691   : > { %s17884_s24 = scalar_lea.hbm %s17952_s8, %s9877_s10  ;;  %s18901_s21 = sand.u32 1, %s11853_s30  }
 0x692   : > { %s17892_s9 = scalar_lea.sflag [#allocation5], %s18901_s21  ;;  %s11775_s19 = scalar_lea.vmem %s17888_s15, 256 }
 0x693   : > { %p11776_p8 = scmp.ne.s32.totalorder %s17888_s15, %s11775_s19  ;;  %s11890_s11 = smov [#allocation4]  }
 0x694   : > { %s11779_s27 = sshll.u32 %s11890_s11, 4  ;;  %s11780_s27 = int_to_ptr.vmem [resolvable:$false] %s11779_s27 }
 0x695   : > { %p11777_p10 = pnand %p11776_p8, %p11990_p3  ;;  %s11781_s1 = scalar_lea.vmem %s11780_s27, 512 }
 0x696   : > { %p11782_p12 = scmp.lt.s32.totalorder %s17888_s15, %s11780_s27  ;;  %p11783_p13 = scmp.lt.s32.totalorder %s11781_s1, %s11775_s19 }
 0x697   : > { %p11778_p11 = pneg %p11777_p10 }
 0x698   : > { %p11784_p0 = por %p11783_p13, %p11782_p12 }
 0x69a   : > { %p11785_p1 = pnand %p11784_p0, %p11778_p11 }
 0x69c   : > { %11788 = shalt.err (!%p11785_p1)
}
 0x69d   : > { %s11789_s25 = scalar_lea.hbm %s17884_s24, 256  ;;  %s11793_s26 = scalar_lea.hbm %s17952_s8, 512 }
 0x69e   : > { %p11790_p2 = scmp.ne.s32.totalorder %s17884_s24, %s11789_s25  ;;  %p11794_p6 = scmp.lt.u32.totalorder %s17884_s24, %s17952_s8 }
 0x69f   : > { %p11795_p7 = scmp.lt.u32.totalorder %s11793_s26, %s11789_s25  ;;  %p11797_p10 = scmp.lt.u32.totalorder %s11789_s25, %s17884_s24 }
 0x6a0   : > { %p11791_p4 = pnand %p11790_p2, %p11990_p3 }
 0x6a1   : > { %p11796_p8 = por %p11795_p7, %p11794_p6 }
 0x6a2   : > { %p11792_p5 = pneg %p11791_p4 }
 0x6a3   : > { %p11798_p11 = por %p11797_p10, %p11796_p8 }
 0x6a5   : > { %p11799_p12 = pnand %p11798_p11, %p11792_p5 }
 0x6a7   : > { %11802 = shalt.err (!%p11799_p12)
}
 0x6a8   : > { %s11891_s28 = smov 32   ;;  %s11892_s12 = smov 2  }
 0x6a9   : > { %11159 = dma.vmem_to_hbm [thread:$0]  (%p11990_p3), %s17888_s15, 256, %s17884_s24, %s17892_s9, %s11891_s28, %s11891_s28, %s11892_s12  }
 0x6aa PF: > { %p11165_p13 = scmp.ge.s32.totalorder %s11877_s14, 2  ;;  %s8791_s0 = sand.u32 1, %s11849_s29  }
 0x6ab   : > { %s8792_s10 = scalar_lea.sflag [#allocation5], %s8791_s0 }
 0x6ac   : > { %p11162_p0 = pnand %p11165_p13, %p12000_p9 }
 0x6ae   : > { %11844 = dma.done.wait (!%p11162_p0), %s8792_s10, 256  }
 0x6af   : > { %11846 = vsyncadd (!%p11162_p0), %s8792_s10, 4294967040  ;;  %s23_s14 = sadd.s32 1, %s11877_s14   ;;  %s18903_s16 = sld [smem:[#allocation7_spill]] }
 0x6b0   : > { %p20_p1 = scmp.ge.s32.totalorder %s23_s14, 8   ;;  %s18904_s9 = sld [smem:[#allocation13_spill]] }
 0x6b1   : > { %s18905_s10 = sld [smem:[#allocation8_spill]]  ;;  %s18906_s11 = sld [smem:[#allocation9_spill]] }
 0x6b2   : > { %s18907_s12 = sld [smem:[#allocation10_spill]]  ;;  %s18908_s13 = sld [smem:[#allocation11_spill]] }
 0x6b3   : > { %s18909_s29 = smov %s11853_s30  ;;  %22 = sbr.rel (!%p20_p1) target bundleno = 8 (0x8), region = 165 }
 0x6b5   : > { %s18910_s30 = smov %s18903_s16 }
 0x6ba   :  { %8797 = vsyncpa [#allocation5], 1 }
 0x6bb   :  { %8799 = vsyncpa [#allocation5 + $0x1], 1 }

</bundles_post_ra>
